<compile_context>
chip_gen: v7x
topology: tpu7x:2x2x1
jax: 0.10.0
libtpu: 0.0.40
codegen_flags: <defaults>
</compile_context>

<pallas_src>
import jax
import jax.numpy as jnp
from jax.experimental import pallas as pl
from jax.experimental.pallas import tpu as pltpu  # noqa: F401  (TPU-specific params if needed)

# ---- sizes (small, consistent with the module) ----
B, T = 2, 6            # batch, target length
VOCAB = 32             # vocab_size (== H == 32 so packed slabs are uniformly lane-dense)
EMB = 16               # embedding_dim
EMBP = 32              # embedding dim zero-padded to one 32-lane tile
H = 32                 # dec_hidden_size == mem_hidden_size (required by initial_h copy)
L = 2                  # num_layers
U = 4                  # max #utterances (u_output seq len)
W = 12                 # max #words (w_output seq len)

NEG = -1e30
OUTL = 128             # lane-dense packed output width: [0:32)=dec [32:44)=suw [44:48)=su

# weight-slab blocks (each 32 rows x 128 lanes, stacked along rows -> (224, 128) bf16):
#   A   [  0: 32]  layer-0 input   [W_ir0 | W_iz0 | W_in0 | wy_col | 0]   (used once, all T)
#   B   [ 32: 64]  layer-0 hidden  [W_hr0 | W_hz0 | W_hn0 | 0]
#   Cx  [ 64: 96]  layer-1 input   [W_ir1 | W_iz1 | W_in1 | 0]
#   Ch  [ 96:128]  layer-1 hidden  [W_hr1 | W_hz1 |   0   | W_hn1]
#   D   [128:160]  attention       [Wu | Ww | bu_col | bw_col | ws_col | 0]
#   Ec  [160:192]  output (ctx)    [Wo_ctx | 0]
#   Er  [192:224]  output (rnn)    [Wo_rnn | 0]
# vec slab (8, 128) f32:
#   row0: [b_r0 | b_z0 | b_in0 | b_hn0]   row1: same for layer 1
#   row2: [bo | wd | bs | 0]              rows 3-7: zeros


def decoder_kernel(
    y_ref,            # (T*B, EMBP) bf16  embedded + padded targets, time-major flattened
    h0_ref,           # (B, H)      f32   initial hidden (same value for both layers)
    u_out_ref,        # (B, U, H)
    w_out_ref,        # (B, W, H)
    w_out_t_ref,      # (B, H, W)   transposed word memory (for the context reduce)
    oh_wu_ref,        # (B, W, U)   word -> utterance one-hot (0/1)
    oh_uw_ref,        # (B, U, W)   utterance -> word one-hot (0/1)
    oh_uw_add_ref,    # (B, U, W)   additive mask form (0 where member, NEG otherwise)
    u_mask_ref,       # (B, U)      additive mask (0 valid / NEG invalid)
    w_mask_ref,       # (B, W)      additive mask
    covered_ref,      # (B, W)      word belongs to some utterance (0/1)
    seg_exists_ref,   # (B, U)      utterance slot is non-empty (0/1)
    wslab_ref,        # (224, 128)  bf16 packed matmul weights
    vec_ref,          # (8, 128)    f32 packed biases
    out_ref,          # (T, B, 128) f32 packed outputs
):
  f32 = jnp.float32
  bf16 = jnp.bfloat16

  # ---------------- hoisted loop-invariant loads (review opt #1) ----------------
  WA = wslab_ref[0:32, :]        # layer-0 input weights (used once, below)
  WB = wslab_ref[32:64, :]
  WCx = wslab_ref[64:96, :]
  WCh = wslab_ref[96:128, :]
  WD = wslab_ref[128:160, :]
  WEc = wslab_ref[160:192, :]
  WEr = wslab_ref[192:224, :]

  b_rz0 = jnp.broadcast_to(vec_ref[0:1, 0:2 * H], (B, 2 * H))
  b_in0 = jnp.broadcast_to(vec_ref[0:1, 2 * H:3 * H], (B, H))
  b_hn0 = jnp.broadcast_to(vec_ref[0:1, 3 * H:4 * H], (B, H))
  b_rz1 = jnp.broadcast_to(vec_ref[1:2, 0:2 * H], (B, 2 * H))
  b_in1 = jnp.broadcast_to(vec_ref[1:2, 2 * H:3 * H], (B, H))
  b_hn1 = jnp.broadcast_to(vec_ref[1:2, 3 * H:4 * H], (B, H))
  bo = jnp.broadcast_to(vec_ref[2:3, 0:VOCAB], (B, VOCAB))
  wd_row = jnp.broadcast_to(vec_ref[2:3, VOCAB:2 * VOCAB], (B, VOCAB))
  bs = jnp.broadcast_to(vec_ref[2:3, 2 * VOCAB:2 * VOCAB + 1], (B, 1))

  u_out = u_out_ref[...]
  w_out = w_out_ref[...]
  w_out_t = w_out_t_ref[...]
  oh_wu = oh_wu_ref[...]
  oh_uw = oh_uw_ref[...]
  oh_uw_add = oh_uw_add_ref[...]
  u_mask_add = u_mask_ref[...]
  w_mask_add = w_mask_ref[...]
  covered = covered_ref[...]
  seg_exists = seg_exists_ref[...]

  out_ref[...] = jnp.zeros_like(out_ref)   # zero pad lanes once

  # ---- layer-0 input projections (+ yt.wy in lane 96) for ALL T: one MXU call (opt #2) ----
  xproj = jnp.dot(y_ref[...], WA, preferred_element_type=f32)   # (T*B, 128)

  def step(t, h_l0, h_l1, d_prev, eu_prev):
    xp = xproj[t * B:(t + 1) * B, :]                            # (B, 128) precomputed

    # ---------------- GRU layer 0 (one hidden-side dot) ----------------
    hp = jnp.dot(h_l0.astype(bf16), WB, preferred_element_type=f32)       # (B, 128)
    rz0 = jax.nn.sigmoid(xp[:, 0:2 * H] + hp[:, 0:2 * H] + b_rz0)
    n0 = jnp.tanh(xp[:, 2 * H:3 * H] + b_in0
                  + rz0[:, 0:H] * (hp[:, 2 * H:3 * H] + b_hn0))
    z0 = rz0[:, H:2 * H]
    h_l0 = (1.0 - z0) * n0 + z0 * h_l0

    # ---------------- GRU layer 1 (two merged dots + add) ----------------
    g1 = (jnp.dot(h_l0.astype(bf16), WCx, preferred_element_type=f32)
          + jnp.dot(h_l1.astype(bf16), WCh, preferred_element_type=f32))  # (B, 128)
    rz1 = jax.nn.sigmoid(g1[:, 0:2 * H] + b_rz1)
    n1 = jnp.tanh(g1[:, 2 * H:3 * H] + b_in1
                  + rz1[:, 0:H] * (g1[:, 3 * H:4 * H] + b_hn1))
    z1 = rz1[:, H:2 * H]
    h_l1 = (1.0 - z1) * n1 + z1 * h_l1
    rnn = h_l1                                                            # (B, H)
    rnn_bf = rnn.astype(bf16)

    # -------- fused attention queries + scalar projections (one dot, opt #3b) --------
    qd = jnp.dot(rnn_bf, WD, preferred_element_type=f32)                  # (B, 128)
    qu = qd[:, 0:H]
    qw = qd[:, H:2 * H]
    rbu = qd[:, 2 * H:2 * H + 1]        # rnn . bu
    rbw = qd[:, 2 * H + 1:2 * H + 2]    # rnn . bw
    rws = qd[:, 2 * H + 2:2 * H + 3]    # rnn . ws

    # ---------------- utterance-level attention ----------------
    su_logit = jnp.sum(u_out * qu[:, None, :], axis=-1) + rbu + u_mask_add    # (B, U)
    su_max = jnp.max(su_logit, axis=-1, keepdims=True)
    su_e = jnp.exp(su_logit - su_max)
    su_soft = su_e / jnp.sum(su_e, axis=-1, keepdims=True)

    # memory gate gamma (yt.wy folded into xproj lane 96, rnn.ws folded into qd)
    gamma = jax.nn.sigmoid(jnp.sum(d_prev * wd_row, axis=-1, keepdims=True)
                           + xp[:, 3 * H:3 * H + 1] + rws + bs)               # (B, 1)
    su = (1.0 - gamma) * su_soft + gamma * eu_prev
    su = su / (jnp.sum(su, axis=-1, keepdims=True) + 1e-20)                   # exact div + eps

    # ---------------- word-level attention with per-utterance softmax ----------------
    sw = jnp.sum(w_out * qw[:, None, :], axis=-1) + rbw + w_mask_add          # (B, W)
    seg_max = jnp.max(sw[:, None, :] + oh_uw_add, axis=-1) * seg_exists       # (B, U)
    max_pw = jnp.sum(oh_wu * seg_max[:, None, :], axis=-1)                    # (B, W)
    e = jnp.exp(sw - max_pw) * covered
    seg_sum = jnp.sum(oh_uw * e[:, None, :], axis=-1)                         # (B, U)
    sum_pw = jnp.sum(oh_wu * seg_sum[:, None, :], axis=-1)                    # (B, W)
    seg_soft = e / jnp.maximum(sum_pw, 1e-20)
    su_pw = jnp.sum(oh_wu * su[:, None, :], axis=-1)                          # (B, W)
    suw = su_pw * seg_soft

    # ---------------- context + output layer (two dots) + log-softmax ----------------
    ctx = jnp.sum(w_out_t * suw[:, None, :], axis=-1)                         # (B, H)
    logits = (jnp.dot(ctx.astype(bf16), WEc, preferred_element_type=f32)
              + jnp.dot(rnn_bf, WEr, preferred_element_type=f32))[:, 0:VOCAB] + bo
    lmax = jnp.max(logits, axis=-1, keepdims=True)
    dec = logits - lmax - jnp.log(
        jnp.sum(jnp.exp(logits - lmax), axis=-1, keepdims=True))

    # packed, lane-dense VMEM-resident output (opt #4)
    out_ref[t, :, 0:VOCAB] = dec
    out_ref[t, :, VOCAB:VOCAB + W] = suw
    out_ref[t, :, VOCAB + W:VOCAB + W + U] = su
    return h_l0, h_l1, dec, su

  # fully-unrolled static time loop
  h_l0 = h0_ref[...]
  h_l1 = h0_ref[...]
  d_prev = jnp.zeros((B, VOCAB), f32)   # matches PyTorch: dt = zeros at t == 0
  eu_prev = jnp.zeros((B, U), f32)      # matches PyTorch: zero_attn_u at t == 0
  for t in range(T):
    h_l0, h_l1, d_prev, eu_prev = step(t, h_l0, h_l1, d_prev, eu_prev)


def build_params(key):
  ks = jax.random.split(key, 28)

  def w(k, shape, scale=0.1):
    return jax.random.normal(k, shape, dtype=jnp.float32) * scale

  emb = w(ks[0], (VOCAB, EMB)).at[0].set(0.0)                     # padding_idx=0
  emb_pad = jnp.pad(emb, ((0, 0), (0, EMBP - EMB))).astype(jnp.bfloat16)

  def pad_rows(m):  # (EMB, H) -> (EMBP, H), zero rows so padded lanes contribute nothing
    return jnp.pad(m, ((0, EMBP - EMB), (0, 0)))

  w_ir0, w_iz0, w_in0 = [pad_rows(w(ks[i], (EMB, H))) for i in (1, 2, 3)]
  w_hr0, w_hz0, w_hn0 = [w(ks[i], (H, H)) for i in (4, 5, 6)]
  w_ir1, w_iz1, w_in1 = [w(ks[i], (H, H)) for i in (7, 8, 9)]
  w_hr1, w_hz1, w_hn1 = [w(ks[i], (H, H)) for i in (10, 11, 12)]
  b_ih0, b_hh0 = w(ks[13], (3 * H,)), w(ks[14], (3 * H,))
  b_ih1, b_hh1 = w(ks[15], (3 * H,)), w(ks[16], (3 * H,))

  wu, bu = w(ks[17], (H, H)), w(ks[18], (H,))       # attention_u (query form) + bias
  ww, bw = w(ks[19], (H, H)), w(ks[20], (H,))       # attention_w
  wd = w(ks[21], (VOCAB,))                          # mem_utt_d (no bias)
  wy_pad = jnp.pad(w(ks[22], (EMB,)), (0, EMBP - EMB))   # mem_utt_y, zero-padded
  ws = w(ks[23], (H,))                              # mem_utt_s weight
  bs = w(ks[24], ())                                # mem_utt_s bias (scalar)
  wo_ctx = w(ks[25], (H, VOCAB))                    # output_layer, context half
  wo_rnn = w(ks[26], (H, VOCAB))                    # output_layer, rnn half
  bo = w(ks[27], (VOCAB,))

  z32 = jnp.zeros((H, 32), jnp.float32)

  def col(v):
    return v[:, None]

  blkA = jnp.concatenate(
      [w_ir0, w_iz0, w_in0, col(wy_pad), jnp.zeros((EMBP, 31), jnp.float32)], axis=1)
  blkB = jnp.concatenate([w_hr0, w_hz0, w_hn0, z32], axis=1)
  blkCx = jnp.concatenate([w_ir1, w_iz1, w_in1, z32], axis=1)
  blkCh = jnp.concatenate([w_hr1, w_hz1, z32, w_hn1], axis=1)
  blkD = jnp.concatenate(
      [wu, ww, col(bu), col(bw), col(ws), jnp.zeros((H, 128 - 2 * H - 3), jnp.float32)], axis=1)
  blkEc = jnp.concatenate([wo_ctx, jnp.zeros((H, 96), jnp.float32)], axis=1)
  blkEr = jnp.concatenate([wo_rnn, jnp.zeros((H, 96), jnp.float32)], axis=1)
  w_slab = jnp.concatenate(
      [blkA, blkB, blkCx, blkCh, blkD, blkEc, blkEr], axis=0).astype(jnp.bfloat16)  # (224,128)

  row0 = jnp.concatenate([b_ih0[0:H] + b_hh0[0:H], b_ih0[H:2 * H] + b_hh0[H:2 * H],
                          b_ih0[2 * H:3 * H], b_hh0[2 * H:3 * H]])
  row1 = jnp.concatenate([b_ih1[0:H] + b_hh1[0:H], b_ih1[H:2 * H] + b_hh1[H:2 * H],
                          b_ih1[2 * H:3 * H], b_hh1[2 * H:3 * H]])
  row2 = jnp.concatenate([bo, wd, jnp.full((1,), bs, jnp.float32),
                          jnp.zeros((128 - 2 * VOCAB - 1,), jnp.float32)])
  vec_slab = jnp.concatenate(
      [row0[None], row1[None], row2[None], jnp.zeros((5, 128), jnp.float32)], axis=0)   # (8,128)

  return dict(emb_pad=emb_pad, w_slab=w_slab, vec_slab=vec_slab)


@jax.jit
def decoder_gru_forward(target, u_output, u_len, w_output, w_len, onehot, params):
  # glue (fused by jit): embedding gather (pre-padded bf16 table -> no pad/transpose of y),
  # initial-hidden gather, additive masks, transposed layouts.
  y2d = params['emb_pad'][jnp.transpose(target).reshape(-1)]          # (T*B, EMBP) bf16

  h_init = u_output[jnp.arange(B), u_len - 1, :].astype(jnp.float32)  # (B, H)
  u_mask_add = jnp.where(
      jax.lax.broadcasted_iota(jnp.int32, (B, U), 1) < u_len[:, None], 0.0, NEG
  ).astype(jnp.float32)
  w_mask_add = jnp.where(
      jax.lax.broadcasted_iota(jnp.int32, (B, W), 1) < w_len[:, None], 0.0, NEG
  ).astype(jnp.float32)

  w_out_t = jnp.transpose(w_output, (0, 2, 1))                        # (B, H, W)
  oh_uw = jnp.transpose(onehot, (0, 2, 1))                            # (B, U, W)
  oh_uw_add = jnp.where(oh_uw > 0, 0.0, NEG).astype(jnp.float32)
  covered = jnp.sum(onehot, axis=-1)                                  # (B, W)
  seg_exists = jnp.max(onehot, axis=1)                                # (B, U)

  # Single invocation, no grid: every input is one full-array VMEM block and the whole
  # decode loop runs inside the kernel (latency-bound; far below VMEM capacity everywhere).
  packed = pl.pallas_call(
      decoder_kernel,
      out_shape=jax.ShapeDtypeStruct((T, B, OUTL), jnp.float32),
  )(y2d, h_init, u_output, w_output, w_out_t, onehot, oh_uw, oh_uw_add,
    u_mask_add, w_mask_add, covered, seg_exists,
    params['w_slab'], params['vec_slab'])

  packed = jnp.transpose(packed, (1, 0, 2))                           # (B, T, 128)
  dec_output = packed[:, :, 0:VOCAB]
  scores_uw = packed[:, :, VOCAB:VOCAB + W]
  scores_u = packed[:, :, VOCAB + W:VOCAB + W + U]
  return dec_output, scores_uw, scores_u


if __name__ == "__main__":
  key = jax.random.PRNGKey(0)
  k_par, k_tgt, k_u, k_w = jax.random.split(key, 4)

  params = build_params(k_par)

  target = jax.random.randint(k_tgt, (B, T), 1, VOCAB, dtype=jnp.int32)
  u_output = jax.random.normal(k_u, (B, U, H), dtype=jnp.float32)
  w_output = jax.random.normal(k_w, (B, W, H), dtype=jnp.float32)

  # per-example #utterances / #words and utterance end-indices (as in the PyTorch dict)
  u_len = jnp.array([4, 3], dtype=jnp.int32)
  w_len = jnp.array([12, 9], dtype=jnp.int32)
  utt_indices = [[2, 5, 8, 11], [3, 6, 8]]   # end word-index of each utterance per example

  # one-hot word->utterance membership (B, W, U), built on host (static glue)
  onehot_list = [[[0.0] * U for _ in range(W)] for _ in range(B)]
  for b, ends in enumerate(utt_indices):
    starts = [0] + [a + 1 for a in ends[:-1]]
    for i, (s, e) in enumerate(zip(starts, ends)):
      for j in range(s, e + 1):
        onehot_list[b][j][i] = 1.0
  onehot = jnp.array(onehot_list, dtype=jnp.float32)

  dec_output, scores_uw, scores_u = decoder_gru_forward(
      target, u_output, u_len, w_output, w_len, onehot, params)
  jax.block_until_ready((dec_output, scores_uw, scores_u))

  assert dec_output.shape == (B, T, VOCAB)
  assert scores_uw.shape == (B, T, W)
  assert scores_u.shape == (B, T, U)
  print("KERNEL_OK")
</pallas_src>

<mosaic_0001>
module attributes {stable_mosaic.version = 11 : i64} {
  func.func @decoder_kernel(%arg0: memref<12x32xbf16, #tpu.memory_space<vmem>>, %arg1: memref<2x32xf32, #tpu.memory_space<vmem>>, %arg2: memref<2x4x32xf32, #tpu.memory_space<vmem>>, %arg3: memref<2x12x32xf32, #tpu.memory_space<vmem>>, %arg4: memref<2x32x12xf32, #tpu.memory_space<vmem>>, %arg5: memref<2x12x4xf32, #tpu.memory_space<vmem>>, %arg6: memref<2x4x12xf32, #tpu.memory_space<vmem>>, %arg7: memref<2x4x12xf32, #tpu.memory_space<vmem>>, %arg8: memref<2x4xf32, #tpu.memory_space<vmem>>, %arg9: memref<2x12xf32, #tpu.memory_space<vmem>>, %arg10: memref<2x12xf32, #tpu.memory_space<vmem>>, %arg11: memref<2x4xf32, #tpu.memory_space<vmem>>, %arg12: memref<224x128xbf16, #tpu.memory_space<vmem>>, %arg13: memref<8x128xf32, #tpu.memory_space<vmem>>, %arg14: memref<6x2x128xf32, #tpu.memory_space<vmem>>) attributes {dimension_semantics = [], scalar_prefetch = 0 : i64, scratch_operands = 0 : i64, tpu.core_type = #tpu.core_type<tc>} {
    %c0 = arith.constant 0 : index
    %c0_0 = arith.constant 0 : index
    %0 = vector.load %arg12[%c0, %c0_0] : memref<224x128xbf16, #tpu.memory_space<vmem>>, vector<32x128xbf16>
    %c32 = arith.constant 32 : index
    %c0_1 = arith.constant 0 : index
    %1 = vector.load %arg12[%c32, %c0_1] : memref<224x128xbf16, #tpu.memory_space<vmem>>, vector<32x128xbf16>
    %c64 = arith.constant 64 : index
    %c0_2 = arith.constant 0 : index
    %2 = vector.load %arg12[%c64, %c0_2] : memref<224x128xbf16, #tpu.memory_space<vmem>>, vector<32x128xbf16>
    %c96 = arith.constant 96 : index
    %c0_3 = arith.constant 0 : index
    %3 = vector.load %arg12[%c96, %c0_3] : memref<224x128xbf16, #tpu.memory_space<vmem>>, vector<32x128xbf16>
    %c128 = arith.constant 128 : index
    %c0_4 = arith.constant 0 : index
    %4 = vector.load %arg12[%c128, %c0_4] : memref<224x128xbf16, #tpu.memory_space<vmem>>, vector<32x128xbf16>
    %c160 = arith.constant 160 : index
    %c0_5 = arith.constant 0 : index
    %5 = vector.load %arg12[%c160, %c0_5] : memref<224x128xbf16, #tpu.memory_space<vmem>>, vector<32x128xbf16>
    %c192 = arith.constant 192 : index
    %c0_6 = arith.constant 0 : index
    %6 = vector.load %arg12[%c192, %c0_6] : memref<224x128xbf16, #tpu.memory_space<vmem>>, vector<32x128xbf16>
    %c0_7 = arith.constant 0 : index
    %c0_8 = arith.constant 0 : index
    %7 = vector.load %arg13[%c0_7, %c0_8] : memref<8x128xf32, #tpu.memory_space<vmem>>, vector<1x64xf32>
    %8 = vector.shape_cast %7 : vector<1x64xf32> to vector<1x64xf32>
    %9 = vector.broadcast %8 : vector<1x64xf32> to vector<2x64xf32>
    %c0_9 = arith.constant 0 : index
    %c64_10 = arith.constant 64 : index
    %10 = vector.load %arg13[%c0_9, %c64_10] : memref<8x128xf32, #tpu.memory_space<vmem>>, vector<1x32xf32>
    %11 = vector.shape_cast %10 : vector<1x32xf32> to vector<1x32xf32>
    %12 = vector.broadcast %11 : vector<1x32xf32> to vector<2x32xf32>
    %c0_11 = arith.constant 0 : index
    %c96_12 = arith.constant 96 : index
    %13 = vector.load %arg13[%c0_11, %c96_12] : memref<8x128xf32, #tpu.memory_space<vmem>>, vector<1x32xf32>
    %14 = vector.shape_cast %13 : vector<1x32xf32> to vector<1x32xf32>
    %15 = vector.broadcast %14 : vector<1x32xf32> to vector<2x32xf32>
    %c1 = arith.constant 1 : index
    %c0_13 = arith.constant 0 : index
    %16 = vector.load %arg13[%c1, %c0_13] : memref<8x128xf32, #tpu.memory_space<vmem>>, vector<1x64xf32>
    %17 = vector.shape_cast %16 : vector<1x64xf32> to vector<1x64xf32>
    %18 = vector.broadcast %17 : vector<1x64xf32> to vector<2x64xf32>
    %c1_14 = arith.constant 1 : index
    %c64_15 = arith.constant 64 : index
    %19 = vector.load %arg13[%c1_14, %c64_15] : memref<8x128xf32, #tpu.memory_space<vmem>>, vector<1x32xf32>
    %20 = vector.shape_cast %19 : vector<1x32xf32> to vector<1x32xf32>
    %21 = vector.broadcast %20 : vector<1x32xf32> to vector<2x32xf32>
    %c1_16 = arith.constant 1 : index
    %c96_17 = arith.constant 96 : index
    %22 = vector.load %arg13[%c1_16, %c96_17] : memref<8x128xf32, #tpu.memory_space<vmem>>, vector<1x32xf32>
    %23 = vector.shape_cast %22 : vector<1x32xf32> to vector<1x32xf32>
    %24 = vector.broadcast %23 : vector<1x32xf32> to vector<2x32xf32>
    %c2 = arith.constant 2 : index
    %c0_18 = arith.constant 0 : index
    %25 = vector.load %arg13[%c2, %c0_18] : memref<8x128xf32, #tpu.memory_space<vmem>>, vector<1x32xf32>
    %26 = vector.shape_cast %25 : vector<1x32xf32> to vector<1x32xf32>
    %27 = vector.broadcast %26 : vector<1x32xf32> to vector<2x32xf32>
    %c2_19 = arith.constant 2 : index
    %c32_20 = arith.constant 32 : index
    %28 = vector.load %arg13[%c2_19, %c32_20] : memref<8x128xf32, #tpu.memory_space<vmem>>, vector<1x32xf32>
    %29 = vector.shape_cast %28 : vector<1x32xf32> to vector<1x32xf32>
    %30 = vector.broadcast %29 : vector<1x32xf32> to vector<2x32xf32>
    %c2_21 = arith.constant 2 : index
    %c64_22 = arith.constant 64 : index
    %31 = vector.load %arg13[%c2_21, %c64_22] : memref<8x128xf32, #tpu.memory_space<vmem>>, vector<1x1xf32>
    %32 = vector.shape_cast %31 : vector<1x1xf32> to vector<1x1xf32>
    %33 = vector.broadcast %32 : vector<1x1xf32> to vector<2x1xf32>
    %c0_23 = arith.constant 0 : index
    %c0_24 = arith.constant 0 : index
    %c0_25 = arith.constant 0 : index
    %34 = vector.load %arg2[%c0_23, %c0_24, %c0_25] : memref<2x4x32xf32, #tpu.memory_space<vmem>>, vector<2x4x32xf32>
    %c0_26 = arith.constant 0 : index
    %c0_27 = arith.constant 0 : index
    %c0_28 = arith.constant 0 : index
    %35 = vector.load %arg3[%c0_26, %c0_27, %c0_28] : memref<2x12x32xf32, #tpu.memory_space<vmem>>, vector<2x12x32xf32>
    %c0_29 = arith.constant 0 : index
    %c0_30 = arith.constant 0 : index
    %c0_31 = arith.constant 0 : index
    %36 = vector.load %arg4[%c0_29, %c0_30, %c0_31] : memref<2x32x12xf32, #tpu.memory_space<vmem>>, vector<2x32x12xf32>
    %c0_32 = arith.constant 0 : index
    %c0_33 = arith.constant 0 : index
    %c0_34 = arith.constant 0 : index
    %37 = vector.load %arg5[%c0_32, %c0_33, %c0_34] : memref<2x12x4xf32, #tpu.memory_space<vmem>>, vector<2x12x4xf32>
    %c0_35 = arith.constant 0 : index
    %c0_36 = arith.constant 0 : index
    %c0_37 = arith.constant 0 : index
    %38 = vector.load %arg6[%c0_35, %c0_36, %c0_37] : memref<2x4x12xf32, #tpu.memory_space<vmem>>, vector<2x4x12xf32>
    %c0_38 = arith.constant 0 : index
    %c0_39 = arith.constant 0 : index
    %c0_40 = arith.constant 0 : index
    %39 = vector.load %arg7[%c0_38, %c0_39, %c0_40] : memref<2x4x12xf32, #tpu.memory_space<vmem>>, vector<2x4x12xf32>
    %c0_41 = arith.constant 0 : index
    %c0_42 = arith.constant 0 : index
    %40 = vector.load %arg8[%c0_41, %c0_42] : memref<2x4xf32, #tpu.memory_space<vmem>>, vector<2x4xf32>
    %c0_43 = arith.constant 0 : index
    %c0_44 = arith.constant 0 : index
    %41 = vector.load %arg9[%c0_43, %c0_44] : memref<2x12xf32, #tpu.memory_space<vmem>>, vector<2x12xf32>
    %c0_45 = arith.constant 0 : index
    %c0_46 = arith.constant 0 : index
    %42 = vector.load %arg10[%c0_45, %c0_46] : memref<2x12xf32, #tpu.memory_space<vmem>>, vector<2x12xf32>
    %c0_47 = arith.constant 0 : index
    %c0_48 = arith.constant 0 : index
    %43 = vector.load %arg11[%c0_47, %c0_48] : memref<2x4xf32, #tpu.memory_space<vmem>>, vector<2x4xf32>
    %cst = arith.constant 0.000000e+00 : f32
    %44 = vector.broadcast %cst : f32 to vector<6x2x128xf32>
    %c0_49 = arith.constant 0 : index
    %c0_50 = arith.constant 0 : index
    %c0_51 = arith.constant 0 : index
    %45 = vector.load %arg14[%c0_49, %c0_50, %c0_51] : memref<6x2x128xf32, #tpu.memory_space<vmem>>, vector<6x2x128xf32>
    tpu.vector_store %arg14[%c0_49, %c0_50, %c0_51], %44 {strides = array<i32>} : memref<6x2x128xf32, #tpu.memory_space<vmem>>, vector<6x2x128xf32>,
    %c0_52 = arith.constant 0 : index
    %c0_53 = arith.constant 0 : index
    %46 = vector.load %arg0[%c0_52, %c0_53] : memref<12x32xbf16, #tpu.memory_space<vmem>>, vector<12x32xbf16>
    %cst_54 = arith.constant dense<0.000000e+00> : vector<12x128xf32>
    %47 = tpu.matmul %46, %0, %cst_54 {dimension_numbers = #tpu.dot_dimension_numbers<[1], [0], [0], [1], [0, 0, 1, 1], [], []>} : vector<12x32xbf16>, vector<32x128xbf16>, vector<12x128xf32> -> vector<12x128xf32>
    %c0_55 = arith.constant 0 : index
    %c0_56 = arith.constant 0 : index
    %48 = vector.load %arg1[%c0_55, %c0_56] : memref<2x32xf32, #tpu.memory_space<vmem>>, vector<2x32xf32>
    %c0_57 = arith.constant 0 : index
    %c0_58 = arith.constant 0 : index
    %49 = vector.load %arg1[%c0_57, %c0_58] : memref<2x32xf32, #tpu.memory_space<vmem>>, vector<2x32xf32>
    %cst_59 = arith.constant 0.000000e+00 : f32
    %50 = vector.broadcast %cst_59 : f32 to vector<2x32xf32>
    %cst_60 = arith.constant 0.000000e+00 : f32
    %51 = vector.broadcast %cst_60 : f32 to vector<2x4xf32>
    %52 = vector.extract_strided_slice %47 {offsets = [0, 0], sizes = [2, 128], strides = [1, 1]} : vector<12x128xf32> to vector<2x128xf32>
    %53 = arith.truncf %48 : vector<2x32xf32> to vector<2x32xbf16>
    %cst_61 = arith.constant dense<0.000000e+00> : vector<2x128xf32>
    %54 = tpu.matmul %53, %1, %cst_61 {dimension_numbers = #tpu.dot_dimension_numbers<[1], [0], [0], [1], [0, 0, 1, 1], [], []>} : vector<2x32xbf16>, vector<32x128xbf16>, vector<2x128xf32> -> vector<2x128xf32>
    %55 = vector.extract_strided_slice %52 {offsets = [0, 0], sizes = [2, 64], strides = [1, 1]} : vector<2x128xf32> to vector<2x64xf32>
    %56 = vector.extract_strided_slice %54 {offsets = [0, 0], sizes = [2, 64], strides = [1, 1]} : vector<2x128xf32> to vector<2x64xf32>
    %57 = arith.addf %55, %56 : vector<2x64xf32>
    %58 = arith.addf %57, %9 : vector<2x64xf32>
    %59 = arith.negf %58 : vector<2x64xf32>
    %60 = math.exp %59 : vector<2x64xf32>
    %cst_62 = arith.constant 1.000000e+00 : f32
    %61 = vector.broadcast %cst_62 : f32 to vector<2x64xf32>
    %62 = arith.addf %61, %60 : vector<2x64xf32>
    %63 = arith.divf %61, %62 : vector<2x64xf32>
    %64 = vector.extract_strided_slice %52 {offsets = [0, 64], sizes = [2, 32], strides = [1, 1]} : vector<2x128xf32> to vector<2x32xf32>
    %65 = arith.addf %64, %12 : vector<2x32xf32>
    %66 = vector.extract_strided_slice %63 {offsets = [0, 0], sizes = [2, 32], strides = [1, 1]} : vector<2x64xf32> to vector<2x32xf32>
    %67 = vector.extract_strided_slice %54 {offsets = [0, 64], sizes = [2, 32], strides = [1, 1]} : vector<2x128xf32> to vector<2x32xf32>
    %68 = arith.addf %67, %15 : vector<2x32xf32>
    %69 = arith.mulf %66, %68 : vector<2x32xf32>
    %70 = arith.addf %65, %69 : vector<2x32xf32>
    %71 = math.tanh %70 : vector<2x32xf32>
    %72 = vector.extract_strided_slice %63 {offsets = [0, 32], sizes = [2, 32], strides = [1, 1]} : vector<2x64xf32> to vector<2x32xf32>
    %cst_63 = arith.constant 1.000000e+00 : f32
    %73 = vector.broadcast %cst_63 : f32 to vector<2x32xf32>
    %74 = arith.subf %73, %72 : vector<2x32xf32>
    %75 = arith.mulf %74, %71 : vector<2x32xf32>
    %76 = arith.mulf %72, %48 : vector<2x32xf32>
    %77 = arith.addf %75, %76 : vector<2x32xf32>
    %78 = arith.truncf %77 : vector<2x32xf32> to vector<2x32xbf16>
    %cst_64 = arith.constant dense<0.000000e+00> : vector<2x128xf32>
    %79 = tpu.matmul %78, %2, %cst_64 {dimension_numbers = #tpu.dot_dimension_numbers<[1], [0], [0], [1], [0, 0, 1, 1], [], []>} : vector<2x32xbf16>, vector<32x128xbf16>, vector<2x128xf32> -> vector<2x128xf32>
    %80 = arith.truncf %49 : vector<2x32xf32> to vector<2x32xbf16>
    %cst_65 = arith.constant dense<0.000000e+00> : vector<2x128xf32>
    %81 = tpu.matmul %80, %3, %cst_65 {dimension_numbers = #tpu.dot_dimension_numbers<[1], [0], [0], [1], [0, 0, 1, 1], [], []>} : vector<2x32xbf16>, vector<32x128xbf16>, vector<2x128xf32> -> vector<2x128xf32>
    %82 = arith.addf %79, %81 : vector<2x128xf32>
    %83 = vector.extract_strided_slice %82 {offsets = [0, 0], sizes = [2, 64], strides = [1, 1]} : vector<2x128xf32> to vector<2x64xf32>
    %84 = arith.addf %83, %18 : vector<2x64xf32>
    %85 = arith.negf %84 : vector<2x64xf32>
    %86 = math.exp %85 : vector<2x64xf32>
    %cst_66 = arith.constant 1.000000e+00 : f32
    %87 = vector.broadcast %cst_66 : f32 to vector<2x64xf32>
    %88 = arith.addf %87, %86 : vector<2x64xf32>
    %89 = arith.divf %87, %88 : vector<2x64xf32>
    %90 = vector.extract_strided_slice %82 {offsets = [0, 64], sizes = [2, 32], strides = [1, 1]} : vector<2x128xf32> to vector<2x32xf32>
    %91 = arith.addf %90, %21 : vector<2x32xf32>
    %92 = vector.extract_strided_slice %89 {offsets = [0, 0], sizes = [2, 32], strides = [1, 1]} : vector<2x64xf32> to vector<2x32xf32>
    %93 = vector.extract_strided_slice %82 {offsets = [0, 96], sizes = [2, 32], strides = [1, 1]} : vector<2x128xf32> to vector<2x32xf32>
    %94 = arith.addf %93, %24 : vector<2x32xf32>
    %95 = arith.mulf %92, %94 : vector<2x32xf32>
    %96 = arith.addf %91, %95 : vector<2x32xf32>
    %97 = math.tanh %96 : vector<2x32xf32>
    %98 = vector.extract_strided_slice %89 {offsets = [0, 32], sizes = [2, 32], strides = [1, 1]} : vector<2x64xf32> to vector<2x32xf32>
    %cst_67 = arith.constant 1.000000e+00 : f32
    %99 = vector.broadcast %cst_67 : f32 to vector<2x32xf32>
    %100 = arith.subf %99, %98 : vector<2x32xf32>
    %101 = arith.mulf %100, %97 : vector<2x32xf32>
    %102 = arith.mulf %98, %49 : vector<2x32xf32>
    %103 = arith.addf %101, %102 : vector<2x32xf32>
    %104 = arith.truncf %103 : vector<2x32xf32> to vector<2x32xbf16>
    %cst_68 = arith.constant dense<0.000000e+00> : vector<2x128xf32>
    %105 = tpu.matmul %104, %4, %cst_68 {dimension_numbers = #tpu.dot_dimension_numbers<[1], [0], [0], [1], [0, 0, 1, 1], [], []>} : vector<2x32xbf16>, vector<32x128xbf16>, vector<2x128xf32> -> vector<2x128xf32>
    %106 = vector.extract_strided_slice %105 {offsets = [0, 0], sizes = [2, 32], strides = [1, 1]} : vector<2x128xf32> to vector<2x32xf32>
    %107 = vector.extract_strided_slice %105 {offsets = [0, 32], sizes = [2, 32], strides = [1, 1]} : vector<2x128xf32> to vector<2x32xf32>
    %108 = vector.extract_strided_slice %105 {offsets = [0, 64], sizes = [2, 1], strides = [1, 1]} : vector<2x128xf32> to vector<2x1xf32>
    %109 = vector.extract_strided_slice %105 {offsets = [0, 65], sizes = [2, 1], strides = [1, 1]} : vector<2x128xf32> to vector<2x1xf32>
    %110 = vector.extract_strided_slice %105 {offsets = [0, 66], sizes = [2, 1], strides = [1, 1]} : vector<2x128xf32> to vector<2x1xf32>
    %111 = vector.shape_cast %106 : vector<2x32xf32> to vector<2x1x32xf32>
    %112 = vector.broadcast %111 : vector<2x1x32xf32> to vector<2x4x32xf32>
    %113 = arith.mulf %34, %112 : vector<2x4x32xf32>
    %cst_69 = arith.constant dense<0.000000e+00> : vector<2x4xf32>
    %114 = vector.multi_reduction <add>, %113, %cst_69 [2] : vector<2x4x32xf32> to vector<2x4xf32>
    %115 = vector.broadcast %108 : vector<2x1xf32> to vector<2x4xf32>
    %116 = arith.addf %114, %115 : vector<2x4xf32>
    %117 = arith.addf %116, %40 : vector<2x4xf32>
    %cst_70 = arith.constant dense<0xFF800000> : vector<2xf32>
    %118 = vector.multi_reduction <maximumf>, %117, %cst_70 [1] : vector<2x4xf32> to vector<2xf32>
    %119 = vector.shape_cast %118 : vector<2xf32> to vector<2x1xf32>
    %120 = vector.broadcast %119 : vector<2x1xf32> to vector<2x4xf32>
    %121 = arith.subf %117, %120 : vector<2x4xf32>
    %122 = math.exp %121 : vector<2x4xf32>
    %cst_71 = arith.constant dense<0.000000e+00> : vector<2xf32>
    %123 = vector.multi_reduction <add>, %122, %cst_71 [1] : vector<2x4xf32> to vector<2xf32>
    %124 = vector.shape_cast %123 : vector<2xf32> to vector<2x1xf32>
    %125 = vector.broadcast %124 : vector<2x1xf32> to vector<2x4xf32>
    %126 = arith.divf %122, %125 : vector<2x4xf32>
    %127 = arith.mulf %50, %30 : vector<2x32xf32>
    %cst_72 = arith.constant dense<0.000000e+00> : vector<2xf32>
    %128 = vector.multi_reduction <add>, %127, %cst_72 [1] : vector<2x32xf32> to vector<2xf32>
    %129 = vector.shape_cast %128 : vector<2xf32> to vector<2x1xf32>
    %130 = vector.extract_strided_slice %52 {offsets = [0, 96], sizes = [2, 1], strides = [1, 1]} : vector<2x128xf32> to vector<2x1xf32>
    %131 = arith.addf %129, %130 : vector<2x1xf32>
    %132 = arith.addf %131, %110 : vector<2x1xf32>
    %133 = arith.addf %132, %33 : vector<2x1xf32>
    %134 = arith.negf %133 : vector<2x1xf32>
    %135 = math.exp %134 : vector<2x1xf32>
    %cst_73 = arith.constant 1.000000e+00 : f32
    %136 = vector.broadcast %cst_73 : f32 to vector<2x1xf32>
    %137 = arith.addf %136, %135 : vector<2x1xf32>
    %138 = arith.divf %136, %137 : vector<2x1xf32>
    %cst_74 = arith.constant 1.000000e+00 : f32
    %139 = vector.broadcast %cst_74 : f32 to vector<2x1xf32>
    %140 = arith.subf %139, %138 : vector<2x1xf32>
    %141 = vector.broadcast %140 : vector<2x1xf32> to vector<2x4xf32>
    %142 = arith.mulf %141, %126 : vector<2x4xf32>
    %143 = vector.broadcast %138 : vector<2x1xf32> to vector<2x4xf32>
    %144 = arith.mulf %143, %51 : vector<2x4xf32>
    %145 = arith.addf %142, %144 : vector<2x4xf32>
    %cst_75 = arith.constant dense<0.000000e+00> : vector<2xf32>
    %146 = vector.multi_reduction <add>, %145, %cst_75 [1] : vector<2x4xf32> to vector<2xf32>
    %147 = vector.shape_cast %146 : vector<2xf32> to vector<2x1xf32>
    %cst_76 = arith.constant 9.99999968E-21 : f32
    %148 = vector.broadcast %cst_76 : f32 to vector<2x1xf32>
    %149 = arith.addf %147, %148 : vector<2x1xf32>
    %150 = vector.broadcast %149 : vector<2x1xf32> to vector<2x4xf32>
    %151 = arith.divf %145, %150 : vector<2x4xf32>
    %152 = vector.shape_cast %107 : vector<2x32xf32> to vector<2x1x32xf32>
    %153 = vector.broadcast %152 : vector<2x1x32xf32> to vector<2x12x32xf32>
    %154 = arith.mulf %35, %153 : vector<2x12x32xf32>
    %cst_77 = arith.constant dense<0.000000e+00> : vector<2x12xf32>
    %155 = vector.multi_reduction <add>, %154, %cst_77 [2] : vector<2x12x32xf32> to vector<2x12xf32>
    %156 = vector.broadcast %109 : vector<2x1xf32> to vector<2x12xf32>
    %157 = arith.addf %155, %156 : vector<2x12xf32>
    %158 = arith.addf %157, %41 : vector<2x12xf32>
    %159 = vector.shape_cast %158 : vector<2x12xf32> to vector<2x1x12xf32>
    %160 = vector.broadcast %159 : vector<2x1x12xf32> to vector<2x4x12xf32>
    %161 = arith.addf %160, %39 : vector<2x4x12xf32>
    %cst_78 = arith.constant dense<0xFF800000> : vector<2x4xf32>
    %162 = vector.multi_reduction <maximumf>, %161, %cst_78 [2] : vector<2x4x12xf32> to vector<2x4xf32>
    %163 = arith.mulf %162, %43 : vector<2x4xf32>
    %164 = vector.shape_cast %163 : vector<2x4xf32> to vector<2x1x4xf32>
    %165 = vector.broadcast %164 : vector<2x1x4xf32> to vector<2x12x4xf32>
    %166 = arith.mulf %37, %165 : vector<2x12x4xf32>
    %cst_79 = arith.constant dense<0.000000e+00> : vector<2x12xf32>
    %167 = vector.multi_reduction <add>, %166, %cst_79 [2] : vector<2x12x4xf32> to vector<2x12xf32>
    %168 = arith.subf %158, %167 : vector<2x12xf32>
    %169 = math.exp %168 : vector<2x12xf32>
    %170 = arith.mulf %169, %42 : vector<2x12xf32>
    %171 = vector.shape_cast %170 : vector<2x12xf32> to vector<2x1x12xf32>
    %172 = vector.broadcast %171 : vector<2x1x12xf32> to vector<2x4x12xf32>
    %173 = arith.mulf %38, %172 : vector<2x4x12xf32>
    %cst_80 = arith.constant dense<0.000000e+00> : vector<2x4xf32>
    %174 = vector.multi_reduction <add>, %173, %cst_80 [2] : vector<2x4x12xf32> to vector<2x4xf32>
    %175 = vector.shape_cast %174 : vector<2x4xf32> to vector<2x1x4xf32>
    %176 = vector.broadcast %175 : vector<2x1x4xf32> to vector<2x12x4xf32>
    %177 = arith.mulf %37, %176 : vector<2x12x4xf32>
    %cst_81 = arith.constant dense<0.000000e+00> : vector<2x12xf32>
    %178 = vector.multi_reduction <add>, %177, %cst_81 [2] : vector<2x12x4xf32> to vector<2x12xf32>
    %cst_82 = arith.constant 9.99999968E-21 : f32
    %179 = vector.broadcast %cst_82 : f32 to vector<2x12xf32>
    %180 = arith.maximumf %178, %179 : vector<2x12xf32>
    %181 = arith.divf %170, %180 : vector<2x12xf32>
    %182 = vector.shape_cast %151 : vector<2x4xf32> to vector<2x1x4xf32>
    %183 = vector.broadcast %182 : vector<2x1x4xf32> to vector<2x12x4xf32>
    %184 = arith.mulf %37, %183 : vector<2x12x4xf32>
    %cst_83 = arith.constant dense<0.000000e+00> : vector<2x12xf32>
    %185 = vector.multi_reduction <add>, %184, %cst_83 [2] : vector<2x12x4xf32> to vector<2x12xf32>
    %186 = arith.mulf %185, %181 : vector<2x12xf32>
    %187 = vector.shape_cast %186 : vector<2x12xf32> to vector<2x1x12xf32>
    %188 = vector.broadcast %187 : vector<2x1x12xf32> to vector<2x32x12xf32>
    %189 = arith.mulf %36, %188 : vector<2x32x12xf32>
    %cst_84 = arith.constant dense<0.000000e+00> : vector<2x32xf32>
    %190 = vector.multi_reduction <add>, %189, %cst_84 [2] : vector<2x32x12xf32> to vector<2x32xf32>
    %191 = arith.truncf %190 : vector<2x32xf32> to vector<2x32xbf16>
    %cst_85 = arith.constant dense<0.000000e+00> : vector<2x128xf32>
    %192 = tpu.matmul %191, %5, %cst_85 {dimension_numbers = #tpu.dot_dimension_numbers<[1], [0], [0], [1], [0, 0, 1, 1], [], []>} : vector<2x32xbf16>, vector<32x128xbf16>, vector<2x128xf32> -> vector<2x128xf32>
    %cst_86 = arith.constant dense<0.000000e+00> : vector<2x128xf32>
    %193 = tpu.matmul %104, %6, %cst_86 {dimension_numbers = #tpu.dot_dimension_numbers<[1], [0], [0], [1], [0, 0, 1, 1], [], []>} : vector<2x32xbf16>, vector<32x128xbf16>, vector<2x128xf32> -> vector<2x128xf32>
    %194 = arith.addf %192, %193 : vector<2x128xf32>
    %195 = vector.extract_strided_slice %194 {offsets = [0, 0], sizes = [2, 32], strides = [1, 1]} : vector<2x128xf32> to vector<2x32xf32>
    %196 = arith.addf %195, %27 : vector<2x32xf32>
    %cst_87 = arith.constant dense<0xFF800000> : vector<2xf32>
    %197 = vector.multi_reduction <maximumf>, %196, %cst_87 [1] : vector<2x32xf32> to vector<2xf32>
    %198 = vector.shape_cast %197 : vector<2xf32> to vector<2x1xf32>
    %199 = vector.broadcast %198 : vector<2x1xf32> to vector<2x32xf32>
    %200 = arith.subf %196, %199 : vector<2x32xf32>
    %201 = vector.broadcast %198 : vector<2x1xf32> to vector<2x32xf32>
    %202 = arith.subf %196, %201 : vector<2x32xf32>
    %203 = math.exp %202 : vector<2x32xf32>
    %cst_88 = arith.constant dense<0.000000e+00> : vector<2xf32>
    %204 = vector.multi_reduction <add>, %203, %cst_88 [1] : vector<2x32xf32> to vector<2xf32>
    %205 = vector.shape_cast %204 : vector<2xf32> to vector<2x1xf32>
    %206 = math.log %205 : vector<2x1xf32>
    %207 = vector.broadcast %206 : vector<2x1xf32> to vector<2x32xf32>
    %208 = arith.subf %200, %207 : vector<2x32xf32>
    %c0_89 = arith.constant 0 : index
    %c0_90 = arith.constant 0 : index
    %c0_91 = arith.constant 0 : index
    %209 = vector.load %arg14[%c0_89, %c0_90, %c0_91] : memref<6x2x128xf32, #tpu.memory_space<vmem>>, vector<1x2x32xf32>
    %210 = vector.shape_cast %209 : vector<1x2x32xf32> to vector<2x32xf32>
    %211 = vector.shape_cast %208 : vector<2x32xf32> to vector<1x2x32xf32>
    tpu.vector_store %arg14[%c0_89, %c0_90, %c0_91], %211 {strides = array<i32>} : memref<6x2x128xf32, #tpu.memory_space<vmem>>, vector<1x2x32xf32>,
    %c0_92 = arith.constant 0 : index
    %c0_93 = arith.constant 0 : index
    %c32_94 = arith.constant 32 : index
    %212 = vector.load %arg14[%c0_92, %c0_93, %c32_94] : memref<6x2x128xf32, #tpu.memory_space<vmem>>, vector<1x2x12xf32>
    %213 = vector.shape_cast %212 : vector<1x2x12xf32> to vector<2x12xf32>
    %214 = vector.shape_cast %186 : vector<2x12xf32> to vector<1x2x12xf32>
    tpu.vector_store %arg14[%c0_92, %c0_93, %c32_94], %214 {strides = array<i32>} : memref<6x2x128xf32, #tpu.memory_space<vmem>>, vector<1x2x12xf32>,
    %c0_95 = arith.constant 0 : index
    %c0_96 = arith.constant 0 : index
    %c44 = arith.constant 44 : index
    %215 = vector.load %arg14[%c0_95, %c0_96, %c44] : memref<6x2x128xf32, #tpu.memory_space<vmem>>, vector<1x2x4xf32>
    %216 = vector.shape_cast %215 : vector<1x2x4xf32> to vector<2x4xf32>
    %217 = vector.shape_cast %151 : vector<2x4xf32> to vector<1x2x4xf32>
    tpu.vector_store %arg14[%c0_95, %c0_96, %c44], %217 {strides = array<i32>} : memref<6x2x128xf32, #tpu.memory_space<vmem>>, vector<1x2x4xf32>,
    %218 = vector.extract_strided_slice %47 {offsets = [2, 0], sizes = [2, 128], strides = [1, 1]} : vector<12x128xf32> to vector<2x128xf32>
    %219 = arith.truncf %77 : vector<2x32xf32> to vector<2x32xbf16>
    %cst_97 = arith.constant dense<0.000000e+00> : vector<2x128xf32>
    %220 = tpu.matmul %219, %1, %cst_97 {dimension_numbers = #tpu.dot_dimension_numbers<[1], [0], [0], [1], [0, 0, 1, 1], [], []>} : vector<2x32xbf16>, vector<32x128xbf16>, vector<2x128xf32> -> vector<2x128xf32>
    %221 = vector.extract_strided_slice %218 {offsets = [0, 0], sizes = [2, 64], strides = [1, 1]} : vector<2x128xf32> to vector<2x64xf32>
    %222 = vector.extract_strided_slice %220 {offsets = [0, 0], sizes = [2, 64], strides = [1, 1]} : vector<2x128xf32> to vector<2x64xf32>
    %223 = arith.addf %221, %222 : vector<2x64xf32>
    %224 = arith.addf %223, %9 : vector<2x64xf32>
    %225 = arith.negf %224 : vector<2x64xf32>
    %226 = math.exp %225 : vector<2x64xf32>
    %cst_98 = arith.constant 1.000000e+00 : f32
    %227 = vector.broadcast %cst_98 : f32 to vector<2x64xf32>
    %228 = arith.addf %227, %226 : vector<2x64xf32>
    %229 = arith.divf %227, %228 : vector<2x64xf32>
    %230 = vector.extract_strided_slice %218 {offsets = [0, 64], sizes = [2, 32], strides = [1, 1]} : vector<2x128xf32> to vector<2x32xf32>
    %231 = arith.addf %230, %12 : vector<2x32xf32>
    %232 = vector.extract_strided_slice %229 {offsets = [0, 0], sizes = [2, 32], strides = [1, 1]} : vector<2x64xf32> to vector<2x32xf32>
    %233 = vector.extract_strided_slice %220 {offsets = [0, 64], sizes = [2, 32], strides = [1, 1]} : vector<2x128xf32> to vector<2x32xf32>
    %234 = arith.addf %233, %15 : vector<2x32xf32>
    %235 = arith.mulf %232, %234 : vector<2x32xf32>
    %236 = arith.addf %231, %235 : vector<2x32xf32>
    %237 = math.tanh %236 : vector<2x32xf32>
    %238 = vector.extract_strided_slice %229 {offsets = [0, 32], sizes = [2, 32], strides = [1, 1]} : vector<2x64xf32> to vector<2x32xf32>
    %cst_99 = arith.constant 1.000000e+00 : f32
    %239 = vector.broadcast %cst_99 : f32 to vector<2x32xf32>
    %240 = arith.subf %239, %238 : vector<2x32xf32>
    %241 = arith.mulf %240, %237 : vector<2x32xf32>
    %242 = arith.mulf %238, %77 : vector<2x32xf32>
    %243 = arith.addf %241, %242 : vector<2x32xf32>
    %244 = arith.truncf %243 : vector<2x32xf32> to vector<2x32xbf16>
    %cst_100 = arith.constant dense<0.000000e+00> : vector<2x128xf32>
    %245 = tpu.matmul %244, %2, %cst_100 {dimension_numbers = #tpu.dot_dimension_numbers<[1], [0], [0], [1], [0, 0, 1, 1], [], []>} : vector<2x32xbf16>, vector<32x128xbf16>, vector<2x128xf32> -> vector<2x128xf32>
    %246 = arith.truncf %103 : vector<2x32xf32> to vector<2x32xbf16>
    %cst_101 = arith.constant dense<0.000000e+00> : vector<2x128xf32>
    %247 = tpu.matmul %246, %3, %cst_101 {dimension_numbers = #tpu.dot_dimension_numbers<[1], [0], [0], [1], [0, 0, 1, 1], [], []>} : vector<2x32xbf16>, vector<32x128xbf16>, vector<2x128xf32> -> vector<2x128xf32>
    %248 = arith.addf %245, %247 : vector<2x128xf32>
    %249 = vector.extract_strided_slice %248 {offsets = [0, 0], sizes = [2, 64], strides = [1, 1]} : vector<2x128xf32> to vector<2x64xf32>
    %250 = arith.addf %249, %18 : vector<2x64xf32>
    %251 = arith.negf %250 : vector<2x64xf32>
    %252 = math.exp %251 : vector<2x64xf32>
    %cst_102 = arith.constant 1.000000e+00 : f32
    %253 = vector.broadcast %cst_102 : f32 to vector<2x64xf32>
    %254 = arith.addf %253, %252 : vector<2x64xf32>
    %255 = arith.divf %253, %254 : vector<2x64xf32>
    %256 = vector.extract_strided_slice %248 {offsets = [0, 64], sizes = [2, 32], strides = [1, 1]} : vector<2x128xf32> to vector<2x32xf32>
    %257 = arith.addf %256, %21 : vector<2x32xf32>
    %258 = vector.extract_strided_slice %255 {offsets = [0, 0], sizes = [2, 32], strides = [1, 1]} : vector<2x64xf32> to vector<2x32xf32>
    %259 = vector.extract_strided_slice %248 {offsets = [0, 96], sizes = [2, 32], strides = [1, 1]} : vector<2x128xf32> to vector<2x32xf32>
    %260 = arith.addf %259, %24 : vector<2x32xf32>
    %261 = arith.mulf %258, %260 : vector<2x32xf32>
    %262 = arith.addf %257, %261 : vector<2x32xf32>
    %263 = math.tanh %262 : vector<2x32xf32>
    %264 = vector.extract_strided_slice %255 {offsets = [0, 32], sizes = [2, 32], strides = [1, 1]} : vector<2x64xf32> to vector<2x32xf32>
    %cst_103 = arith.constant 1.000000e+00 : f32
    %265 = vector.broadcast %cst_103 : f32 to vector<2x32xf32>
    %266 = arith.subf %265, %264 : vector<2x32xf32>
    %267 = arith.mulf %266, %263 : vector<2x32xf32>
    %268 = arith.mulf %264, %103 : vector<2x32xf32>
    %269 = arith.addf %267, %268 : vector<2x32xf32>
    %270 = arith.truncf %269 : vector<2x32xf32> to vector<2x32xbf16>
    %cst_104 = arith.constant dense<0.000000e+00> : vector<2x128xf32>
    %271 = tpu.matmul %270, %4, %cst_104 {dimension_numbers = #tpu.dot_dimension_numbers<[1], [0], [0], [1], [0, 0, 1, 1], [], []>} : vector<2x32xbf16>, vector<32x128xbf16>, vector<2x128xf32> -> vector<2x128xf32>
    %272 = vector.extract_strided_slice %271 {offsets = [0, 0], sizes = [2, 32], strides = [1, 1]} : vector<2x128xf32> to vector<2x32xf32>
    %273 = vector.extract_strided_slice %271 {offsets = [0, 32], sizes = [2, 32], strides = [1, 1]} : vector<2x128xf32> to vector<2x32xf32>
    %274 = vector.extract_strided_slice %271 {offsets = [0, 64], sizes = [2, 1], strides = [1, 1]} : vector<2x128xf32> to vector<2x1xf32>
    %275 = vector.extract_strided_slice %271 {offsets = [0, 65], sizes = [2, 1], strides = [1, 1]} : vector<2x128xf32> to vector<2x1xf32>
    %276 = vector.extract_strided_slice %271 {offsets = [0, 66], sizes = [2, 1], strides = [1, 1]} : vector<2x128xf32> to vector<2x1xf32>
    %277 = vector.shape_cast %272 : vector<2x32xf32> to vector<2x1x32xf32>
    %278 = vector.broadcast %277 : vector<2x1x32xf32> to vector<2x4x32xf32>
    %279 = arith.mulf %34, %278 : vector<2x4x32xf32>
    %cst_105 = arith.constant dense<0.000000e+00> : vector<2x4xf32>
    %280 = vector.multi_reduction <add>, %279, %cst_105 [2] : vector<2x4x32xf32> to vector<2x4xf32>
    %281 = vector.broadcast %274 : vector<2x1xf32> to vector<2x4xf32>
    %282 = arith.addf %280, %281 : vector<2x4xf32>
    %283 = arith.addf %282, %40 : vector<2x4xf32>
    %cst_106 = arith.constant dense<0xFF800000> : vector<2xf32>
    %284 = vector.multi_reduction <maximumf>, %283, %cst_106 [1] : vector<2x4xf32> to vector<2xf32>
    %285 = vector.shape_cast %284 : vector<2xf32> to vector<2x1xf32>
    %286 = vector.broadcast %285 : vector<2x1xf32> to vector<2x4xf32>
    %287 = arith.subf %283, %286 : vector<2x4xf32>
    %288 = math.exp %287 : vector<2x4xf32>
    %cst_107 = arith.constant dense<0.000000e+00> : vector<2xf32>
    %289 = vector.multi_reduction <add>, %288, %cst_107 [1] : vector<2x4xf32> to vector<2xf32>
    %290 = vector.shape_cast %289 : vector<2xf32> to vector<2x1xf32>
    %291 = vector.broadcast %290 : vector<2x1xf32> to vector<2x4xf32>
    %292 = arith.divf %288, %291 : vector<2x4xf32>
    %293 = arith.mulf %208, %30 : vector<2x32xf32>
    %cst_108 = arith.constant dense<0.000000e+00> : vector<2xf32>
    %294 = vector.multi_reduction <add>, %293, %cst_108 [1] : vector<2x32xf32> to vector<2xf32>
    %295 = vector.shape_cast %294 : vector<2xf32> to vector<2x1xf32>
    %296 = vector.extract_strided_slice %218 {offsets = [0, 96], sizes = [2, 1], strides = [1, 1]} : vector<2x128xf32> to vector<2x1xf32>
    %297 = arith.addf %295, %296 : vector<2x1xf32>
    %298 = arith.addf %297, %276 : vector<2x1xf32>
    %299 = arith.addf %298, %33 : vector<2x1xf32>
    %300 = arith.negf %299 : vector<2x1xf32>
    %301 = math.exp %300 : vector<2x1xf32>
    %cst_109 = arith.constant 1.000000e+00 : f32
    %302 = vector.broadcast %cst_109 : f32 to vector<2x1xf32>
    %303 = arith.addf %302, %301 : vector<2x1xf32>
    %304 = arith.divf %302, %303 : vector<2x1xf32>
    %cst_110 = arith.constant 1.000000e+00 : f32
    %305 = vector.broadcast %cst_110 : f32 to vector<2x1xf32>
    %306 = arith.subf %305, %304 : vector<2x1xf32>
    %307 = vector.broadcast %306 : vector<2x1xf32> to vector<2x4xf32>
    %308 = arith.mulf %307, %292 : vector<2x4xf32>
    %309 = vector.broadcast %304 : vector<2x1xf32> to vector<2x4xf32>
    %310 = arith.mulf %309, %151 : vector<2x4xf32>
    %311 = arith.addf %308, %310 : vector<2x4xf32>
    %cst_111 = arith.constant dense<0.000000e+00> : vector<2xf32>
    %312 = vector.multi_reduction <add>, %311, %cst_111 [1] : vector<2x4xf32> to vector<2xf32>
    %313 = vector.shape_cast %312 : vector<2xf32> to vector<2x1xf32>
    %cst_112 = arith.constant 9.99999968E-21 : f32
    %314 = vector.broadcast %cst_112 : f32 to vector<2x1xf32>
    %315 = arith.addf %313, %314 : vector<2x1xf32>
    %316 = vector.broadcast %315 : vector<2x1xf32> to vector<2x4xf32>
    %317 = arith.divf %311, %316 : vector<2x4xf32>
    %318 = vector.shape_cast %273 : vector<2x32xf32> to vector<2x1x32xf32>
    %319 = vector.broadcast %318 : vector<2x1x32xf32> to vector<2x12x32xf32>
    %320 = arith.mulf %35, %319 : vector<2x12x32xf32>
    %cst_113 = arith.constant dense<0.000000e+00> : vector<2x12xf32>
    %321 = vector.multi_reduction <add>, %320, %cst_113 [2] : vector<2x12x32xf32> to vector<2x12xf32>
    %322 = vector.broadcast %275 : vector<2x1xf32> to vector<2x12xf32>
    %323 = arith.addf %321, %322 : vector<2x12xf32>
    %324 = arith.addf %323, %41 : vector<2x12xf32>
    %325 = vector.shape_cast %324 : vector<2x12xf32> to vector<2x1x12xf32>
    %326 = vector.broadcast %325 : vector<2x1x12xf32> to vector<2x4x12xf32>
    %327 = arith.addf %326, %39 : vector<2x4x12xf32>
    %cst_114 = arith.constant dense<0xFF800000> : vector<2x4xf32>
    %328 = vector.multi_reduction <maximumf>, %327, %cst_114 [2] : vector<2x4x12xf32> to vector<2x4xf32>
    %329 = arith.mulf %328, %43 : vector<2x4xf32>
    %330 = vector.shape_cast %329 : vector<2x4xf32> to vector<2x1x4xf32>
    %331 = vector.broadcast %330 : vector<2x1x4xf32> to vector<2x12x4xf32>
    %332 = arith.mulf %37, %331 : vector<2x12x4xf32>
    %cst_115 = arith.constant dense<0.000000e+00> : vector<2x12xf32>
    %333 = vector.multi_reduction <add>, %332, %cst_115 [2] : vector<2x12x4xf32> to vector<2x12xf32>
    %334 = arith.subf %324, %333 : vector<2x12xf32>
    %335 = math.exp %334 : vector<2x12xf32>
    %336 = arith.mulf %335, %42 : vector<2x12xf32>
    %337 = vector.shape_cast %336 : vector<2x12xf32> to vector<2x1x12xf32>
    %338 = vector.broadcast %337 : vector<2x1x12xf32> to vector<2x4x12xf32>
    %339 = arith.mulf %38, %338 : vector<2x4x12xf32>
    %cst_116 = arith.constant dense<0.000000e+00> : vector<2x4xf32>
    %340 = vector.multi_reduction <add>, %339, %cst_116 [2] : vector<2x4x12xf32> to vector<2x4xf32>
    %341 = vector.shape_cast %340 : vector<2x4xf32> to vector<2x1x4xf32>
    %342 = vector.broadcast %341 : vector<2x1x4xf32> to vector<2x12x4xf32>
    %343 = arith.mulf %37, %342 : vector<2x12x4xf32>
    %cst_117 = arith.constant dense<0.000000e+00> : vector<2x12xf32>
    %344 = vector.multi_reduction <add>, %343, %cst_117 [2] : vector<2x12x4xf32> to vector<2x12xf32>
    %cst_118 = arith.constant 9.99999968E-21 : f32
    %345 = vector.broadcast %cst_118 : f32 to vector<2x12xf32>
    %346 = arith.maximumf %344, %345 : vector<2x12xf32>
    %347 = arith.divf %336, %346 : vector<2x12xf32>
    %348 = vector.shape_cast %317 : vector<2x4xf32> to vector<2x1x4xf32>
    %349 = vector.broadcast %348 : vector<2x1x4xf32> to vector<2x12x4xf32>
    %350 = arith.mulf %37, %349 : vector<2x12x4xf32>
    %cst_119 = arith.constant dense<0.000000e+00> : vector<2x12xf32>
    %351 = vector.multi_reduction <add>, %350, %cst_119 [2] : vector<2x12x4xf32> to vector<2x12xf32>
    %352 = arith.mulf %351, %347 : vector<2x12xf32>
    %353 = vector.shape_cast %352 : vector<2x12xf32> to vector<2x1x12xf32>
    %354 = vector.broadcast %353 : vector<2x1x12xf32> to vector<2x32x12xf32>
    %355 = arith.mulf %36, %354 : vector<2x32x12xf32>
    %cst_120 = arith.constant dense<0.000000e+00> : vector<2x32xf32>
    %356 = vector.multi_reduction <add>, %355, %cst_120 [2] : vector<2x32x12xf32> to vector<2x32xf32>
    %357 = arith.truncf %356 : vector<2x32xf32> to vector<2x32xbf16>
    %cst_121 = arith.constant dense<0.000000e+00> : vector<2x128xf32>
    %358 = tpu.matmul %357, %5, %cst_121 {dimension_numbers = #tpu.dot_dimension_numbers<[1], [0], [0], [1], [0, 0, 1, 1], [], []>} : vector<2x32xbf16>, vector<32x128xbf16>, vector<2x128xf32> -> vector<2x128xf32>
    %cst_122 = arith.constant dense<0.000000e+00> : vector<2x128xf32>
    %359 = tpu.matmul %270, %6, %cst_122 {dimension_numbers = #tpu.dot_dimension_numbers<[1], [0], [0], [1], [0, 0, 1, 1], [], []>} : vector<2x32xbf16>, vector<32x128xbf16>, vector<2x128xf32> -> vector<2x128xf32>
    %360 = arith.addf %358, %359 : vector<2x128xf32>
    %361 = vector.extract_strided_slice %360 {offsets = [0, 0], sizes = [2, 32], strides = [1, 1]} : vector<2x128xf32> to vector<2x32xf32>
    %362 = arith.addf %361, %27 : vector<2x32xf32>
    %cst_123 = arith.constant dense<0xFF800000> : vector<2xf32>
    %363 = vector.multi_reduction <maximumf>, %362, %cst_123 [1] : vector<2x32xf32> to vector<2xf32>
    %364 = vector.shape_cast %363 : vector<2xf32> to vector<2x1xf32>
    %365 = vector.broadcast %364 : vector<2x1xf32> to vector<2x32xf32>
    %366 = arith.subf %362, %365 : vector<2x32xf32>
    %367 = vector.broadcast %364 : vector<2x1xf32> to vector<2x32xf32>
    %368 = arith.subf %362, %367 : vector<2x32xf32>
    %369 = math.exp %368 : vector<2x32xf32>
    %cst_124 = arith.constant dense<0.000000e+00> : vector<2xf32>
    %370 = vector.multi_reduction <add>, %369, %cst_124 [1] : vector<2x32xf32> to vector<2xf32>
    %371 = vector.shape_cast %370 : vector<2xf32> to vector<2x1xf32>
    %372 = math.log %371 : vector<2x1xf32>
    %373 = vector.broadcast %372 : vector<2x1xf32> to vector<2x32xf32>
    %374 = arith.subf %366, %373 : vector<2x32xf32>
    %c1_125 = arith.constant 1 : index
    %c0_126 = arith.constant 0 : index
    %c0_127 = arith.constant 0 : index
    %375 = vector.load %arg14[%c1_125, %c0_126, %c0_127] : memref<6x2x128xf32, #tpu.memory_space<vmem>>, vector<1x2x32xf32>
    %376 = vector.shape_cast %375 : vector<1x2x32xf32> to vector<2x32xf32>
    %377 = vector.shape_cast %374 : vector<2x32xf32> to vector<1x2x32xf32>
    tpu.vector_store %arg14[%c1_125, %c0_126, %c0_127], %377 {strides = array<i32>} : memref<6x2x128xf32, #tpu.memory_space<vmem>>, vector<1x2x32xf32>,
    %c1_128 = arith.constant 1 : index
    %c0_129 = arith.constant 0 : index
    %c32_130 = arith.constant 32 : index
    %378 = vector.load %arg14[%c1_128, %c0_129, %c32_130] : memref<6x2x128xf32, #tpu.memory_space<vmem>>, vector<1x2x12xf32>
    %379 = vector.shape_cast %378 : vector<1x2x12xf32> to vector<2x12xf32>
    %380 = vector.shape_cast %352 : vector<2x12xf32> to vector<1x2x12xf32>
    tpu.vector_store %arg14[%c1_128, %c0_129, %c32_130], %380 {strides = array<i32>} : memref<6x2x128xf32, #tpu.memory_space<vmem>>, vector<1x2x12xf32>,
    %c1_131 = arith.constant 1 : index
    %c0_132 = arith.constant 0 : index
    %c44_133 = arith.constant 44 : index
    %381 = vector.load %arg14[%c1_131, %c0_132, %c44_133] : memref<6x2x128xf32, #tpu.memory_space<vmem>>, vector<1x2x4xf32>
    %382 = vector.shape_cast %381 : vector<1x2x4xf32> to vector<2x4xf32>
    %383 = vector.shape_cast %317 : vector<2x4xf32> to vector<1x2x4xf32>
    tpu.vector_store %arg14[%c1_131, %c0_132, %c44_133], %383 {strides = array<i32>} : memref<6x2x128xf32, #tpu.memory_space<vmem>>, vector<1x2x4xf32>,
    %384 = vector.extract_strided_slice %47 {offsets = [4, 0], sizes = [2, 128], strides = [1, 1]} : vector<12x128xf32> to vector<2x128xf32>
    %385 = arith.truncf %243 : vector<2x32xf32> to vector<2x32xbf16>
    %cst_134 = arith.constant dense<0.000000e+00> : vector<2x128xf32>
    %386 = tpu.matmul %385, %1, %cst_134 {dimension_numbers = #tpu.dot_dimension_numbers<[1], [0], [0], [1], [0, 0, 1, 1], [], []>} : vector<2x32xbf16>, vector<32x128xbf16>, vector<2x128xf32> -> vector<2x128xf32>
    %387 = vector.extract_strided_slice %384 {offsets = [0, 0], sizes = [2, 64], strides = [1, 1]} : vector<2x128xf32> to vector<2x64xf32>
    %388 = vector.extract_strided_slice %386 {offsets = [0, 0], sizes = [2, 64], strides = [1, 1]} : vector<2x128xf32> to vector<2x64xf32>
    %389 = arith.addf %387, %388 : vector<2x64xf32>
    %390 = arith.addf %389, %9 : vector<2x64xf32>
    %391 = arith.negf %390 : vector<2x64xf32>
    %392 = math.exp %391 : vector<2x64xf32>
    %cst_135 = arith.constant 1.000000e+00 : f32
    %393 = vector.broadcast %cst_135 : f32 to vector<2x64xf32>
    %394 = arith.addf %393, %392 : vector<2x64xf32>
    %395 = arith.divf %393, %394 : vector<2x64xf32>
    %396 = vector.extract_strided_slice %384 {offsets = [0, 64], sizes = [2, 32], strides = [1, 1]} : vector<2x128xf32> to vector<2x32xf32>
    %397 = arith.addf %396, %12 : vector<2x32xf32>
    %398 = vector.extract_strided_slice %395 {offsets = [0, 0], sizes = [2, 32], strides = [1, 1]} : vector<2x64xf32> to vector<2x32xf32>
    %399 = vector.extract_strided_slice %386 {offsets = [0, 64], sizes = [2, 32], strides = [1, 1]} : vector<2x128xf32> to vector<2x32xf32>
    %400 = arith.addf %399, %15 : vector<2x32xf32>
    %401 = arith.mulf %398, %400 : vector<2x32xf32>
    %402 = arith.addf %397, %401 : vector<2x32xf32>
    %403 = math.tanh %402 : vector<2x32xf32>
    %404 = vector.extract_strided_slice %395 {offsets = [0, 32], sizes = [2, 32], strides = [1, 1]} : vector<2x64xf32> to vector<2x32xf32>
    %cst_136 = arith.constant 1.000000e+00 : f32
    %405 = vector.broadcast %cst_136 : f32 to vector<2x32xf32>
    %406 = arith.subf %405, %404 : vector<2x32xf32>
    %407 = arith.mulf %406, %403 : vector<2x32xf32>
    %408 = arith.mulf %404, %243 : vector<2x32xf32>
    %409 = arith.addf %407, %408 : vector<2x32xf32>
    %410 = arith.truncf %409 : vector<2x32xf32> to vector<2x32xbf16>
    %cst_137 = arith.constant dense<0.000000e+00> : vector<2x128xf32>
    %411 = tpu.matmul %410, %2, %cst_137 {dimension_numbers = #tpu.dot_dimension_numbers<[1], [0], [0], [1], [0, 0, 1, 1], [], []>} : vector<2x32xbf16>, vector<32x128xbf16>, vector<2x128xf32> -> vector<2x128xf32>
    %412 = arith.truncf %269 : vector<2x32xf32> to vector<2x32xbf16>
    %cst_138 = arith.constant dense<0.000000e+00> : vector<2x128xf32>
    %413 = tpu.matmul %412, %3, %cst_138 {dimension_numbers = #tpu.dot_dimension_numbers<[1], [0], [0], [1], [0, 0, 1, 1], [], []>} : vector<2x32xbf16>, vector<32x128xbf16>, vector<2x128xf32> -> vector<2x128xf32>
    %414 = arith.addf %411, %413 : vector<2x128xf32>
    %415 = vector.extract_strided_slice %414 {offsets = [0, 0], sizes = [2, 64], strides = [1, 1]} : vector<2x128xf32> to vector<2x64xf32>
    %416 = arith.addf %415, %18 : vector<2x64xf32>
    %417 = arith.negf %416 : vector<2x64xf32>
    %418 = math.exp %417 : vector<2x64xf32>
    %cst_139 = arith.constant 1.000000e+00 : f32
    %419 = vector.broadcast %cst_139 : f32 to vector<2x64xf32>
    %420 = arith.addf %419, %418 : vector<2x64xf32>
    %421 = arith.divf %419, %420 : vector<2x64xf32>
    %422 = vector.extract_strided_slice %414 {offsets = [0, 64], sizes = [2, 32], strides = [1, 1]} : vector<2x128xf32> to vector<2x32xf32>
    %423 = arith.addf %422, %21 : vector<2x32xf32>
    %424 = vector.extract_strided_slice %421 {offsets = [0, 0], sizes = [2, 32], strides = [1, 1]} : vector<2x64xf32> to vector<2x32xf32>
    %425 = vector.extract_strided_slice %414 {offsets = [0, 96], sizes = [2, 32], strides = [1, 1]} : vector<2x128xf32> to vector<2x32xf32>
    %426 = arith.addf %425, %24 : vector<2x32xf32>
    %427 = arith.mulf %424, %426 : vector<2x32xf32>
    %428 = arith.addf %423, %427 : vector<2x32xf32>
    %429 = math.tanh %428 : vector<2x32xf32>
    %430 = vector.extract_strided_slice %421 {offsets = [0, 32], sizes = [2, 32], strides = [1, 1]} : vector<2x64xf32> to vector<2x32xf32>
    %cst_140 = arith.constant 1.000000e+00 : f32
    %431 = vector.broadcast %cst_140 : f32 to vector<2x32xf32>
    %432 = arith.subf %431, %430 : vector<2x32xf32>
    %433 = arith.mulf %432, %429 : vector<2x32xf32>
    %434 = arith.mulf %430, %269 : vector<2x32xf32>
    %435 = arith.addf %433, %434 : vector<2x32xf32>
    %436 = arith.truncf %435 : vector<2x32xf32> to vector<2x32xbf16>
    %cst_141 = arith.constant dense<0.000000e+00> : vector<2x128xf32>
    %437 = tpu.matmul %436, %4, %cst_141 {dimension_numbers = #tpu.dot_dimension_numbers<[1], [0], [0], [1], [0, 0, 1, 1], [], []>} : vector<2x32xbf16>, vector<32x128xbf16>, vector<2x128xf32> -> vector<2x128xf32>
    %438 = vector.extract_strided_slice %437 {offsets = [0, 0], sizes = [2, 32], strides = [1, 1]} : vector<2x128xf32> to vector<2x32xf32>
    %439 = vector.extract_strided_slice %437 {offsets = [0, 32], sizes = [2, 32], strides = [1, 1]} : vector<2x128xf32> to vector<2x32xf32>
    %440 = vector.extract_strided_slice %437 {offsets = [0, 64], sizes = [2, 1], strides = [1, 1]} : vector<2x128xf32> to vector<2x1xf32>
    %441 = vector.extract_strided_slice %437 {offsets = [0, 65], sizes = [2, 1], strides = [1, 1]} : vector<2x128xf32> to vector<2x1xf32>
    %442 = vector.extract_strided_slice %437 {offsets = [0, 66], sizes = [2, 1], strides = [1, 1]} : vector<2x128xf32> to vector<2x1xf32>
    %443 = vector.shape_cast %438 : vector<2x32xf32> to vector<2x1x32xf32>
    %444 = vector.broadcast %443 : vector<2x1x32xf32> to vector<2x4x32xf32>
    %445 = arith.mulf %34, %444 : vector<2x4x32xf32>
    %cst_142 = arith.constant dense<0.000000e+00> : vector<2x4xf32>
    %446 = vector.multi_reduction <add>, %445, %cst_142 [2] : vector<2x4x32xf32> to vector<2x4xf32>
    %447 = vector.broadcast %440 : vector<2x1xf32> to vector<2x4xf32>
    %448 = arith.addf %446, %447 : vector<2x4xf32>
    %449 = arith.addf %448, %40 : vector<2x4xf32>
    %cst_143 = arith.constant dense<0xFF800000> : vector<2xf32>
    %450 = vector.multi_reduction <maximumf>, %449, %cst_143 [1] : vector<2x4xf32> to vector<2xf32>
    %451 = vector.shape_cast %450 : vector<2xf32> to vector<2x1xf32>
    %452 = vector.broadcast %451 : vector<2x1xf32> to vector<2x4xf32>
    %453 = arith.subf %449, %452 : vector<2x4xf32>
    %454 = math.exp %453 : vector<2x4xf32>
    %cst_144 = arith.constant dense<0.000000e+00> : vector<2xf32>
    %455 = vector.multi_reduction <add>, %454, %cst_144 [1] : vector<2x4xf32> to vector<2xf32>
    %456 = vector.shape_cast %455 : vector<2xf32> to vector<2x1xf32>
    %457 = vector.broadcast %456 : vector<2x1xf32> to vector<2x4xf32>
    %458 = arith.divf %454, %457 : vector<2x4xf32>
    %459 = arith.mulf %374, %30 : vector<2x32xf32>
    %cst_145 = arith.constant dense<0.000000e+00> : vector<2xf32>
    %460 = vector.multi_reduction <add>, %459, %cst_145 [1] : vector<2x32xf32> to vector<2xf32>
    %461 = vector.shape_cast %460 : vector<2xf32> to vector<2x1xf32>
    %462 = vector.extract_strided_slice %384 {offsets = [0, 96], sizes = [2, 1], strides = [1, 1]} : vector<2x128xf32> to vector<2x1xf32>
    %463 = arith.addf %461, %462 : vector<2x1xf32>
    %464 = arith.addf %463, %442 : vector<2x1xf32>
    %465 = arith.addf %464, %33 : vector<2x1xf32>
    %466 = arith.negf %465 : vector<2x1xf32>
    %467 = math.exp %466 : vector<2x1xf32>
    %cst_146 = arith.constant 1.000000e+00 : f32
    %468 = vector.broadcast %cst_146 : f32 to vector<2x1xf32>
    %469 = arith.addf %468, %467 : vector<2x1xf32>
    %470 = arith.divf %468, %469 : vector<2x1xf32>
    %cst_147 = arith.constant 1.000000e+00 : f32
    %471 = vector.broadcast %cst_147 : f32 to vector<2x1xf32>
    %472 = arith.subf %471, %470 : vector<2x1xf32>
    %473 = vector.broadcast %472 : vector<2x1xf32> to vector<2x4xf32>
    %474 = arith.mulf %473, %458 : vector<2x4xf32>
    %475 = vector.broadcast %470 : vector<2x1xf32> to vector<2x4xf32>
    %476 = arith.mulf %475, %317 : vector<2x4xf32>
    %477 = arith.addf %474, %476 : vector<2x4xf32>
    %cst_148 = arith.constant dense<0.000000e+00> : vector<2xf32>
    %478 = vector.multi_reduction <add>, %477, %cst_148 [1] : vector<2x4xf32> to vector<2xf32>
    %479 = vector.shape_cast %478 : vector<2xf32> to vector<2x1xf32>
    %cst_149 = arith.constant 9.99999968E-21 : f32
    %480 = vector.broadcast %cst_149 : f32 to vector<2x1xf32>
    %481 = arith.addf %479, %480 : vector<2x1xf32>
    %482 = vector.broadcast %481 : vector<2x1xf32> to vector<2x4xf32>
    %483 = arith.divf %477, %482 : vector<2x4xf32>
    %484 = vector.shape_cast %439 : vector<2x32xf32> to vector<2x1x32xf32>
    %485 = vector.broadcast %484 : vector<2x1x32xf32> to vector<2x12x32xf32>
    %486 = arith.mulf %35, %485 : vector<2x12x32xf32>
    %cst_150 = arith.constant dense<0.000000e+00> : vector<2x12xf32>
    %487 = vector.multi_reduction <add>, %486, %cst_150 [2] : vector<2x12x32xf32> to vector<2x12xf32>
    %488 = vector.broadcast %441 : vector<2x1xf32> to vector<2x12xf32>
    %489 = arith.addf %487, %488 : vector<2x12xf32>
    %490 = arith.addf %489, %41 : vector<2x12xf32>
    %491 = vector.shape_cast %490 : vector<2x12xf32> to vector<2x1x12xf32>
    %492 = vector.broadcast %491 : vector<2x1x12xf32> to vector<2x4x12xf32>
    %493 = arith.addf %492, %39 : vector<2x4x12xf32>
    %cst_151 = arith.constant dense<0xFF800000> : vector<2x4xf32>
    %494 = vector.multi_reduction <maximumf>, %493, %cst_151 [2] : vector<2x4x12xf32> to vector<2x4xf32>
    %495 = arith.mulf %494, %43 : vector<2x4xf32>
    %496 = vector.shape_cast %495 : vector<2x4xf32> to vector<2x1x4xf32>
    %497 = vector.broadcast %496 : vector<2x1x4xf32> to vector<2x12x4xf32>
    %498 = arith.mulf %37, %497 : vector<2x12x4xf32>
    %cst_152 = arith.constant dense<0.000000e+00> : vector<2x12xf32>
    %499 = vector.multi_reduction <add>, %498, %cst_152 [2] : vector<2x12x4xf32> to vector<2x12xf32>
    %500 = arith.subf %490, %499 : vector<2x12xf32>
    %501 = math.exp %500 : vector<2x12xf32>
    %502 = arith.mulf %501, %42 : vector<2x12xf32>
    %503 = vector.shape_cast %502 : vector<2x12xf32> to vector<2x1x12xf32>
    %504 = vector.broadcast %503 : vector<2x1x12xf32> to vector<2x4x12xf32>
    %505 = arith.mulf %38, %504 : vector<2x4x12xf32>
    %cst_153 = arith.constant dense<0.000000e+00> : vector<2x4xf32>
    %506 = vector.multi_reduction <add>, %505, %cst_153 [2] : vector<2x4x12xf32> to vector<2x4xf32>
    %507 = vector.shape_cast %506 : vector<2x4xf32> to vector<2x1x4xf32>
    %508 = vector.broadcast %507 : vector<2x1x4xf32> to vector<2x12x4xf32>
    %509 = arith.mulf %37, %508 : vector<2x12x4xf32>
    %cst_154 = arith.constant dense<0.000000e+00> : vector<2x12xf32>
    %510 = vector.multi_reduction <add>, %509, %cst_154 [2] : vector<2x12x4xf32> to vector<2x12xf32>
    %cst_155 = arith.constant 9.99999968E-21 : f32
    %511 = vector.broadcast %cst_155 : f32 to vector<2x12xf32>
    %512 = arith.maximumf %510, %511 : vector<2x12xf32>
    %513 = arith.divf %502, %512 : vector<2x12xf32>
    %514 = vector.shape_cast %483 : vector<2x4xf32> to vector<2x1x4xf32>
    %515 = vector.broadcast %514 : vector<2x1x4xf32> to vector<2x12x4xf32>
    %516 = arith.mulf %37, %515 : vector<2x12x4xf32>
    %cst_156 = arith.constant dense<0.000000e+00> : vector<2x12xf32>
    %517 = vector.multi_reduction <add>, %516, %cst_156 [2] : vector<2x12x4xf32> to vector<2x12xf32>
    %518 = arith.mulf %517, %513 : vector<2x12xf32>
    %519 = vector.shape_cast %518 : vector<2x12xf32> to vector<2x1x12xf32>
    %520 = vector.broadcast %519 : vector<2x1x12xf32> to vector<2x32x12xf32>
    %521 = arith.mulf %36, %520 : vector<2x32x12xf32>
    %cst_157 = arith.constant dense<0.000000e+00> : vector<2x32xf32>
    %522 = vector.multi_reduction <add>, %521, %cst_157 [2] : vector<2x32x12xf32> to vector<2x32xf32>
    %523 = arith.truncf %522 : vector<2x32xf32> to vector<2x32xbf16>
    %cst_158 = arith.constant dense<0.000000e+00> : vector<2x128xf32>
    %524 = tpu.matmul %523, %5, %cst_158 {dimension_numbers = #tpu.dot_dimension_numbers<[1], [0], [0], [1], [0, 0, 1, 1], [], []>} : vector<2x32xbf16>, vector<32x128xbf16>, vector<2x128xf32> -> vector<2x128xf32>
    %cst_159 = arith.constant dense<0.000000e+00> : vector<2x128xf32>
    %525 = tpu.matmul %436, %6, %cst_159 {dimension_numbers = #tpu.dot_dimension_numbers<[1], [0], [0], [1], [0, 0, 1, 1], [], []>} : vector<2x32xbf16>, vector<32x128xbf16>, vector<2x128xf32> -> vector<2x128xf32>
    %526 = arith.addf %524, %525 : vector<2x128xf32>
    %527 = vector.extract_strided_slice %526 {offsets = [0, 0], sizes = [2, 32], strides = [1, 1]} : vector<2x128xf32> to vector<2x32xf32>
    %528 = arith.addf %527, %27 : vector<2x32xf32>
    %cst_160 = arith.constant dense<0xFF800000> : vector<2xf32>
    %529 = vector.multi_reduction <maximumf>, %528, %cst_160 [1] : vector<2x32xf32> to vector<2xf32>
    %530 = vector.shape_cast %529 : vector<2xf32> to vector<2x1xf32>
    %531 = vector.broadcast %530 : vector<2x1xf32> to vector<2x32xf32>
    %532 = arith.subf %528, %531 : vector<2x32xf32>
    %533 = vector.broadcast %530 : vector<2x1xf32> to vector<2x32xf32>
    %534 = arith.subf %528, %533 : vector<2x32xf32>
    %535 = math.exp %534 : vector<2x32xf32>
    %cst_161 = arith.constant dense<0.000000e+00> : vector<2xf32>
    %536 = vector.multi_reduction <add>, %535, %cst_161 [1] : vector<2x32xf32> to vector<2xf32>
    %537 = vector.shape_cast %536 : vector<2xf32> to vector<2x1xf32>
    %538 = math.log %537 : vector<2x1xf32>
    %539 = vector.broadcast %538 : vector<2x1xf32> to vector<2x32xf32>
    %540 = arith.subf %532, %539 : vector<2x32xf32>
    %c2_162 = arith.constant 2 : index
    %c0_163 = arith.constant 0 : index
    %c0_164 = arith.constant 0 : index
    %541 = vector.load %arg14[%c2_162, %c0_163, %c0_164] : memref<6x2x128xf32, #tpu.memory_space<vmem>>, vector<1x2x32xf32>
    %542 = vector.shape_cast %541 : vector<1x2x32xf32> to vector<2x32xf32>
    %543 = vector.shape_cast %540 : vector<2x32xf32> to vector<1x2x32xf32>
    tpu.vector_store %arg14[%c2_162, %c0_163, %c0_164], %543 {strides = array<i32>} : memref<6x2x128xf32, #tpu.memory_space<vmem>>, vector<1x2x32xf32>,
    %c2_165 = arith.constant 2 : index
    %c0_166 = arith.constant 0 : index
    %c32_167 = arith.constant 32 : index
    %544 = vector.load %arg14[%c2_165, %c0_166, %c32_167] : memref<6x2x128xf32, #tpu.memory_space<vmem>>, vector<1x2x12xf32>
    %545 = vector.shape_cast %544 : vector<1x2x12xf32> to vector<2x12xf32>
    %546 = vector.shape_cast %518 : vector<2x12xf32> to vector<1x2x12xf32>
    tpu.vector_store %arg14[%c2_165, %c0_166, %c32_167], %546 {strides = array<i32>} : memref<6x2x128xf32, #tpu.memory_space<vmem>>, vector<1x2x12xf32>,
    %c2_168 = arith.constant 2 : index
    %c0_169 = arith.constant 0 : index
    %c44_170 = arith.constant 44 : index
    %547 = vector.load %arg14[%c2_168, %c0_169, %c44_170] : memref<6x2x128xf32, #tpu.memory_space<vmem>>, vector<1x2x4xf32>
    %548 = vector.shape_cast %547 : vector<1x2x4xf32> to vector<2x4xf32>
    %549 = vector.shape_cast %483 : vector<2x4xf32> to vector<1x2x4xf32>
    tpu.vector_store %arg14[%c2_168, %c0_169, %c44_170], %549 {strides = array<i32>} : memref<6x2x128xf32, #tpu.memory_space<vmem>>, vector<1x2x4xf32>,
    %550 = vector.extract_strided_slice %47 {offsets = [6, 0], sizes = [2, 128], strides = [1, 1]} : vector<12x128xf32> to vector<2x128xf32>
    %551 = arith.truncf %409 : vector<2x32xf32> to vector<2x32xbf16>
    %cst_171 = arith.constant dense<0.000000e+00> : vector<2x128xf32>
    %552 = tpu.matmul %551, %1, %cst_171 {dimension_numbers = #tpu.dot_dimension_numbers<[1], [0], [0], [1], [0, 0, 1, 1], [], []>} : vector<2x32xbf16>, vector<32x128xbf16>, vector<2x128xf32> -> vector<2x128xf32>
    %553 = vector.extract_strided_slice %550 {offsets = [0, 0], sizes = [2, 64], strides = [1, 1]} : vector<2x128xf32> to vector<2x64xf32>
    %554 = vector.extract_strided_slice %552 {offsets = [0, 0], sizes = [2, 64], strides = [1, 1]} : vector<2x128xf32> to vector<2x64xf32>
    %555 = arith.addf %553, %554 : vector<2x64xf32>
    %556 = arith.addf %555, %9 : vector<2x64xf32>
    %557 = arith.negf %556 : vector<2x64xf32>
    %558 = math.exp %557 : vector<2x64xf32>
    %cst_172 = arith.constant 1.000000e+00 : f32
    %559 = vector.broadcast %cst_172 : f32 to vector<2x64xf32>
    %560 = arith.addf %559, %558 : vector<2x64xf32>
    %561 = arith.divf %559, %560 : vector<2x64xf32>
    %562 = vector.extract_strided_slice %550 {offsets = [0, 64], sizes = [2, 32], strides = [1, 1]} : vector<2x128xf32> to vector<2x32xf32>
    %563 = arith.addf %562, %12 : vector<2x32xf32>
    %564 = vector.extract_strided_slice %561 {offsets = [0, 0], sizes = [2, 32], strides = [1, 1]} : vector<2x64xf32> to vector<2x32xf32>
    %565 = vector.extract_strided_slice %552 {offsets = [0, 64], sizes = [2, 32], strides = [1, 1]} : vector<2x128xf32> to vector<2x32xf32>
    %566 = arith.addf %565, %15 : vector<2x32xf32>
    %567 = arith.mulf %564, %566 : vector<2x32xf32>
    %568 = arith.addf %563, %567 : vector<2x32xf32>
    %569 = math.tanh %568 : vector<2x32xf32>
    %570 = vector.extract_strided_slice %561 {offsets = [0, 32], sizes = [2, 32], strides = [1, 1]} : vector<2x64xf32> to vector<2x32xf32>
    %cst_173 = arith.constant 1.000000e+00 : f32
    %571 = vector.broadcast %cst_173 : f32 to vector<2x32xf32>
    %572 = arith.subf %571, %570 : vector<2x32xf32>
    %573 = arith.mulf %572, %569 : vector<2x32xf32>
    %574 = arith.mulf %570, %409 : vector<2x32xf32>
    %575 = arith.addf %573, %574 : vector<2x32xf32>
    %576 = arith.truncf %575 : vector<2x32xf32> to vector<2x32xbf16>
    %cst_174 = arith.constant dense<0.000000e+00> : vector<2x128xf32>
    %577 = tpu.matmul %576, %2, %cst_174 {dimension_numbers = #tpu.dot_dimension_numbers<[1], [0], [0], [1], [0, 0, 1, 1], [], []>} : vector<2x32xbf16>, vector<32x128xbf16>, vector<2x128xf32> -> vector<2x128xf32>
    %578 = arith.truncf %435 : vector<2x32xf32> to vector<2x32xbf16>
    %cst_175 = arith.constant dense<0.000000e+00> : vector<2x128xf32>
    %579 = tpu.matmul %578, %3, %cst_175 {dimension_numbers = #tpu.dot_dimension_numbers<[1], [0], [0], [1], [0, 0, 1, 1], [], []>} : vector<2x32xbf16>, vector<32x128xbf16>, vector<2x128xf32> -> vector<2x128xf32>
    %580 = arith.addf %577, %579 : vector<2x128xf32>
    %581 = vector.extract_strided_slice %580 {offsets = [0, 0], sizes = [2, 64], strides = [1, 1]} : vector<2x128xf32> to vector<2x64xf32>
    %582 = arith.addf %581, %18 : vector<2x64xf32>
    %583 = arith.negf %582 : vector<2x64xf32>
    %584 = math.exp %583 : vector<2x64xf32>
    %cst_176 = arith.constant 1.000000e+00 : f32
    %585 = vector.broadcast %cst_176 : f32 to vector<2x64xf32>
    %586 = arith.addf %585, %584 : vector<2x64xf32>
    %587 = arith.divf %585, %586 : vector<2x64xf32>
    %588 = vector.extract_strided_slice %580 {offsets = [0, 64], sizes = [2, 32], strides = [1, 1]} : vector<2x128xf32> to vector<2x32xf32>
    %589 = arith.addf %588, %21 : vector<2x32xf32>
    %590 = vector.extract_strided_slice %587 {offsets = [0, 0], sizes = [2, 32], strides = [1, 1]} : vector<2x64xf32> to vector<2x32xf32>
    %591 = vector.extract_strided_slice %580 {offsets = [0, 96], sizes = [2, 32], strides = [1, 1]} : vector<2x128xf32> to vector<2x32xf32>
    %592 = arith.addf %591, %24 : vector<2x32xf32>
    %593 = arith.mulf %590, %592 : vector<2x32xf32>
    %594 = arith.addf %589, %593 : vector<2x32xf32>
    %595 = math.tanh %594 : vector<2x32xf32>
    %596 = vector.extract_strided_slice %587 {offsets = [0, 32], sizes = [2, 32], strides = [1, 1]} : vector<2x64xf32> to vector<2x32xf32>
    %cst_177 = arith.constant 1.000000e+00 : f32
    %597 = vector.broadcast %cst_177 : f32 to vector<2x32xf32>
    %598 = arith.subf %597, %596 : vector<2x32xf32>
    %599 = arith.mulf %598, %595 : vector<2x32xf32>
    %600 = arith.mulf %596, %435 : vector<2x32xf32>
    %601 = arith.addf %599, %600 : vector<2x32xf32>
    %602 = arith.truncf %601 : vector<2x32xf32> to vector<2x32xbf16>
    %cst_178 = arith.constant dense<0.000000e+00> : vector<2x128xf32>
    %603 = tpu.matmul %602, %4, %cst_178 {dimension_numbers = #tpu.dot_dimension_numbers<[1], [0], [0], [1], [0, 0, 1, 1], [], []>} : vector<2x32xbf16>, vector<32x128xbf16>, vector<2x128xf32> -> vector<2x128xf32>
    %604 = vector.extract_strided_slice %603 {offsets = [0, 0], sizes = [2, 32], strides = [1, 1]} : vector<2x128xf32> to vector<2x32xf32>
    %605 = vector.extract_strided_slice %603 {offsets = [0, 32], sizes = [2, 32], strides = [1, 1]} : vector<2x128xf32> to vector<2x32xf32>
    %606 = vector.extract_strided_slice %603 {offsets = [0, 64], sizes = [2, 1], strides = [1, 1]} : vector<2x128xf32> to vector<2x1xf32>
    %607 = vector.extract_strided_slice %603 {offsets = [0, 65], sizes = [2, 1], strides = [1, 1]} : vector<2x128xf32> to vector<2x1xf32>
    %608 = vector.extract_strided_slice %603 {offsets = [0, 66], sizes = [2, 1], strides = [1, 1]} : vector<2x128xf32> to vector<2x1xf32>
    %609 = vector.shape_cast %604 : vector<2x32xf32> to vector<2x1x32xf32>
    %610 = vector.broadcast %609 : vector<2x1x32xf32> to vector<2x4x32xf32>
    %611 = arith.mulf %34, %610 : vector<2x4x32xf32>
    %cst_179 = arith.constant dense<0.000000e+00> : vector<2x4xf32>
    %612 = vector.multi_reduction <add>, %611, %cst_179 [2] : vector<2x4x32xf32> to vector<2x4xf32>
    %613 = vector.broadcast %606 : vector<2x1xf32> to vector<2x4xf32>
    %614 = arith.addf %612, %613 : vector<2x4xf32>
    %615 = arith.addf %614, %40 : vector<2x4xf32>
    %cst_180 = arith.constant dense<0xFF800000> : vector<2xf32>
    %616 = vector.multi_reduction <maximumf>, %615, %cst_180 [1] : vector<2x4xf32> to vector<2xf32>
    %617 = vector.shape_cast %616 : vector<2xf32> to vector<2x1xf32>
    %618 = vector.broadcast %617 : vector<2x1xf32> to vector<2x4xf32>
    %619 = arith.subf %615, %618 : vector<2x4xf32>
    %620 = math.exp %619 : vector<2x4xf32>
    %cst_181 = arith.constant dense<0.000000e+00> : vector<2xf32>
    %621 = vector.multi_reduction <add>, %620, %cst_181 [1] : vector<2x4xf32> to vector<2xf32>
    %622 = vector.shape_cast %621 : vector<2xf32> to vector<2x1xf32>
    %623 = vector.broadcast %622 : vector<2x1xf32> to vector<2x4xf32>
    %624 = arith.divf %620, %623 : vector<2x4xf32>
    %625 = arith.mulf %540, %30 : vector<2x32xf32>
    %cst_182 = arith.constant dense<0.000000e+00> : vector<2xf32>
    %626 = vector.multi_reduction <add>, %625, %cst_182 [1] : vector<2x32xf32> to vector<2xf32>
    %627 = vector.shape_cast %626 : vector<2xf32> to vector<2x1xf32>
    %628 = vector.extract_strided_slice %550 {offsets = [0, 96], sizes = [2, 1], strides = [1, 1]} : vector<2x128xf32> to vector<2x1xf32>
    %629 = arith.addf %627, %628 : vector<2x1xf32>
    %630 = arith.addf %629, %608 : vector<2x1xf32>
    %631 = arith.addf %630, %33 : vector<2x1xf32>
    %632 = arith.negf %631 : vector<2x1xf32>
    %633 = math.exp %632 : vector<2x1xf32>
    %cst_183 = arith.constant 1.000000e+00 : f32
    %634 = vector.broadcast %cst_183 : f32 to vector<2x1xf32>
    %635 = arith.addf %634, %633 : vector<2x1xf32>
    %636 = arith.divf %634, %635 : vector<2x1xf32>
    %cst_184 = arith.constant 1.000000e+00 : f32
    %637 = vector.broadcast %cst_184 : f32 to vector<2x1xf32>
    %638 = arith.subf %637, %636 : vector<2x1xf32>
    %639 = vector.broadcast %638 : vector<2x1xf32> to vector<2x4xf32>
    %640 = arith.mulf %639, %624 : vector<2x4xf32>
    %641 = vector.broadcast %636 : vector<2x1xf32> to vector<2x4xf32>
    %642 = arith.mulf %641, %483 : vector<2x4xf32>
    %643 = arith.addf %640, %642 : vector<2x4xf32>
    %cst_185 = arith.constant dense<0.000000e+00> : vector<2xf32>
    %644 = vector.multi_reduction <add>, %643, %cst_185 [1] : vector<2x4xf32> to vector<2xf32>
    %645 = vector.shape_cast %644 : vector<2xf32> to vector<2x1xf32>
    %cst_186 = arith.constant 9.99999968E-21 : f32
    %646 = vector.broadcast %cst_186 : f32 to vector<2x1xf32>
    %647 = arith.addf %645, %646 : vector<2x1xf32>
    %648 = vector.broadcast %647 : vector<2x1xf32> to vector<2x4xf32>
    %649 = arith.divf %643, %648 : vector<2x4xf32>
    %650 = vector.shape_cast %605 : vector<2x32xf32> to vector<2x1x32xf32>
    %651 = vector.broadcast %650 : vector<2x1x32xf32> to vector<2x12x32xf32>
    %652 = arith.mulf %35, %651 : vector<2x12x32xf32>
    %cst_187 = arith.constant dense<0.000000e+00> : vector<2x12xf32>
    %653 = vector.multi_reduction <add>, %652, %cst_187 [2] : vector<2x12x32xf32> to vector<2x12xf32>
    %654 = vector.broadcast %607 : vector<2x1xf32> to vector<2x12xf32>
    %655 = arith.addf %653, %654 : vector<2x12xf32>
    %656 = arith.addf %655, %41 : vector<2x12xf32>
    %657 = vector.shape_cast %656 : vector<2x12xf32> to vector<2x1x12xf32>
    %658 = vector.broadcast %657 : vector<2x1x12xf32> to vector<2x4x12xf32>
    %659 = arith.addf %658, %39 : vector<2x4x12xf32>
    %cst_188 = arith.constant dense<0xFF800000> : vector<2x4xf32>
    %660 = vector.multi_reduction <maximumf>, %659, %cst_188 [2] : vector<2x4x12xf32> to vector<2x4xf32>
    %661 = arith.mulf %660, %43 : vector<2x4xf32>
    %662 = vector.shape_cast %661 : vector<2x4xf32> to vector<2x1x4xf32>
    %663 = vector.broadcast %662 : vector<2x1x4xf32> to vector<2x12x4xf32>
    %664 = arith.mulf %37, %663 : vector<2x12x4xf32>
    %cst_189 = arith.constant dense<0.000000e+00> : vector<2x12xf32>
    %665 = vector.multi_reduction <add>, %664, %cst_189 [2] : vector<2x12x4xf32> to vector<2x12xf32>
    %666 = arith.subf %656, %665 : vector<2x12xf32>
    %667 = math.exp %666 : vector<2x12xf32>
    %668 = arith.mulf %667, %42 : vector<2x12xf32>
    %669 = vector.shape_cast %668 : vector<2x12xf32> to vector<2x1x12xf32>
    %670 = vector.broadcast %669 : vector<2x1x12xf32> to vector<2x4x12xf32>
    %671 = arith.mulf %38, %670 : vector<2x4x12xf32>
    %cst_190 = arith.constant dense<0.000000e+00> : vector<2x4xf32>
    %672 = vector.multi_reduction <add>, %671, %cst_190 [2] : vector<2x4x12xf32> to vector<2x4xf32>
    %673 = vector.shape_cast %672 : vector<2x4xf32> to vector<2x1x4xf32>
    %674 = vector.broadcast %673 : vector<2x1x4xf32> to vector<2x12x4xf32>
    %675 = arith.mulf %37, %674 : vector<2x12x4xf32>
    %cst_191 = arith.constant dense<0.000000e+00> : vector<2x12xf32>
    %676 = vector.multi_reduction <add>, %675, %cst_191 [2] : vector<2x12x4xf32> to vector<2x12xf32>
    %cst_192 = arith.constant 9.99999968E-21 : f32
    %677 = vector.broadcast %cst_192 : f32 to vector<2x12xf32>
    %678 = arith.maximumf %676, %677 : vector<2x12xf32>
    %679 = arith.divf %668, %678 : vector<2x12xf32>
    %680 = vector.shape_cast %649 : vector<2x4xf32> to vector<2x1x4xf32>
    %681 = vector.broadcast %680 : vector<2x1x4xf32> to vector<2x12x4xf32>
    %682 = arith.mulf %37, %681 : vector<2x12x4xf32>
    %cst_193 = arith.constant dense<0.000000e+00> : vector<2x12xf32>
    %683 = vector.multi_reduction <add>, %682, %cst_193 [2] : vector<2x12x4xf32> to vector<2x12xf32>
    %684 = arith.mulf %683, %679 : vector<2x12xf32>
    %685 = vector.shape_cast %684 : vector<2x12xf32> to vector<2x1x12xf32>
    %686 = vector.broadcast %685 : vector<2x1x12xf32> to vector<2x32x12xf32>
    %687 = arith.mulf %36, %686 : vector<2x32x12xf32>
    %cst_194 = arith.constant dense<0.000000e+00> : vector<2x32xf32>
    %688 = vector.multi_reduction <add>, %687, %cst_194 [2] : vector<2x32x12xf32> to vector<2x32xf32>
    %689 = arith.truncf %688 : vector<2x32xf32> to vector<2x32xbf16>
    %cst_195 = arith.constant dense<0.000000e+00> : vector<2x128xf32>
    %690 = tpu.matmul %689, %5, %cst_195 {dimension_numbers = #tpu.dot_dimension_numbers<[1], [0], [0], [1], [0, 0, 1, 1], [], []>} : vector<2x32xbf16>, vector<32x128xbf16>, vector<2x128xf32> -> vector<2x128xf32>
    %cst_196 = arith.constant dense<0.000000e+00> : vector<2x128xf32>
    %691 = tpu.matmul %602, %6, %cst_196 {dimension_numbers = #tpu.dot_dimension_numbers<[1], [0], [0], [1], [0, 0, 1, 1], [], []>} : vector<2x32xbf16>, vector<32x128xbf16>, vector<2x128xf32> -> vector<2x128xf32>
    %692 = arith.addf %690, %691 : vector<2x128xf32>
    %693 = vector.extract_strided_slice %692 {offsets = [0, 0], sizes = [2, 32], strides = [1, 1]} : vector<2x128xf32> to vector<2x32xf32>
    %694 = arith.addf %693, %27 : vector<2x32xf32>
    %cst_197 = arith.constant dense<0xFF800000> : vector<2xf32>
    %695 = vector.multi_reduction <maximumf>, %694, %cst_197 [1] : vector<2x32xf32> to vector<2xf32>
    %696 = vector.shape_cast %695 : vector<2xf32> to vector<2x1xf32>
    %697 = vector.broadcast %696 : vector<2x1xf32> to vector<2x32xf32>
    %698 = arith.subf %694, %697 : vector<2x32xf32>
    %699 = vector.broadcast %696 : vector<2x1xf32> to vector<2x32xf32>
    %700 = arith.subf %694, %699 : vector<2x32xf32>
    %701 = math.exp %700 : vector<2x32xf32>
    %cst_198 = arith.constant dense<0.000000e+00> : vector<2xf32>
    %702 = vector.multi_reduction <add>, %701, %cst_198 [1] : vector<2x32xf32> to vector<2xf32>
    %703 = vector.shape_cast %702 : vector<2xf32> to vector<2x1xf32>
    %704 = math.log %703 : vector<2x1xf32>
    %705 = vector.broadcast %704 : vector<2x1xf32> to vector<2x32xf32>
    %706 = arith.subf %698, %705 : vector<2x32xf32>
    %c3 = arith.constant 3 : index
    %c0_199 = arith.constant 0 : index
    %c0_200 = arith.constant 0 : index
    %707 = vector.load %arg14[%c3, %c0_199, %c0_200] : memref<6x2x128xf32, #tpu.memory_space<vmem>>, vector<1x2x32xf32>
    %708 = vector.shape_cast %707 : vector<1x2x32xf32> to vector<2x32xf32>
    %709 = vector.shape_cast %706 : vector<2x32xf32> to vector<1x2x32xf32>
    tpu.vector_store %arg14[%c3, %c0_199, %c0_200], %709 {strides = array<i32>} : memref<6x2x128xf32, #tpu.memory_space<vmem>>, vector<1x2x32xf32>,
    %c3_201 = arith.constant 3 : index
    %c0_202 = arith.constant 0 : index
    %c32_203 = arith.constant 32 : index
    %710 = vector.load %arg14[%c3_201, %c0_202, %c32_203] : memref<6x2x128xf32, #tpu.memory_space<vmem>>, vector<1x2x12xf32>
    %711 = vector.shape_cast %710 : vector<1x2x12xf32> to vector<2x12xf32>
    %712 = vector.shape_cast %684 : vector<2x12xf32> to vector<1x2x12xf32>
    tpu.vector_store %arg14[%c3_201, %c0_202, %c32_203], %712 {strides = array<i32>} : memref<6x2x128xf32, #tpu.memory_space<vmem>>, vector<1x2x12xf32>,
    %c3_204 = arith.constant 3 : index
    %c0_205 = arith.constant 0 : index
    %c44_206 = arith.constant 44 : index
    %713 = vector.load %arg14[%c3_204, %c0_205, %c44_206] : memref<6x2x128xf32, #tpu.memory_space<vmem>>, vector<1x2x4xf32>
    %714 = vector.shape_cast %713 : vector<1x2x4xf32> to vector<2x4xf32>
    %715 = vector.shape_cast %649 : vector<2x4xf32> to vector<1x2x4xf32>
    tpu.vector_store %arg14[%c3_204, %c0_205, %c44_206], %715 {strides = array<i32>} : memref<6x2x128xf32, #tpu.memory_space<vmem>>, vector<1x2x4xf32>,
    %716 = vector.extract_strided_slice %47 {offsets = [8, 0], sizes = [2, 128], strides = [1, 1]} : vector<12x128xf32> to vector<2x128xf32>
    %717 = arith.truncf %575 : vector<2x32xf32> to vector<2x32xbf16>
    %cst_207 = arith.constant dense<0.000000e+00> : vector<2x128xf32>
    %718 = tpu.matmul %717, %1, %cst_207 {dimension_numbers = #tpu.dot_dimension_numbers<[1], [0], [0], [1], [0, 0, 1, 1], [], []>} : vector<2x32xbf16>, vector<32x128xbf16>, vector<2x128xf32> -> vector<2x128xf32>
    %719 = vector.extract_strided_slice %716 {offsets = [0, 0], sizes = [2, 64], strides = [1, 1]} : vector<2x128xf32> to vector<2x64xf32>
    %720 = vector.extract_strided_slice %718 {offsets = [0, 0], sizes = [2, 64], strides = [1, 1]} : vector<2x128xf32> to vector<2x64xf32>
    %721 = arith.addf %719, %720 : vector<2x64xf32>
    %722 = arith.addf %721, %9 : vector<2x64xf32>
    %723 = arith.negf %722 : vector<2x64xf32>
    %724 = math.exp %723 : vector<2x64xf32>
    %cst_208 = arith.constant 1.000000e+00 : f32
    %725 = vector.broadcast %cst_208 : f32 to vector<2x64xf32>
    %726 = arith.addf %725, %724 : vector<2x64xf32>
    %727 = arith.divf %725, %726 : vector<2x64xf32>
    %728 = vector.extract_strided_slice %716 {offsets = [0, 64], sizes = [2, 32], strides = [1, 1]} : vector<2x128xf32> to vector<2x32xf32>
    %729 = arith.addf %728, %12 : vector<2x32xf32>
    %730 = vector.extract_strided_slice %727 {offsets = [0, 0], sizes = [2, 32], strides = [1, 1]} : vector<2x64xf32> to vector<2x32xf32>
    %731 = vector.extract_strided_slice %718 {offsets = [0, 64], sizes = [2, 32], strides = [1, 1]} : vector<2x128xf32> to vector<2x32xf32>
    %732 = arith.addf %731, %15 : vector<2x32xf32>
    %733 = arith.mulf %730, %732 : vector<2x32xf32>
    %734 = arith.addf %729, %733 : vector<2x32xf32>
    %735 = math.tanh %734 : vector<2x32xf32>
    %736 = vector.extract_strided_slice %727 {offsets = [0, 32], sizes = [2, 32], strides = [1, 1]} : vector<2x64xf32> to vector<2x32xf32>
    %cst_209 = arith.constant 1.000000e+00 : f32
    %737 = vector.broadcast %cst_209 : f32 to vector<2x32xf32>
    %738 = arith.subf %737, %736 : vector<2x32xf32>
    %739 = arith.mulf %738, %735 : vector<2x32xf32>
    %740 = arith.mulf %736, %575 : vector<2x32xf32>
    %741 = arith.addf %739, %740 : vector<2x32xf32>
    %742 = arith.truncf %741 : vector<2x32xf32> to vector<2x32xbf16>
    %cst_210 = arith.constant dense<0.000000e+00> : vector<2x128xf32>
    %743 = tpu.matmul %742, %2, %cst_210 {dimension_numbers = #tpu.dot_dimension_numbers<[1], [0], [0], [1], [0, 0, 1, 1], [], []>} : vector<2x32xbf16>, vector<32x128xbf16>, vector<2x128xf32> -> vector<2x128xf32>
    %744 = arith.truncf %601 : vector<2x32xf32> to vector<2x32xbf16>
    %cst_211 = arith.constant dense<0.000000e+00> : vector<2x128xf32>
    %745 = tpu.matmul %744, %3, %cst_211 {dimension_numbers = #tpu.dot_dimension_numbers<[1], [0], [0], [1], [0, 0, 1, 1], [], []>} : vector<2x32xbf16>, vector<32x128xbf16>, vector<2x128xf32> -> vector<2x128xf32>
    %746 = arith.addf %743, %745 : vector<2x128xf32>
    %747 = vector.extract_strided_slice %746 {offsets = [0, 0], sizes = [2, 64], strides = [1, 1]} : vector<2x128xf32> to vector<2x64xf32>
    %748 = arith.addf %747, %18 : vector<2x64xf32>
    %749 = arith.negf %748 : vector<2x64xf32>
    %750 = math.exp %749 : vector<2x64xf32>
    %cst_212 = arith.constant 1.000000e+00 : f32
    %751 = vector.broadcast %cst_212 : f32 to vector<2x64xf32>
    %752 = arith.addf %751, %750 : vector<2x64xf32>
    %753 = arith.divf %751, %752 : vector<2x64xf32>
    %754 = vector.extract_strided_slice %746 {offsets = [0, 64], sizes = [2, 32], strides = [1, 1]} : vector<2x128xf32> to vector<2x32xf32>
    %755 = arith.addf %754, %21 : vector<2x32xf32>
    %756 = vector.extract_strided_slice %753 {offsets = [0, 0], sizes = [2, 32], strides = [1, 1]} : vector<2x64xf32> to vector<2x32xf32>
    %757 = vector.extract_strided_slice %746 {offsets = [0, 96], sizes = [2, 32], strides = [1, 1]} : vector<2x128xf32> to vector<2x32xf32>
    %758 = arith.addf %757, %24 : vector<2x32xf32>
    %759 = arith.mulf %756, %758 : vector<2x32xf32>
    %760 = arith.addf %755, %759 : vector<2x32xf32>
    %761 = math.tanh %760 : vector<2x32xf32>
    %762 = vector.extract_strided_slice %753 {offsets = [0, 32], sizes = [2, 32], strides = [1, 1]} : vector<2x64xf32> to vector<2x32xf32>
    %cst_213 = arith.constant 1.000000e+00 : f32
    %763 = vector.broadcast %cst_213 : f32 to vector<2x32xf32>
    %764 = arith.subf %763, %762 : vector<2x32xf32>
    %765 = arith.mulf %764, %761 : vector<2x32xf32>
    %766 = arith.mulf %762, %601 : vector<2x32xf32>
    %767 = arith.addf %765, %766 : vector<2x32xf32>
    %768 = arith.truncf %767 : vector<2x32xf32> to vector<2x32xbf16>
    %cst_214 = arith.constant dense<0.000000e+00> : vector<2x128xf32>
    %769 = tpu.matmul %768, %4, %cst_214 {dimension_numbers = #tpu.dot_dimension_numbers<[1], [0], [0], [1], [0, 0, 1, 1], [], []>} : vector<2x32xbf16>, vector<32x128xbf16>, vector<2x128xf32> -> vector<2x128xf32>
    %770 = vector.extract_strided_slice %769 {offsets = [0, 0], sizes = [2, 32], strides = [1, 1]} : vector<2x128xf32> to vector<2x32xf32>
    %771 = vector.extract_strided_slice %769 {offsets = [0, 32], sizes = [2, 32], strides = [1, 1]} : vector<2x128xf32> to vector<2x32xf32>
    %772 = vector.extract_strided_slice %769 {offsets = [0, 64], sizes = [2, 1], strides = [1, 1]} : vector<2x128xf32> to vector<2x1xf32>
    %773 = vector.extract_strided_slice %769 {offsets = [0, 65], sizes = [2, 1], strides = [1, 1]} : vector<2x128xf32> to vector<2x1xf32>
    %774 = vector.extract_strided_slice %769 {offsets = [0, 66], sizes = [2, 1], strides = [1, 1]} : vector<2x128xf32> to vector<2x1xf32>
    %775 = vector.shape_cast %770 : vector<2x32xf32> to vector<2x1x32xf32>
    %776 = vector.broadcast %775 : vector<2x1x32xf32> to vector<2x4x32xf32>
    %777 = arith.mulf %34, %776 : vector<2x4x32xf32>
    %cst_215 = arith.constant dense<0.000000e+00> : vector<2x4xf32>
    %778 = vector.multi_reduction <add>, %777, %cst_215 [2] : vector<2x4x32xf32> to vector<2x4xf32>
    %779 = vector.broadcast %772 : vector<2x1xf32> to vector<2x4xf32>
    %780 = arith.addf %778, %779 : vector<2x4xf32>
    %781 = arith.addf %780, %40 : vector<2x4xf32>
    %cst_216 = arith.constant dense<0xFF800000> : vector<2xf32>
    %782 = vector.multi_reduction <maximumf>, %781, %cst_216 [1] : vector<2x4xf32> to vector<2xf32>
    %783 = vector.shape_cast %782 : vector<2xf32> to vector<2x1xf32>
    %784 = vector.broadcast %783 : vector<2x1xf32> to vector<2x4xf32>
    %785 = arith.subf %781, %784 : vector<2x4xf32>
    %786 = math.exp %785 : vector<2x4xf32>
    %cst_217 = arith.constant dense<0.000000e+00> : vector<2xf32>
    %787 = vector.multi_reduction <add>, %786, %cst_217 [1] : vector<2x4xf32> to vector<2xf32>
    %788 = vector.shape_cast %787 : vector<2xf32> to vector<2x1xf32>
    %789 = vector.broadcast %788 : vector<2x1xf32> to vector<2x4xf32>
    %790 = arith.divf %786, %789 : vector<2x4xf32>
    %791 = arith.mulf %706, %30 : vector<2x32xf32>
    %cst_218 = arith.constant dense<0.000000e+00> : vector<2xf32>
    %792 = vector.multi_reduction <add>, %791, %cst_218 [1] : vector<2x32xf32> to vector<2xf32>
    %793 = vector.shape_cast %792 : vector<2xf32> to vector<2x1xf32>
    %794 = vector.extract_strided_slice %716 {offsets = [0, 96], sizes = [2, 1], strides = [1, 1]} : vector<2x128xf32> to vector<2x1xf32>
    %795 = arith.addf %793, %794 : vector<2x1xf32>
    %796 = arith.addf %795, %774 : vector<2x1xf32>
    %797 = arith.addf %796, %33 : vector<2x1xf32>
    %798 = arith.negf %797 : vector<2x1xf32>
    %799 = math.exp %798 : vector<2x1xf32>
    %cst_219 = arith.constant 1.000000e+00 : f32
    %800 = vector.broadcast %cst_219 : f32 to vector<2x1xf32>
    %801 = arith.addf %800, %799 : vector<2x1xf32>
    %802 = arith.divf %800, %801 : vector<2x1xf32>
    %cst_220 = arith.constant 1.000000e+00 : f32
    %803 = vector.broadcast %cst_220 : f32 to vector<2x1xf32>
    %804 = arith.subf %803, %802 : vector<2x1xf32>
    %805 = vector.broadcast %804 : vector<2x1xf32> to vector<2x4xf32>
    %806 = arith.mulf %805, %790 : vector<2x4xf32>
    %807 = vector.broadcast %802 : vector<2x1xf32> to vector<2x4xf32>
    %808 = arith.mulf %807, %649 : vector<2x4xf32>
    %809 = arith.addf %806, %808 : vector<2x4xf32>
    %cst_221 = arith.constant dense<0.000000e+00> : vector<2xf32>
    %810 = vector.multi_reduction <add>, %809, %cst_221 [1] : vector<2x4xf32> to vector<2xf32>
    %811 = vector.shape_cast %810 : vector<2xf32> to vector<2x1xf32>
    %cst_222 = arith.constant 9.99999968E-21 : f32
    %812 = vector.broadcast %cst_222 : f32 to vector<2x1xf32>
    %813 = arith.addf %811, %812 : vector<2x1xf32>
    %814 = vector.broadcast %813 : vector<2x1xf32> to vector<2x4xf32>
    %815 = arith.divf %809, %814 : vector<2x4xf32>
    %816 = vector.shape_cast %771 : vector<2x32xf32> to vector<2x1x32xf32>
    %817 = vector.broadcast %816 : vector<2x1x32xf32> to vector<2x12x32xf32>
    %818 = arith.mulf %35, %817 : vector<2x12x32xf32>
    %cst_223 = arith.constant dense<0.000000e+00> : vector<2x12xf32>
    %819 = vector.multi_reduction <add>, %818, %cst_223 [2] : vector<2x12x32xf32> to vector<2x12xf32>
    %820 = vector.broadcast %773 : vector<2x1xf32> to vector<2x12xf32>
    %821 = arith.addf %819, %820 : vector<2x12xf32>
    %822 = arith.addf %821, %41 : vector<2x12xf32>
    %823 = vector.shape_cast %822 : vector<2x12xf32> to vector<2x1x12xf32>
    %824 = vector.broadcast %823 : vector<2x1x12xf32> to vector<2x4x12xf32>
    %825 = arith.addf %824, %39 : vector<2x4x12xf32>
    %cst_224 = arith.constant dense<0xFF800000> : vector<2x4xf32>
    %826 = vector.multi_reduction <maximumf>, %825, %cst_224 [2] : vector<2x4x12xf32> to vector<2x4xf32>
    %827 = arith.mulf %826, %43 : vector<2x4xf32>
    %828 = vector.shape_cast %827 : vector<2x4xf32> to vector<2x1x4xf32>
    %829 = vector.broadcast %828 : vector<2x1x4xf32> to vector<2x12x4xf32>
    %830 = arith.mulf %37, %829 : vector<2x12x4xf32>
    %cst_225 = arith.constant dense<0.000000e+00> : vector<2x12xf32>
    %831 = vector.multi_reduction <add>, %830, %cst_225 [2] : vector<2x12x4xf32> to vector<2x12xf32>
    %832 = arith.subf %822, %831 : vector<2x12xf32>
    %833 = math.exp %832 : vector<2x12xf32>
    %834 = arith.mulf %833, %42 : vector<2x12xf32>
    %835 = vector.shape_cast %834 : vector<2x12xf32> to vector<2x1x12xf32>
    %836 = vector.broadcast %835 : vector<2x1x12xf32> to vector<2x4x12xf32>
    %837 = arith.mulf %38, %836 : vector<2x4x12xf32>
    %cst_226 = arith.constant dense<0.000000e+00> : vector<2x4xf32>
    %838 = vector.multi_reduction <add>, %837, %cst_226 [2] : vector<2x4x12xf32> to vector<2x4xf32>
    %839 = vector.shape_cast %838 : vector<2x4xf32> to vector<2x1x4xf32>
    %840 = vector.broadcast %839 : vector<2x1x4xf32> to vector<2x12x4xf32>
    %841 = arith.mulf %37, %840 : vector<2x12x4xf32>
    %cst_227 = arith.constant dense<0.000000e+00> : vector<2x12xf32>
    %842 = vector.multi_reduction <add>, %841, %cst_227 [2] : vector<2x12x4xf32> to vector<2x12xf32>
    %cst_228 = arith.constant 9.99999968E-21 : f32
    %843 = vector.broadcast %cst_228 : f32 to vector<2x12xf32>
    %844 = arith.maximumf %842, %843 : vector<2x12xf32>
    %845 = arith.divf %834, %844 : vector<2x12xf32>
    %846 = vector.shape_cast %815 : vector<2x4xf32> to vector<2x1x4xf32>
    %847 = vector.broadcast %846 : vector<2x1x4xf32> to vector<2x12x4xf32>
    %848 = arith.mulf %37, %847 : vector<2x12x4xf32>
    %cst_229 = arith.constant dense<0.000000e+00> : vector<2x12xf32>
    %849 = vector.multi_reduction <add>, %848, %cst_229 [2] : vector<2x12x4xf32> to vector<2x12xf32>
    %850 = arith.mulf %849, %845 : vector<2x12xf32>
    %851 = vector.shape_cast %850 : vector<2x12xf32> to vector<2x1x12xf32>
    %852 = vector.broadcast %851 : vector<2x1x12xf32> to vector<2x32x12xf32>
    %853 = arith.mulf %36, %852 : vector<2x32x12xf32>
    %cst_230 = arith.constant dense<0.000000e+00> : vector<2x32xf32>
    %854 = vector.multi_reduction <add>, %853, %cst_230 [2] : vector<2x32x12xf32> to vector<2x32xf32>
    %855 = arith.truncf %854 : vector<2x32xf32> to vector<2x32xbf16>
    %cst_231 = arith.constant dense<0.000000e+00> : vector<2x128xf32>
    %856 = tpu.matmul %855, %5, %cst_231 {dimension_numbers = #tpu.dot_dimension_numbers<[1], [0], [0], [1], [0, 0, 1, 1], [], []>} : vector<2x32xbf16>, vector<32x128xbf16>, vector<2x128xf32> -> vector<2x128xf32>
    %cst_232 = arith.constant dense<0.000000e+00> : vector<2x128xf32>
    %857 = tpu.matmul %768, %6, %cst_232 {dimension_numbers = #tpu.dot_dimension_numbers<[1], [0], [0], [1], [0, 0, 1, 1], [], []>} : vector<2x32xbf16>, vector<32x128xbf16>, vector<2x128xf32> -> vector<2x128xf32>
    %858 = arith.addf %856, %857 : vector<2x128xf32>
    %859 = vector.extract_strided_slice %858 {offsets = [0, 0], sizes = [2, 32], strides = [1, 1]} : vector<2x128xf32> to vector<2x32xf32>
    %860 = arith.addf %859, %27 : vector<2x32xf32>
    %cst_233 = arith.constant dense<0xFF800000> : vector<2xf32>
    %861 = vector.multi_reduction <maximumf>, %860, %cst_233 [1] : vector<2x32xf32> to vector<2xf32>
    %862 = vector.shape_cast %861 : vector<2xf32> to vector<2x1xf32>
    %863 = vector.broadcast %862 : vector<2x1xf32> to vector<2x32xf32>
    %864 = arith.subf %860, %863 : vector<2x32xf32>
    %865 = vector.broadcast %862 : vector<2x1xf32> to vector<2x32xf32>
    %866 = arith.subf %860, %865 : vector<2x32xf32>
    %867 = math.exp %866 : vector<2x32xf32>
    %cst_234 = arith.constant dense<0.000000e+00> : vector<2xf32>
    %868 = vector.multi_reduction <add>, %867, %cst_234 [1] : vector<2x32xf32> to vector<2xf32>
    %869 = vector.shape_cast %868 : vector<2xf32> to vector<2x1xf32>
    %870 = math.log %869 : vector<2x1xf32>
    %871 = vector.broadcast %870 : vector<2x1xf32> to vector<2x32xf32>
    %872 = arith.subf %864, %871 : vector<2x32xf32>
    %c4 = arith.constant 4 : index
    %c0_235 = arith.constant 0 : index
    %c0_236 = arith.constant 0 : index
    %873 = vector.load %arg14[%c4, %c0_235, %c0_236] : memref<6x2x128xf32, #tpu.memory_space<vmem>>, vector<1x2x32xf32>
    %874 = vector.shape_cast %873 : vector<1x2x32xf32> to vector<2x32xf32>
    %875 = vector.shape_cast %872 : vector<2x32xf32> to vector<1x2x32xf32>
    tpu.vector_store %arg14[%c4, %c0_235, %c0_236], %875 {strides = array<i32>} : memref<6x2x128xf32, #tpu.memory_space<vmem>>, vector<1x2x32xf32>,
    %c4_237 = arith.constant 4 : index
    %c0_238 = arith.constant 0 : index
    %c32_239 = arith.constant 32 : index
    %876 = vector.load %arg14[%c4_237, %c0_238, %c32_239] : memref<6x2x128xf32, #tpu.memory_space<vmem>>, vector<1x2x12xf32>
    %877 = vector.shape_cast %876 : vector<1x2x12xf32> to vector<2x12xf32>
    %878 = vector.shape_cast %850 : vector<2x12xf32> to vector<1x2x12xf32>
    tpu.vector_store %arg14[%c4_237, %c0_238, %c32_239], %878 {strides = array<i32>} : memref<6x2x128xf32, #tpu.memory_space<vmem>>, vector<1x2x12xf32>,
    %c4_240 = arith.constant 4 : index
    %c0_241 = arith.constant 0 : index
    %c44_242 = arith.constant 44 : index
    %879 = vector.load %arg14[%c4_240, %c0_241, %c44_242] : memref<6x2x128xf32, #tpu.memory_space<vmem>>, vector<1x2x4xf32>
    %880 = vector.shape_cast %879 : vector<1x2x4xf32> to vector<2x4xf32>
    %881 = vector.shape_cast %815 : vector<2x4xf32> to vector<1x2x4xf32>
    tpu.vector_store %arg14[%c4_240, %c0_241, %c44_242], %881 {strides = array<i32>} : memref<6x2x128xf32, #tpu.memory_space<vmem>>, vector<1x2x4xf32>,
    %882 = vector.extract_strided_slice %47 {offsets = [10, 0], sizes = [2, 128], strides = [1, 1]} : vector<12x128xf32> to vector<2x128xf32>
    %883 = arith.truncf %741 : vector<2x32xf32> to vector<2x32xbf16>
    %cst_243 = arith.constant dense<0.000000e+00> : vector<2x128xf32>
    %884 = tpu.matmul %883, %1, %cst_243 {dimension_numbers = #tpu.dot_dimension_numbers<[1], [0], [0], [1], [0, 0, 1, 1], [], []>} : vector<2x32xbf16>, vector<32x128xbf16>, vector<2x128xf32> -> vector<2x128xf32>
    %885 = vector.extract_strided_slice %882 {offsets = [0, 0], sizes = [2, 64], strides = [1, 1]} : vector<2x128xf32> to vector<2x64xf32>
    %886 = vector.extract_strided_slice %884 {offsets = [0, 0], sizes = [2, 64], strides = [1, 1]} : vector<2x128xf32> to vector<2x64xf32>
    %887 = arith.addf %885, %886 : vector<2x64xf32>
    %888 = arith.addf %887, %9 : vector<2x64xf32>
    %889 = arith.negf %888 : vector<2x64xf32>
    %890 = math.exp %889 : vector<2x64xf32>
    %cst_244 = arith.constant 1.000000e+00 : f32
    %891 = vector.broadcast %cst_244 : f32 to vector<2x64xf32>
    %892 = arith.addf %891, %890 : vector<2x64xf32>
    %893 = arith.divf %891, %892 : vector<2x64xf32>
    %894 = vector.extract_strided_slice %882 {offsets = [0, 64], sizes = [2, 32], strides = [1, 1]} : vector<2x128xf32> to vector<2x32xf32>
    %895 = arith.addf %894, %12 : vector<2x32xf32>
    %896 = vector.extract_strided_slice %893 {offsets = [0, 0], sizes = [2, 32], strides = [1, 1]} : vector<2x64xf32> to vector<2x32xf32>
    %897 = vector.extract_strided_slice %884 {offsets = [0, 64], sizes = [2, 32], strides = [1, 1]} : vector<2x128xf32> to vector<2x32xf32>
    %898 = arith.addf %897, %15 : vector<2x32xf32>
    %899 = arith.mulf %896, %898 : vector<2x32xf32>
    %900 = arith.addf %895, %899 : vector<2x32xf32>
    %901 = math.tanh %900 : vector<2x32xf32>
    %902 = vector.extract_strided_slice %893 {offsets = [0, 32], sizes = [2, 32], strides = [1, 1]} : vector<2x64xf32> to vector<2x32xf32>
    %cst_245 = arith.constant 1.000000e+00 : f32
    %903 = vector.broadcast %cst_245 : f32 to vector<2x32xf32>
    %904 = arith.subf %903, %902 : vector<2x32xf32>
    %905 = arith.mulf %904, %901 : vector<2x32xf32>
    %906 = arith.mulf %902, %741 : vector<2x32xf32>
    %907 = arith.addf %905, %906 : vector<2x32xf32>
    %908 = arith.truncf %907 : vector<2x32xf32> to vector<2x32xbf16>
    %cst_246 = arith.constant dense<0.000000e+00> : vector<2x128xf32>
    %909 = tpu.matmul %908, %2, %cst_246 {dimension_numbers = #tpu.dot_dimension_numbers<[1], [0], [0], [1], [0, 0, 1, 1], [], []>} : vector<2x32xbf16>, vector<32x128xbf16>, vector<2x128xf32> -> vector<2x128xf32>
    %910 = arith.truncf %767 : vector<2x32xf32> to vector<2x32xbf16>
    %cst_247 = arith.constant dense<0.000000e+00> : vector<2x128xf32>
    %911 = tpu.matmul %910, %3, %cst_247 {dimension_numbers = #tpu.dot_dimension_numbers<[1], [0], [0], [1], [0, 0, 1, 1], [], []>} : vector<2x32xbf16>, vector<32x128xbf16>, vector<2x128xf32> -> vector<2x128xf32>
    %912 = arith.addf %909, %911 : vector<2x128xf32>
    %913 = vector.extract_strided_slice %912 {offsets = [0, 0], sizes = [2, 64], strides = [1, 1]} : vector<2x128xf32> to vector<2x64xf32>
    %914 = arith.addf %913, %18 : vector<2x64xf32>
    %915 = arith.negf %914 : vector<2x64xf32>
    %916 = math.exp %915 : vector<2x64xf32>
    %cst_248 = arith.constant 1.000000e+00 : f32
    %917 = vector.broadcast %cst_248 : f32 to vector<2x64xf32>
    %918 = arith.addf %917, %916 : vector<2x64xf32>
    %919 = arith.divf %917, %918 : vector<2x64xf32>
    %920 = vector.extract_strided_slice %912 {offsets = [0, 64], sizes = [2, 32], strides = [1, 1]} : vector<2x128xf32> to vector<2x32xf32>
    %921 = arith.addf %920, %21 : vector<2x32xf32>
    %922 = vector.extract_strided_slice %919 {offsets = [0, 0], sizes = [2, 32], strides = [1, 1]} : vector<2x64xf32> to vector<2x32xf32>
    %923 = vector.extract_strided_slice %912 {offsets = [0, 96], sizes = [2, 32], strides = [1, 1]} : vector<2x128xf32> to vector<2x32xf32>
    %924 = arith.addf %923, %24 : vector<2x32xf32>
    %925 = arith.mulf %922, %924 : vector<2x32xf32>
    %926 = arith.addf %921, %925 : vector<2x32xf32>
    %927 = math.tanh %926 : vector<2x32xf32>
    %928 = vector.extract_strided_slice %919 {offsets = [0, 32], sizes = [2, 32], strides = [1, 1]} : vector<2x64xf32> to vector<2x32xf32>
    %cst_249 = arith.constant 1.000000e+00 : f32
    %929 = vector.broadcast %cst_249 : f32 to vector<2x32xf32>
    %930 = arith.subf %929, %928 : vector<2x32xf32>
    %931 = arith.mulf %930, %927 : vector<2x32xf32>
    %932 = arith.mulf %928, %767 : vector<2x32xf32>
    %933 = arith.addf %931, %932 : vector<2x32xf32>
    %934 = arith.truncf %933 : vector<2x32xf32> to vector<2x32xbf16>
    %cst_250 = arith.constant dense<0.000000e+00> : vector<2x128xf32>
    %935 = tpu.matmul %934, %4, %cst_250 {dimension_numbers = #tpu.dot_dimension_numbers<[1], [0], [0], [1], [0, 0, 1, 1], [], []>} : vector<2x32xbf16>, vector<32x128xbf16>, vector<2x128xf32> -> vector<2x128xf32>
    %936 = vector.extract_strided_slice %935 {offsets = [0, 0], sizes = [2, 32], strides = [1, 1]} : vector<2x128xf32> to vector<2x32xf32>
    %937 = vector.extract_strided_slice %935 {offsets = [0, 32], sizes = [2, 32], strides = [1, 1]} : vector<2x128xf32> to vector<2x32xf32>
    %938 = vector.extract_strided_slice %935 {offsets = [0, 64], sizes = [2, 1], strides = [1, 1]} : vector<2x128xf32> to vector<2x1xf32>
    %939 = vector.extract_strided_slice %935 {offsets = [0, 65], sizes = [2, 1], strides = [1, 1]} : vector<2x128xf32> to vector<2x1xf32>
    %940 = vector.extract_strided_slice %935 {offsets = [0, 66], sizes = [2, 1], strides = [1, 1]} : vector<2x128xf32> to vector<2x1xf32>
    %941 = vector.shape_cast %936 : vector<2x32xf32> to vector<2x1x32xf32>
    %942 = vector.broadcast %941 : vector<2x1x32xf32> to vector<2x4x32xf32>
    %943 = arith.mulf %34, %942 : vector<2x4x32xf32>
    %cst_251 = arith.constant dense<0.000000e+00> : vector<2x4xf32>
    %944 = vector.multi_reduction <add>, %943, %cst_251 [2] : vector<2x4x32xf32> to vector<2x4xf32>
    %945 = vector.broadcast %938 : vector<2x1xf32> to vector<2x4xf32>
    %946 = arith.addf %944, %945 : vector<2x4xf32>
    %947 = arith.addf %946, %40 : vector<2x4xf32>
    %cst_252 = arith.constant dense<0xFF800000> : vector<2xf32>
    %948 = vector.multi_reduction <maximumf>, %947, %cst_252 [1] : vector<2x4xf32> to vector<2xf32>
    %949 = vector.shape_cast %948 : vector<2xf32> to vector<2x1xf32>
    %950 = vector.broadcast %949 : vector<2x1xf32> to vector<2x4xf32>
    %951 = arith.subf %947, %950 : vector<2x4xf32>
    %952 = math.exp %951 : vector<2x4xf32>
    %cst_253 = arith.constant dense<0.000000e+00> : vector<2xf32>
    %953 = vector.multi_reduction <add>, %952, %cst_253 [1] : vector<2x4xf32> to vector<2xf32>
    %954 = vector.shape_cast %953 : vector<2xf32> to vector<2x1xf32>
    %955 = vector.broadcast %954 : vector<2x1xf32> to vector<2x4xf32>
    %956 = arith.divf %952, %955 : vector<2x4xf32>
    %957 = arith.mulf %872, %30 : vector<2x32xf32>
    %cst_254 = arith.constant dense<0.000000e+00> : vector<2xf32>
    %958 = vector.multi_reduction <add>, %957, %cst_254 [1] : vector<2x32xf32> to vector<2xf32>
    %959 = vector.shape_cast %958 : vector<2xf32> to vector<2x1xf32>
    %960 = vector.extract_strided_slice %882 {offsets = [0, 96], sizes = [2, 1], strides = [1, 1]} : vector<2x128xf32> to vector<2x1xf32>
    %961 = arith.addf %959, %960 : vector<2x1xf32>
    %962 = arith.addf %961, %940 : vector<2x1xf32>
    %963 = arith.addf %962, %33 : vector<2x1xf32>
    %964 = arith.negf %963 : vector<2x1xf32>
    %965 = math.exp %964 : vector<2x1xf32>
    %cst_255 = arith.constant 1.000000e+00 : f32
    %966 = vector.broadcast %cst_255 : f32 to vector<2x1xf32>
    %967 = arith.addf %966, %965 : vector<2x1xf32>
    %968 = arith.divf %966, %967 : vector<2x1xf32>
    %cst_256 = arith.constant 1.000000e+00 : f32
    %969 = vector.broadcast %cst_256 : f32 to vector<2x1xf32>
    %970 = arith.subf %969, %968 : vector<2x1xf32>
    %971 = vector.broadcast %970 : vector<2x1xf32> to vector<2x4xf32>
    %972 = arith.mulf %971, %956 : vector<2x4xf32>
    %973 = vector.broadcast %968 : vector<2x1xf32> to vector<2x4xf32>
    %974 = arith.mulf %973, %815 : vector<2x4xf32>
    %975 = arith.addf %972, %974 : vector<2x4xf32>
    %cst_257 = arith.constant dense<0.000000e+00> : vector<2xf32>
    %976 = vector.multi_reduction <add>, %975, %cst_257 [1] : vector<2x4xf32> to vector<2xf32>
    %977 = vector.shape_cast %976 : vector<2xf32> to vector<2x1xf32>
    %cst_258 = arith.constant 9.99999968E-21 : f32
    %978 = vector.broadcast %cst_258 : f32 to vector<2x1xf32>
    %979 = arith.addf %977, %978 : vector<2x1xf32>
    %980 = vector.broadcast %979 : vector<2x1xf32> to vector<2x4xf32>
    %981 = arith.divf %975, %980 : vector<2x4xf32>
    %982 = vector.shape_cast %937 : vector<2x32xf32> to vector<2x1x32xf32>
    %983 = vector.broadcast %982 : vector<2x1x32xf32> to vector<2x12x32xf32>
    %984 = arith.mulf %35, %983 : vector<2x12x32xf32>
    %cst_259 = arith.constant dense<0.000000e+00> : vector<2x12xf32>
    %985 = vector.multi_reduction <add>, %984, %cst_259 [2] : vector<2x12x32xf32> to vector<2x12xf32>
    %986 = vector.broadcast %939 : vector<2x1xf32> to vector<2x12xf32>
    %987 = arith.addf %985, %986 : vector<2x12xf32>
    %988 = arith.addf %987, %41 : vector<2x12xf32>
    %989 = vector.shape_cast %988 : vector<2x12xf32> to vector<2x1x12xf32>
    %990 = vector.broadcast %989 : vector<2x1x12xf32> to vector<2x4x12xf32>
    %991 = arith.addf %990, %39 : vector<2x4x12xf32>
    %cst_260 = arith.constant dense<0xFF800000> : vector<2x4xf32>
    %992 = vector.multi_reduction <maximumf>, %991, %cst_260 [2] : vector<2x4x12xf32> to vector<2x4xf32>
    %993 = arith.mulf %992, %43 : vector<2x4xf32>
    %994 = vector.shape_cast %993 : vector<2x4xf32> to vector<2x1x4xf32>
    %995 = vector.broadcast %994 : vector<2x1x4xf32> to vector<2x12x4xf32>
    %996 = arith.mulf %37, %995 : vector<2x12x4xf32>
    %cst_261 = arith.constant dense<0.000000e+00> : vector<2x12xf32>
    %997 = vector.multi_reduction <add>, %996, %cst_261 [2] : vector<2x12x4xf32> to vector<2x12xf32>
    %998 = arith.subf %988, %997 : vector<2x12xf32>
    %999 = math.exp %998 : vector<2x12xf32>
    %1000 = arith.mulf %999, %42 : vector<2x12xf32>
    %1001 = vector.shape_cast %1000 : vector<2x12xf32> to vector<2x1x12xf32>
    %1002 = vector.broadcast %1001 : vector<2x1x12xf32> to vector<2x4x12xf32>
    %1003 = arith.mulf %38, %1002 : vector<2x4x12xf32>
    %cst_262 = arith.constant dense<0.000000e+00> : vector<2x4xf32>
    %1004 = vector.multi_reduction <add>, %1003, %cst_262 [2] : vector<2x4x12xf32> to vector<2x4xf32>
    %1005 = vector.shape_cast %1004 : vector<2x4xf32> to vector<2x1x4xf32>
    %1006 = vector.broadcast %1005 : vector<2x1x4xf32> to vector<2x12x4xf32>
    %1007 = arith.mulf %37, %1006 : vector<2x12x4xf32>
    %cst_263 = arith.constant dense<0.000000e+00> : vector<2x12xf32>
    %1008 = vector.multi_reduction <add>, %1007, %cst_263 [2] : vector<2x12x4xf32> to vector<2x12xf32>
    %cst_264 = arith.constant 9.99999968E-21 : f32
    %1009 = vector.broadcast %cst_264 : f32 to vector<2x12xf32>
    %1010 = arith.maximumf %1008, %1009 : vector<2x12xf32>
    %1011 = arith.divf %1000, %1010 : vector<2x12xf32>
    %1012 = vector.shape_cast %981 : vector<2x4xf32> to vector<2x1x4xf32>
    %1013 = vector.broadcast %1012 : vector<2x1x4xf32> to vector<2x12x4xf32>
    %1014 = arith.mulf %37, %1013 : vector<2x12x4xf32>
    %cst_265 = arith.constant dense<0.000000e+00> : vector<2x12xf32>
    %1015 = vector.multi_reduction <add>, %1014, %cst_265 [2] : vector<2x12x4xf32> to vector<2x12xf32>
    %1016 = arith.mulf %1015, %1011 : vector<2x12xf32>
    %1017 = vector.shape_cast %1016 : vector<2x12xf32> to vector<2x1x12xf32>
    %1018 = vector.broadcast %1017 : vector<2x1x12xf32> to vector<2x32x12xf32>
    %1019 = arith.mulf %36, %1018 : vector<2x32x12xf32>
    %cst_266 = arith.constant dense<0.000000e+00> : vector<2x32xf32>
    %1020 = vector.multi_reduction <add>, %1019, %cst_266 [2] : vector<2x32x12xf32> to vector<2x32xf32>
    %1021 = arith.truncf %1020 : vector<2x32xf32> to vector<2x32xbf16>
    %cst_267 = arith.constant dense<0.000000e+00> : vector<2x128xf32>
    %1022 = tpu.matmul %1021, %5, %cst_267 {dimension_numbers = #tpu.dot_dimension_numbers<[1], [0], [0], [1], [0, 0, 1, 1], [], []>} : vector<2x32xbf16>, vector<32x128xbf16>, vector<2x128xf32> -> vector<2x128xf32>
    %cst_268 = arith.constant dense<0.000000e+00> : vector<2x128xf32>
    %1023 = tpu.matmul %934, %6, %cst_268 {dimension_numbers = #tpu.dot_dimension_numbers<[1], [0], [0], [1], [0, 0, 1, 1], [], []>} : vector<2x32xbf16>, vector<32x128xbf16>, vector<2x128xf32> -> vector<2x128xf32>
    %1024 = arith.addf %1022, %1023 : vector<2x128xf32>
    %1025 = vector.extract_strided_slice %1024 {offsets = [0, 0], sizes = [2, 32], strides = [1, 1]} : vector<2x128xf32> to vector<2x32xf32>
    %1026 = arith.addf %1025, %27 : vector<2x32xf32>
    %cst_269 = arith.constant dense<0xFF800000> : vector<2xf32>
    %1027 = vector.multi_reduction <maximumf>, %1026, %cst_269 [1] : vector<2x32xf32> to vector<2xf32>
    %1028 = vector.shape_cast %1027 : vector<2xf32> to vector<2x1xf32>
    %1029 = vector.broadcast %1028 : vector<2x1xf32> to vector<2x32xf32>
    %1030 = arith.subf %1026, %1029 : vector<2x32xf32>
    %1031 = vector.broadcast %1028 : vector<2x1xf32> to vector<2x32xf32>
    %1032 = arith.subf %1026, %1031 : vector<2x32xf32>
    %1033 = math.exp %1032 : vector<2x32xf32>
    %cst_270 = arith.constant dense<0.000000e+00> : vector<2xf32>
    %1034 = vector.multi_reduction <add>, %1033, %cst_270 [1] : vector<2x32xf32> to vector<2xf32>
    %1035 = vector.shape_cast %1034 : vector<2xf32> to vector<2x1xf32>
    %1036 = math.log %1035 : vector<2x1xf32>
    %1037 = vector.broadcast %1036 : vector<2x1xf32> to vector<2x32xf32>
    %1038 = arith.subf %1030, %1037 : vector<2x32xf32>
    %c5 = arith.constant 5 : index
    %c0_271 = arith.constant 0 : index
    %c0_272 = arith.constant 0 : index
    %1039 = vector.load %arg14[%c5, %c0_271, %c0_272] : memref<6x2x128xf32, #tpu.memory_space<vmem>>, vector<1x2x32xf32>
    %1040 = vector.shape_cast %1039 : vector<1x2x32xf32> to vector<2x32xf32>
    %1041 = vector.shape_cast %1038 : vector<2x32xf32> to vector<1x2x32xf32>
    tpu.vector_store %arg14[%c5, %c0_271, %c0_272], %1041 {strides = array<i32>} : memref<6x2x128xf32, #tpu.memory_space<vmem>>, vector<1x2x32xf32>,
    %c5_273 = arith.constant 5 : index
    %c0_274 = arith.constant 0 : index
    %c32_275 = arith.constant 32 : index
    %1042 = vector.load %arg14[%c5_273, %c0_274, %c32_275] : memref<6x2x128xf32, #tpu.memory_space<vmem>>, vector<1x2x12xf32>
    %1043 = vector.shape_cast %1042 : vector<1x2x12xf32> to vector<2x12xf32>
    %1044 = vector.shape_cast %1016 : vector<2x12xf32> to vector<1x2x12xf32>
    tpu.vector_store %arg14[%c5_273, %c0_274, %c32_275], %1044 {strides = array<i32>} : memref<6x2x128xf32, #tpu.memory_space<vmem>>, vector<1x2x12xf32>,
    %c5_276 = arith.constant 5 : index
    %c0_277 = arith.constant 0 : index
    %c44_278 = arith.constant 44 : index
    %1045 = vector.load %arg14[%c5_276, %c0_277, %c44_278] : memref<6x2x128xf32, #tpu.memory_space<vmem>>, vector<1x2x4xf32>
    %1046 = vector.shape_cast %1045 : vector<1x2x4xf32> to vector<2x4xf32>
    %1047 = vector.shape_cast %981 : vector<2x4xf32> to vector<1x2x4xf32>
    tpu.vector_store %arg14[%c5_276, %c0_277, %c44_278], %1047 {strides = array<i32>} : memref<6x2x128xf32, #tpu.memory_space<vmem>>, vector<1x2x4xf32>,
    return
  }
}

</mosaic_0001>

<bundles_post_ra>
// kernel: decoder_gru_forward.1
= control target key start
LH: loop header
LB: loop body
LE: loop exit
PB: predicated region body
PF: predicated region fallthrough
CT: control target
= control target key end

     0   :  { %v11295_v0 = vmov 0.0   ;;  %vm8182_vm0 = vmmov 0   ;;  %vm142_vm1 = vcmask 261120   ;;  %s8183_s27 = smov 96   ;;  %vm11355_vm2 = vcmask 257024   ;;  %s8190_s20 = smov 30   ;;  %s11280_s12 = inlined_call_operand.vmem [shape: bf16[224,128], index: 12, kind: input, shape index: {}]   ;;  %s11281_s0 = inlined_call_operand.vmem [shape: bf16[12,32], index: 0, kind: input, shape index: {}]   ;;  %s11282_s1 = inlined_call_operand.vmem [shape: f32[2,32], index: 1, kind: input, shape index: {}]   ;;  %s11283_s13 = inlined_call_operand.vmem [shape: f32[8,128], index: 13, kind: input, shape index: {}]   ;;  %s11284_s8 = inlined_call_operand.vmem [shape: f32[2,4], index: 8, kind: input, shape index: {}]   ;;  %s11285_s9 = inlined_call_operand.vmem [shape: f32[2,12], index: 9, kind: input, shape index: {}]   ;;  %s11286_s7 = inlined_call_operand.vmem [shape: f32[2,4,12], index: 7, kind: input, shape index: {}]   ;;  %s11287_s2 = inlined_call_operand.vmem [shape: f32[2,4,32], index: 2, kind: input, shape index: {}]   ;;  %s11288_s3 = inlined_call_operand.vmem [shape: f32[2,12,32], index: 3, kind: input, shape index: {}]   ;;  %s11289_s11 = inlined_call_operand.vmem [shape: f32[2,4], index: 11, kind: input, shape index: {}]   ;;  %s11290_s10 = inlined_call_operand.vmem [shape: f32[2,12], index: 10, kind: input, shape index: {}]   ;;  %s11291_s5 = inlined_call_operand.vmem [shape: f32[2,12,4], index: 5, kind: input, shape index: {}]   ;;  %s11292_s6 = inlined_call_operand.vmem [shape: f32[2,4,12], index: 6, kind: input, shape index: {}]   ;;  %s11293_s4 = inlined_call_operand.vmem [shape: f32[2,32,12], index: 4, kind: input, shape index: {}]   ;;  %s11294_s14 = inlined_call_operand.vmem [shape: f32[6,2,128], index: 14, kind: output, shape index: {}]  }
   0x1   :  { %7382 = vmatprep.subr.bf16.mxu0 %v11295_v0  ;;  %7390 = vmatprep.subr.bf16.mxu1 %v11295_v0  ;;  %v7721_v1 = vld [vmem:[%s11280_s12] sm:$0xff]   ;;  %v8277_v2 = vld [vmem:[%s11280_s12 + $0x10] sm:$0xff]   ;;  %v7723_v3 = vld [vmem:[%s11280_s12 + $0x8] sm:$0xff]   ;;  %vm571_vm3 = vcmask 1041409   ;;  %vm574_vm4 = vcmask 25600   ;;  %vm958_vm5 = vcmask 130112  }
   0x2   :  { %7386 = vmatprep.mubr.msk.bf16.mxu0 %vm8182_vm0, %v11295_v0  ;;  %7394 = vmatprep.mubr.msk.bf16.mxu1 %vm8182_vm0, %v11295_v0  ;;  %v8291_v4 = vld [vmem:[%s11280_s12 + $0x18] sm:$0xff]   ;;  %v7725_v5 = vld [vmem:[%s11281_s0] sm:$0x3f]   ;;  %s8184_s0 = smov 64   ;;  %v7726_v30 = vld [vmem:[%s11280_s12 + $0x30] sm:$0xff]   ;;  %vm1024_vm6 = vcmask 1042434  }
   0x3   :  { %7383 = vmatpush3.bf16.msra.mxu0 %v7721_v1  ;;  %7391 = vmatpush3.bf16.msra.mxu1 %v8277_v2  ;;  %v187_v6 = vld [vmem:[%s11282_s1] sm:$0x3]  ;;  %s8185_s1 = smov 32   ;;  %v7728_v32 = vld [vmem:[%s11280_s12 + $0x38] sm:$0xff]   ;;  %v8343_v33 = vld [vmem:[%s11280_s12 + $0x28] sm:$0xff]   ;;  %vm11337_vm7 = vcmask 1043459  }
   0x4   :  { %7384 = vmatprep.subr.bf16.mxu0 %v11295_v0  ;;  %7392 = vmatprep.subr.bf16.mxu1 %v11295_v0  ;;  %v7183_v7 = vld [vmem:[%s11283_s13] ss:$0 sm:$0xff]  ;;  %v188_v8 = vpack.c.bf16 %v187_v6, %v187_v6  ;;  %v7184_v47 = vld [vmem:[%s11283_s13 + $0x1] ss:$0 sm:$0xff]  ;;  %v7732_v1 = vld [vmem:[%s11280_s12 + $0x48] sm:$0xff]   ;;  %vm1033_vm8 = vcmask 93184  }
   0x5   :  { %254 = vrot.lane.b32.xlu0 %v7183_v7, %s8183_s27  ;;  %v8334_v31 = vld [vmem:[%s11280_s12 + $0x20] sm:$0xff]   ;;  %vm1103_vm9 = vcmask 27648   ;;  %vm1099_vm10 = vcmask 31744   ;;  %vm1367_vm11 = vcmask 97280   ;;  %vm1474_vm12 = vcmask 195712   ;;  %s8192_s30 = smov 62  }
   0x6   :  { %v7730_v62 = vld [vmem:[%s11280_s12 + $0x40] sm:$0xff]   ;;  %vm11356_vm13 = vcmask 261312   ;;  %vm1560_vm14 = vcmask 254976   ;;  %vm1584_vm15 = vcmask 392512   ;;  %s8193_s19 = smov 44  }
   0x7   :  { %7385 = vmatpush3.bf16.msra.mxu0 %v7723_v3  ;;  %7393 = vmatpush3.bf16.msra.mxu1 %v8291_v4  ;;  %v7731_v63 = vld [vmem:[%s11280_s12 + $0x60] sm:$0xff]   ;;  %v7733_v3 = vld [vmem:[%s11280_s12 + $0x68] sm:$0xff]  }
   0x8   :  { %7398 = vmatprep.subr.bf16.mxu0 %v11295_v0  ;;  %7406 = vmatprep.subr.bf16.mxu1 %v11295_v0 }
   0xa   :  { %7387 = vmatmul.mubr.msk.bf16.vlgmr.msra.gmra.mrb[0].mxu0 %vm142_vm1, %v7725_v5  ;;  %7395 = vmatmul.mubr.msk.bf16.vlgmr.msra.gmra.mrb[0].mxu1 %vm142_vm1, %v188_v8 }
   0xb   :  { %7402 = vmatprep.mubr.msk.bf16.mxu0 %vm8182_vm0, %v11295_v0  ;;  %7410 = vmatprep.mubr.msk.bf16.mxu1 %vm8182_vm0, %v11295_v0 }
   0xc   :  { %7399 = vmatpush3.bf16.msra.mxu0 %v7726_v30  ;;  %7407 = vmatpush3.bf16.msra.mxu1 %v8334_v31 }
   0xd   :  { %7400 = vmatprep.subr.bf16.mxu0 %v11295_v0  ;;  %7408 = vmatprep.subr.bf16.mxu1 %v11295_v0 }
  0x10   :  { %7401 = vmatpush3.bf16.msra.mxu0 %v7728_v32  ;;  %7409 = vmatpush3.bf16.msra.mxu1 %v8343_v33  ;;  %v111_v32 = vld [vmem:[%s11286_s7] sm:$0xf] }
  0x11   :  { %7414 = vmatprep.subr.bf16.mxu0 %v11295_v0  ;;  %7422 = vmatprep.subr.bf16.mxu1 %v11295_v0 }
  0x13   :  { %7403 = vmatmul.mubr.msk.bf16.vlgmr.msra.gmra.mrb[4].mxu0 %vm142_vm1, %v188_v8 }
  0x14   :  { %7418 = vmatprep.mubr.msk.bf16.mxu0 %vm8182_vm0, %v11295_v0  ;;  %7415 = vmatpush3.bf16.msra.mxu0 %v7730_v62 }
  0x15   :  { %7416 = vmatprep.subr.bf16.mxu0 %v11295_v0 }
  0x18   :  { %7417 = vmatpush3.bf16.msra.mxu0 %v7732_v1 }
  0x19   :  { %7430 = vmatprep.subr.bf16.mxu0 %v11295_v0 }
  0x77   :  { %v8313_v9 = vpop.permute.xlu0 %254 }
  0x78   :  { %11364 = vst [vmem:[#allocation2_spill] sm:$0xff] %v8313_v9 }
  0xdd   :  { %v8315_v10 = vpop.f32.mrb[0].mxu0  ;;  %v238_v11 = vpop.f32.mrb[0].mxu1 }
  0xde   :  { %v7388_v12 = vpop.f32.mrb[1].mxu0  ;;  %v244_v13 = vadd.f32 %v238_v11, %v8315_v10  ;;  %v257_v14 = vadd.f32 %v8313_v9, %v238_v11  ;;  %v7396_v15 = vpop.f32.mrb[1].mxu1  ;;  %v8325_v27 = vadd.f32 %v7183_v7, %v8315_v10 }
  0xdf   :  { %v8319_v16 = vpop.f32.mrb[2].mxu0  ;;  %v241_v17 = vpop.f32.mrb[2].mxu1  ;;  %v481_v12 = vlaneseq  ;;  %v11297_v15 = vmov 64  }
  0xe0   :  { %11365 = vst [vmem:[#allocation3_spill] sm:$0xff] %v8319_v16  ;;  %v7389_v18 = vpop.f32.mrb[3].mxu0  ;;  %259 = vrot.lane.b32.xlu0 %v257_v14, %s8184_s0  ;;  %v7397_v19 = vpop.f32.mrb[3].mxu1  ;;  %v245_v20 = vadd.f32 %v7183_v7, %v244_v13  ;;  %11366 = vst [vmem:[#allocation4_spill] sm:$0xff] %v8325_v27  ;;  %v11299_v14 = vmov 65  }
  0xe1   :  { %7692 = vset.pattern.permute.xlu1 %v11299_v14  ;;  %7691 = vset.pattern.permute.xlu0 %v11297_v15  ;;  %v8392_v17 = vshrl.u32 %v481_v12, 7  ;;  %v113_v19 = vld [vmem:[%s11284_s8] sm:$0x3] }
  0xe2   :  { %v7193_v21 = vmul.f32 -1.442695, %v245_v20  ;;  %v114_v20 = vld [vmem:[%s11285_s9] sm:$0x3] }
  0xe4   :  { %276 = vrot.lane.b32.xlu0 %v187_v6, %s8185_s1  ;;  %7736 = vpow2.f32 %v7193_v21  ;;  %v8403_v21 = vsub.s32 0, %v8392_v17 }
  0xe6   :  { %v328_v42 = vpop.f32.mrb[4].mxu0 }
  0xe7   :  { %v7404_v43 = vpop.f32.mrb[5].mxu0 }
  0xe8   :  { %v331_v44 = vpop.f32.mrb[6].mxu0 }
  0xe9   :  { %v7405_v45 = vpop.f32.mrb[7].mxu0 }
  0xee   :  { %v7737_v22 = vpop.eup %7736 }
  0xef   :  { %v249_v23 = vadd.f32 1.0, %v7737_v22  ;;  %v8407_v22 = vsub.s32 1, %v8392_v17 }
  0xf1   :  { %7738 = vrcp.f32 %v249_v23  ;;  %v538_v23 = vrot.slane %v113_v19, %v8403_v21  ;;  %v779_v45 = vrot.slane %v111_v32, %v8407_v22 }
  0xfb   :  { %v7739_v24 = vpop.eup %7738 }
  0xfc   :  { %v269_v36 = vsub.f32 1.0, %v7739_v24 }
 0x152   :  { %v260_v25 = vpop.permute.xlu0 %259 }
 0x153   :  { %v262_v26 = vmul.f32 %v7739_v24, %v260_v25  ;;  %v747_v25 = vrot.slane %v114_v20, %v8407_v22 }
 0x155   :  { %264 = vrot.lane.b32.xlu1 %v262_v26, %s8184_s0  ;;  %v545_v26 = vrot.slane %v113_v19, %v8407_v22 }
 0x156   :  { %v277_v35 = vpop.permute.xlu0 %276 }
 0x157   :  { %v279_v38 = vmul.f32 %v7739_v24, %v277_v35  ;;  %v736_v24 = vrot.slane %v114_v20, %v8403_v21 }
 0x1c7   :  { %v265_v28 = vpop.permute.xlu1 %264 }
 0x1c8   :  { %v267_v29 = vadd.f32 %v265_v28, %v8325_v27 }
 0x1ca   :  { %7740 = vtanh.f32 %v267_v29 }
 0x1d4   :  { %v7741_v34 = vpop.eup %7740 }
 0x1d5   :  { %271 = vrot.lane.b32.xlu1 %v7741_v34, %s8183_s27 }
 0x247   :  { %v272_v37 = vpop.permute.xlu1 %271 }
 0x248   :  { %v274_v39 = vmul.f32 %v272_v37, %v269_v36  ;;  %v768_v37 = vrot.slane %v111_v32, %v8403_v21 }
 0x24a   :  { %v8354_v40 = vadd.f32 %v279_v38, %v274_v39 }
 0x24c   :  { %v281_v41 = vpack.c.bf16 %v8354_v40, %v8354_v40 }
 0x24e   :  { %335 = vrot.lane.b32.xlu1 %v281_v41, %s8183_s27 }
 0x2c0   :  { %v8359_v46 = vpop.permute.xlu1 %335 }
 0x2c1   :  { %7411 = vmatmul.mubr.msk.bf16.vlgmr.msra.gmra.mrb[4].mxu1 %vm142_vm1, %v8359_v46 }
 0x2c2   :  { %7426 = vmatprep.mubr.msk.bf16.mxu1 %vm8182_vm0, %v11295_v0  ;;  %7423 = vmatpush3.bf16.msra.mxu1 %v7731_v63  ;;  %v91_v63 = vld [vmem:[%s11287_s2] sm:$0xf] }
 0x2c3   :  { %7424 = vmatprep.subr.bf16.mxu1 %v11295_v0 }
 0x2c6   :  { %7425 = vmatpush3.bf16.msra.mxu1 %v7733_v3 }
 0x2c7   :  { %7438 = vmatprep.subr.bf16.mxu1 %v11295_v0 }
 0x394   :  { %v386_v48 = vpop.f32.mrb[4].mxu1 }
 0x395   :  { %v387_v49 = vadd.f32 %v386_v48, %v328_v42  ;;  %v7412_v50 = vpop.f32.mrb[5].mxu1 }
 0x396   :  { %v389_v51 = vpop.f32.mrb[6].mxu1 }
 0x397   :  { %v392_v52 = vadd.f32 %v7184_v47, %v387_v49  ;;  %v7413_v53 = vpop.f32.mrb[7].mxu1 }
 0x399   :  { %400 = vrot.lane.b32.xlu0 %v392_v52, %s8185_s1  ;;  %v7200_v54 = vmul.f32 -1.442695, %v392_v52 }
 0x39b   :  { %7742 = vpow2.f32 %v7200_v54 }
 0x3a5   :  { %v7743_v55 = vpop.eup %7742 }
 0x3a6   :  { %v396_v56 = vadd.f32 1.0, %v7743_v55 }
 0x3a8   :  { %7744 = vrcp.f32 %v396_v56 }
 0x3b2   :  { %v7745_v57 = vpop.eup %7744 }
 0x3b3   :  { %v410_v6 = vsub.f32 1.0, %v7745_v57  ;;  %v416_v8 = vmul.f32 %v7745_v57, %v277_v35 }
 0x40b   :  { %v401_v58 = vpop.permute.xlu0 %400 }
 0x40c   :  { %v403_v59 = vmul.f32 %v7745_v57, %v401_v58  ;;  %v789_v57 = vsub.s32 2, %v8392_v17 }
 0x40e   :  { %405 = vrot.lane.b32.xlu1 %v403_v59, %s8184_s0  ;;  %v790_v59 = vrot.slane %v111_v32, %v789_v57 }
 0x480   :  { %v406_v60 = vpop.permute.xlu1 %405 }
 0x481   :  { %v408_v61 = vadd.f32 %v406_v60, %v392_v52 }
 0x483   :  { %7746 = vtanh.f32 %v408_v61  ;;  %v800_v61 = vsub.s32 3, %v8392_v17 }
 0x485   :  { %v801_v62 = vrot.slane %v111_v32, %v800_v61 }
 0x48d   :  { %v7747_v5 = vpop.eup %7746 }
 0x48e   :  { %412 = vrot.lane.b32.xlu0 %v7747_v5, %s8183_s27  ;;  %v92_v5 = vld [vmem:[%s11287_s2 + $0x4] sm:$0xf] }
 0x492   :  { %738 = vbcast.lane.b32.xlu0 %v736_v24, 256 }
 0x496   :  { %749 = vbcast.lane.b32.xlu0 %v747_v25, 256 }
 0x500   :  { %v413_v7 = vpop.permute.xlu0 %412 }
 0x501   :  { %v415_v11 = vmul.f32 %v413_v7, %v410_v6 }
 0x503   :  { %v8387_v13 = vadd.f32 %v416_v8, %v415_v11  ;;  %v11301_v8 = vmov 0  }
 0x505   :  { %v418_v18 = vpack.c.bf16 %v8387_v13, %v8387_v13 }
 0x507   :  { %420 = vrot.lane.b32.xlu1 %v418_v18, %s8183_s27 }
 0x50b   :  { %540 = vbcast.lane.b32.xlu1 %v538_v23, 256  ;;  %v8486_v23 = vpop.permute.xlu0 %738 }
 0x50f   :  { %547 = vbcast.lane.b32.xlu1 %v545_v26, 256 }
 0x513   :  { %742 = vbcast.lane.b32.xlu1 %v736_v24, 264 }
 0x517   :  { %753 = vbcast.lane.b32.xlu1 %v747_v25, 264  ;;  %v8490_v25 = vpop.permute.xlu0 %749 }
 0x518   :  { %11369 = vst [vmem:[#allocation7_spill] sm:$0xff] %v8490_v25 }
 0x579   :  { %v8413_v28 = vpop.permute.xlu1 %420 }
 0x57a   :  { %7419 = vmatmul.mubr.msk.bf16.vlgmr.msra.gmra.mrb[8].mxu0 %vm142_vm1, %v8413_v28  ;;  %7427 = vmatmul.mubr.msk.bf16.vlgmr.msra.gmra.mrb[8].mxu1 %vm142_vm1, %v8413_v28 }
 0x57b   :  { %7439 = vmatpush3.bf16.msra.mxu1 %v8277_v2  ;;  %7442 = vmatprep.mubr.msk.bf16.mxu1 %vm8182_vm0, %v11295_v0  ;;  %v8188_v2 = vmov 1966171168  }
 0x57c   :  { %7440 = vmatprep.subr.bf16.mxu1 %v11295_v0  ;;  %7434 = vmatprep.mubr.msk.bf16.mxu0 %vm8182_vm0, %v11295_v0  ;;  %v479_v29 = vunpack.c.l.s4 %v8188_v2 }
 0x57d   :  { %v8480_v18 = vpop.permute.xlu1 %540 }
 0x57e   :  { %v480_v30 = vunpack.c.0.s8 %v479_v29  ;;  %v93_v29 = vld [vmem:[%s11288_s3] sm:$0xff] }
 0x57f   :  { %7441 = vmatpush3.bf16.msra.mxu1 %v8291_v4 }
 0x580   :  { %7454 = vmatprep.subr.bf16.mxu1 %v11295_v0  ;;  %v8436_v4 = vsub.s32 %v480_v30, %v8392_v17 }
 0x581   :  { %v8482_v19 = vpop.permute.xlu1 %547 }
 0x582   :  { %7443 = vmatmul.mubr.msk.bf16.vlgmr.msra.gmra.mrb[12].mxu1 %vm142_vm1, %v8359_v46  ;;  %v112_v46 = vld [vmem:[%s11286_s7 + $0x4] sm:$0xf] }
 0x583   :  { %7455 = vmatpush3.bf16.msra.mxu1 %v8334_v31  ;;  %7458 = vmatprep.mubr.msk.bf16.mxu1 %vm8182_vm0, %v11295_v0  ;;  %v812_v50 = vrot.slane %v112_v46, %v8403_v21  ;;  %v823_v55 = vrot.slane %v112_v46, %v8407_v22  ;;  %v834_v60 = vrot.slane %v112_v46, %v789_v57 }
 0x584   :  { %7456 = vmatprep.subr.bf16.mxu1 %v11295_v0  ;;  %v845_v11 = vrot.slane %v112_v46, %v800_v61 }
 0x585   :  { %v8484_v20 = vpop.permute.xlu1 %742 }
 0x586   :  { %11367 = vst [vmem:[#allocation5_spill] sm:$0xff] %v8484_v20 }
 0x587   :  { %7457 = vmatpush3.bf16.msra.mxu1 %v8343_v33 }
 0x588   :  { %7470 = vmatprep.subr.bf16.mxu1 %v11295_v0 }
 0x589   :  { %v8488_v24 = vpop.permute.xlu1 %753 }
 0x58a   :  { %11368 = vst [vmem:[#allocation6_spill] sm:$0xff] %v8488_v24 }
 0x64d   :  { %v8441_v31 = vpop.f32.mrb[8].mxu0  ;;  %v8443_v34 = vpop.f32.mrb[8].mxu1 }
 0x64e   :  { %v484_v35 = vrot.slane %v8441_v31, %v8436_v4  ;;  %v7428_v33 = vpop.f32.mrb[9].mxu1  ;;  %716 = vperm.xlu1 %7692, %v8441_v31   ;;  %520 = vperm.xlu0 %7691, %v8441_v31   ;;  %v7420_v36 = vpop.f32.mrb[9].mxu0 }
 0x64f   :  { %v474_v38 = vpop.f32.mrb[10].mxu0  ;;  %v1445_v39 = vpop.f32.mrb[10].mxu1 }
 0x650   :  { %v7421_v41 = vpop.f32.mrb[11].mxu0  ;;  %v7429_v42 = vpop.f32.mrb[11].mxu1  ;;  %v492_v43 = vrot.slane %v484_v35, %v8436_v4  ;;  %v485_v52 = vcombine.high %v484_v35, %v484_v35  ;;  %v94_v35 = vld [vmem:[%s11288_s3 + $0x8] sm:$0xf] }
 0x652   :  { %774 = vbcast.lane.b32.xlu1 %v768_v37, 264  ;;  %v503_v44 = vrot.slane %v492_v43, %v8403_v21  ;;  %v499_v56 = vrot.slane %v485_v52, %v8436_v4  ;;  %7693 = vset.pattern.permute.xlu0 %v11301_v8  ;;  %v95_v43 = vld [vmem:[%s11288_s3 + $0x10] sm:$0xff] }
 0x653   :  { %7694 = vset.pattern.permute.xlu1 %v11301_v8 }
 0x654   :  { %693 = vrot.lane.b32.xlu0 %v503_v44, %s8183_s27  ;;  %v507_v58 = vrot.slane %v499_v56, %v8403_v21  ;;  %v510_v1 = vmul.f32 %v503_v44, %v91_v63 }
 0x655   :  { %v8457_v47 = vpop.f32.mrb[12].mxu1 }
 0x656   :  { %v1645_v48 = vrot.slane %v8457_v47, 6  ;;  %v7444_v49 = vpop.f32.mrb[13].mxu1  ;;  %785 = vbcast.lane.b32.xlu1 %v779_v45, 264  ;;  %v513_v3 = vsel %vm11355_vm2, %v510_v1, 0.0  ;;  %v511_v6 = vmul.f32 %v507_v58, %v92_v5 }
 0x657   :  { %v1641_v51 = vpop.f32.mrb[14].mxu1 }
 0x658   :  { %v8462_v53 = vadd.f32 %v1645_v48, %v8315_v10  ;;  %v7445_v54 = vpop.f32.mrb[15].mxu1  ;;  %770 = vbcast.lane.b32.xlu0 %v768_v37, 256  ;;  %v516_v7 = vsel %vm11355_vm2, %v511_v6, 0.0 }
 0x65a   :  { %818 = vbcast.lane.b32.xlu1 %v812_v50, 264 }
 0x65c   :  { %781 = vbcast.lane.b32.xlu0 %v779_v45, 256  ;;  %v96_v45 = vld [vmem:[%s11288_s3 + $0x18] sm:$0xf] }
 0x65e   :  { %829 = vbcast.lane.b32.xlu1 %v823_v55, 264 }
 0x660   :  { %814 = vbcast.lane.b32.xlu0 %v812_v50, 256 }
 0x662   :  { %695 = vrot.lane.b32.xlu1 %v507_v58, %s8183_s27 }
 0x664   :  { %825 = vbcast.lane.b32.xlu0 %v823_v55, 256 }
 0x666   :  { %796 = vbcast.lane.b32.xlu1 %v790_v59, 264 }
 0x668   :  { %792 = vbcast.lane.b32.xlu0 %v790_v59, 256 }
 0x66a   :  { %840 = vbcast.lane.b32.xlu1 %v834_v60, 264 }
 0x66c   :  { %836 = vbcast.lane.b32.xlu0 %v834_v60, 256 }
 0x66e   :  { %807 = vbcast.lane.b32.xlu1 %v801_v62, 264 }
 0x68b   :  { %514 = vadd.xlane.f32.xlu0 %v513_v3 }
 0x692   :  { %517 = vadd.xlane.f32.xlu1 %v516_v7 }
 0x6a1   :  { %803 = vbcast.lane.b32.xlu0 %v801_v62, 256 }
 0x6a5   :  { %847 = vbcast.lane.b32.xlu0 %v845_v11, 256 }
 0x6cd   :  { %v717_v26 = vpop.permute.xlu1 %716  ;;  %v521_v2 = vpop.permute.xlu0 %520 }
 0x6ce   :  { %v525_v60 = vrot.slane %v521_v2, %v8403_v21  ;;  %v529_v3 = vrot.slane %v521_v2, %v8407_v22 }
 0x6d1   :  { %v8495_v30 = vpop.permute.xlu1 %774  ;;  %v694_v32 = vpop.permute.xlu0 %693 }
 0x6d2   :  { %11370 = vst [vmem:[#allocation8_spill] sm:$0xff] %v8495_v30  ;;  %v699_v33 = vmul.f32 %v694_v32, %v93_v29  ;;  %v700_v37 = vmul.f32 %v694_v32, %v94_v35 }
 0x6d4   :  { %v703_v36 = vsel %vm142_vm1, %v699_v33, 0.0  ;;  %v706_v39 = vsel %vm11355_vm2, %v700_v37, 0.0 }
 0x6d5   :  { %v8501_v38 = vpop.permute.xlu1 %785  ;;  %704 = vadd.xlane.f32.xlu1 %v703_v36  ;;  %v8516_v51 = vpop.permute.xlu0 %770 }
 0x6d6   :  { %11371 = vst [vmem:[#allocation9_spill] sm:$0xff] %v8501_v38  ;;  %11374 = vst [vmem:[#allocation12_spill] sm:$0xff] %v8516_v51 }
 0x6d9   :  { %v8504_v41 = vpop.permute.xlu1 %818  ;;  %707 = vadd.xlane.f32.xlu1 %v706_v39  ;;  %v8518_v52 = vpop.permute.xlu0 %781 }
 0x6da   :  { %11372 = vst [vmem:[#allocation10_spill] sm:$0xff] %v8504_v41  ;;  %11375 = vst [vmem:[#allocation13_spill] sm:$0xff] %v8518_v52 }
 0x6dd   :  { %v8506_v42 = vpop.permute.xlu1 %829  ;;  %v8520_v54 = vpop.permute.xlu0 %814 }
 0x6de   :  { %11373 = vst [vmem:[#allocation11_spill] sm:$0xff] %v8506_v42  ;;  %11376 = vst [vmem:[#allocation14_spill] sm:$0xff] %v8520_v54 }
 0x6e1   :  { %v696_v44 = vpop.permute.xlu1 %695  ;;  %v8522_v55 = vpop.permute.xlu0 %825 }
 0x6e2   :  { %v701_v46 = vmul.f32 %v696_v44, %v95_v43  ;;  %v702_v49 = vmul.f32 %v696_v44, %v96_v45  ;;  %11377 = vst [vmem:[#allocation15_spill] sm:$0xff] %v8522_v55 }
 0x6e4   :  { %v709_v48 = vsel %vm142_vm1, %v701_v46, 0.0  ;;  %v712_v50 = vsel %vm11355_vm2, %v702_v49, 0.0 }
 0x6e5   :  { %710 = vadd.xlane.f32.xlu1 %v709_v48  ;;  %v8524_v56 = vpop.permute.xlu0 %792  ;;  %v8526_v57 = vpop.permute.xlu1 %796  ;;  %v725_v48 = vrot.slane %v717_v26, %v8407_v22 }
 0x6e6   :  { %11378 = vst [vmem:[#allocation16_spill] sm:$0xff] %v8524_v56  ;;  %11379 = vst [vmem:[#allocation17_spill] sm:$0xff] %v8526_v57 }
 0x6e9   :  { %713 = vadd.xlane.f32.xlu1 %v712_v50  ;;  %v8528_v58 = vpop.permute.xlu0 %836  ;;  %v8530_v59 = vpop.permute.xlu1 %840 }
 0x6ea   :  { %11380 = vst [vmem:[#allocation18_spill] sm:$0xff] %v8528_v58  ;;  %11381 = vst [vmem:[#allocation19_spill] sm:$0xff] %v8530_v59 }
 0x6ed   :  { %v8533_v63 = vpop.permute.xlu1 %807 }
 0x6ee   :  { %11382 = vst [vmem:[#allocation20_spill] sm:$0xff] %v8533_v63 }
 0x6fa   :  { %851 = vbcast.lane.b32.xlu1 %v845_v11, 264  ;;  %v721_v11 = vrot.slane %v717_v26, %v8403_v21 }
 0x718   :  { %v515_v61 = vpop.xlane.xlu0 %514 }
 0x719   :  { %v532_v62 = vadd.f32 %v525_v60, %v515_v61 }
 0x71b   :  { %v8536_v1 = vadd.f32 %v8480_v18, %v532_v62 }
 0x71c   :  { %v8561_v46 = vpop.permute.xlu0 %803 }
 0x71d   :  { %556 = vperm.xlu0 %7693, %v8536_v1   ;;  %11383 = vst [vmem:[#allocation21_spill] sm:$0xff] %v8561_v46 }
 0x71f   :  { %v518_v5 = vpop.xlane.xlu1 %517 }
 0x720   :  { %v533_v6 = vadd.f32 %v529_v3, %v518_v5 }
 0x722   :  { %v8541_v7 = vadd.f32 %v8482_v19, %v533_v6 }
 0x724   :  { %559 = vperm.xlu1 %7694, %v8541_v7  }
 0x762   :  { %v705_v29 = vpop.xlane.xlu1 %704 }
 0x763   :  { %v728_v32 = vadd.f32 %v721_v11, %v705_v29 }
 0x765   :  { %v8546_v35 = vadd.f32 %v8486_v23, %v728_v32 }
 0x766   :  { %v708_v33 = vpop.xlane.xlu1 %707 }
 0x767   :  { %v729_v36 = vadd.f32 %v721_v11, %v708_v33  ;;  %v869_v37 = vadd.f32 %v8516_v51, %v8546_v35  ;;  %v871_v39 = vadd.f32 %v8518_v52, %v8546_v35  ;;  %v873_v44 = vadd.f32 %v8524_v56, %v8546_v35 }
 0x768   :  { %v875_v60 = vadd.f32 %v8561_v46, %v8546_v35 }
 0x769   :  { %v8551_v2 = vadd.f32 %v8484_v20, %v729_v36  ;;  %902 = vperm.xlu1 %7694, %v869_v37   ;;  %v8586_v37 = vpop.permute.xlu0 %847 }
 0x76a   :  { %11384 = vst [vmem:[#allocation22_spill] sm:$0xff] %v8586_v37 }
 0x76b   :  { %v870_v43 = vadd.f32 %v8495_v30, %v8551_v2  ;;  %v872_v45 = vadd.f32 %v8501_v38, %v8551_v2  ;;  %v874_v61 = vadd.f32 %v8526_v57, %v8551_v2  ;;  %v876_v26 = vadd.f32 %v8533_v63, %v8551_v2 }
 0x76d   :  { %908 = vperm.xlu1 %7694, %v871_v39   ;;  %905 = vperm.xlu0 %7693, %v870_v43  }
 0x771   :  { %914 = vperm.xlu1 %7694, %v873_v44   ;;  %911 = vperm.xlu0 %7693, %v872_v45  }
 0x772   :  { %v711_v49 = vpop.xlane.xlu1 %710 }
 0x773   :  { %v730_v50 = vadd.f32 %v725_v48, %v711_v49 }
 0x775   :  { %v8569_v62 = vadd.f32 %v8490_v25, %v730_v50  ;;  %920 = vperm.xlu1 %7694, %v875_v60   ;;  %917 = vperm.xlu0 %7693, %v874_v61  }
 0x776   :  { %v714_v3 = vpop.xlane.xlu1 %713 }
 0x777   :  { %v731_v5 = vadd.f32 %v725_v48, %v714_v3  ;;  %v877_v6 = vadd.f32 %v8520_v54, %v8569_v62  ;;  %v879_v29 = vadd.f32 %v8522_v55, %v8569_v62  ;;  %v881_v33 = vadd.f32 %v8528_v58, %v8569_v62 }
 0x778   :  { %v883_v39 = vadd.f32 %v8586_v37, %v8569_v62  ;;  %v8597_v48 = vand.u32 127, %v481_v12  ;;  %v8610_v12 = vld [vmem:[%s11289_s11] sm:$0x3] }
 0x779   :  { %v8576_v11 = vadd.f32 %v8488_v24, %v731_v5  ;;  %923 = vperm.xlu0 %7693, %v876_v26   ;;  %926 = vperm.xlu1 %7694, %v877_v6   ;;  %v1044_v6 = vrot.slane %v8610_v12, %v8403_v21 }
 0x77a   :  { %v8592_v44 = vpop.permute.xlu1 %851  ;;  %v8601_v49 = vsub.s32 %v8597_v48, %v8392_v17 }
 0x77b   :  { %v878_v32 = vadd.f32 %v8504_v41, %v8576_v11  ;;  %v880_v36 = vadd.f32 %v8506_v42, %v8576_v11  ;;  %v882_v43 = vadd.f32 %v8530_v59, %v8576_v11  ;;  %11385 = vst [vmem:[#allocation23_spill] sm:$0xff] %v8592_v44  ;;  %v884_v45 = vadd.f32 %v8592_v44, %v8576_v11 }
 0x77d   :  { %932 = vperm.xlu1 %7694, %v879_v29   ;;  %929 = vperm.xlu0 %7693, %v878_v32   ;;  %v8617_v29 = vld [vmem:[%s11283_s13 + $0x2] ss:$0 sm:$0xff] }
 0x77e   :  { %v631_v32 = vmul.f32 0.0, %v8617_v29 }
 0x781   :  { %938 = vperm.xlu1 %7694, %v881_v33   ;;  %935 = vperm.xlu0 %7693, %v880_v36  }
 0x785   :  { %944 = vperm.xlu1 %7694, %v883_v39   ;;  %941 = vperm.xlu0 %7693, %v882_v43   ;;  %v953_v43 = vadd.s32 4294967288, %v8597_v48 }
 0x789   :  { %947 = vperm.xlu0 %7693, %v884_v45  }
 0x79c   :  { %v557_v50 = vpop.permute.xlu0 %556 }
 0x79d   :  { %v566_v61 = vrot.slane %v557_v50, %v8601_v49 }
 0x7a3   :  { %v560_v60 = vpop.permute.xlu1 %559 }
 0x7a4   :  { %v570_v3 = vrot.slane %v560_v60, %v8601_v49  ;;  %v8623_v60 = vsub.s32 %v953_v43, %v8392_v17 }
 0x7a6   :  { %v572_v5 = vsel %vm571_vm3, %v570_v3, %v566_v61 }
 0x7a7   :  { %v575_v26 = vsel %vm574_vm4, %v572_v5, -inf }
 0x7a9   :  { %576 = vmax.xlane.f32.xlu1 %v575_v26 }
 0x7ba   :  { %1046 = vbcast.lane.b32.xlu1 %v1044_v6, 256 }
 0x7be   :  { %633 = vrot.lane.b32.xlu1 %v631_v32, %s8183_s27 }
 0x7e8   :  { %v903_v33 = vpop.permute.xlu1 %902 }
 0x7e9   :  { %v952_v15 = vrot.slane %v903_v33, %v8601_v49 }
 0x7ec   :  { %v906_v36 = vpop.permute.xlu0 %905  ;;  %v909_v39 = vpop.permute.xlu1 %908 }
 0x7ed   :  { %v957_v26 = vrot.slane %v906_v36, %v8623_v60  ;;  %v963_v6 = vrot.slane %v909_v39, %v8601_v49 }
 0x7f0   :  { %v912_v45 = vpop.permute.xlu0 %911  ;;  %v915_v50 = vpop.permute.xlu1 %914 }
 0x7f1   :  { %v967_v61 = vrot.slane %v912_v45, %v8623_v60  ;;  %v972_v0 = vrot.slane %v915_v50, %v8601_v49  ;;  %v959_v45 = vsel %vm958_vm5, %v957_v26, %v952_v15 }
 0x7f3   :  { %v968_v14 = vsel %vm958_vm5, %v967_v61, %v963_v6 }
 0x7f4   :  { %v918_v3 = vpop.permute.xlu0 %917  ;;  %v921_v5 = vpop.permute.xlu1 %920 }
 0x7f5   :  { %v976_v32 = vrot.slane %v918_v3, %v8623_v60  ;;  %v981_v36 = vrot.slane %v921_v5, %v8601_v49  ;;  %v1023_v3 = vsel %vm571_vm3, %v968_v14, %v959_v45 }
 0x7f7   :  { %v977_v16 = vsel %vm958_vm5, %v976_v32, %v972_v0 }
 0x7f8   :  { %v924_v8 = vpop.permute.xlu0 %923  ;;  %v927_v43 = vpop.permute.xlu1 %926  ;;  %v1025_v33 = vsel %vm1024_vm6, %v977_v16, %v1023_v3 }
 0x7f9   :  { %v985_v39 = vrot.slane %v924_v8, %v8623_v60 }
 0x7fb   :  { %v986_v50 = vsel %vm958_vm5, %v985_v39, %v981_v36  ;;  %v990_v39 = vrot.slane %v927_v43, %v8601_v49 }
 0x7fc   :  { %v930_v61 = vpop.permute.xlu0 %929  ;;  %v933_v6 = vpop.permute.xlu1 %932  ;;  %v1027_v37 = vsel %vm11337_vm7, %v986_v50, %v1025_v33 }
 0x7fd   :  { %v1034_v0 = vsel %vm1033_vm8, %v1027_v37, -inf  ;;  %v994_v32 = vrot.slane %v930_v61, %v8623_v60  ;;  %v999_v14 = vrot.slane %v933_v6, %v8601_v49 }
 0x7fe   :  { %1035 = vmax.xlane.f32.xlu0 %v1034_v0 }
 0x7ff   :  { %v995_v33 = vsel %vm958_vm5, %v994_v32, %v990_v39 }
 0x800   :  { %v936_v15 = vpop.permute.xlu0 %935  ;;  %v939_v26 = vpop.permute.xlu1 %938 }
 0x801   :  { %v1003_v5 = vrot.slane %v936_v15, %v8623_v60  ;;  %v1008_v16 = vrot.slane %v939_v26, %v8601_v49 }
 0x803   :  { %v1004_v3 = vsel %vm958_vm5, %v1003_v5, %v999_v14  ;;  %v1051_v5 = vrot.slane %v8610_v12, %v8407_v22 }
 0x804   :  { %v942_v8 = vpop.permute.xlu0 %941  ;;  %v945_v36 = vpop.permute.xlu1 %944  ;;  %v1028_v6 = vsel %vm571_vm3, %v1004_v3, %v995_v33 }
 0x805   :  { %v1012_v45 = vrot.slane %v942_v8, %v8623_v60  ;;  %v1017_v0 = vrot.slane %v945_v36, %v8601_v49 }
 0x807   :  { %v1013_v50 = vsel %vm958_vm5, %v1012_v45, %v1008_v16 }
 0x808   :  { %v948_v37 = vpop.permute.xlu0 %947  ;;  %v1029_v26 = vsel %vm1024_vm6, %v1013_v50, %v1028_v6  ;;  %v115_v6 = vld [vmem:[%s11290_s10] sm:$0x3] }
 0x809   :  { %v1021_v61 = vrot.slane %v948_v37, %v8623_v60 }
 0x80b   :  { %v1022_v15 = vsel %vm958_vm5, %v1021_v61, %v1017_v0 }
 0x80c   :  { %v1030_v8 = vsel %vm11337_vm7, %v1022_v15, %v1029_v26  ;;  %v1129_v15 = vrot.slane %v115_v6, %v8403_v21 }
 0x80d   :  { %v1037_v43 = vsel %vm1033_vm8, %v1030_v8, -inf }
 0x80e   :  { %1038 = vmax.xlane.f32.xlu0 %v1037_v43 }
 0x824   :  { %1053 = vbcast.lane.b32.xlu0 %v1051_v5, 256 }
 0x836   :  { %v577_v32 = vpop.xlane.xlu1 %576 }
 0x837   :  { %v582_v14 = vrot.slane %v577_v32, %v8403_v21  ;;  %v586_v45 = vrot.slane %v577_v32, %v8407_v22 }
 0x839   :  { %v589_v16 = vsub.f32 %v8536_v1, %v582_v14  ;;  %v590_v36 = vsub.f32 %v8541_v7, %v586_v45 }
 0x83a   :  { %v8669_v12 = vpop.permute.xlu1 %1046 }
 0x83b   :  { %v591_v39 = vmul.f32 1.442695, %v589_v16  ;;  %v593_v3 = vmul.f32 1.442695, %v590_v36  ;;  %v11307_v16 = vmov 96  }
 0x83d   :  { %7748 = vpow2.f32 %v591_v39  ;;  %v8697_v39 = vld [vmem:[%s11291_s5] sm:$0xff] }
 0x83e   :  { %7750 = vpow2.f32 %v593_v3  ;;  %v634_v26 = vpop.permute.xlu1 %633 }
 0x83f   :  { %v636_v8 = vsel %vm142_vm1, %v634_v26, 0.0  ;;  %v8707_v26 = vld [vmem:[%s11291_s5 + $0x10] sm:$0xff] }
 0x847   :  { %v8663_v37 = vpop.eup %7748 }
 0x848   :  { %v8665_v50 = vpop.eup %7750  ;;  %598 = vperm.xlu1 %7694, %v8663_v37  }
 0x849   :  { %601 = vperm.xlu0 %7693, %v8665_v50  }
 0x88b   :  { %v1036_v33 = vpop.xlane.xlu0 %1035 }
 0x88c   :  { %v1057_v0 = vmul.f32 %v8669_v12, %v1036_v33 }
 0x88e   :  { %1062 = vperm.xlu1 %7694, %v1057_v0  }
 0x892   :  { %7695 = vset.pattern.permute.xlu1 %v11307_v16 }
 0x89b   :  { %v1039_v1 = vpop.xlane.xlu0 %1038 }
 0x89f   :  { %v8672_v7 = vpop.permute.xlu0 %1053 }
 0x8a0   :  { %v1058_v61 = vmul.f32 %v8672_v7, %v1039_v1 }
 0x8a2   :  { %1065 = vperm.xlu0 %7693, %v1058_v61  }
 0x8a6   :  { %640 = vrot.lane.b32.xlu0 %v8441_v31, %s8190_s20 }
 0x8aa   :  { %1131 = vbcast.lane.b32.xlu0 %v1129_v15, 256 }
 0x8b2   :  { %637 = vadd.xlane.f32.xlu1 %v636_v8  ;;  %v8712_v8 = vld [vmem:[%s11291_s5 + $0x18] sm:$0xf] }
 0x8c3   :  { %645 = vrot.lane.b32.xlu1 %v8617_v29, %s8185_s1  ;;  %v8692_v29 = vld [vmem:[%s11291_s5 + $0x8] sm:$0xf] }
 0x8c7   :  { %v599_v43 = vpop.permute.xlu1 %598  ;;  %1135 = vbcast.lane.b32.xlu1 %v1129_v15, 264 }
 0x8c8   :  { %v602_v5 = vpop.permute.xlu0 %601  ;;  %v606_v32 = vrot.slane %v599_v43, %v8601_v49 }
 0x8c9   :  { %v610_v14 = vrot.slane %v602_v5, %v8601_v49 }
 0x8cb   :  { %v611_v45 = vsel %vm571_vm3, %v610_v14, %v606_v32 }
 0x8cc   :  { %v613_v31 = vsel %vm574_vm4, %v611_v45, 0.0 }
 0x8cd   :  { %614 = vadd.xlane.f32.xlu0 %v613_v31  ;;  %v1140_v31 = vrot.slane %v115_v6, %v8407_v22 }
 0x90d   :  { %v1063_v36 = vpop.permute.xlu1 %1062 }
 0x90e   :  { %v1070_v3 = vrot.slane %v1063_v36, %v8601_v49 }
 0x910   :  { %v1096_v33 = vmul.f32 %v1070_v3, %v8692_v29  ;;  %v1095_v0 = vmul.f32 %v1070_v3, %v8697_v39 }
 0x912   :  { %v1104_v1 = vsel %vm1103_vm9, %v1096_v33, 0.0  ;;  %v1100_v61 = vsel %vm1099_vm10, %v1095_v0, 0.0 }
 0x913   :  { %1105 = vadd.xlane.f32.xlu0 %v1104_v1  ;;  %1101 = vadd.xlane.f32.xlu1 %v1100_v61 }
 0x921   :  { %v1066_v15 = vpop.permute.xlu0 %1065 }
 0x922   :  { %v1074_v43 = vrot.slane %v1066_v15, %v8601_v49 }
 0x924   :  { %v1097_v5 = vmul.f32 %v1074_v43, %v8707_v26  ;;  %v1098_v32 = vmul.f32 %v1074_v43, %v8712_v8 }
 0x925   :  { %v641_v33 = vpop.permute.xlu0 %640 }
 0x926   :  { %v1107_v14 = vsel %vm1099_vm10, %v1097_v5, 0.0  ;;  %v1110_v45 = vsel %vm1103_vm9, %v1098_v32, 0.0 }
 0x927   :  { %1108 = vadd.xlane.f32.xlu0 %v1107_v14  ;;  %1111 = vadd.xlane.f32.xlu1 %v1110_v45 }
 0x929   :  { %v8724_v32 = vpop.permute.xlu0 %1131 }
 0x92a   :  { %11387 = vst [vmem:[#allocation25_spill] sm:$0xff] %v8724_v32 }
 0x938   :  { %1142 = vbcast.lane.b32.xlu1 %v1140_v31, 256 }
 0x93d   :  { %1146 = vbcast.lane.b32.xlu0 %v1140_v31, 264 }
 0x93f   :  { %v638_v36 = vpop.xlane.xlu1 %637 }
 0x940   :  { %v639_v3 = vadd.f32 %v638_v36, %v8315_v10 }
 0x942   :  { %v643_v0 = vadd.f32 %v641_v33, %v639_v3  ;;  %v11388_v3 = vmov 0  }
 0x943   :  { %v8721_v1 = vpop.permute.xlu1 %645 }
 0x944   :  { %11386 = vst [vmem:[#allocation24_spill] sm:$0xff] %v8721_v1  ;;  %v648_v61 = vadd.f32 %v8721_v1, %v643_v0 }
 0x946   :  { %v7204_v15 = vmul.f32 -1.442695, %v648_v61 }
 0x948   :  { %7752 = vpow2.f32 %v7204_v15 }
 0x952   :  { %v7753_v43 = vpop.eup %7752 }
 0x953   :  { %v652_v5 = vadd.f32 1.0, %v7753_v43  ;;  %v8733_v43 = vpop.permute.xlu1 %1135 }
 0x955   :  { %7754 = vrcp.f32 %v652_v5 }
 0x95a   :  { %v615_v14 = vpop.xlane.xlu0 %614 }
 0x95b   :  { %v620_v6 = vrot.slane %v615_v14, %v8403_v21  ;;  %v624_v45 = vrot.slane %v615_v14, %v8407_v22 }
 0x95d   :  { %7756 = vrcp.f32 %v620_v6 }
 0x95e   :  { %7758 = vrcp.f32 %v624_v45 }
 0x95f   :  { %v7755_v31 = vpop.eup %7754 }
 0x960   :  { %v655_v36 = vsub.f32 1.0, %v7755_v31 }
 0x962   :  { %658 = vperm.xlu1 %7695, %v655_v36  }
 0x966   :  { %7696 = vset.pattern.permute.xlu1 %v11388_v3 }
 0x967   :  { %v7757_v33 = vpop.eup %7756 }
 0x968   :  { %v7759_v0 = vpop.eup %7758  ;;  %v628_v61 = vmul.f32 %v7757_v33, %v8663_v37 }
 0x969   :  { %v630_v15 = vmul.f32 %v7759_v0, %v8665_v50 }
 0x96a   :  { %664 = vperm.xlu1 %7696, %v628_v61  }
 0x96b   :  { %667 = vperm.xlu0 %7693, %v630_v15  }
 0x96f   :  { %7697 = vset.pattern.permute.xlu0 %v11307_v16  ;;  %v1655_v16 = vadd.f32 %v8457_v47, %v8313_v9 }
 0x970   :  { %682 = vperm.xlu0 %7697, %v7755_v31  }
 0x974   :  { %7698 = vset.pattern.permute.xlu0 %v11388_v3 }
 0x9a0   :  { %v1106_v5 = vpop.xlane.xlu0 %1105  ;;  %v1102_v14 = vpop.xlane.xlu1 %1101 }
 0x9a1   :  { %v1114_v6 = vsub.f32 %v8551_v2, %v1106_v5  ;;  %v1113_v45 = vsub.f32 %v8546_v35, %v1102_v14 }
 0x9a3   :  { %v1117_v36 = vmul.f32 1.442695, %v1113_v45  ;;  %v1119_v1 = vmul.f32 1.442695, %v1114_v6 }
 0x9a5   :  { %7760 = vpow2.f32 %v1117_v36 }
 0x9a6   :  { %7762 = vpow2.f32 %v1119_v1 }
 0x9af   :  { %v7761_v37 = vpop.eup %7760 }
 0x9b0   :  { %v8738_v50 = vmul.f32 %v7761_v37, %v8724_v32  ;;  %v7763_v33 = vpop.eup %7762 }
 0x9b1   :  { %v8744_v2 = vmul.f32 %v7763_v33, %v8733_v43 }
 0x9b2   :  { %1161 = vperm.xlu1 %7696, %v8738_v50  }
 0x9b4   :  { %v1109_v31 = vpop.xlane.xlu0 %1108  ;;  %v1112_v0 = vpop.xlane.xlu1 %1111 }
 0x9b5   :  { %v1115_v61 = vsub.f32 %v8569_v62, %v1109_v31  ;;  %v1116_v15 = vsub.f32 %v8576_v11, %v1112_v0 }
 0x9b6   :  { %1164 = vperm.xlu1 %7696, %v8744_v2  }
 0x9b7   :  { %v1121_v35 = vmul.f32 1.442695, %v1115_v61  ;;  %v1123_v5 = vmul.f32 1.442695, %v1116_v15 }
 0x9b8   :  { %v8747_v1 = vpop.permute.xlu1 %1142  ;;  %v8749_v14 = vpop.permute.xlu0 %1146 }
 0x9b9   :  { %7764 = vpow2.f32 %v1121_v35  ;;  %11389 = vst [vmem:[#allocation26_spill] sm:$0xff] %v8747_v1  ;;  %11390 = vst [vmem:[#allocation27_spill] sm:$0xff] %v8749_v14 }
 0x9ba   :  { %7766 = vpow2.f32 %v1123_v5 }
 0x9c3   :  { %v7765_v6 = vpop.eup %7764 }
 0x9c4   :  { %v7767_v45 = vpop.eup %7766  ;;  %v8752_v36 = vmul.f32 %v7765_v6, %v8747_v1  ;;  %v1657_v1 = vrot.slane %v1655_v16, 6 }
 0x9c5   :  { %v8755_v62 = vmul.f32 %v7767_v45, %v8749_v14 }
 0x9c6   :  { %1167 = vperm.xlu0 %7698, %v8752_v36  }
 0x9c7   :  { %1170 = vperm.xlu1 %7696, %v8755_v62  }
 0x9e1   :  { %v659_v11 = vpop.permute.xlu1 %658 }
 0x9e9   :  { %v665_v37 = vpop.permute.xlu1 %664 }
 0x9ea   :  { %v668_v33 = vpop.permute.xlu0 %667  ;;  %v672_v31 = vrot.slane %v665_v37, %v8601_v49 }
 0x9eb   :  { %v676_v0 = vrot.slane %v668_v33, %v8601_v49 }
 0x9ed   :  { %v677_v61 = vsel %vm571_vm3, %v676_v0, %v672_v31 }
 0x9ee   :  { %v679_v5 = vmul.f32 %v677_v61, %v659_v11  ;;  %v109_v11 = vld [vmem:[%s11292_s6] sm:$0xf] }
 0x9ef   :  { %v683_v15 = vpop.permute.xlu0 %682 }
 0x9f0   :  { %v685_v35 = vmul.f32 0.0, %v683_v15 }
 0x9f2   :  { %v686_v6 = vadd.f32 %v685_v35, %v679_v5 }
 0x9f4   :  { %v687_v45 = vsel %vm574_vm4, %v686_v6, 0.0 }
 0x9f5   :  { %688 = vadd.xlane.f32.xlu1 %v687_v45 }
 0xa06   :  { %1658 = vrot.lane.b32.xlu1 %v1657_v1, %s8184_s0 }
 0xa31   :  { %v1162_v14 = vpop.permute.xlu1 %1161 }
 0xa32   :  { %v1175_v37 = vrot.slane %v1162_v14, %v8601_v49 }
 0xa35   :  { %v1165_v32 = vpop.permute.xlu1 %1164 }
 0xa36   :  { %v1179_v33 = vrot.slane %v1165_v32, %v8623_v60  ;;  %v110_v32 = vld [vmem:[%s11292_s6 + $0x4] sm:$0xf] }
 0xa38   :  { %v1180_v31 = vsel %vm958_vm5, %v1179_v33, %v1175_v37 }
 0xa39   :  { %v1196_v0 = vmul.f32 %v1180_v31, %v109_v11 }
 0xa3b   :  { %v1198_v61 = vsel %vm1033_vm8, %v1196_v0, 0.0 }
 0xa3c   :  { %1199 = vadd.xlane.f32.xlu0 %v1198_v61 }
 0xa45   :  { %v1168_v47 = vpop.permute.xlu0 %1167 }
 0xa46   :  { %v1184_v16 = vrot.slane %v1168_v47, %v8601_v49  ;;  %v1171_v1 = vpop.permute.xlu1 %1170 }
 0xa47   :  { %v1188_v15 = vrot.slane %v1171_v1, %v8623_v60 }
 0xa49   :  { %v1189_v14 = vsel %vm958_vm5, %v1188_v15, %v1184_v16 }
 0xa4a   :  { %v1197_v35 = vmul.f32 %v1189_v14, %v110_v32 }
 0xa4c   :  { %v1201_v5 = vsel %vm1033_vm8, %v1197_v35, 0.0 }
 0xa4d   :  { %1202 = vadd.xlane.f32.xlu0 %v1201_v5 }
 0xa82   :  { %v689_v45 = vpop.xlane.xlu1 %688 }
 0xa83   :  { %v690_v37 = vadd.f32 1e-20, %v689_v45 }
 0xa85   :  { %7768 = vrcp.f32 %v690_v37 }
 0xa8f   :  { %v7769_v33 = vpop.eup %7768 }
 0xa90   :  { %v8780_v11 = vmul.f32 %v7769_v33, %v686_v6 }
 0xa92   :  { %11391 = vst [vmem:[#allocation28_spill] sm:$0xff] %v8780_v11  ;;  %v1265_v31 = vrot.slane %v8780_v11, %v8436_v4 }
 0xa94   :  { %v1273_v0 = vrot.slane %v1265_v31, %v8436_v4  ;;  %v1266_v37 = vcombine.high %v1265_v31, %v1265_v31 }
 0xa96   :  { %v1284_v61 = vrot.slane %v1273_v0, %v8403_v21 }
 0xa98   :  { %v1292_v47 = vmul.f32 %v1284_v61, %v8692_v29 }
 0xa9a   :  { %v1298_v16 = vsel %vm1103_vm9, %v1292_v47, 0.0 }
 0xa9b   :  { %1299 = vadd.xlane.f32.xlu1 %v1298_v16  ;;  %v1280_v16 = vrot.slane %v1266_v37, %v8436_v4 }
 0xa9d   :  { %v1288_v31 = vrot.slane %v1280_v16, %v8403_v21 }
 0xac9   :  { %v1200_v1 = vpop.xlane.xlu0 %1199 }
 0xaca   :  { %v1209_v15 = vrot.slane %v1200_v1, %v8601_v49 }
 0xacc   :  { %v1230_v32 = vmul.f32 %v1209_v15, %v8697_v39  ;;  %v1231_v14 = vmul.f32 %v1209_v15, %v8692_v29  ;;  %v8012_v29 = vld [vmem:[%s11283_s13] ss:$0 sm:$0xff] }
 0xacd   :  { %v1648_v1 = vadd.f32 %v8012_v29, %v8462_v53 }
 0xace   :  { %v1234_v6 = vsel %vm1099_vm10, %v1230_v32, 0.0  ;;  %v1237_v35 = vsel %vm1103_vm9, %v1231_v14, 0.0  ;;  %v1291_v32 = vmul.f32 %v1284_v61, %v8697_v39  ;;  %v1659_v61 = vpop.permute.xlu1 %1658 }
 0xacf   :  { %1235 = vadd.xlane.f32.xlu0 %v1234_v6  ;;  %v7212_v6 = vmul.f32 -1.442695, %v1648_v1 }
 0xad0   :  { %v1295_v14 = vsel %vm1099_vm10, %v1291_v32, 0.0 }
 0xad1   :  { %7770 = vpow2.f32 %v7212_v6 }
 0xad3   :  { %1238 = vadd.xlane.f32.xlu0 %v1237_v35  ;;  %v1293_v35 = vmul.f32 %v1288_v31, %v8707_v26 }
 0xada   :  { %v1203_v5 = vpop.xlane.xlu0 %1202 }
 0xadb   :  { %v1213_v45 = vrot.slane %v1203_v5, %v8601_v49  ;;  %v1301_v5 = vsel %vm1099_vm10, %v1293_v35, 0.0  ;;  %v7771_v37 = vpop.eup %7770 }
 0xadc   :  { %v1652_v39 = vadd.f32 1.0, %v7771_v37 }
 0xadd   :  { %v1232_v33 = vmul.f32 %v1213_v45, %v8707_v26  ;;  %v1233_v47 = vmul.f32 %v1213_v45, %v8712_v8  ;;  %v1294_v45 = vmul.f32 %v1288_v31, %v8712_v8 }
 0xade   :  { %7772 = vrcp.f32 %v1652_v39  ;;  %v11392_v39 = vmov 65  }
 0xadf   :  { %v1240_v0 = vsel %vm1099_vm10, %v1232_v33, 0.0  ;;  %v1243_v15 = vsel %vm1103_vm9, %v1233_v47, 0.0  ;;  %v1304_v53 = vsel %vm1103_vm9, %v1294_v45, 0.0 }
 0xae0   :  { %1241 = vadd.xlane.f32.xlu0 %v1240_v0 }
 0xae4   :  { %1244 = vadd.xlane.f32.xlu0 %v1243_v15 }
 0xae8   :  { %1296 = vadd.xlane.f32.xlu0 %v1295_v14  ;;  %v8810_v33 = vpop.eup %7772 }
 0xae9   :  { %v1661_v0 = vmul.f32 %v8810_v33, %v1659_v61 }
 0xaec   :  { %1302 = vadd.xlane.f32.xlu0 %v1301_v5 }
 0xaf0   :  { %1305 = vadd.xlane.f32.xlu0 %v1304_v53 }
 0xb06   :  { %1663 = vrot.lane.b32.xlu0 %v1661_v0, %s8184_s0 }
 0xb28   :  { %v1300_v31 = vpop.xlane.xlu1 %1299 }
 0xb5c   :  { %v1236_v26 = vpop.xlane.xlu0 %1235 }
 0xb5d   :  { %v1246_v29 = vmax.f32 %v1236_v26, 1e-20 }
 0xb60   :  { %v1239_v47 = vpop.xlane.xlu0 %1238 }
 0xb61   :  { %v1247_v16 = vmax.f32 %v1239_v47, 1e-20 }
 0xb63   :  { %7774 = vrcp.f32 %v1247_v16 }
 0xb64   :  { %7776 = vrcp.f32 %v1246_v29 }
 0xb6d   :  { %v1242_v8 = vpop.xlane.xlu0 %1241  ;;  %v7775_v1 = vpop.eup %7774 }
 0xb6e   :  { %v1248_v15 = vmax.f32 %v1242_v8, 1e-20  ;;  %v1253_v32 = vmul.f32 %v7775_v1, %v8744_v2  ;;  %v7777_v6 = vpop.eup %7776 }
 0xb6f   :  { %v1251_v45 = vmul.f32 %v7777_v6, %v8738_v50  ;;  %v11393_v50 = vmov 64  }
 0xb70   :  { %7778 = vrcp.f32 %v1248_v15  ;;  %v1308_v35 = vmul.f32 %v1300_v31, %v1253_v32 }
 0xb71   :  { %v1245_v14 = vpop.xlane.xlu0 %1244 }
 0xb72   :  { %v1249_v5 = vmax.f32 %v1245_v14, 1e-20  ;;  %1319 = vperm.xlu1 %7696, %v1308_v35   ;;  %v98_v14 = vld [vmem:[%s11293_s4 + $0x8] sm:$0xff]  ;;  %v97_v35 = vld [vmem:[%s11293_s4] sm:$0xff] }
 0xb74   :  { %7780 = vrcp.f32 %v1249_v5 }
 0xb75   :  { %v1297_v53 = vpop.xlane.xlu0 %1296 }
 0xb76   :  { %v1307_v37 = vmul.f32 %v1297_v53, %v1251_v45  ;;  %7700 = vset.pattern.permute.xlu1 %v11392_v39  ;;  %v100_v45 = vld [vmem:[%s11293_s4 + $0x18] sm:$0xff]  ;;  %v99_v53 = vld [vmem:[%s11293_s4 + $0x10] sm:$0xff] }
 0xb78   :  { %1316 = vperm.xlu0 %7698, %v1307_v37  }
 0xb79   :  { %v1303_v61 = vpop.xlane.xlu0 %1302 }
 0xb7a   :  { %v7779_v0 = vpop.eup %7778 }
 0xb7b   :  { %v1255_v26 = vmul.f32 %v7779_v0, %v8752_v36 }
 0xb7d   :  { %v1309_v2 = vmul.f32 %v1303_v61, %v1255_v26  ;;  %v1306_v47 = vpop.xlane.xlu0 %1305 }
 0xb7e   :  { %v7781_v16 = vpop.eup %7780 }
 0xb7f   :  { %v1257_v29 = vmul.f32 %v7781_v16, %v8755_v62  ;;  %1322 = vperm.xlu0 %7698, %v1309_v2  }
 0xb81   :  { %v1310_v8 = vmul.f32 %v1306_v47, %v1257_v29  ;;  %v1664_v1 = vpop.permute.xlu0 %1663 }
 0xb82   :  { %v1666_v15 = vadd.f32 %v1664_v1, %v8325_v27 }
 0xb83   :  { %1325 = vperm.xlu0 %7698, %v1310_v8  }
 0xb84   :  { %7782 = vtanh.f32 %v1666_v15 }
 0xb87   :  { %7699 = vset.pattern.permute.xlu0 %v11393_v50 }
 0xb8e   :  { %v7783_v32 = vpop.eup %7782 }
 0xb8f   :  { %1670 = vrot.lane.b32.xlu0 %v7783_v32, %s8183_s27 }
 0xbf1   :  { %v8822_v31 = vpop.permute.xlu1 %1319 }
 0xbf2   :  { %v1334_v6 = vrot.slane %v8822_v31, %v8623_v60 }
 0xbf7   :  { %v8824_v36 = vpop.permute.xlu0 %1316 }
 0xbf8   :  { %v1330_v62 = vrot.slane %v8824_v36, %v8601_v49 }
 0xbfa   :  { %v1335_v5 = vsel %vm958_vm5, %v1334_v6, %v1330_v62  ;;  %v104_v6 = vld [vmem:[%s11293_s4 + $0x38] sm:$0xff]  ;;  %v101_v62 = vld [vmem:[%s11293_s4 + $0x20] sm:$0xff] }
 0xbfb   :  { %v1360_v37 = vmul.f32 %v1335_v5, %v98_v14  ;;  %v1359_v61 = vmul.f32 %v1335_v5, %v97_v35  ;;  %v1362_v2 = vmul.f32 %v1335_v5, %v100_v45  ;;  %v1361_v47 = vmul.f32 %v1335_v5, %v99_v53  ;;  %v102_v35 = vld [vmem:[%s11293_s4 + $0x28] sm:$0xff] }
 0xbfd   :  { %v1371_v0 = vsel %vm1367_vm11, %v1360_v37, 0.0  ;;  %v1368_v26 = vsel %vm1367_vm11, %v1359_v61, 0.0  ;;  %v1377_v29 = vsel %vm1367_vm11, %v1362_v2, 0.0  ;;  %v1374_v8 = vsel %vm1367_vm11, %v1361_v47, 0.0 }
 0xbfe   :  { %v8845_v16 = vpop.permute.xlu0 %1322  ;;  %1372 = vadd.xlane.f32.xlu1 %v1371_v0  ;;  %1369 = vadd.xlane.f32.xlu0 %v1368_v26  ;;  %v103_v0 = vld [vmem:[%s11293_s4 + $0x30] sm:$0xff] }
 0xbff   :  { %v1339_v15 = vrot.slane %v8845_v16, %v8601_v49 }
 0xc02   :  { %v8849_v1 = vpop.permute.xlu0 %1325  ;;  %1378 = vadd.xlane.f32.xlu1 %v1377_v29  ;;  %1375 = vadd.xlane.f32.xlu0 %v1374_v8  ;;  %v1668_v8 = vsub.f32 1.0, %v8810_v33 }
 0xc03   :  { %v1343_v32 = vrot.slane %v8849_v1, %v8623_v60 }
 0xc05   :  { %v1344_v14 = vsel %vm958_vm5, %v1343_v32, %v1339_v15  ;;  %v1675_v15 = vrot.slane %v8354_v40, 6  ;;  %v8889_v40 = vld [vmem:[%s11280_s12 + $0x58] sm:$0xff]  }
 0xc06   :  { %v1366_v5 = vmul.f32 %v1344_v14, %v104_v6  ;;  %v1363_v45 = vmul.f32 %v1344_v14, %v101_v62  ;;  %v1364_v61 = vmul.f32 %v1344_v14, %v102_v35  ;;  %v1365_v2 = vmul.f32 %v1344_v14, %v103_v0  ;;  %v1671_v29 = vpop.permute.xlu0 %1670  ;;  %v8882_v14 = vld [vmem:[%s11280_s12 + $0x50] sm:$0xff]  }
 0xc07   :  { %v1673_v32 = vmul.f32 %v1671_v29, %v1668_v8  ;;  %v1677_v6 = vmul.f32 %v8810_v33, %v1675_v15  ;;  %7431 = vmatpush3.bf16.msra.mxu0 %v8882_v14  ;;  %v1476_v15 = vadd.s32 4294967272, %v8597_v48 }
 0xc08   :  { %v1389_v53 = vsel %vm1367_vm11, %v1366_v5, 0.0  ;;  %v1380_v37 = vsel %vm1367_vm11, %v1363_v45, 0.0  ;;  %v1383_v26 = vsel %vm1367_vm11, %v1364_v61, 0.0  ;;  %v1386_v47 = vsel %vm1367_vm11, %v1365_v2, 0.0 }
 0xc09   :  { %1390 = vadd.xlane.f32.xlu1 %v1389_v53  ;;  %1381 = vadd.xlane.f32.xlu0 %v1380_v37  ;;  %v8875_v62 = vadd.f32 %v1677_v6, %v1673_v32  ;;  %v11395_v45 = vmov 0.0   ;;  %v1469_v2 = vadd.s32 4294967280, %v8597_v48 }
 0xc0a   :  { %7432 = vmatprep.subr.bf16.mxu0 %v11395_v45  ;;  %118 = vst [vmem:[%s11294_s14 + $0x2] sm:$0x3] %v11395_v45  ;;  %117 = vst [vmem:[%s11294_s14] sm:$0x3] %v11395_v45 }
 0xc0b   :  { %11394 = vst [vmem:[#allocation29_spill] sm:$0xff] %v8875_v62  ;;  %v1679_v35 = vpack.c.bf16 %v8875_v62, %v8875_v62  ;;  %7433 = vmatpush3.bf16.msra.mxu0 %v8889_v40  ;;  %v8897_v6 = vsub.s32 %v1469_v2, %v8392_v17  ;;  %119 = vst [vmem:[%s11294_s14 + $0x4] sm:$0x3] %v11395_v45 }
 0xc0c   :  { %7446 = vmatprep.subr.bf16.mxu0 %v11395_v45  ;;  %120 = vst [vmem:[%s11294_s14 + $0x6] sm:$0x3] %v11395_v45  ;;  %121 = vst [vmem:[%s11294_s14 + $0x8] sm:$0x3] %v11395_v45 }
 0xc0d   :  { %1384 = vadd.xlane.f32.xlu0 %v1383_v26  ;;  %v1721_v5 = vrot.slane %v1679_v35, 1  ;;  %122 = vst [vmem:[%s11294_s14 + $0xa] sm:$0x3] %v11395_v45 }
 0xc11   :  { %1387 = vadd.xlane.f32.xlu0 %v1386_v47 }
 0xc27   :  { %1722 = vrot.lane.b32.xlu0 %v1721_v5, %s8183_s27 }
 0xc8b   :  { %v1370_v33 = vpop.xlane.xlu0 %1369  ;;  %v1373_v53 = vpop.xlane.xlu1 %1372 }
 0xc8c   :  { %v1392_v0 = vpack.c.bf16 %v1373_v53, %v1370_v33  ;;  %v8902_v53 = vsub.s32 %v1476_v15, %v8392_v17 }
 0xc8e   :  { %v1452_v29 = vunpack.c.l.b16 %v1392_v0  ;;  %v1453_v8 = vunpack.c.h.b16 %v1392_v0 }
 0xc8f   :  { %v1376_v37 = vpop.xlane.xlu0 %1375  ;;  %v1379_v61 = vpop.xlane.xlu1 %1378 }
 0xc90   :  { %v1393_v47 = vpack.c.bf16 %v1379_v61, %v1376_v37  ;;  %v1463_v50 = vrot.slane %v1452_v29, %v8601_v49  ;;  %v1467_v33 = vrot.slane %v1453_v8, %v8623_v60 }
 0xc92   :  { %v1454_v35 = vunpack.c.l.b16 %v1393_v47  ;;  %v1455_v37 = vunpack.c.h.b16 %v1393_v47  ;;  %v1468_v29 = vsel %vm958_vm5, %v1467_v33, %v1463_v50 }
 0xc94   :  { %v1473_v27 = vrot.slane %v1454_v35, %v8897_v6  ;;  %v1480_v8 = vrot.slane %v1455_v37, %v8902_v53 }
 0xc96   :  { %v1382_v26 = vpop.xlane.xlu0 %1381  ;;  %v1391_v61 = vpop.xlane.xlu1 %1390  ;;  %v1475_v47 = vsel %vm1474_vm12, %v1473_v27, %v1468_v29 }
 0xc97   :  { %v1482_v27 = vsel %vm11356_vm13, %v1480_v8, %v1475_v47 }
 0xc9a   :  { %v1385_v32 = vpop.xlane.xlu0 %1384 }
 0xc9b   :  { %v1394_v5 = vpack.c.bf16 %v1385_v32, %v1382_v26 }
 0xc9d   :  { %v1456_v62 = vunpack.c.l.b16 %v1394_v5  ;;  %v1457_v39 = vunpack.c.h.b16 %v1394_v5 }
 0xc9e   :  { %v1388_v0 = vpop.xlane.xlu0 %1387 }
 0xc9f   :  { %v1395_v9 = vpack.c.bf16 %v1391_v61, %v1388_v0  ;;  %v1486_v2 = vrot.slane %v1456_v62, %v8601_v49  ;;  %v1490_v26 = vrot.slane %v1457_v39, %v8623_v60  ;;  %v8014_v61 = vld [vmem:[%s11280_s12 + $0x68] sm:$0xff]   ;;  %v8015_v0 = vld [vmem:[%s11280_s12 + $0x30] sm:$0xff]  }
 0xca1   :  { %v1458_v32 = vunpack.c.l.b16 %v1395_v9  ;;  %v1459_v5 = vunpack.c.h.b16 %v1395_v9  ;;  %v1491_v39 = vsel %vm958_vm5, %v1490_v26, %v1486_v2  ;;  %v8013_v9 = vld [vmem:[%s11280_s12 + $0x60] sm:$0xff]   ;;  %v8016_v2 = vld [vmem:[%s11280_s12 + $0x38] sm:$0xff]  }
 0xca2   :  { %v8909_v11 = vpop.permute.xlu0 %1722  ;;  %v8017_v26 = vld [vmem:[%s11280_s12 + $0x40] sm:$0xff]  }
 0xca3   :  { %v1495_v15 = vrot.slane %v1458_v32, %v8897_v6  ;;  %v1500_v35 = vrot.slane %v1459_v5, %v8902_v53  ;;  %7459 = vmatmul.mubr.msk.bf16.vlgmr.msra.gmra.mrb[16].mxu1 %vm142_vm1, %v8909_v11  ;;  %v8018_v32 = vld [vmem:[%s11280_s12 + $0x48] sm:$0xff]  }
 0xca4   :  { %7471 = vmatpush3.bf16.msra.mxu1 %v8013_v9  ;;  %7474 = vmatprep.mubr.msk.bf16.mxu1 %vm8182_vm0, %v11395_v45 }
 0xca5   :  { %v1496_v50 = vsel %vm1474_vm12, %v1495_v15, %v1491_v39  ;;  %7472 = vmatprep.subr.bf16.mxu1 %v11395_v45 }
 0xca6   :  { %v1501_v62 = vsel %vm11356_vm13, %v1500_v35, %v1496_v50 }
 0xca7   :  { %v1502_v33 = vsel %vm571_vm3, %v1501_v62, %v1482_v27 }
 0xca8   :  { %v1503_v37 = vpack.c.b16 %v1502_v33, %v1502_v33  ;;  %7473 = vmatpush3.bf16.msra.mxu1 %v8014_v61 }
 0xca9   :  { %7486 = vmatprep.subr.bf16.mxu1 %v11395_v45 }
 0xcaa   :  { %7435 = vmatmul.mubr.msk.bf16.vlgmr.msra.gmra.mrb[12].mxu0 %vm142_vm1, %v1503_v37  ;;  %v8019_v37 = vld [vmem:[%s11283_s13 + $0x1] ss:$0 sm:$0xff] }
 0xcab   :  { %7447 = vmatpush3.bf16.msra.mxu0 %v8015_v0  ;;  %7450 = vmatprep.mubr.msk.bf16.mxu0 %vm8182_vm0, %v11395_v45 }
 0xcac   :  { %7448 = vmatprep.subr.bf16.mxu0 %v11395_v45 }
 0xcaf   :  { %7449 = vmatpush3.bf16.msra.mxu0 %v8016_v2 }
 0xcb0   :  { %7462 = vmatprep.subr.bf16.mxu0 %v11395_v45 }
 0xcb2   :  { %7451 = vmatmul.mubr.msk.bf16.vlgmr.msra.gmra.mrb[16].mxu0 %vm142_vm1, %v8413_v28 }
 0xcb3   :  { %7463 = vmatpush3.bf16.msra.mxu0 %v8017_v26  ;;  %7466 = vmatprep.mubr.msk.bf16.mxu0 %vm8182_vm0, %v11395_v45 }
 0xcb4   :  { %7464 = vmatprep.subr.bf16.mxu0 %v11395_v45 }
 0xcb7   :  { %7465 = vmatpush3.bf16.msra.mxu0 %v8018_v32 }
 0xcb8   :  { %7478 = vmatprep.subr.bf16.mxu0 %v11395_v45 }
 0xd76   :  { %v1761_v5 = vpop.f32.mrb[16].mxu1 }
 0xd77   :  { %v7460_v29 = vpop.f32.mrb[17].mxu1 }
 0xd78   :  { %v1764_v28 = vpop.f32.mrb[18].mxu1 }
 0xd79   :  { %v7461_v8 = vpop.f32.mrb[19].mxu1 }
 0xd7d   :  { %v1553_v47 = vpop.f32.mrb[12].mxu0 }
 0xd7e   :  { %v8955_v15 = vadd.f32 %v1553_v47, %v8443_v34  ;;  %v7436_v35 = vpop.f32.mrb[13].mxu0 }
 0xd7f   :  { %v1556_v39 = vpop.f32.mrb[14].mxu0 }
 0xd80   :  { %v7437_v9 = vpop.f32.mrb[15].mxu0 }
 0xd85   :  { %v1714_v50 = vpop.f32.mrb[16].mxu0 }
 0xd86   :  { %v1762_v27 = vadd.f32 %v1761_v5, %v1714_v50  ;;  %v7452_v62 = vpop.f32.mrb[17].mxu0 }
 0xd87   :  { %v1717_v33 = vpop.f32.mrb[18].mxu0 }
 0xd88   :  { %v1767_v61 = vadd.f32 %v8019_v37, %v1762_v27  ;;  %v7453_v0 = vpop.f32.mrb[19].mxu0  ;;  %v8021_v37 = vld [vmem:[%s11280_s12 + $0x18] sm:$0xff]  }
 0xd8a   :  { %1775 = vrot.lane.b32.xlu1 %v1767_v61, %s8185_s1  ;;  %v7215_v2 = vmul.f32 -1.442695, %v1767_v61 }
 0xd8c   :  { %7784 = vpow2.f32 %v7215_v2 }
 0xd96   :  { %v7785_v26 = vpop.eup %7784 }
 0xd97   :  { %v1771_v34 = vadd.f32 1.0, %v7785_v26 }
 0xd99   :  { %7786 = vrcp.f32 %v1771_v34 }
 0xda3   :  { %v7787_v32 = vpop.eup %7786 }
 0xda4   :  { %v1785_v35 = vsub.f32 1.0, %v7787_v32  ;;  %v1791_v9 = vmul.f32 %v7787_v32, %v8387_v13  ;;  %v8020_v13 = vld [vmem:[%s11280_s12 + $0x10] sm:$0xff]  }
 0xdfc   :  { %v1776_v29 = vpop.permute.xlu1 %1775 }
 0xdfd   :  { %v1778_v28 = vmul.f32 %v7787_v32, %v1776_v29 }
 0xdff   :  { %1780 = vrot.lane.b32.xlu1 %v1778_v28, %s8184_s0 }
 0xe71   :  { %v1781_v5 = vpop.permute.xlu1 %1780 }
 0xe72   :  { %v1783_v8 = vadd.f32 %v1781_v5, %v1767_v61  ;;  %v8023_v61 = vld [vmem:[%s11280_s12 + $0x28] sm:$0xff]  }
 0xe74   :  { %7788 = vtanh.f32 %v1783_v8 }
 0xe7e   :  { %v7789_v47 = vpop.eup %7788 }
 0xe7f   :  { %1787 = vrot.lane.b32.xlu1 %v7789_v47, %s8183_s27 }
 0xef1   :  { %v1788_v39 = vpop.permute.xlu1 %1787 }
 0xef2   :  { %v1790_v50 = vmul.f32 %v1788_v39, %v1785_v35 }
 0xef4   :  { %v8964_v27 = vadd.f32 %v1791_v9, %v1790_v50 }
 0xef6   :  { %v1793_v62 = vpack.c.bf16 %v8964_v27, %v8964_v27 }
 0xef8   :  { %1795 = vrot.lane.b32.xlu0 %v1793_v62, %s8183_s27 }
 0xf6a   :  { %v8969_v33 = vpop.permute.xlu0 %1795 }
 0xf6b   :  { %7467 = vmatmul.mubr.msk.bf16.vlgmr.msra.gmra.mrb[20].mxu0 %vm142_vm1, %v8969_v33  ;;  %7475 = vmatmul.mubr.msk.bf16.vlgmr.msra.gmra.mrb[20].mxu1 %vm142_vm1, %v8969_v33 }
 0xf6c   :  { %7487 = vmatpush3.bf16.msra.mxu1 %v8020_v13  ;;  %7490 = vmatprep.mubr.msk.bf16.mxu1 %vm8182_vm0, %v11395_v45 }
 0xf6d   :  { %7488 = vmatprep.subr.bf16.mxu1 %v11395_v45  ;;  %7479 = vmatpush3.bf16.msra.mxu0 %v8882_v14  ;;  %v8022_v14 = vld [vmem:[%s11280_s12 + $0x20] sm:$0xff]  }
 0xf6e   :  { %7480 = vmatprep.subr.bf16.mxu0 %v11395_v45  ;;  %7482 = vmatprep.mubr.msk.bf16.mxu0 %vm8182_vm0, %v11395_v45 }
 0xf70   :  { %7489 = vmatpush3.bf16.msra.mxu1 %v8021_v37 }
 0xf71   :  { %7502 = vmatprep.subr.bf16.mxu1 %v11395_v45  ;;  %7481 = vmatpush3.bf16.msra.mxu0 %v8889_v40 }
 0xf72   :  { %7494 = vmatprep.subr.bf16.mxu0 %v11395_v45 }
 0xf73   :  { %7491 = vmatmul.mubr.msk.bf16.vlgmr.msra.gmra.mrb[24].mxu1 %vm142_vm1, %v8909_v11 }
 0xf74   :  { %7503 = vmatpush3.bf16.msra.mxu1 %v8022_v14  ;;  %7506 = vmatprep.mubr.msk.bf16.mxu1 %vm8182_vm0, %v11395_v45 }
 0xf75   :  { %7504 = vmatprep.subr.bf16.mxu1 %v11395_v45 }
 0xf78   :  { %7505 = vmatpush3.bf16.msra.mxu1 %v8023_v61  ;;  %v8024_v61 = vld [vmem:[%s11287_s2 + $0x4] sm:$0xf] }
 0xf79   :  { %7518 = vmatprep.subr.bf16.mxu1 %v11395_v45 }
0x103e   :  { %v9003_v40 = vpop.f32.mrb[20].mxu0  ;;  %v9005_v11 = vpop.f32.mrb[20].mxu1 }
0x103f   :  { %v1847_v0 = vrot.slane %v9003_v40, %v8436_v4  ;;  %v7468_v2 = vpop.f32.mrb[21].mxu0  ;;  %v7476_v26 = vpop.f32.mrb[21].mxu1 }
0x1040   :  { %v1837_v34 = vpop.f32.mrb[22].mxu0  ;;  %v2588_v32 = vpop.f32.mrb[22].mxu1  ;;  %v8025_v2 = vld [vmem:[%s11287_s2] sm:$0xf] }
0x1041   :  { %v1848_v29 = vcombine.high %v1847_v0, %v1847_v0  ;;  %v1855_v28 = vrot.slane %v1847_v0, %v8436_v4  ;;  %v7469_v5 = vpop.f32.mrb[23].mxu0  ;;  %v7477_v8 = vpop.f32.mrb[23].mxu1 }
0x1042   :  { %v8027_v8 = vld [vmem:[%s11288_s3 + $0x8] sm:$0xf] }
0x1043   :  { %v1866_v47 = vrot.slane %v1855_v28, %v8403_v21  ;;  %v1862_v35 = vrot.slane %v1848_v29, %v8436_v4  ;;  %v8026_v28 = vld [vmem:[%s11288_s3] sm:$0xff] }
0x1045   :  { %2037 = vrot.lane.b32.xlu1 %v1866_v47, %s8183_s27  ;;  %v1870_v39 = vrot.slane %v1862_v35, %v8403_v21  ;;  %v1873_v26 = vmul.f32 %v8025_v2, %v1866_v47 }
0x1046   :  { %v9014_v9 = vpop.f32.mrb[24].mxu1 }
0x1047   :  { %v2767_v50 = vrot.slane %v9014_v9, 4  ;;  %v7492_v62 = vpop.f32.mrb[25].mxu1  ;;  %2039 = vrot.lane.b32.xlu0 %v1870_v39, %s8183_s27  ;;  %v1874_v0 = vmul.f32 %v8024_v61, %v1870_v39  ;;  %v1875_v32 = vsel %vm11355_vm2, %v1873_v26, 0.0 }
0x1048   :  { %v2763_v13 = vpop.f32.mrb[26].mxu1 }
0x1049   :  { %v9019_v37 = vadd.f32 %v2767_v50, %v8315_v10  ;;  %v7493_v14 = vpop.f32.mrb[27].mxu1  ;;  %v1878_v34 = vsel %vm11355_vm2, %v1874_v0, 0.0  ;;  %v8028_v50 = vld [vmem:[%s11288_s3 + $0x10] sm:$0xff] }
0x104a   :  { %v8029_v14 = vld [vmem:[%s11288_s3 + $0x18] sm:$0xf] }
0x1066   :  { %1879 = vadd.xlane.f32.xlu0 %v1878_v34 }
0x1069   :  { %1876 = vadd.xlane.f32.xlu1 %v1875_v32 }
0x107c   :  { %1882 = vperm.xlu0 %7699, %v9003_v40  }
0x1080   :  { %7702 = vset.pattern.permute.xlu0 %v11388_v3 }
0x10b7   :  { %v2038_v29 = vpop.permute.xlu1 %2037 }
0x10b8   :  { %v2043_v5 = vmul.f32 %v8026_v28, %v2038_v29  ;;  %v2044_v47 = vmul.f32 %v8027_v8, %v2038_v29 }
0x10b9   :  { %v2040_v39 = vpop.permute.xlu0 %2039 }
0x10ba   :  { %v2047_v35 = vsel %vm142_vm1, %v2043_v5, 0.0  ;;  %v2045_v62 = vmul.f32 %v8028_v50, %v2040_v39  ;;  %v2050_v13 = vsel %vm11355_vm2, %v2044_v47, 0.0  ;;  %v2046_v61 = vmul.f32 %v8029_v14, %v2040_v39 }
0x10bb   :  { %2048 = vadd.xlane.f32.xlu1 %v2047_v35 }
0x10bc   :  { %v2053_v0 = vsel %vm142_vm1, %v2045_v62, 0.0  ;;  %v2056_v2 = vsel %vm11355_vm2, %v2046_v61, 0.0 }
0x10bf   :  { %2051 = vadd.xlane.f32.xlu1 %v2050_v13 }
0x10c3   :  { %2054 = vadd.xlane.f32.xlu1 %v2053_v0 }
0x10c7   :  { %2057 = vadd.xlane.f32.xlu1 %v2056_v2 }
0x10d8   :  { %2060 = vperm.xlu1 %7700, %v9003_v40  }
0x10dc   :  { %7701 = vset.pattern.permute.xlu1 %v11388_v3 }
0x10f3   :  { %v1880_v26 = vpop.xlane.xlu0 %1879 }
0x10f6   :  { %v1877_v28 = vpop.xlane.xlu1 %1876 }
0x10fb   :  { %v1883_v34 = vpop.permute.xlu0 %1882 }
0x10fc   :  { %v1887_v32 = vrot.slane %v1883_v34, %v8403_v21  ;;  %v1891_v29 = vrot.slane %v1883_v34, %v8407_v22 }
0x10fe   :  { %v1894_v5 = vadd.f32 %v1887_v32, %v1877_v28  ;;  %v1895_v8 = vadd.f32 %v1891_v29, %v1880_v26 }
0x1100   :  { %v9052_v47 = vadd.f32 %v1894_v5, %v8480_v18  ;;  %v9056_v35 = vadd.f32 %v1895_v8, %v8482_v19 }
0x1102   :  { %1901 = vperm.xlu1 %7701, %v9052_v47  }
0x1106   :  { %1904 = vperm.xlu1 %7701, %v9056_v35  }
0x1148   :  { %v2049_v39 = vpop.xlane.xlu1 %2048 }
0x114c   :  { %v2052_v50 = vpop.xlane.xlu1 %2051 }
0x1150   :  { %v2055_v62 = vpop.xlane.xlu1 %2054 }
0x1154   :  { %v2058_v13 = vpop.xlane.xlu1 %2057 }
0x1158   :  { %v2061_v14 = vpop.permute.xlu1 %2060 }
0x1159   :  { %v2065_v61 = vrot.slane %v2061_v14, %v8403_v21  ;;  %v2069_v28 = vrot.slane %v2061_v14, %v8407_v22 }
0x115b   :  { %v2072_v0 = vadd.f32 %v2065_v61, %v2049_v39  ;;  %v2073_v2 = vadd.f32 %v2065_v61, %v2052_v50  ;;  %v2074_v39 = vadd.f32 %v2069_v28, %v2055_v62  ;;  %v2075_v50 = vadd.f32 %v2069_v28, %v2058_v13 }
0x115d   :  { %v9061_v26 = vadd.f32 %v2072_v0, %v8486_v23  ;;  %v9064_v34 = vadd.f32 %v2073_v2, %v8484_v20  ;;  %v9080_v14 = vadd.f32 %v2074_v39, %v8490_v25  ;;  %v9083_v2 = vadd.f32 %v2075_v50, %v8488_v24 }
0x115f   :  { %v2080_v32 = vadd.f32 %v9061_v26, %v8516_v51  ;;  %v2081_v29 = vadd.f32 %v9064_v34, %v8495_v30  ;;  %v2083_v5 = vadd.f32 %v9064_v34, %v8501_v38  ;;  %v2082_v8 = vadd.f32 %v9061_v26, %v8518_v52 }
0x1160   :  { %v2085_v61 = vadd.f32 %v9064_v34, %v8526_v57  ;;  %v2084_v0 = vadd.f32 %v9061_v26, %v8524_v56  ;;  %v2086_v62 = vadd.f32 %v9061_v26, %v8561_v46  ;;  %v2089_v13 = vadd.f32 %v9083_v2, %v8504_v41 }
0x1161   :  { %2113 = vperm.xlu0 %7702, %v2080_v32   ;;  %2116 = vperm.xlu1 %7701, %v2081_v29   ;;  %v2087_v32 = vadd.f32 %v9064_v34, %v8533_v63  ;;  %v2088_v29 = vadd.f32 %v9080_v14, %v8520_v54  ;;  %v2091_v28 = vadd.f32 %v9083_v2, %v8506_v42 }
0x1162   :  { %v2092_v39 = vadd.f32 %v9080_v14, %v8528_v58  ;;  %v2095_v50 = vadd.f32 %v9083_v2, %v8592_v44 }
0x1165   :  { %2122 = vperm.xlu0 %7702, %v2083_v5   ;;  %2119 = vperm.xlu1 %7701, %v2082_v8   ;;  %v2090_v5 = vadd.f32 %v9080_v14, %v8522_v55  ;;  %v2093_v8 = vadd.f32 %v9083_v2, %v8530_v59 }
0x1169   :  { %2128 = vperm.xlu0 %7702, %v2085_v61   ;;  %2125 = vperm.xlu1 %7701, %v2084_v0   ;;  %v11396_v61 = vld [vmem:[#allocation22_spill] sm:$0xff] }
0x116a   :  { %v2094_v0 = vadd.f32 %v9080_v14, %v11396_v61 }
0x116d   :  { %2134 = vperm.xlu0 %7702, %v2087_v32   ;;  %2131 = vperm.xlu1 %7701, %v2086_v62  }
0x1171   :  { %2140 = vperm.xlu0 %7702, %v2089_v13   ;;  %2137 = vperm.xlu1 %7701, %v2088_v29  }
0x1175   :  { %2146 = vperm.xlu0 %7702, %v2091_v28   ;;  %2143 = vperm.xlu1 %7701, %v2090_v5  }
0x1179   :  { %2152 = vperm.xlu0 %7702, %v2093_v8   ;;  %2149 = vperm.xlu1 %7701, %v2092_v39   ;;  %v9112_v8 = vld [vmem:[%s11283_s13 + $0x2] ss:$0 sm:$0xff] }
0x117a   :  { %v1559_v39 = vadd.f32 %v9112_v8, %v8955_v15 }
0x117d   :  { %2158 = vperm.xlu0 %7702, %v2095_v50   ;;  %2155 = vperm.xlu1 %7701, %v2094_v0   ;;  %v1561_v50 = vsel %vm1560_vm14, %v1559_v39, -inf }
0x1181   :  { %v1902_v32 = vpop.permute.xlu1 %1901 }
0x1182   :  { %v1909_v29 = vrot.slane %v1902_v32, %v8601_v49 }
0x1185   :  { %v1905_v62 = vpop.permute.xlu1 %1904 }
0x1186   :  { %v1913_v13 = vrot.slane %v1905_v62, %v8601_v49 }
0x1188   :  { %v1914_v28 = vsel %vm571_vm3, %v1913_v13, %v1909_v29 }
0x1189   :  { %v1916_v5 = vsel %vm574_vm4, %v1914_v28, -inf }
0x119c   :  { %1917 = vmax.xlane.f32.xlu0 %v1916_v5 }
0x11a1   :  { %1562 = vmax.xlane.f32.xlu1 %v1561_v50 }
0x11e0   :  { %v2117_v0 = vpop.permute.xlu1 %2116  ;;  %v2114_v62 = vpop.permute.xlu0 %2113 }
0x11e1   :  { %v2167_v59 = vrot.slane %v2117_v0, %v8623_v60  ;;  %v2163_v58 = vrot.slane %v2114_v62, %v8601_v49 }
0x11e4   :  { %v2120_v32 = vpop.permute.xlu1 %2119  ;;  %v2123_v44 = vpop.permute.xlu0 %2122 }
0x11e5   :  { %v2172_v13 = vrot.slane %v2120_v32, %v8601_v49  ;;  %v2176_v29 = vrot.slane %v2123_v44, %v8623_v60  ;;  %v2168_v32 = vsel %vm958_vm5, %v2167_v59, %v2163_v58 }
0x11e7   :  { %v2177_v50 = vsel %vm958_vm5, %v2176_v29, %v2172_v13 }
0x11e8   :  { %v2126_v28 = vpop.permute.xlu1 %2125  ;;  %v2129_v61 = vpop.permute.xlu0 %2128  ;;  %v2232_v0 = vsel %vm571_vm3, %v2177_v50, %v2168_v32 }
0x11e9   :  { %v2181_v15 = vrot.slane %v2126_v28, %v8601_v49  ;;  %v2185_v5 = vrot.slane %v2129_v61, %v8623_v60 }
0x11eb   :  { %v2186_v42 = vsel %vm958_vm5, %v2185_v5, %v2181_v15 }
0x11ec   :  { %v2132_v55 = vpop.permute.xlu1 %2131  ;;  %v2135_v41 = vpop.permute.xlu0 %2134  ;;  %v2233_v28 = vsel %vm1024_vm6, %v2186_v42, %v2232_v0 }
0x11ed   :  { %v2190_v44 = vrot.slane %v2132_v55, %v8601_v49  ;;  %v2194_v54 = vrot.slane %v2135_v41, %v8623_v60 }
0x11ef   :  { %v2195_v62 = vsel %vm958_vm5, %v2194_v54, %v2190_v44 }
0x11f0   :  { %v2138_v63 = vpop.permute.xlu1 %2137  ;;  %v2141_v61 = vpop.permute.xlu0 %2140  ;;  %v2234_v13 = vsel %vm11337_vm7, %v2195_v62, %v2233_v28 }
0x11f1   :  { %v2240_v29 = vsel %vm1033_vm8, %v2234_v13, -inf  ;;  %v2199_v50 = vrot.slane %v2138_v63, %v8601_v49  ;;  %v2203_v54 = vrot.slane %v2141_v61, %v8623_v60 }
0x11f2   :  { %2241 = vmax.xlane.f32.xlu0 %v2240_v29 }
0x11f3   :  { %v2204_v13 = vsel %vm958_vm5, %v2203_v54, %v2199_v50 }
0x11f4   :  { %v2144_v15 = vpop.permute.xlu1 %2143  ;;  %v2147_v5 = vpop.permute.xlu0 %2146 }
0x11f5   :  { %v2208_v58 = vrot.slane %v2144_v15, %v8601_v49  ;;  %v2212_v55 = vrot.slane %v2147_v5, %v8623_v60 }
0x11f7   :  { %v2213_v44 = vsel %vm958_vm5, %v2212_v55, %v2208_v58 }
0x11f8   :  { %v2150_v41 = vpop.permute.xlu1 %2149  ;;  %v2153_v59 = vpop.permute.xlu0 %2152  ;;  %v2235_v63 = vsel %vm571_vm3, %v2213_v44, %v2204_v13 }
0x11f9   :  { %v2217_v42 = vrot.slane %v2150_v41, %v8601_v49  ;;  %v2221_v32 = vrot.slane %v2153_v59, %v8623_v60 }
0x11fb   :  { %v2222_v0 = vsel %vm958_vm5, %v2221_v32, %v2217_v42 }
0x11fc   :  { %v2156_v62 = vpop.permute.xlu1 %2155  ;;  %v2159_v28 = vpop.permute.xlu0 %2158  ;;  %v2236_v5 = vsel %vm1024_vm6, %v2222_v0, %v2235_v63 }
0x11fd   :  { %v2226_v29 = vrot.slane %v2156_v62, %v8601_v49  ;;  %v2230_v15 = vrot.slane %v2159_v28, %v8623_v60 }
0x11ff   :  { %v2231_v61 = vsel %vm958_vm5, %v2230_v15, %v2226_v29 }
0x1200   :  { %v2237_v41 = vsel %vm11337_vm7, %v2231_v61, %v2236_v5  ;;  %v1980_v5 = vrot.slane %v8315_v10, 2  ;;  %vm1597_vm7 = vcmask 353536  }
0x1201   :  { %v2243_v58 = vsel %vm1033_vm8, %v2237_v41, -inf }
0x1202   :  { %2244 = vmax.xlane.f32.xlu1 %v2243_v58 }
0x1213   :  { %1972 = vrot.lane.b32.xlu1 %v9112_v8, %s8183_s27 }
0x1229   :  { %v1918_v55 = vpop.xlane.xlu0 %1917 }
0x122a   :  { %v1927_v59 = vrot.slane %v1918_v55, %v8407_v22  ;;  %v1923_v28 = vrot.slane %v1918_v55, %v8403_v21  ;;  %v1579_v55 = vadd.s32 4294967256, %v8597_v48 }
0x122c   :  { %v1931_v50 = vsub.f32 %v9056_v35, %v1927_v59  ;;  %v1930_v29 = vsub.f32 %v9052_v47, %v1923_v28  ;;  %v1574_v59 = vadd.s32 4294967264, %v8597_v48 }
0x122e   :  { %v1934_v54 = vmul.f32 1.442695, %v1931_v50  ;;  %v1563_v42 = vpop.xlane.xlu1 %1562  ;;  %v1932_v15 = vmul.f32 1.442695, %v1930_v29 }
0x122f   :  { %v1564_v32 = vsub.f32 %v1559_v39, %v1563_v42  ;;  %v9200_v42 = vsub.s32 %v1574_v59, %v8392_v17 }
0x1230   :  { %7790 = vpow2.f32 %v1934_v54  ;;  %v9197_v54 = vsub.s32 %v1579_v55, %v8392_v17 }
0x1231   :  { %v1565_v44 = vmul.f32 1.442695, %v1564_v32  ;;  %v1578_v29 = vrot.slane %v8824_v36, %v9200_v42  ;;  %v1589_v48 = vrot.slane %v8845_v16, %v9200_v42 }
0x1233   :  { %7792 = vpow2.f32 %v1565_v44 }
0x1234   :  { %7794 = vpow2.f32 %v1932_v15 }
0x123a   :  { %v9153_v0 = vpop.eup %7790 }
0x123b   :  { %1942 = vperm.xlu1 %7701, %v9153_v0  }
0x123d   :  { %v7793_v62 = vpop.eup %7792 }
0x123e   :  { %v1567_v13 = vsel %vm1560_vm14, %v7793_v62, 0.0  ;;  %v9159_v35 = vpop.eup %7794  ;;  %v1593_v62 = vrot.slane %v8849_v1, %v9197_v54  ;;  %v1583_v1 = vrot.slane %v8822_v31, %v9197_v54 }
0x123f   :  { %1568 = vadd.xlane.f32.xlu0 %v1567_v13 }
0x1255   :  { %1939 = vperm.xlu0 %7702, %v9159_v35  }
0x127f   :  { %v2242_v47 = vpop.xlane.xlu0 %2241 }
0x1280   :  { %v2246_v39 = vmul.f32 %v2242_v47, %v8669_v12 }
0x1282   :  { %2251 = vperm.xlu1 %7701, %v2246_v39   ;;  %v1594_v39 = vsel %vm1584_vm15, %v1593_v62, %v1589_v48 }
0x128f   :  { %v2245_v63 = vpop.xlane.xlu1 %2244 }
0x1290   :  { %v2247_v61 = vmul.f32 %v2245_v63, %v8672_v7 }
0x1292   :  { %2254 = vperm.xlu0 %7702, %v2247_v61   ;;  %v1585_v61 = vsel %vm1584_vm15, %v1583_v1, %v1578_v29  ;;  %v9254_v29 = vld [vmem:[%s11291_s5 + $0x10] sm:$0xff] }
0x1293   :  { %v9192_v41 = vpop.permute.xlu1 %1972  ;;  %v1595_v36 = vsel %vm571_vm3, %v1594_v39, %v1585_v61 }
0x1296   :  { %1981 = vrot.lane.b32.xlu0 %v1980_v5, %s8185_s1 }
0x129a   :  { %1989 = vrot.lane.b32.xlu0 %v9112_v8, %s8184_s0 }
0x12ba   :  { %v1943_v50 = vpop.permute.xlu1 %1942 }
0x12bb   :  { %v1951_v8 = vrot.slane %v1943_v50, %v8601_v49  ;;  %v9240_v50 = vld [vmem:[%s11291_s5] sm:$0xff] }
0x12cc   :  { %v1569_v58 = vpop.xlane.xlu0 %1568 }
0x12cd   :  { %7796 = vlog2.f32 %v1569_v58  ;;  %v9233_v58 = vld [vmem:[%s11291_s5 + $0x8] sm:$0xf] }
0x12d4   :  { %v1940_v44 = vpop.permute.xlu0 %1939 }
0x12d5   :  { %v1947_v28 = vrot.slane %v1940_v44, %v8601_v49 }
0x12d7   :  { %v7797_v13 = vpop.eup %7796  ;;  %v1952_v15 = vsel %vm571_vm3, %v1951_v8, %v1947_v28  ;;  %v9248_v28 = vld [vmem:[%s11291_s5 + $0x18] sm:$0xf] }
0x12d8   :  { %v1571_v17 = vmul.f32 0.6931472, %v7797_v13  ;;  %v1954_v47 = vsel %vm574_vm4, %v1952_v15, 0.0 }
0x12d9   :  { %1955 = vadd.xlane.f32.xlu0 %v1954_v47 }
0x12da   :  { %v1572_v63 = vsub.f32 %v1564_v32, %v1571_v17 }
0x12dc   :  { %v1975_v16 = vmul.f32 %v9192_v41, %v1572_v63  ;;  %1573 = vst.msk [vmem:[%s11294_s14] sm:$0x3] %vm1560_vm14, %v1572_v63 }
0x12dd   :  { %1598 = vst.msk [vmem:[%s11294_s14] sm:$0x3] %vm1597_vm7, %v1595_v36 }
0x12de   :  { %v1976_v31 = vsel %vm1560_vm14, %v1975_v16, 0.0 }
0x12df   :  { %1977 = vadd.xlane.f32.xlu1 %v1976_v31 }
0x12f0   :  { %1985 = vrot.lane.b32.xlu1 %v9003_v40, %s8192_s30 }
0x1301   :  { %v2252_v32 = vpop.permute.xlu1 %2251 }
0x1302   :  { %v2259_v5 = vrot.slane %v2252_v32, %v8601_v49 }
0x1304   :  { %v2281_v55 = vmul.f32 %v9233_v58, %v2259_v5  ;;  %v2280_v40 = vmul.f32 %v9240_v50, %v2259_v5 }
0x1306   :  { %v2287_v59 = vsel %vm1103_vm9, %v2281_v55, 0.0  ;;  %v2284_v8 = vsel %vm1099_vm10, %v2280_v40, 0.0 }
0x1307   :  { %2288 = vadd.xlane.f32.xlu0 %v2287_v59 }
0x1311   :  { %v2255_v44 = vpop.permute.xlu0 %2254 }
0x1312   :  { %v2263_v62 = vrot.slane %v2255_v44, %v8601_v49 }
0x1314   :  { %2285 = vadd.xlane.f32.xlu1 %v2284_v8  ;;  %v2283_v13 = vmul.f32 %v9248_v28, %v2263_v62  ;;  %v2282_v48 = vmul.f32 %v9254_v29, %v2263_v62 }
0x1315   :  { %v1982_v47 = vpop.permute.xlu0 %1981 }
0x1316   :  { %v2293_v15 = vsel %vm1103_vm9, %v2283_v13, 0.0  ;;  %v2290_v17 = vsel %vm1099_vm10, %v2282_v48, 0.0 }
0x1317   :  { %2294 = vadd.xlane.f32.xlu0 %v2293_v15 }
0x1318   :  { %2291 = vadd.xlane.f32.xlu1 %v2290_v17 }
0x1319   :  { %v9259_v1 = vpop.permute.xlu0 %1989 }
0x131a   :  { %11397 = vst [vmem:[#allocation30_spill] sm:$0xff] %v9259_v1 }
0x1366   :  { %v1956_v39 = vpop.xlane.xlu0 %1955 }
0x1367   :  { %v1965_v63 = vrot.slane %v1956_v39, %v8407_v22  ;;  %v1961_v62 = vrot.slane %v1956_v39, %v8403_v21 }
0x1369   :  { %7798 = vrcp.f32 %v1965_v63 }
0x136c   :  { %v1978_v61 = vpop.xlane.xlu1 %1977 }
0x136d   :  { %v1984_v36 = vadd.f32 %v1982_v47, %v1978_v61 }
0x1370   :  { %v1986_v16 = vpop.permute.xlu1 %1985 }
0x1371   :  { %v1988_v31 = vadd.f32 %v1986_v16, %v1984_v36 }
0x1373   :  { %v1992_v32 = vadd.f32 %v9259_v1, %v1988_v31  ;;  %v7799_v5 = vpop.eup %7798 }
0x1374   :  { %v1971_v59 = vmul.f32 %v7799_v5, %v9153_v0 }
0x1375   :  { %v7217_v55 = vmul.f32 -1.442695, %v1992_v32 }
0x1376   :  { %2011 = vperm.xlu0 %7702, %v1971_v59  }
0x1377   :  { %7800 = vpow2.f32 %v7217_v55 }
0x1381   :  { %v7801_v40 = vpop.eup %7800 }
0x1382   :  { %v1996_v44 = vadd.f32 1.0, %v7801_v40 }
0x1384   :  { %7802 = vrcp.f32 %v1996_v44 }
0x1385   :  { %7804 = vrcp.f32 %v1961_v62 }
0x138e   :  { %v7803_v8 = vpop.eup %7802 }
0x138f   :  { %v1999_v13 = vsub.f32 1.0, %v7803_v8  ;;  %v7805_v48 = vpop.eup %7804 }
0x1390   :  { %v1969_v63 = vmul.f32 %v7805_v48, %v9159_v35 }
0x1391   :  { %2002 = vperm.xlu1 %7701, %v1999_v13   ;;  %v11400_v13 = vld [vmem:[#allocation26_spill] sm:$0xff] }
0x1394   :  { %v2289_v15 = vpop.xlane.xlu0 %2288 }
0x1395   :  { %v2297_v17 = vsub.f32 %v9064_v34, %v2289_v15  ;;  %2026 = vperm.xlu1 %7701, %v7803_v8   ;;  %v11399_v8 = vld [vmem:[#allocation27_spill] sm:$0xff] }
0x1397   :  { %v2302_v47 = vmul.f32 1.442695, %v2297_v17 }
0x1399   :  { %7806 = vpow2.f32 %v2302_v47  ;;  %2008 = vperm.xlu1 %7701, %v1969_v63  }
0x13a1   :  { %v2286_v0 = vpop.xlane.xlu1 %2285 }
0x13a2   :  { %v2296_v61 = vsub.f32 %v9061_v26, %v2286_v0  ;;  %v11398_v26 = vld [vmem:[#allocation25_spill] sm:$0xff] }
0x13a3   :  { %v7807_v36 = vpop.eup %7806 }
0x13a4   :  { %v2300_v16 = vmul.f32 1.442695, %v2296_v61  ;;  %v2295_v39 = vpop.xlane.xlu0 %2294  ;;  %v9269_v31 = vmul.f32 %v7807_v36, %v8733_v43  ;;  %v11401_v36 = vld [vmem:[#allocation28_spill] sm:$0xff] }
0x13a5   :  { %v2299_v32 = vsub.f32 %v9083_v2, %v2295_v39  ;;  %v2292_v5 = vpop.xlane.xlu1 %2291 }
0x13a6   :  { %7808 = vpow2.f32 %v2300_v16  ;;  %v2298_v34 = vsub.f32 %v9080_v14, %v2292_v5  ;;  %2320 = vperm.xlu1 %7701, %v9269_v31  }
0x13a7   :  { %v2306_v35 = vmul.f32 1.442695, %v2299_v32 }
0x13a8   :  { %v2304_v55 = vmul.f32 1.442695, %v2298_v34 }
0x13a9   :  { %7810 = vpow2.f32 %v2306_v35 }
0x13aa   :  { %7812 = vpow2.f32 %v2304_v55 }
0x13b0   :  { %v7809_v59 = vpop.eup %7808 }
0x13b1   :  { %v9275_v40 = vmul.f32 %v7809_v59, %v11398_v26 }
0x13b3   :  { %v7811_v44 = vpop.eup %7810  ;;  %2317 = vperm.xlu0 %7702, %v9275_v40  }
0x13b4   :  { %v7813_v62 = vpop.eup %7812  ;;  %v9279_v2 = vmul.f32 %v7811_v44, %v11399_v8 }
0x13b5   :  { %v9282_v48 = vmul.f32 %v7813_v62, %v11400_v13 }
0x13b6   :  { %2326 = vperm.xlu1 %7701, %v9279_v2  }
0x13b7   :  { %2323 = vperm.xlu0 %7702, %v9282_v48  }
0x13f5   :  { %v2012_v17 = vpop.permute.xlu0 %2011 }
0x13f6   :  { %v2020_v63 = vrot.slane %v2012_v17, %v8601_v49 }
0x1410   :  { %v2003_v14 = vpop.permute.xlu1 %2002 }
0x1414   :  { %v2027_v15 = vpop.permute.xlu1 %2026 }
0x1415   :  { %v2029_v16 = vmul.f32 %v2027_v15, %v11401_v36  ;;  %v8047_v36 = vld [vmem:[%s11280_s12 + $0x68] sm:$0xff]  }
0x1418   :  { %v2009_v47 = vpop.permute.xlu1 %2008 }
0x1419   :  { %v2016_v0 = vrot.slane %v2009_v47, %v8601_v49 }
0x141b   :  { %v2021_v61 = vsel %vm571_vm3, %v2020_v63, %v2016_v0 }
0x141c   :  { %v2023_v39 = vmul.f32 %v2021_v61, %v2003_v14  ;;  %v8035_v14 = vld [vmem:[%s11292_s6] sm:$0xf] }
0x141e   :  { %v2030_v32 = vadd.f32 %v2029_v16, %v2023_v39  ;;  %v8036_v16 = vld [vmem:[%s11292_s6 + $0x4] sm:$0xf] }
0x1420   :  { %v2031_v5 = vsel %vm574_vm4, %v2030_v32, 0.0 }
0x1421   :  { %2032 = vadd.xlane.f32.xlu0 %v2031_v5 }
0x1425   :  { %v2321_v34 = vpop.permute.xlu1 %2320 }
0x1426   :  { %v2335_v55 = vrot.slane %v2321_v34, %v8623_v60  ;;  %v11402_v34 = vld [vmem:[#allocation2_spill] sm:$0xff] }
0x1432   :  { %v2318_v35 = vpop.permute.xlu0 %2317 }
0x1433   :  { %v2331_v59 = vrot.slane %v2318_v35, %v8601_v49  ;;  %v2777_v35 = vadd.f32 %v9014_v9, %v11402_v34 }
0x1435   :  { %v2327_v44 = vpop.permute.xlu1 %2326  ;;  %v2336_v62 = vsel %vm958_vm5, %v2335_v55, %v2331_v59  ;;  %v2779_v55 = vrot.slane %v2777_v35, 4 }
0x1436   :  { %v2344_v17 = vrot.slane %v2327_v44, %v8623_v60  ;;  %v2324_v47 = vpop.permute.xlu0 %2323  ;;  %v2352_v15 = vmul.f32 %v8035_v14, %v2336_v62 }
0x1437   :  { %v2340_v63 = vrot.slane %v2324_v47, %v8601_v49 }
0x1438   :  { %v2354_v0 = vsel %vm1033_vm8, %v2352_v15, 0.0 }
0x1439   :  { %2355 = vadd.xlane.f32.xlu1 %v2354_v0  ;;  %v2345_v61 = vsel %vm958_vm5, %v2344_v17, %v2340_v63 }
0x143a   :  { %v2353_v39 = vmul.f32 %v8036_v16, %v2345_v61 }
0x143c   :  { %v2357_v5 = vsel %vm1033_vm8, %v2353_v39, 0.0 }
0x143d   :  { %2358 = vadd.xlane.f32.xlu0 %v2357_v5 }
0x1453   :  { %2780 = vrot.lane.b32.xlu0 %v2779_v55, %s8184_s0  ;;  %v8037_v55 = vld [vmem:[%s11283_s13] ss:$0 sm:$0xff] }
0x14ae   :  { %v2033_v59 = vpop.xlane.xlu0 %2032 }
0x14af   :  { %v2034_v44 = vadd.f32 1e-20, %v2033_v59  ;;  %v2770_v59 = vadd.f32 %v8037_v55, %v9019_v37 }
0x14b1   :  { %7814 = vrcp.f32 %v2034_v44 }
0x14bb   :  { %v7815_v62 = vpop.eup %7814 }
0x14bc   :  { %v9308_v47 = vmul.f32 %v7815_v62, %v2030_v32 }
0x14be   :  { %11403 = vst [vmem:[#allocation25_spill] sm:$0xff] %v9308_v47  ;;  %v2421_v17 = vrot.slane %v9308_v47, %v8436_v4 }
0x14c0   :  { %v2429_v14 = vrot.slane %v2421_v17, %v8436_v4 }
0x14c2   :  { %v2440_v15 = vrot.slane %v2429_v14, %v8403_v21  ;;  %v2422_v14 = vcombine.high %v2421_v17, %v2421_v17 }
0x14c4   :  { %v2448_v63 = vmul.f32 %v9233_v58, %v2440_v15 }
0x14c6   :  { %v2356_v0 = vpop.xlane.xlu1 %2355  ;;  %v2454_v9 = vsel %vm1103_vm9, %v2448_v63, 0.0  ;;  %v7224_v63 = vmul.f32 -1.442695, %v2770_v59 }
0x14c7   :  { %v2365_v61 = vrot.slane %v2356_v0, %v8601_v49  ;;  %2455 = vadd.xlane.f32.xlu0 %v2454_v9 }
0x14c8   :  { %7816 = vpow2.f32 %v7224_v63 }
0x14c9   :  { %v2386_v16 = vmul.f32 %v9240_v50, %v2365_v61  ;;  %v2387_v35 = vmul.f32 %v9233_v58, %v2365_v61  ;;  %v2436_v58 = vrot.slane %v2422_v14, %v8436_v4 }
0x14ca   :  { %v2359_v39 = vpop.xlane.xlu0 %2358 }
0x14cb   :  { %v2369_v32 = vrot.slane %v2359_v39, %v8601_v49  ;;  %v2390_v5 = vsel %vm1099_vm10, %v2386_v16, 0.0  ;;  %v2393_v44 = vsel %vm1103_vm9, %v2387_v35, 0.0  ;;  %v2447_v16 = vmul.f32 %v9240_v50, %v2440_v15 }
0x14cc   :  { %2391 = vadd.xlane.f32.xlu1 %v2390_v5  ;;  %v2444_v37 = vrot.slane %v2436_v58, %v8403_v21 }
0x14cd   :  { %v2388_v62 = vmul.f32 %v9254_v29, %v2369_v32  ;;  %v2389_v9 = vmul.f32 %v9248_v28, %v2369_v32  ;;  %v2451_v39 = vsel %vm1099_vm10, %v2447_v16, 0.0 }
0x14ce   :  { %v2449_v17 = vmul.f32 %v9254_v29, %v2444_v37  ;;  %v2450_v32 = vmul.f32 %v9248_v28, %v2444_v37  ;;  %v2781_v50 = vpop.permute.xlu0 %2780 }
0x14cf   :  { %v2396_v0 = vsel %vm1099_vm10, %v2388_v62, 0.0  ;;  %v2399_v61 = vsel %vm1103_vm9, %v2389_v9, 0.0 }
0x14d0   :  { %2394 = vadd.xlane.f32.xlu1 %v2393_v44  ;;  %v2457_v5 = vsel %vm1099_vm10, %v2449_v17, 0.0  ;;  %v2460_v55 = vsel %vm1103_vm9, %v2450_v32, 0.0 }
0x14d2   :  { %v7817_v35 = vpop.eup %7816 }
0x14d3   :  { %v2774_v59 = vadd.f32 1.0, %v7817_v35 }
0x14d4   :  { %2397 = vadd.xlane.f32.xlu1 %v2396_v0 }
0x14d5   :  { %7818 = vrcp.f32 %v2774_v59 }
0x14d8   :  { %2400 = vadd.xlane.f32.xlu1 %v2399_v61 }
0x14dc   :  { %2452 = vadd.xlane.f32.xlu1 %v2451_v39 }
0x14df   :  { %v9338_v15 = vpop.eup %7818 }
0x14e0   :  { %2458 = vadd.xlane.f32.xlu1 %v2457_v5  ;;  %v2783_v44 = vmul.f32 %v9338_v15, %v2781_v50 }
0x14e4   :  { %2461 = vadd.xlane.f32.xlu1 %v2460_v55 }
0x14f5   :  { %2785 = vrot.lane.b32.xlu1 %v2783_v44, %s8184_s0 }
0x1554   :  { %v2456_v32 = vpop.xlane.xlu0 %2455 }
0x1559   :  { %v2392_v29 = vpop.xlane.xlu1 %2391 }
0x155a   :  { %v2402_v62 = vmax.f32 %v2392_v29, 1e-20 }
0x155c   :  { %7820 = vrcp.f32 %v2402_v62 }
0x155d   :  { %v2395_v14 = vpop.xlane.xlu1 %2394 }
0x155e   :  { %v2403_v63 = vmax.f32 %v2395_v14, 1e-20 }
0x1560   :  { %7822 = vrcp.f32 %v2403_v63 }
0x1561   :  { %v2398_v28 = vpop.xlane.xlu1 %2397 }
0x1562   :  { %v2404_v0 = vmax.f32 %v2398_v28, 1e-20  ;;  %v11404_v28 = vld [vmem:[#allocation4_spill] sm:$0xff] }
0x1564   :  { %7824 = vrcp.f32 %v2404_v0 }
0x1565   :  { %v2401_v9 = vpop.xlane.xlu1 %2400 }
0x1566   :  { %v7821_v58 = vpop.eup %7820  ;;  %v2405_v61 = vmax.f32 %v2401_v9, 1e-20  ;;  %v11406_v9 = vmov 65  }
0x1567   :  { %v2407_v16 = vmul.f32 %v7821_v58, %v9275_v40 }
0x1568   :  { %7826 = vrcp.f32 %v2405_v61 }
0x1569   :  { %v2453_v37 = vpop.xlane.xlu1 %2452 }
0x156a   :  { %v7823_v39 = vpop.eup %7822  ;;  %v2463_v17 = vmul.f32 %v2453_v37, %v2407_v16 }
0x156b   :  { %v2409_v5 = vmul.f32 %v7823_v39, %v9269_v31  ;;  %v11405_v31 = vmov 64   ;;  %v8038_v39 = vld [vmem:[%s11293_s4 + $0x8] sm:$0xff] }
0x156c   :  { %2472 = vperm.xlu1 %7701, %v2463_v17  }
0x156d   :  { %v2459_v35 = vpop.xlane.xlu1 %2458  ;;  %v2464_v55 = vmul.f32 %v2456_v32, %v2409_v5  ;;  %v8039_v5 = vld [vmem:[%s11293_s4] sm:$0xff] }
0x156e   :  { %v7825_v59 = vpop.eup %7824 }
0x156f   :  { %v2411_v50 = vmul.f32 %v7825_v59, %v9282_v48 }
0x1570   :  { %2475 = vperm.xlu1 %7701, %v2464_v55  }
0x1571   :  { %v2465_v44 = vmul.f32 %v2459_v35, %v2411_v50  ;;  %v2462_v29 = vpop.xlane.xlu1 %2461  ;;  %v8040_v50 = vld [vmem:[%s11293_s4 + $0x10] sm:$0xff] }
0x1572   :  { %v7827_v62 = vpop.eup %7826 }
0x1573   :  { %v2413_v14 = vmul.f32 %v7827_v62, %v9279_v2  ;;  %2478 = vperm.xlu0 %7702, %v2465_v44  }
0x1575   :  { %v2466_v40 = vmul.f32 %v2462_v29, %v2413_v14  ;;  %v2786_v63 = vpop.permute.xlu1 %2785  ;;  %v8041_v29 = vld [vmem:[%s11293_s4 + $0x18] sm:$0xff] }
0x1576   :  { %v2788_v0 = vadd.f32 %v2786_v63, %v11404_v28 }
0x1577   :  { %2481 = vperm.xlu1 %7701, %v2466_v40   ;;  %7703 = vset.pattern.permute.xlu0 %v11405_v31 }
0x1578   :  { %7828 = vtanh.f32 %v2788_v0 }
0x157b   :  { %7704 = vset.pattern.permute.xlu1 %v11406_v9 }
0x1582   :  { %v7829_v58 = vpop.eup %7828 }
0x1583   :  { %2792 = vrot.lane.b32.xlu1 %v7829_v58, %s8183_s27 }
0x15eb   :  { %v9350_v48 = vpop.permute.xlu1 %2472 }
0x15ec   :  { %v2486_v2 = vrot.slane %v9350_v48, %v8601_v49 }
0x15ef   :  { %v9352_v61 = vpop.permute.xlu1 %2475 }
0x15f0   :  { %v2490_v16 = vrot.slane %v9352_v61, %v8623_v60 }
0x15f2   :  { %v2491_v37 = vsel %vm958_vm5, %v2490_v16, %v2486_v2  ;;  %v9365_v35 = vpop.permute.xlu0 %2478  ;;  %v8042_v16 = vld [vmem:[%s11293_s4 + $0x30] sm:$0xff] }
0x15f3   :  { %v2516_v17 = vmul.f32 %v8038_v39, %v2491_v37  ;;  %v2515_v32 = vmul.f32 %v8039_v5, %v2491_v37  ;;  %v2517_v44 = vmul.f32 %v8040_v50, %v2491_v37  ;;  %v2518_v62 = vmul.f32 %v8041_v29, %v2491_v37  ;;  %v8043_v39 = vld [vmem:[%s11293_s4 + $0x20] sm:$0xff] }
0x15f4   :  { %v2495_v40 = vrot.slane %v9365_v35, %v8601_v49 }
0x15f5   :  { %v2526_v55 = vsel %vm1367_vm11, %v2516_v17, 0.0  ;;  %v2523_v59 = vsel %vm1367_vm11, %v2515_v32, 0.0  ;;  %v2529_v0 = vsel %vm1367_vm11, %v2517_v44, 0.0  ;;  %v2532_v58 = vsel %vm1367_vm11, %v2518_v62, 0.0  ;;  %v8045_v44 = vld [vmem:[%s11293_s4 + $0x38] sm:$0xff] }
0x15f6   :  { %2527 = vadd.xlane.f32.xlu0 %v2526_v55  ;;  %2524 = vadd.xlane.f32.xlu1 %v2523_v59  ;;  %v9375_v14 = vpop.permute.xlu1 %2481  ;;  %v8044_v55 = vld [vmem:[%s11293_s4 + $0x28] sm:$0xff] }
0x15f7   :  { %v2499_v63 = vrot.slane %v9375_v14, %v8623_v60 }
0x15f9   :  { %v2500_v2 = vsel %vm958_vm5, %v2499_v63, %v2495_v40  ;;  %v2790_v40 = vsub.f32 1.0, %v9338_v15 }
0x15fa   :  { %2530 = vadd.xlane.f32.xlu0 %v2529_v0  ;;  %2533 = vadd.xlane.f32.xlu1 %v2532_v58  ;;  %v2521_v37 = vmul.f32 %v8042_v16, %v2500_v2  ;;  %v2519_v17 = vmul.f32 %v8043_v39, %v2500_v2  ;;  %v2520_v59 = vmul.f32 %v8044_v55, %v2500_v2  ;;  %v2793_v62 = vpop.permute.xlu1 %2792  ;;  %v11407_v0 = vld [vmem:[#allocation29_spill] sm:$0xff] }
0x15fb   :  { %v2522_v29 = vmul.f32 %v8045_v44, %v2500_v2  ;;  %v2797_v58 = vrot.slane %v11407_v0, 6  ;;  %v2795_v16 = vmul.f32 %v2793_v62, %v2790_v40 }
0x15fc   :  { %v2541_v5 = vsel %vm1367_vm11, %v2521_v37, 0.0  ;;  %v2535_v32 = vsel %vm1367_vm11, %v2519_v17, 0.0  ;;  %v2538_v50 = vsel %vm1367_vm11, %v2520_v59, 0.0 }
0x15fd   :  { %v2544_v63 = vsel %vm1367_vm11, %v2522_v29, 0.0  ;;  %v2799_v37 = vmul.f32 %v9338_v15, %v2797_v58 }
0x15fe   :  { %2542 = vadd.xlane.f32.xlu0 %v2541_v5  ;;  %2536 = vadd.xlane.f32.xlu1 %v2535_v32 }
0x15ff   :  { %v9403_v39 = vadd.f32 %v2799_v37, %v2795_v16  ;;  %v8046_v37 = vld [vmem:[%s11280_s12 + $0x60] sm:$0xff]  }
0x1601   :  { %11408 = vst [vmem:[#allocation27_spill] sm:$0xff] %v9403_v39  ;;  %v2801_v17 = vpack.c.bf16 %v9403_v39, %v9403_v39 }
0x1602   :  { %2539 = vadd.xlane.f32.xlu1 %v2538_v50 }
0x1603   :  { %v2843_v5 = vrot.slane %v2801_v17, 2 }
0x1606   :  { %2545 = vadd.xlane.f32.xlu1 %v2544_v63 }
0x1614   :  { %2844 = vrot.lane.b32.xlu0 %v2843_v5, %s8183_s27 }
0x1683   :  { %v2525_v2 = vpop.xlane.xlu1 %2524  ;;  %v2528_v32 = vpop.xlane.xlu0 %2527 }
0x1684   :  { %v2547_v50 = vpack.c.bf16 %v2528_v32, %v2525_v2 }
0x1686   :  { %v2595_v62 = vunpack.c.l.b16 %v2547_v50  ;;  %v2596_v40 = vunpack.c.h.b16 %v2547_v50 }
0x1687   :  { %v2534_v55 = vpop.xlane.xlu1 %2533  ;;  %v2531_v59 = vpop.xlane.xlu0 %2530 }
0x1688   :  { %v2548_v0 = vpack.c.bf16 %v2534_v55, %v2531_v59  ;;  %v2606_v2 = vrot.slane %v2595_v62, %v8601_v49  ;;  %v2610_v32 = vrot.slane %v2596_v40, %v8623_v60 }
0x168a   :  { %v2597_v58 = vunpack.c.l.b16 %v2548_v0  ;;  %v2598_v55 = vunpack.c.h.b16 %v2548_v0  ;;  %v2611_v62 = vsel %vm958_vm5, %v2610_v32, %v2606_v2  ;;  %v8048_v2 = vld [vmem:[%s11280_s12 + $0x30] sm:$0xff]   ;;  %v8051_v32 = vld [vmem:[%s11280_s12 + $0x48] sm:$0xff]  }
0x168b   :  { %v2537_v44 = vpop.xlane.xlu1 %2536  ;;  %v2543_v29 = vpop.xlane.xlu0 %2542 }
0x168c   :  { %v2615_v50 = vrot.slane %v2597_v58, %v8897_v6  ;;  %v2620_v0 = vrot.slane %v2598_v55, %v8902_v53 }
0x168e   :  { %v2616_v40 = vsel %vm1474_vm12, %v2615_v50, %v2611_v62 }
0x168f   :  { %v2540_v63 = vpop.xlane.xlu1 %2539  ;;  %v9408_v15 = vpop.permute.xlu0 %2844 }
0x1690   :  { %v2549_v16 = vpack.c.bf16 %v2540_v63, %v2537_v44  ;;  %7507 = vmatmul.mubr.msk.bf16.vlgmr.msra.gmra.mrb[28].mxu1 %vm142_vm1, %v9408_v15 }
0x1691   :  { %7519 = vmatpush3.bf16.msra.mxu1 %v8046_v37  ;;  %7522 = vmatprep.mubr.msk.bf16.mxu1 %vm8182_vm0, %v11395_v45 }
0x1692   :  { %v2599_v17 = vunpack.c.l.b16 %v2549_v16  ;;  %v2600_v5 = vunpack.c.h.b16 %v2549_v16  ;;  %7520 = vmatprep.subr.bf16.mxu1 %v11395_v45 }
0x1693   :  { %v2546_v59 = vpop.xlane.xlu1 %2545 }
0x1694   :  { %v2550_v44 = vpack.c.bf16 %v2546_v59, %v2543_v29  ;;  %v2625_v63 = vrot.slane %v2599_v17, %v8601_v49  ;;  %v2629_v37 = vrot.slane %v2600_v5, %v8623_v60 }
0x1695   :  { %7521 = vmatpush3.bf16.msra.mxu1 %v8047_v36  ;;  %v2621_v36 = vsel %vm11356_vm13, %v2620_v0, %v2616_v40 }
0x1696   :  { %v2601_v16 = vunpack.c.l.b16 %v2550_v44  ;;  %v2602_v39 = vunpack.c.h.b16 %v2550_v44  ;;  %7534 = vmatprep.subr.bf16.mxu1 %v11395_v45  ;;  %v2630_v17 = vsel %vm958_vm5, %v2629_v37, %v2625_v63 }
0x1698   :  { %v2634_v29 = vrot.slane %v2601_v16, %v8897_v6  ;;  %v2639_v58 = vrot.slane %v2602_v39, %v8902_v53  ;;  %v8049_v39 = vld [vmem:[%s11280_s12 + $0x38] sm:$0xff]  }
0x169a   :  { %v2635_v5 = vsel %vm1474_vm12, %v2634_v29, %v2630_v17 }
0x169b   :  { %v2640_v59 = vsel %vm11356_vm13, %v2639_v58, %v2635_v5 }
0x169c   :  { %v2641_v44 = vsel %vm571_vm3, %v2640_v59, %v2621_v36  ;;  %v8052_v36 = vld [vmem:[%s11283_s13 + $0x1] ss:$0 sm:$0xff] }
0x169d   :  { %v2642_v31 = vpack.c.b16 %v2641_v44, %v2641_v44 }
0x169f   :  { %7483 = vmatmul.mubr.msk.bf16.vlgmr.msra.gmra.mrb[24].mxu0 %vm142_vm1, %v2642_v31  ;;  %v8050_v31 = vld [vmem:[%s11280_s12 + $0x40] sm:$0xff]  }
0x16a0   :  { %7495 = vmatpush3.bf16.msra.mxu0 %v8048_v2  ;;  %7498 = vmatprep.mubr.msk.bf16.mxu0 %vm8182_vm0, %v11395_v45 }
0x16a1   :  { %7496 = vmatprep.subr.bf16.mxu0 %v11395_v45 }
0x16a4   :  { %7497 = vmatpush3.bf16.msra.mxu0 %v8049_v39 }
0x16a5   :  { %7510 = vmatprep.subr.bf16.mxu0 %v11395_v45 }
0x16a7   :  { %7499 = vmatmul.mubr.msk.bf16.vlgmr.msra.gmra.mrb[28].mxu0 %vm142_vm1, %v8969_v33 }
0x16a8   :  { %7511 = vmatpush3.bf16.msra.mxu0 %v8050_v31  ;;  %7514 = vmatprep.mubr.msk.bf16.mxu0 %vm8182_vm0, %v11395_v45 }
0x16a9   :  { %7512 = vmatprep.subr.bf16.mxu0 %v11395_v45 }
0x16ac   :  { %7513 = vmatpush3.bf16.msra.mxu0 %v8051_v32 }
0x16ad   :  { %7526 = vmatprep.subr.bf16.mxu0 %v11395_v45 }
0x1763   :  { %v2883_v55 = vpop.f32.mrb[28].mxu1 }
0x1764   :  { %v7508_v50 = vpop.f32.mrb[29].mxu1 }
0x1765   :  { %v2886_v33 = vpop.f32.mrb[30].mxu1 }
0x1766   :  { %v7509_v63 = vpop.f32.mrb[31].mxu1 }
0x1772   :  { %v2680_v37 = vpop.f32.mrb[24].mxu0 }
0x1773   :  { %v9461_v16 = vadd.f32 %v2680_v37, %v9005_v11  ;;  %v7484_v62 = vpop.f32.mrb[25].mxu0 }
0x1774   :  { %v2683_v0 = vpop.f32.mrb[26].mxu0 }
0x1775   :  { %v7485_v40 = vpop.f32.mrb[27].mxu0 }
0x177a   :  { %v2836_v29 = vpop.f32.mrb[28].mxu0 }
0x177b   :  { %v2884_v58 = vadd.f32 %v2883_v55, %v2836_v29  ;;  %v7500_v17 = vpop.f32.mrb[29].mxu0 }
0x177c   :  { %v2839_v5 = vpop.f32.mrb[30].mxu0 }
0x177d   :  { %v2889_v59 = vadd.f32 %v8052_v36, %v2884_v58  ;;  %v7501_v44 = vpop.f32.mrb[31].mxu0  ;;  %v8054_v5 = vld [vmem:[%s11280_s12 + $0x50] sm:$0xff]   ;;  %v8055_v36 = vld [vmem:[%s11280_s12 + $0x18] sm:$0xff]  }
0x177e   :  { %v8057_v44 = vld [vmem:[%s11280_s12 + $0x20] sm:$0xff]  }
0x177f   :  { %2897 = vrot.lane.b32.xlu1 %v2889_v59, %s8185_s1  ;;  %v7227_v2 = vmul.f32 -1.442695, %v2889_v59 }
0x1781   :  { %7830 = vpow2.f32 %v7227_v2  ;;  %v8058_v2 = vld [vmem:[%s11280_s12 + $0x28] sm:$0xff]  }
0x178b   :  { %v7831_v39 = vpop.eup %7830 }
0x178c   :  { %v2893_v11 = vadd.f32 1.0, %v7831_v39 }
0x178e   :  { %7832 = vrcp.f32 %v2893_v11 }
0x1798   :  { %v7833_v31 = vpop.eup %7832 }
0x1799   :  { %v2907_v37 = vsub.f32 1.0, %v7833_v31  ;;  %v2913_v0 = vmul.f32 %v7833_v31, %v8964_v27  ;;  %v8053_v27 = vld [vmem:[%s11280_s12 + $0x10] sm:$0xff]  }
0x17f1   :  { %v2898_v32 = vpop.permute.xlu1 %2897 }
0x17f2   :  { %v2900_v50 = vmul.f32 %v7833_v31, %v2898_v32 }
0x17f4   :  { %2902 = vrot.lane.b32.xlu1 %v2900_v50, %s8184_s0 }
0x1866   :  { %v2903_v55 = vpop.permute.xlu1 %2902 }
0x1867   :  { %v2905_v33 = vadd.f32 %v2903_v55, %v2889_v59  ;;  %v8056_v59 = vld [vmem:[%s11280_s12 + $0x58] sm:$0xff]  }
0x1869   :  { %7834 = vtanh.f32 %v2905_v33 }
0x1873   :  { %v7835_v63 = vpop.eup %7834 }
0x1874   :  { %2909 = vrot.lane.b32.xlu0 %v7835_v63, %s8183_s27 }
0x18e6   :  { %v2910_v62 = vpop.permute.xlu0 %2909 }
0x18e7   :  { %v2912_v40 = vmul.f32 %v2910_v62, %v2907_v37 }
0x18e9   :  { %v9470_v29 = vadd.f32 %v2913_v0, %v2912_v40 }
0x18eb   :  { %v2915_v58 = vpack.c.bf16 %v9470_v29, %v9470_v29 }
0x18ed   :  { %2917 = vrot.lane.b32.xlu1 %v2915_v58, %s8183_s27 }
0x195f   :  { %v9475_v17 = vpop.permute.xlu1 %2917 }
0x1960   :  { %7515 = vmatmul.mubr.msk.bf16.vlgmr.msra.gmra.mrb[32].mxu0 %vm142_vm1, %v9475_v17  ;;  %7523 = vmatmul.mubr.msk.bf16.vlgmr.msra.gmra.mrb[32].mxu1 %vm142_vm1, %v9475_v17 }
0x1961   :  { %7535 = vmatpush3.bf16.msra.mxu1 %v8053_v27  ;;  %7538 = vmatprep.mubr.msk.bf16.mxu1 %vm8182_vm0, %v11395_v45 }
0x1962   :  { %7536 = vmatprep.subr.bf16.mxu1 %v11395_v45  ;;  %7527 = vmatpush3.bf16.msra.mxu0 %v8054_v5 }
0x1963   :  { %7528 = vmatprep.subr.bf16.mxu0 %v11395_v45  ;;  %7530 = vmatprep.mubr.msk.bf16.mxu0 %vm8182_vm0, %v11395_v45 }
0x1965   :  { %7537 = vmatpush3.bf16.msra.mxu1 %v8055_v36 }
0x1966   :  { %7550 = vmatprep.subr.bf16.mxu1 %v11395_v45  ;;  %7529 = vmatpush3.bf16.msra.mxu0 %v8056_v59 }
0x1967   :  { %7542 = vmatprep.subr.bf16.mxu0 %v11395_v45 }
0x1968   :  { %7539 = vmatmul.mubr.msk.bf16.vlgmr.msra.gmra.mrb[36].mxu1 %vm142_vm1, %v9408_v15 }
0x1969   :  { %7551 = vmatpush3.bf16.msra.mxu1 %v8057_v44  ;;  %7554 = vmatprep.mubr.msk.bf16.mxu1 %vm8182_vm0, %v11395_v45 }
0x196a   :  { %7552 = vmatprep.subr.bf16.mxu1 %v11395_v45 }
0x196d   :  { %7553 = vmatpush3.bf16.msra.mxu1 %v8058_v2 }
0x196e   :  { %7566 = vmatprep.subr.bf16.mxu1 %v11395_v45 }
0x1a33   :  { %v9513_v39 = vpop.f32.mrb[32].mxu0  ;;  %v9515_v15 = vpop.f32.mrb[32].mxu1 }
0x1a34   :  { %v2969_v11 = vrot.slane %v9513_v39, %v8436_v4  ;;  %v7516_v31 = vpop.f32.mrb[33].mxu0  ;;  %v7524_v32 = vpop.f32.mrb[33].mxu1 }
0x1a35   :  { %v2959_v50 = vpop.f32.mrb[34].mxu0  ;;  %v3703_v55 = vpop.f32.mrb[34].mxu1 }
0x1a36   :  { %v2970_v33 = vcombine.high %v2969_v11, %v2969_v11  ;;  %v2977_v63 = vrot.slane %v2969_v11, %v8436_v4  ;;  %v7517_v37 = vpop.f32.mrb[35].mxu0  ;;  %v7525_v62 = vpop.f32.mrb[35].mxu1  ;;  %v8059_v11 = vld [vmem:[%s11287_s2] sm:$0xf]  ;;  %v8060_v50 = vld [vmem:[%s11287_s2 + $0x4] sm:$0xf] }
0x1a37   :  { %v8061_v37 = vld [vmem:[%s11288_s3] sm:$0xff] }
0x1a38   :  { %v2988_v0 = vrot.slane %v2977_v63, %v8403_v21  ;;  %v2984_v40 = vrot.slane %v2970_v33, %v8436_v4 }
0x1a3a   :  { %3152 = vrot.lane.b32.xlu0 %v2988_v0, %s8183_s27  ;;  %v2992_v58 = vrot.slane %v2984_v40, %v8403_v21  ;;  %v2995_v31 = vmul.f32 %v8059_v11, %v2988_v0  ;;  %v8062_v0 = vld [vmem:[%s11288_s3 + $0x8] sm:$0xf]  ;;  %v8064_v11 = vld [vmem:[%s11288_s3 + $0x18] sm:$0xf] }
0x1a3b   :  { %v9524_v27 = vpop.f32.mrb[36].mxu1 }
0x1a3c   :  { %v3882_v5 = vrot.slane %v9524_v27, 2  ;;  %v7540_v36 = vpop.f32.mrb[37].mxu1  ;;  %3154 = vrot.lane.b32.xlu1 %v2992_v58, %s8183_s27  ;;  %v2997_v32 = vsel %vm11355_vm2, %v2995_v31, 0.0  ;;  %v2996_v55 = vmul.f32 %v8060_v50, %v2992_v58 }
0x1a3d   :  { %v3878_v59 = vpop.f32.mrb[38].mxu1  ;;  %v8063_v36 = vld [vmem:[%s11288_s3 + $0x10] sm:$0xff] }
0x1a3e   :  { %v9529_v44 = vadd.f32 %v3882_v5, %v8315_v10  ;;  %v7541_v2 = vpop.f32.mrb[39].mxu1  ;;  %v3000_v33 = vsel %vm11355_vm2, %v2996_v55, 0.0 }
0x1a59   :  { %2998 = vadd.xlane.f32.xlu0 %v2997_v32 }
0x1a60   :  { %3001 = vadd.xlane.f32.xlu1 %v3000_v33 }
0x1a6f   :  { %3004 = vperm.xlu0 %7703, %v9513_v39  }
0x1a73   :  { %7706 = vset.pattern.permute.xlu0 %v11388_v3 }
0x1aac   :  { %v3153_v63 = vpop.permute.xlu0 %3152 }
0x1aad   :  { %v3158_v62 = vmul.f32 %v8061_v37, %v3153_v63  ;;  %v3159_v40 = vmul.f32 %v8062_v0, %v3153_v63 }
0x1aae   :  { %v3155_v5 = vpop.permute.xlu1 %3154 }
0x1aaf   :  { %v3162_v58 = vsel %vm142_vm1, %v3158_v62, 0.0  ;;  %v3160_v59 = vmul.f32 %v8063_v36, %v3155_v5  ;;  %v3165_v2 = vsel %vm11355_vm2, %v3159_v40, 0.0  ;;  %v3161_v31 = vmul.f32 %v8064_v11, %v3155_v5 }
0x1ab0   :  { %3163 = vadd.xlane.f32.xlu1 %v3162_v58 }
0x1ab1   :  { %v3168_v32 = vsel %vm142_vm1, %v3160_v59, 0.0  ;;  %v3171_v50 = vsel %vm11355_vm2, %v3161_v31, 0.0  ;;  %vm11418_vm2 = vcmask 1043459  }
0x1ab4   :  { %3166 = vadd.xlane.f32.xlu1 %v3165_v2 }
0x1ab8   :  { %3169 = vadd.xlane.f32.xlu1 %v3168_v32 }
0x1abc   :  { %3172 = vadd.xlane.f32.xlu1 %v3171_v50 }
0x1acd   :  { %3175 = vperm.xlu1 %7704, %v9513_v39  }
0x1ad1   :  { %7705 = vset.pattern.permute.xlu1 %v11388_v3 }
0x1ae6   :  { %v2999_v55 = vpop.xlane.xlu0 %2998 }
0x1aed   :  { %v3002_v0 = vpop.xlane.xlu1 %3001 }
0x1aee   :  { %v3005_v33 = vpop.permute.xlu0 %3004 }
0x1aef   :  { %v3009_v63 = vrot.slane %v3005_v33, %v8403_v21  ;;  %v3013_v37 = vrot.slane %v3005_v33, %v8407_v22 }
0x1af1   :  { %v3016_v62 = vadd.f32 %v3009_v63, %v2999_v55  ;;  %v3017_v40 = vadd.f32 %v3013_v37, %v3002_v0 }
0x1af3   :  { %v9562_v58 = vadd.f32 %v3016_v62, %v8480_v18  ;;  %v9566_v5 = vadd.f32 %v3017_v40, %v8482_v19 }
0x1af5   :  { %3023 = vperm.xlu1 %7705, %v9562_v58  }
0x1af9   :  { %3026 = vperm.xlu1 %7705, %v9566_v5  }
0x1b3d   :  { %v3164_v36 = vpop.xlane.xlu1 %3163 }
0x1b41   :  { %v3167_v59 = vpop.xlane.xlu1 %3166 }
0x1b45   :  { %v3170_v2 = vpop.xlane.xlu1 %3169 }
0x1b49   :  { %v3173_v11 = vpop.xlane.xlu1 %3172 }
0x1b4d   :  { %v3176_v31 = vpop.permute.xlu1 %3175 }
0x1b4e   :  { %v3180_v32 = vrot.slane %v3176_v31, %v8403_v21  ;;  %v3184_v0 = vrot.slane %v3176_v31, %v8407_v22 }
0x1b50   :  { %v3187_v50 = vadd.f32 %v3180_v32, %v3164_v36  ;;  %v3188_v55 = vadd.f32 %v3180_v32, %v3167_v59  ;;  %v3189_v59 = vadd.f32 %v3184_v0, %v3170_v2  ;;  %v3190_v32 = vadd.f32 %v3184_v0, %v3173_v11  ;;  %v11410_v11 = vld [vmem:[#allocation14_spill] sm:$0xff] }
0x1b52   :  { %v9571_v33 = vadd.f32 %v3187_v50, %v8486_v23  ;;  %v9574_v63 = vadd.f32 %v3188_v55, %v8484_v20  ;;  %v9590_v31 = vadd.f32 %v3189_v59, %v8490_v25  ;;  %v11412_v59 = vld [vmem:[#allocation15_spill] sm:$0xff] }
0x1b54   :  { %v3196_v37 = vadd.f32 %v9574_v63, %v8495_v30  ;;  %v3195_v62 = vadd.f32 %v9571_v33, %v8516_v51  ;;  %v3197_v40 = vadd.f32 %v9571_v33, %v8518_v52  ;;  %v3198_v36 = vadd.f32 %v9574_v63, %v8501_v38 }
0x1b55   :  { %v3199_v50 = vadd.f32 %v9571_v33, %v8524_v56  ;;  %v3200_v55 = vadd.f32 %v9574_v63, %v8526_v57  ;;  %v3203_v0 = vadd.f32 %v9590_v31, %v11410_v11  ;;  %v11416_v11 = vld [vmem:[#allocation22_spill] sm:$0xff] }
0x1b56   :  { %3231 = vperm.xlu1 %7705, %v3196_v37   ;;  %3228 = vperm.xlu0 %7706, %v3195_v62   ;;  %v9593_v37 = vadd.f32 %v3190_v32, %v8488_v24  ;;  %v3201_v62 = vadd.f32 %v9571_v33, %v8561_v46  ;;  %v3205_v32 = vadd.f32 %v9590_v31, %v11412_v59  ;;  %v11414_v46 = vld [vmem:[#allocation18_spill] sm:$0xff] }
0x1b5a   :  { %3234 = vperm.xlu1 %7705, %v3197_v40   ;;  %3237 = vperm.xlu0 %7706, %v3198_v36   ;;  %v11409_v40 = vld [vmem:[#allocation20_spill] sm:$0xff]  ;;  %v11411_v36 = vld [vmem:[#allocation10_spill] sm:$0xff] }
0x1b5b   :  { %v3202_v2 = vadd.f32 %v9574_v63, %v11409_v40 }
0x1b5e   :  { %3240 = vperm.xlu1 %7705, %v3199_v50   ;;  %3243 = vperm.xlu0 %7706, %v3200_v55   ;;  %v3204_v50 = vadd.f32 %v9593_v37, %v11411_v36  ;;  %v11413_v55 = vld [vmem:[#allocation11_spill] sm:$0xff] }
0x1b5f   :  { %v3206_v24 = vadd.f32 %v9593_v37, %v11413_v55 }
0x1b62   :  { %3246 = vperm.xlu1 %7705, %v3201_v62   ;;  %3249 = vperm.xlu0 %7706, %v3202_v2   ;;  %v3207_v62 = vadd.f32 %v9590_v31, %v11414_v46  ;;  %v11415_v2 = vld [vmem:[#allocation19_spill] sm:$0xff] }
0x1b63   :  { %v3208_v40 = vadd.f32 %v9593_v37, %v11415_v2 }
0x1b66   :  { %3252 = vperm.xlu1 %7705, %v3203_v0   ;;  %3255 = vperm.xlu0 %7706, %v3204_v50   ;;  %v3209_v0 = vadd.f32 %v9590_v31, %v11416_v11  ;;  %v11417_v50 = vld [vmem:[#allocation23_spill] sm:$0xff] }
0x1b67   :  { %v3210_v36 = vadd.f32 %v9593_v37, %v11417_v50 }
0x1b6a   :  { %3258 = vperm.xlu1 %7705, %v3205_v32   ;;  %3261 = vperm.xlu0 %7706, %v3206_v24  }
0x1b6e   :  { %3264 = vperm.xlu1 %7705, %v3207_v62   ;;  %3267 = vperm.xlu0 %7706, %v3208_v40   ;;  %v8065_v40 = vld [vmem:[%s11283_s13 + $0x2] ss:$0 sm:$0xff] }
0x1b6f   :  { %v2686_v62 = vadd.f32 %v8065_v40, %v9461_v16 }
0x1b72   :  { %3270 = vperm.xlu1 %7705, %v3209_v0   ;;  %3273 = vperm.xlu0 %7706, %v3210_v36   ;;  %v2687_v0 = vsel %vm1560_vm14, %v2686_v62, -inf }
0x1b74   :  { %v3024_v59 = vpop.permute.xlu1 %3023 }
0x1b75   :  { %v3031_v32 = vrot.slane %v3024_v59, %v8601_v49 }
0x1b78   :  { %v3027_v55 = vpop.permute.xlu1 %3026 }
0x1b79   :  { %v3035_v24 = vrot.slane %v3027_v55, %v8601_v49 }
0x1b7b   :  { %v3036_v46 = vsel %vm571_vm3, %v3035_v24, %v3031_v32 }
0x1b7c   :  { %v3038_v2 = vsel %vm574_vm4, %v3036_v46, -inf }
0x1b91   :  { %3039 = vmax.xlane.f32.xlu0 %v3038_v2 }
0x1b96   :  { %2688 = vmax.xlane.f32.xlu1 %v2687_v0 }
0x1bd5   :  { %v3229_v36 = vpop.permute.xlu0 %3228  ;;  %v3232_v11 = vpop.permute.xlu1 %3231 }
0x1bd6   :  { %v3278_v25 = vrot.slane %v3229_v36, %v8601_v49  ;;  %v3282_v56 = vrot.slane %v3232_v11, %v8623_v60 }
0x1bd9   :  { %v3238_v50 = vpop.permute.xlu0 %3237  ;;  %v3235_v55 = vpop.permute.xlu1 %3234 }
0x1bda   :  { %v3291_v59 = vrot.slane %v3238_v50, %v8623_v60  ;;  %v3287_v24 = vrot.slane %v3235_v55, %v8601_v49  ;;  %v3283_v50 = vsel %vm958_vm5, %v3282_v56, %v3278_v25 }
0x1bdc   :  { %v3292_v40 = vsel %vm958_vm5, %v3291_v59, %v3287_v24 }
0x1bdd   :  { %v3244_v32 = vpop.permute.xlu0 %3243  ;;  %v3241_v46 = vpop.permute.xlu1 %3240  ;;  %v3347_v36 = vsel %vm571_vm3, %v3292_v40, %v3283_v50 }
0x1bde   :  { %v3300_v16 = vrot.slane %v3244_v32, %v8623_v60  ;;  %v3296_v2 = vrot.slane %v3241_v46, %v8601_v49 }
0x1be0   :  { %v3301_v0 = vsel %vm958_vm5, %v3300_v16, %v3296_v2 }
0x1be1   :  { %v3250_v57 = vpop.permute.xlu0 %3249  ;;  %v3247_v52 = vpop.permute.xlu1 %3246  ;;  %v3348_v32 = vsel %vm1024_vm6, %v3301_v0, %v3347_v36 }
0x1be2   :  { %v3309_v55 = vrot.slane %v3250_v57, %v8623_v60  ;;  %v3305_v38 = vrot.slane %v3247_v52, %v8601_v49 }
0x1be4   :  { %v3310_v11 = vsel %vm958_vm5, %v3309_v55, %v3305_v38 }
0x1be5   :  { %v3256_v30 = vpop.permute.xlu0 %3255  ;;  %v3253_v46 = vpop.permute.xlu1 %3252  ;;  %v3349_v59 = vsel %vm11418_vm2, %v3310_v11, %v3348_v32 }
0x1be6   :  { %v3355_v24 = vsel %vm1033_vm8, %v3349_v59, -inf  ;;  %v3318_v40 = vrot.slane %v3256_v30, %v8623_v60  ;;  %v3314_v38 = vrot.slane %v3253_v46, %v8601_v49 }
0x1be7   :  { %3356 = vmax.xlane.f32.xlu0 %v3355_v24 }
0x1be8   :  { %v3319_v59 = vsel %vm958_vm5, %v3318_v40, %v3314_v38 }
0x1be9   :  { %v3262_v16 = vpop.permute.xlu0 %3261  ;;  %v3259_v2 = vpop.permute.xlu1 %3258 }
0x1bea   :  { %v3327_v25 = vrot.slane %v3262_v16, %v8623_v60  ;;  %v3323_v56 = vrot.slane %v3259_v2, %v8601_v49 }
0x1bec   :  { %v3328_v55 = vsel %vm958_vm5, %v3327_v25, %v3323_v56 }
0x1bed   :  { %v3268_v52 = vpop.permute.xlu0 %3267  ;;  %v3265_v57 = vpop.permute.xlu1 %3264  ;;  %v3350_v30 = vsel %vm571_vm3, %v3328_v55, %v3319_v59 }
0x1bee   :  { %v3336_v0 = vrot.slane %v3268_v52, %v8623_v60  ;;  %v3332_v50 = vrot.slane %v3265_v57, %v8601_v49 }
0x1bf0   :  { %v3337_v36 = vsel %vm958_vm5, %v3336_v0, %v3332_v50 }
0x1bf1   :  { %v3274_v11 = vpop.permute.xlu0 %3273  ;;  %v3271_v32 = vpop.permute.xlu1 %3270  ;;  %v3351_v2 = vsel %vm1024_vm6, %v3337_v36, %v3350_v30 }
0x1bf2   :  { %v3345_v24 = vrot.slane %v3274_v11, %v8623_v60  ;;  %v3341_v16 = vrot.slane %v3271_v32, %v8601_v49 }
0x1bf4   :  { %v3346_v46 = vsel %vm958_vm5, %v3345_v24, %v3341_v16 }
0x1bf5   :  { %v3352_v52 = vsel %vm11418_vm2, %v3346_v46, %v3351_v2  ;;  %vm11423_vm2 = vcmask 257024  }
0x1bf6   :  { %v3358_v25 = vsel %vm1033_vm8, %v3352_v52, -inf  ;;  %v3098_v52 = vrot.slane %v8315_v10, 4 }
0x1bf7   :  { %3359 = vmax.xlane.f32.xlu1 %v3358_v25 }
0x1c1e   :  { %v3040_v56 = vpop.xlane.xlu0 %3039 }
0x1c1f   :  { %v3045_v57 = vrot.slane %v3040_v56, %v8403_v21  ;;  %v3049_v32 = vrot.slane %v3040_v56, %v8407_v22 }
0x1c21   :  { %v3052_v40 = vsub.f32 %v9562_v58, %v3045_v57  ;;  %v3053_v24 = vsub.f32 %v9566_v5, %v3049_v32  ;;  %v2717_v57 = vrot.slane %v9375_v14, %v9197_v54 }
0x1c23   :  { %v3054_v38 = vmul.f32 1.442695, %v3052_v40  ;;  %v2689_v0 = vpop.xlane.xlu1 %2688  ;;  %v3056_v16 = vmul.f32 1.442695, %v3053_v24 }
0x1c24   :  { %v2690_v50 = vsub.f32 %v2686_v62, %v2689_v0 }
0x1c25   :  { %7836 = vpow2.f32 %v3054_v38 }
0x1c26   :  { %v2691_v11 = vmul.f32 1.442695, %v2690_v50 }
0x1c28   :  { %7838 = vpow2.f32 %v2691_v11  ;;  %v2708_v11 = vrot.slane %v9352_v61, %v9197_v54 }
0x1c29   :  { %7840 = vpow2.f32 %v3056_v16  ;;  %v2704_v16 = vrot.slane %v9350_v48, %v9200_v42 }
0x1c2f   :  { %v9658_v55 = vpop.eup %7836 }
0x1c30   :  { %3061 = vperm.xlu1 %7705, %v9658_v55  }
0x1c32   :  { %v7839_v36 = vpop.eup %7838 }
0x1c33   :  { %v2693_v59 = vsel %vm1560_vm14, %v7839_v36, 0.0  ;;  %v9664_v58 = vpop.eup %7840  ;;  %v2713_v36 = vrot.slane %v9365_v35, %v9200_v42 }
0x1c34   :  { %2694 = vadd.xlane.f32.xlu0 %v2693_v59 }
0x1c35   :  { %v2718_v14 = vsel %vm1584_vm15, %v2717_v57, %v2713_v36 }
0x1c4a   :  { %3064 = vperm.xlu0 %7706, %v9664_v58  }
0x1c74   :  { %v3357_v62 = vpop.xlane.xlu0 %3356 }
0x1c75   :  { %v3361_v30 = vmul.f32 %v3357_v62, %v8669_v12 }
0x1c77   :  { %3366 = vperm.xlu1 %7705, %v3361_v30   ;;  %v2709_v30 = vsel %vm1584_vm15, %v2708_v11, %v2704_v16  ;;  %v9723_v11 = vld [vmem:[%s11291_s5 + $0x10] sm:$0xff] }
0x1c84   :  { %v3360_v46 = vpop.xlane.xlu1 %3359 }
0x1c85   :  { %v3362_v2 = vmul.f32 %v3360_v46, %v8672_v7  ;;  %v2719_v46 = vsel %vm571_vm3, %v2718_v14, %v2709_v30 }
0x1c87   :  { %3369 = vperm.xlu1 %7705, %v3362_v2   ;;  %v9702_v2 = vld [vmem:[%s11291_s5] sm:$0xff] }
0x1c8b   :  { %3099 = vrot.lane.b32.xlu1 %v3098_v52, %s8185_s1 }
0x1caf   :  { %v3062_v5 = vpop.permute.xlu1 %3061 }
0x1cb0   :  { %v3069_v40 = vrot.slane %v3062_v5, %v8601_v49  ;;  %v9709_v5 = vld [vmem:[%s11291_s5 + $0x8] sm:$0xf] }
0x1cc1   :  { %v2695_v25 = vpop.xlane.xlu0 %2694 }
0x1cc2   :  { %7842 = vlog2.f32 %v2695_v25 }
0x1cc9   :  { %v3065_v56 = vpop.permute.xlu0 %3064 }
0x1cca   :  { %v3073_v38 = vrot.slane %v3065_v56, %v8601_v49 }
0x1ccc   :  { %v7843_v0 = vpop.eup %7842  ;;  %v3074_v32 = vsel %vm571_vm3, %v3073_v38, %v3069_v40  ;;  %v9717_v38 = vld [vmem:[%s11291_s5 + $0x18] sm:$0xf] }
0x1ccd   :  { %v2697_v59 = vmul.f32 0.6931472, %v7843_v0  ;;  %v3076_v24 = vsel %vm574_vm4, %v3074_v32, 0.0 }
0x1cce   :  { %3077 = vadd.xlane.f32.xlu1 %v3076_v24 }
0x1ccf   :  { %v2698_v62 = vsub.f32 %v2690_v50, %v2697_v59 }
0x1cd1   :  { %v3094_v61 = vmul.f32 %v2698_v62, %v9192_v41  ;;  %7220 = vst.msk [vmem:[%s11294_s14 + $0x2] sm:$0x3] %vm1560_vm14, %v2698_v62 }
0x1cd2   :  { %7221 = vst.msk [vmem:[%s11294_s14 + $0x2] sm:$0x3] %vm1597_vm7, %v2719_v46 }
0x1cd3   :  { %v3095_v48 = vsel %vm1560_vm14, %v3094_v61, 0.0 }
0x1cd4   :  { %3096 = vadd.xlane.f32.xlu0 %v3095_v48 }
0x1cea   :  { %3103 = vrot.lane.b32.xlu0 %v9513_v39, %s8192_s30 }
0x1cf6   :  { %v3367_v35 = vpop.permute.xlu1 %3366 }
0x1cf7   :  { %v3374_v50 = vrot.slane %v3367_v35, %v8601_v49 }
0x1cf9   :  { %v3395_v52 = vmul.f32 %v9702_v2, %v3374_v50  ;;  %v3396_v56 = vmul.f32 %v9709_v5, %v3374_v50 }
0x1cfb   :  { %v3399_v25 = vsel %vm1099_vm10, %v3395_v52, 0.0  ;;  %v3402_v39 = vsel %vm1103_vm9, %v3396_v56, 0.0 }
0x1cfc   :  { %3400 = vadd.xlane.f32.xlu1 %v3399_v25 }
0x1d00   :  { %3403 = vadd.xlane.f32.xlu1 %v3402_v39 }
0x1d06   :  { %v3370_v57 = vpop.permute.xlu1 %3369 }
0x1d07   :  { %v3378_v40 = vrot.slane %v3370_v57, %v8601_v49 }
0x1d09   :  { %v3398_v0 = vmul.f32 %v9717_v38, %v3378_v40  ;;  %v3397_v36 = vmul.f32 %v9723_v11, %v3378_v40 }
0x1d0a   :  { %v3100_v16 = vpop.permute.xlu1 %3099 }
0x1d0b   :  { %v3408_v32 = vsel %vm1103_vm9, %v3398_v0, 0.0  ;;  %v3405_v59 = vsel %vm1099_vm10, %v3397_v36, 0.0 }
0x1d0c   :  { %3409 = vadd.xlane.f32.xlu0 %v3408_v32  ;;  %3406 = vadd.xlane.f32.xlu1 %v3405_v59 }
0x1d5b   :  { %v3078_v50 = vpop.xlane.xlu1 %3077 }
0x1d5c   :  { %v3083_v52 = vrot.slane %v3078_v50, %v8403_v21  ;;  %v3087_v25 = vrot.slane %v3078_v50, %v8407_v22 }
0x1d61   :  { %v3097_v24 = vpop.xlane.xlu0 %3096 }
0x1d62   :  { %v3102_v14 = vadd.f32 %v3100_v16, %v3097_v24 }
0x1d65   :  { %v3104_v62 = vpop.permute.xlu0 %3103 }
0x1d66   :  { %v3106_v30 = vadd.f32 %v3104_v62, %v3102_v14 }
0x1d68   :  { %v3107_v46 = vadd.f32 %v3106_v30, %v9259_v1 }
0x1d6a   :  { %v7229_v61 = vmul.f32 -1.442695, %v3107_v46 }
0x1d6c   :  { %7844 = vpow2.f32 %v7229_v61 }
0x1d76   :  { %v7845_v48 = vpop.eup %7844 }
0x1d77   :  { %v3111_v35 = vadd.f32 1.0, %v7845_v48 }
0x1d79   :  { %7846 = vrcp.f32 %v3111_v35 }
0x1d7a   :  { %7848 = vrcp.f32 %v3083_v52 }
0x1d7b   :  { %7850 = vrcp.f32 %v3087_v25 }
0x1d83   :  { %v7847_v56 = vpop.eup %7846 }
0x1d84   :  { %v3114_v39 = vsub.f32 1.0, %v7847_v56  ;;  %v7849_v57 = vpop.eup %7848 }
0x1d85   :  { %v3091_v32 = vmul.f32 %v7849_v57, %v9658_v55  ;;  %v7851_v59 = vpop.eup %7850 }
0x1d86   :  { %3117 = vperm.xlu1 %7705, %v3114_v39   ;;  %v3093_v62 = vmul.f32 %v7851_v59, %v9664_v58 }
0x1d89   :  { %v3401_v40 = vpop.xlane.xlu1 %3400 }
0x1d8a   :  { %v3411_v0 = vsub.f32 %v9571_v33, %v3401_v40  ;;  %3141 = vperm.xlu1 %7705, %v7847_v56  }
0x1d8c   :  { %v3415_v36 = vmul.f32 1.442695, %v3411_v0 }
0x1d8d   :  { %v3404_v24 = vpop.xlane.xlu1 %3403 }
0x1d8e   :  { %7852 = vpow2.f32 %v3415_v36  ;;  %v3412_v16 = vsub.f32 %v9574_v63, %v3404_v24  ;;  %3123 = vperm.xlu1 %7705, %v3091_v32  }
0x1d90   :  { %v3417_v14 = vmul.f32 1.442695, %v3412_v16 }
0x1d92   :  { %7854 = vpow2.f32 %v3417_v14  ;;  %3126 = vperm.xlu1 %7705, %v3093_v62  }
0x1d98   :  { %v7853_v30 = vpop.eup %7852 }
0x1d99   :  { %v3410_v46 = vpop.xlane.xlu0 %3409  ;;  %v3407_v61 = vpop.xlane.xlu1 %3406  ;;  %v9736_v33 = vmul.f32 %v7853_v30, %v11398_v26 }
0x1d9a   :  { %v3414_v48 = vsub.f32 %v9593_v37, %v3410_v46  ;;  %v3413_v55 = vsub.f32 %v9590_v31, %v3407_v61 }
0x1d9b   :  { %3432 = vperm.xlu1 %7705, %v9736_v33  }
0x1d9c   :  { %v7855_v35 = vpop.eup %7854  ;;  %v3419_v63 = vmul.f32 1.442695, %v3413_v55  ;;  %v3421_v50 = vmul.f32 1.442695, %v3414_v48  ;;  %v8070_v55 = vld [vmem:[%s11292_s6] sm:$0xf] }
0x1d9d   :  { %v9742_v52 = vmul.f32 %v7855_v35, %v8733_v43 }
0x1d9e   :  { %7856 = vpow2.f32 %v3419_v63 }
0x1d9f   :  { %3435 = vperm.xlu0 %7706, %v9742_v52   ;;  %7858 = vpow2.f32 %v3421_v50 }
0x1da8   :  { %v7857_v58 = vpop.eup %7856 }
0x1da9   :  { %v9746_v25 = vmul.f32 %v7857_v58, %v11400_v13  ;;  %v7859_v56 = vpop.eup %7858 }
0x1daa   :  { %v9750_v31 = vmul.f32 %v7859_v56, %v11399_v8 }
0x1dab   :  { %3438 = vperm.xlu1 %7705, %v9746_v25  }
0x1daf   :  { %3441 = vperm.xlu1 %7705, %v9750_v31  }
0x1e05   :  { %v3118_v37 = vpop.permute.xlu1 %3117 }
0x1e09   :  { %v3142_v39 = vpop.permute.xlu1 %3141 }
0x1e0a   :  { %v3144_v59 = vmul.f32 %v3142_v39, %v9308_v47 }
0x1e0d   :  { %v3124_v57 = vpop.permute.xlu1 %3123 }
0x1e0e   :  { %v3131_v0 = vrot.slane %v3124_v57, %v8601_v49  ;;  %v8071_v57 = vld [vmem:[%s11292_s6 + $0x4] sm:$0xf] }
0x1e11   :  { %v3127_v40 = vpop.permute.xlu1 %3126 }
0x1e12   :  { %v3135_v36 = vrot.slane %v3127_v40, %v8601_v49 }
0x1e14   :  { %v3136_v32 = vsel %vm571_vm3, %v3135_v36, %v3131_v0  ;;  %v3892_v36 = vadd.f32 %v9524_v27, %v11402_v34 }
0x1e15   :  { %v3138_v24 = vmul.f32 %v3136_v32, %v3118_v37 }
0x1e16   :  { %v3894_v32 = vrot.slane %v3892_v36, 2 }
0x1e17   :  { %v3145_v16 = vadd.f32 %v3144_v59, %v3138_v24 }
0x1e19   :  { %v3146_v14 = vsel %vm574_vm4, %v3145_v16, 0.0 }
0x1e1a   :  { %3147 = vadd.xlane.f32.xlu1 %v3146_v14  ;;  %v3433_v62 = vpop.permute.xlu1 %3432 }
0x1e1b   :  { %v3446_v46 = vrot.slane %v3433_v62, %v8601_v49 }
0x1e1e   :  { %v3436_v30 = vpop.permute.xlu0 %3435 }
0x1e1f   :  { %v3450_v61 = vrot.slane %v3436_v30, %v8623_v60 }
0x1e21   :  { %v3451_v48 = vsel %vm958_vm5, %v3450_v61, %v3446_v46 }
0x1e22   :  { %v3467_v35 = vmul.f32 %v8070_v55, %v3451_v48 }
0x1e24   :  { %v3469_v63 = vsel %vm1033_vm8, %v3467_v35, 0.0 }
0x1e25   :  { %3470 = vadd.xlane.f32.xlu0 %v3469_v63 }
0x1e2a   :  { %v3439_v50 = vpop.permute.xlu1 %3438 }
0x1e2b   :  { %v3455_v56 = vrot.slane %v3439_v50, %v8601_v49 }
0x1e2e   :  { %v3442_v58 = vpop.permute.xlu1 %3441 }
0x1e2f   :  { %v3459_v37 = vrot.slane %v3442_v58, %v8623_v60 }
0x1e31   :  { %v3460_v39 = vsel %vm958_vm5, %v3459_v37, %v3455_v56 }
0x1e32   :  { %v3468_v40 = vmul.f32 %v8071_v57, %v3460_v39 }
0x1e34   :  { %v3472_v0 = vsel %vm1033_vm8, %v3468_v40, 0.0 }
0x1e35   :  { %3473 = vadd.xlane.f32.xlu1 %v3472_v0 }
0x1e46   :  { %3895 = vrot.lane.b32.xlu1 %v3894_v32, %s8184_s0  ;;  %v8072_v32 = vld [vmem:[%s11283_s13] ss:$0 sm:$0xff] }
0x1ea7   :  { %v3148_v59 = vpop.xlane.xlu1 %3147 }
0x1ea8   :  { %v3149_v24 = vadd.f32 1e-20, %v3148_v59 }
0x1eaa   :  { %7860 = vrcp.f32 %v3149_v24 }
0x1eb2   :  { %v3471_v14 = vpop.xlane.xlu0 %3470 }
0x1eb3   :  { %v3480_v62 = vrot.slane %v3471_v14, %v8601_v49 }
0x1eb4   :  { %v7861_v30 = vpop.eup %7860 }
0x1eb5   :  { %v9776_v46 = vmul.f32 %v7861_v30, %v3145_v16  ;;  %v3501_v61 = vmul.f32 %v9702_v2, %v3480_v62  ;;  %v3502_v55 = vmul.f32 %v9709_v5, %v3480_v62 }
0x1eb7   :  { %11419 = vst [vmem:[#allocation26_spill] sm:$0xff] %v9776_v46  ;;  %v3505_v48 = vsel %vm1099_vm10, %v3501_v61, 0.0  ;;  %v3536_v27 = vrot.slane %v9776_v46, %v8436_v4  ;;  %v3508_v63 = vsel %vm1103_vm9, %v3502_v55, 0.0 }
0x1eb8   :  { %3506 = vadd.xlane.f32.xlu0 %v3505_v48 }
0x1eb9   :  { %v3544_v35 = vrot.slane %v3536_v27, %v8436_v4  ;;  %v3537_v39 = vcombine.high %v3536_v27, %v3536_v27 }
0x1ebb   :  { %v3555_v50 = vrot.slane %v3544_v35, %v8403_v21  ;;  %v3551_v36 = vrot.slane %v3537_v39, %v8436_v4 }
0x1ebc   :  { %3509 = vadd.xlane.f32.xlu0 %v3508_v63 }
0x1ebd   :  { %v3562_v16 = vmul.f32 %v9702_v2, %v3555_v50  ;;  %v3885_v2 = vadd.f32 %v8072_v32, %v9529_v44  ;;  %v3563_v24 = vmul.f32 %v9709_v5, %v3555_v50  ;;  %v3559_v14 = vrot.slane %v3551_v36, %v8403_v21 }
0x1ebf   :  { %v3566_v58 = vsel %vm1099_vm10, %v3562_v16, 0.0  ;;  %v7236_v62 = vmul.f32 -1.442695, %v3885_v2  ;;  %v3569_v30 = vsel %vm1103_vm9, %v3563_v24, 0.0  ;;  %v3564_v61 = vmul.f32 %v9723_v11, %v3559_v14 }
0x1ec0   :  { %3567 = vadd.xlane.f32.xlu1 %v3566_v58  ;;  %v3565_v55 = vmul.f32 %v9717_v38, %v3559_v14 }
0x1ec1   :  { %7862 = vpow2.f32 %v7236_v62  ;;  %v3572_v48 = vsel %vm1099_vm10, %v3564_v61, 0.0 }
0x1ec2   :  { %v3474_v56 = vpop.xlane.xlu1 %3473  ;;  %v3575_v44 = vsel %vm1103_vm9, %v3565_v55, 0.0 }
0x1ec3   :  { %v3484_v37 = vrot.slane %v3474_v56, %v8601_v49 }
0x1ec5   :  { %v3503_v57 = vmul.f32 %v9723_v11, %v3484_v37  ;;  %v3504_v0 = vmul.f32 %v9717_v38, %v3484_v37 }
0x1ec6   :  { %v3896_v35 = vpop.permute.xlu1 %3895 }
0x1ec7   :  { %v3511_v40 = vsel %vm1099_vm10, %v3503_v57, 0.0  ;;  %v3514_v59 = vsel %vm1103_vm9, %v3504_v0, 0.0 }
0x1ec8   :  { %3512 = vadd.xlane.f32.xlu0 %v3511_v40 }
0x1ecb   :  { %v7863_v27 = vpop.eup %7862 }
0x1ecc   :  { %3515 = vadd.xlane.f32.xlu0 %v3514_v59  ;;  %v3889_v5 = vadd.f32 1.0, %v7863_v27 }
0x1ece   :  { %7864 = vrcp.f32 %v3889_v5 }
0x1ed0   :  { %3570 = vadd.xlane.f32.xlu0 %v3569_v30 }
0x1ed4   :  { %3573 = vadd.xlane.f32.xlu0 %v3572_v48 }
0x1ed8   :  { %3576 = vadd.xlane.f32.xlu0 %v3575_v44  ;;  %v9805_v63 = vpop.eup %7864 }
0x1ed9   :  { %v3898_v50 = vmul.f32 %v9805_v63, %v3896_v35 }
0x1eee   :  { %3900 = vrot.lane.b32.xlu0 %v3898_v50, %s8184_s0 }
0x1f45   :  { %v3507_v11 = vpop.xlane.xlu0 %3506 }
0x1f46   :  { %v3517_v16 = vmax.f32 %v3507_v11, 1e-20 }
0x1f48   :  { %7866 = vrcp.f32 %v3517_v16 }
0x1f49   :  { %v3510_v58 = vpop.xlane.xlu0 %3509 }
0x1f4a   :  { %v3518_v56 = vmax.f32 %v3510_v58, 1e-20 }
0x1f4c   :  { %7868 = vrcp.f32 %v3518_v56 }
0x1f4d   :  { %v3568_v39 = vpop.xlane.xlu1 %3567 }
0x1f52   :  { %v7867_v38 = vpop.eup %7866 }
0x1f53   :  { %v3522_v37 = vmul.f32 %v7867_v38, %v9736_v33  ;;  %v8074_v38 = vld [vmem:[%s11293_s4] sm:$0xff] }
0x1f55   :  { %v3578_v57 = vmul.f32 %v3568_v39, %v3522_v37  ;;  %v3513_v40 = vpop.xlane.xlu0 %3512 }
0x1f56   :  { %v3519_v0 = vmax.f32 %v3513_v40, 1e-20  ;;  %v7869_v36 = vpop.eup %7868  ;;  %v8075_v40 = vld [vmem:[%s11293_s4 + $0x10] sm:$0xff] }
0x1f57   :  { %3587 = vperm.xlu0 %7706, %v3578_v57   ;;  %v3524_v59 = vmul.f32 %v7869_v36, %v9742_v52  ;;  %v11420_v52 = vmov 64   ;;  %v8076_v36 = vld [vmem:[%s11293_s4 + $0x18] sm:$0xff] }
0x1f58   :  { %7870 = vrcp.f32 %v3519_v0 }
0x1f59   :  { %v3516_v32 = vpop.xlane.xlu0 %3515 }
0x1f5a   :  { %v3520_v2 = vmax.f32 %v3516_v32, 1e-20 }
0x1f5c   :  { %7872 = vrcp.f32 %v3520_v2 }
0x1f5d   :  { %v3571_v24 = vpop.xlane.xlu0 %3570 }
0x1f5e   :  { %v3579_v14 = vmul.f32 %v3571_v24, %v3524_v59 }
0x1f60   :  { %3590 = vperm.xlu1 %7705, %v3579_v14  }
0x1f61   :  { %v3574_v62 = vpop.xlane.xlu0 %3573 }
0x1f62   :  { %v7871_v30 = vpop.eup %7870 }
0x1f63   :  { %v3526_v61 = vmul.f32 %v7871_v30, %v9746_v25 }
0x1f64   :  { %7708 = vset.pattern.permute.xlu1 %v11406_v9 }
0x1f65   :  { %v3580_v33 = vmul.f32 %v3574_v62, %v3526_v61  ;;  %v3577_v48 = vpop.xlane.xlu0 %3576 }
0x1f66   :  { %v7873_v55 = vpop.eup %7872 }
0x1f67   :  { %v3528_v44 = vmul.f32 %v7873_v55, %v9750_v31  ;;  %3593 = vperm.xlu0 %7706, %v3580_v33   ;;  %v8077_v33 = vld [vmem:[%s11293_s4 + $0x30] sm:$0xff]  ;;  %v8078_v55 = vld [vmem:[%s11293_s4 + $0x20] sm:$0xff] }
0x1f69   :  { %v3581_v27 = vmul.f32 %v3577_v48, %v3528_v44  ;;  %v3901_v5 = vpop.permute.xlu0 %3900 }
0x1f6a   :  { %v3903_v35 = vadd.f32 %v3901_v5, %v11404_v28  ;;  %v8073_v28 = vld [vmem:[%s11293_s4 + $0x8] sm:$0xff] }
0x1f6b   :  { %3596 = vperm.xlu0 %7706, %v3581_v27  }
0x1f6c   :  { %7874 = vtanh.f32 %v3903_v35  ;;  %v8079_v35 = vld [vmem:[%s11293_s4 + $0x28] sm:$0xff] }
0x1f6f   :  { %7707 = vset.pattern.permute.xlu0 %v11420_v52 }
0x1f76   :  { %v7875_v50 = vpop.eup %7874 }
0x1f77   :  { %3907 = vrot.lane.b32.xlu0 %v7875_v50, %s8183_s27 }
0x1fd6   :  { %v9817_v25 = vpop.permute.xlu0 %3587 }
0x1fd7   :  { %v3601_v16 = vrot.slane %v9817_v25, %v8601_v49 }
0x1fdf   :  { %v9819_v11 = vpop.permute.xlu1 %3590 }
0x1fe0   :  { %v3605_v31 = vrot.slane %v9819_v11, %v8623_v60 }
0x1fe2   :  { %v3606_v58 = vsel %vm958_vm5, %v3605_v31, %v3601_v16  ;;  %v3905_v31 = vsub.f32 1.0, %v9805_v63 }
0x1fe3   :  { %v3631_v56 = vmul.f32 %v8073_v28, %v3606_v58  ;;  %v3630_v37 = vmul.f32 %v8074_v38, %v3606_v58  ;;  %v3632_v0 = vmul.f32 %v8075_v40, %v3606_v58  ;;  %v3633_v32 = vmul.f32 %v8076_v36, %v3606_v58  ;;  %v11421_v58 = vld [vmem:[#allocation27_spill] sm:$0xff] }
0x1fe4   :  { %v3912_v28 = vrot.slane %v11421_v58, 6 }
0x1fe5   :  { %v3641_v39 = vsel %vm1367_vm11, %v3631_v56, 0.0  ;;  %v3638_v57 = vsel %vm1367_vm11, %v3630_v37, 0.0  ;;  %v3644_v59 = vsel %vm1367_vm11, %v3632_v0, 0.0  ;;  %v3647_v24 = vsel %vm1367_vm11, %v3633_v32, 0.0  ;;  %v8080_v37 = vld [vmem:[%s11293_s4 + $0x38] sm:$0xff] }
0x1fe6   :  { %v9840_v2 = vpop.permute.xlu0 %3593  ;;  %3642 = vadd.xlane.f32.xlu1 %v3641_v39  ;;  %3639 = vadd.xlane.f32.xlu0 %v3638_v57  ;;  %v3914_v57 = vmul.f32 %v9805_v63, %v3912_v28 }
0x1fe7   :  { %v3610_v62 = vrot.slane %v9840_v2, %v8601_v49 }
0x1fea   :  { %v9844_v14 = vpop.permute.xlu0 %3596  ;;  %3645 = vadd.xlane.f32.xlu1 %v3644_v59  ;;  %3648 = vadd.xlane.f32.xlu0 %v3647_v24 }
0x1feb   :  { %v3614_v30 = vrot.slane %v9844_v14, %v8623_v60 }
0x1fed   :  { %v3615_v61 = vsel %vm958_vm5, %v3614_v30, %v3610_v62 }
0x1fee   :  { %v3636_v48 = vmul.f32 %v8077_v33, %v3615_v61  ;;  %v3634_v44 = vmul.f32 %v8078_v55, %v3615_v61  ;;  %v3635_v50 = vmul.f32 %v8079_v35, %v3615_v61  ;;  %v3908_v16 = vpop.permute.xlu0 %3907  ;;  %v3637_v39 = vmul.f32 %v8080_v37, %v3615_v61 }
0x1fef   :  { %v3910_v56 = vmul.f32 %v3908_v16, %v3905_v31  ;;  %v8081_v16 = vld [vmem:[%s11280_s12 + $0x60] sm:$0xff]  }
0x1ff0   :  { %v3656_v27 = vsel %vm1367_vm11, %v3636_v48, 0.0  ;;  %v3650_v5 = vsel %vm1367_vm11, %v3634_v44, 0.0  ;;  %v3653_v38 = vsel %vm1367_vm11, %v3635_v50, 0.0  ;;  %v3659_v0 = vsel %vm1367_vm11, %v3637_v39, 0.0 }
0x1ff1   :  { %3657 = vadd.xlane.f32.xlu1 %v3656_v27  ;;  %3651 = vadd.xlane.f32.xlu0 %v3650_v5  ;;  %v9869_v40 = vadd.f32 %v3914_v57, %v3910_v56 }
0x1ff3   :  { %v3916_v36 = vpack.c.bf16 %v9869_v40, %v9869_v40 }
0x1ff5   :  { %3654 = vadd.xlane.f32.xlu0 %v3653_v38  ;;  %v3958_v32 = vrot.slane %v3916_v36, 3 }
0x1ff9   :  { %3660 = vadd.xlane.f32.xlu0 %v3659_v0 }
0x2002   :  { %3959 = vrot.lane.b32.xlu1 %v3958_v32, %s8183_s27  ;;  %v8082_v32 = vld [vmem:[%s11280_s12 + $0x68] sm:$0xff]  }
0x2073   :  { %v3643_v59 = vpop.xlane.xlu1 %3642  ;;  %v3640_v24 = vpop.xlane.xlu0 %3639 }
0x2074   :  { %v3662_v33 = vpack.c.bf16 %v3643_v59, %v3640_v24 }
0x2076   :  { %v3710_v63 = vunpack.c.l.b16 %v3662_v33  ;;  %v3711_v44 = vunpack.c.h.b16 %v3662_v33 }
0x2077   :  { %v3646_v62 = vpop.xlane.xlu1 %3645  ;;  %v3649_v30 = vpop.xlane.xlu0 %3648 }
0x2078   :  { %v3663_v55 = vpack.c.bf16 %v3649_v30, %v3646_v62  ;;  %v3721_v28 = vrot.slane %v3710_v63, %v8601_v49  ;;  %v3725_v56 = vrot.slane %v3711_v44, %v8623_v60 }
0x207a   :  { %v3712_v35 = vunpack.c.l.b16 %v3663_v55  ;;  %v3713_v38 = vunpack.c.h.b16 %v3663_v55  ;;  %v3726_v62 = vsel %vm958_vm5, %v3725_v56, %v3721_v28  ;;  %v8086_v28 = vld [vmem:[%s11280_s12 + $0x48] sm:$0xff]  }
0x207c   :  { %v3730_v39 = vrot.slane %v3712_v35, %v8897_v6  ;;  %v3735_v30 = vrot.slane %v3713_v38, %v8902_v53 }
0x207e   :  { %v3658_v61 = vpop.xlane.xlu1 %3657  ;;  %v3652_v48 = vpop.xlane.xlu0 %3651  ;;  %v3731_v33 = vsel %vm1474_vm12, %v3730_v39, %v3726_v62 }
0x207f   :  { %v3736_v44 = vsel %vm11356_vm13, %v3735_v30, %v3731_v33  ;;  %v8087_v33 = vld [vmem:[%s11283_s13 + $0x1] ss:$0 sm:$0xff] }
0x2082   :  { %v9875_v27 = vpop.permute.xlu1 %3959  ;;  %v3655_v5 = vpop.xlane.xlu0 %3654 }
0x2083   :  { %v3664_v50 = vpack.c.bf16 %v3655_v5, %v3652_v48  ;;  %7555 = vmatmul.mubr.msk.bf16.vlgmr.msra.gmra.mrb[40].mxu1 %vm142_vm1, %v9875_v27 }
0x2084   :  { %7567 = vmatpush3.bf16.msra.mxu1 %v8081_v16  ;;  %7570 = vmatprep.mubr.msk.bf16.mxu1 %vm8182_vm0, %v11395_v45  ;;  %v8083_v16 = vld [vmem:[%s11280_s12 + $0x30] sm:$0xff]  }
0x2085   :  { %v3714_v31 = vunpack.c.l.b16 %v3664_v50  ;;  %v3715_v58 = vunpack.c.h.b16 %v3664_v50  ;;  %7568 = vmatprep.subr.bf16.mxu1 %v11395_v45 }
0x2086   :  { %v3661_v37 = vpop.xlane.xlu0 %3660 }
0x2087   :  { %v3665_v57 = vpack.c.bf16 %v3661_v37, %v3658_v61  ;;  %v3740_v0 = vrot.slane %v3714_v31, %v8601_v49  ;;  %v3744_v36 = vrot.slane %v3715_v58, %v8623_v60  ;;  %v8084_v31 = vld [vmem:[%s11280_s12 + $0x38] sm:$0xff]   ;;  %v8085_v58 = vld [vmem:[%s11280_s12 + $0x40] sm:$0xff]  }
0x2088   :  { %7569 = vmatpush3.bf16.msra.mxu1 %v8082_v32 }
0x2089   :  { %v3716_v59 = vunpack.c.l.b16 %v3665_v57  ;;  %v3717_v24 = vunpack.c.h.b16 %v3665_v57  ;;  %7582 = vmatprep.subr.bf16.mxu1 %v11395_v45  ;;  %v3745_v55 = vsel %vm958_vm5, %v3744_v36, %v3740_v0 }
0x208b   :  { %v3749_v61 = vrot.slane %v3716_v59, %v8897_v6  ;;  %v3754_v48 = vrot.slane %v3717_v24, %v8902_v53 }
0x208d   :  { %v3750_v63 = vsel %vm1474_vm12, %v3749_v61, %v3745_v55 }
0x208e   :  { %v3755_v5 = vsel %vm11356_vm13, %v3754_v48, %v3750_v63  ;;  %vm11424_vm13 = vmmov %vm11423_vm2 }
0x208f   :  { %v3756_v35 = vsel %vm571_vm3, %v3755_v5, %v3736_v44 }
0x2090   :  { %v3757_v50 = vpack.c.b16 %v3756_v35, %v3756_v35 }
0x2092   :  { %7531 = vmatmul.mubr.msk.bf16.vlgmr.msra.gmra.mrb[36].mxu0 %vm142_vm1, %v3757_v50 }
0x2093   :  { %7543 = vmatpush3.bf16.msra.mxu0 %v8083_v16  ;;  %7546 = vmatprep.mubr.msk.bf16.mxu0 %vm8182_vm0, %v11395_v45 }
0x2094   :  { %7544 = vmatprep.subr.bf16.mxu0 %v11395_v45 }
0x2097   :  { %7545 = vmatpush3.bf16.msra.mxu0 %v8084_v31 }
0x2098   :  { %7558 = vmatprep.subr.bf16.mxu0 %v11395_v45 }
0x209a   :  { %7547 = vmatmul.mubr.msk.bf16.vlgmr.msra.gmra.mrb[40].mxu0 %vm142_vm1, %v9475_v17 }
0x209b   :  { %7559 = vmatpush3.bf16.msra.mxu0 %v8085_v58  ;;  %7562 = vmatprep.mubr.msk.bf16.mxu0 %vm8182_vm0, %v11395_v45 }
0x209c   :  { %7560 = vmatprep.subr.bf16.mxu0 %v11395_v45 }
0x209f   :  { %7561 = vmatpush3.bf16.msra.mxu0 %v8086_v28 }
0x20a0   :  { %7574 = vmatprep.subr.bf16.mxu0 %v11395_v45 }
0x2156   :  { %v3998_v56 = vpop.f32.mrb[40].mxu1 }
0x2157   :  { %v7556_v38 = vpop.f32.mrb[41].mxu1 }
0x2158   :  { %v4001_v17 = vpop.f32.mrb[42].mxu1 }
0x2159   :  { %v7557_v37 = vpop.f32.mrb[43].mxu1 }
0x2165   :  { %v3795_v39 = vpop.f32.mrb[36].mxu0 }
0x2166   :  { %v9928_v57 = vadd.f32 %v3795_v39, %v9515_v15  ;;  %v7532_v0 = vpop.f32.mrb[37].mxu0 }
0x2167   :  { %v3798_v36 = vpop.f32.mrb[38].mxu0  ;;  %v8089_v0 = vld [vmem:[%s11280_s12 + $0x50] sm:$0xff]  }
0x2168   :  { %v7533_v32 = vpop.f32.mrb[39].mxu0  ;;  %v8090_v36 = vld [vmem:[%s11280_s12 + $0x18] sm:$0xff]  }
0x2169   :  { %v8091_v32 = vld [vmem:[%s11280_s12 + $0x58] sm:$0xff]  }
0x216d   :  { %v3951_v59 = vpop.f32.mrb[40].mxu0 }
0x216e   :  { %v3999_v24 = vadd.f32 %v3998_v56, %v3951_v59  ;;  %v7548_v62 = vpop.f32.mrb[41].mxu0  ;;  %v8092_v59 = vld [vmem:[%s11280_s12 + $0x20] sm:$0xff]  }
0x216f   :  { %v3954_v30 = vpop.f32.mrb[42].mxu0 }
0x2170   :  { %v4004_v61 = vadd.f32 %v8087_v33, %v3999_v24  ;;  %v7549_v48 = vpop.f32.mrb[43].mxu0  ;;  %v8093_v24 = vld [vmem:[%s11280_s12 + $0x28] sm:$0xff]  }
0x2172   :  { %4012 = vrot.lane.b32.xlu0 %v4004_v61, %s8185_s1  ;;  %v7239_v55 = vmul.f32 -1.442695, %v4004_v61 }
0x2174   :  { %7876 = vpow2.f32 %v7239_v55 }
0x217e   :  { %v7877_v63 = vpop.eup %7876 }
0x217f   :  { %v4008_v15 = vadd.f32 1.0, %v7877_v63 }
0x2181   :  { %7878 = vrcp.f32 %v4008_v15 }
0x218b   :  { %v7879_v44 = vpop.eup %7878 }
0x218c   :  { %v4022_v58 = vsub.f32 1.0, %v7879_v44  ;;  %v4028_v56 = vmul.f32 %v7879_v44, %v9470_v29  ;;  %v8088_v29 = vld [vmem:[%s11280_s12 + $0x10] sm:$0xff]  }
0x21e4   :  { %v4013_v5 = vpop.permute.xlu0 %4012 }
0x21e5   :  { %v4015_v35 = vmul.f32 %v7879_v44, %v4013_v5 }
0x21e7   :  { %4017 = vrot.lane.b32.xlu1 %v4015_v35, %s8184_s0 }
0x2259   :  { %v4018_v50 = vpop.permute.xlu1 %4017 }
0x225a   :  { %v4020_v16 = vadd.f32 %v4018_v50, %v4004_v61 }
0x225c   :  { %7880 = vtanh.f32 %v4020_v16 }
0x2266   :  { %v7881_v31 = vpop.eup %7880 }
0x2267   :  { %4024 = vrot.lane.b32.xlu1 %v7881_v31, %s8183_s27 }
0x22d9   :  { %v4025_v28 = vpop.permute.xlu1 %4024 }
0x22da   :  { %v4027_v38 = vmul.f32 %v4025_v28, %v4022_v58  ;;  %v11422_v58 = vld [vmem:[#allocation3_spill] sm:$0xff] }
0x22dc   :  { %v9937_v17 = vadd.f32 %v4028_v56, %v4027_v38 }
0x22de   :  { %v4030_v37 = vpack.c.bf16 %v9937_v17, %v9937_v17 }
0x22e0   :  { %4032 = vrot.lane.b32.xlu0 %v4030_v37, %s8183_s27 }
0x2352   :  { %v9942_v39 = vpop.permute.xlu0 %4032 }
0x2353   :  { %7563 = vmatmul.mubr.msk.bf16.vlgmr.msra.gmra.mrb[44].mxu0 %vm142_vm1, %v9942_v39  ;;  %7571 = vmatmul.mubr.msk.bf16.vlgmr.msra.gmra.mrb[44].mxu1 %vm142_vm1, %v9942_v39 }
0x2354   :  { %7583 = vmatpush3.bf16.msra.mxu1 %v8088_v29  ;;  %7586 = vmatprep.mubr.msk.bf16.mxu1 %vm8182_vm0, %v11395_v45  ;;  %v8094_v29 = vld [vmem:[%s11287_s2 + $0x4] sm:$0xf] }
0x2355   :  { %7584 = vmatprep.subr.bf16.mxu1 %v11395_v45  ;;  %7575 = vmatpush3.bf16.msra.mxu0 %v8089_v0 }
0x2356   :  { %7576 = vmatprep.subr.bf16.mxu0 %v11395_v45  ;;  %7578 = vmatprep.mubr.msk.bf16.mxu0 %vm8182_vm0, %v11395_v45 }
0x2358   :  { %7585 = vmatpush3.bf16.msra.mxu1 %v8090_v36  ;;  %v8095_v36 = vld [vmem:[%s11287_s2] sm:$0xf] }
0x2359   :  { %7598 = vmatprep.subr.bf16.mxu1 %v11395_v45  ;;  %7577 = vmatpush3.bf16.msra.mxu0 %v8091_v32 }
0x235a   :  { %7590 = vmatprep.subr.bf16.mxu0 %v11395_v45 }
0x235b   :  { %7587 = vmatmul.mubr.msk.bf16.vlgmr.msra.gmra.mrb[48].mxu1 %vm142_vm1, %v9875_v27 }
0x235c   :  { %7599 = vmatpush3.bf16.msra.mxu1 %v8092_v59  ;;  %7602 = vmatprep.mubr.msk.bf16.mxu1 %vm8182_vm0, %v11395_v45 }
0x235d   :  { %7600 = vmatprep.subr.bf16.mxu1 %v11395_v45 }
0x2360   :  { %7601 = vmatpush3.bf16.msra.mxu1 %v8093_v24 }
0x2361   :  { %7614 = vmatprep.subr.bf16.mxu1 %v11395_v45 }
0x2426   :  { %v9980_v62 = vpop.f32.mrb[44].mxu0  ;;  %v9982_v27 = vpop.f32.mrb[44].mxu1 }
0x2427   :  { %v4084_v30 = vrot.slane %v9980_v62, %v8436_v4  ;;  %v7564_v33 = vpop.f32.mrb[45].mxu0  ;;  %v7572_v61 = vpop.f32.mrb[45].mxu1 }
0x2428   :  { %v4074_v48 = vpop.f32.mrb[46].mxu0  ;;  %v4818_v55 = vpop.f32.mrb[46].mxu1  ;;  %v8096_v33 = vld [vmem:[%s11288_s3] sm:$0xff] }
0x2429   :  { %v4085_v63 = vcombine.high %v4084_v30, %v4084_v30  ;;  %v4092_v15 = vrot.slane %v4084_v30, %v8436_v4  ;;  %v7565_v44 = vpop.f32.mrb[47].mxu0  ;;  %v7573_v5 = vpop.f32.mrb[47].mxu1  ;;  %v8097_v48 = vld [vmem:[%s11288_s3 + $0x8] sm:$0xf] }
0x242a   :  { %v8098_v44 = vld [vmem:[%s11288_s3 + $0x10] sm:$0xff] }
0x242b   :  { %v4103_v35 = vrot.slane %v4092_v15, %v8403_v21  ;;  %v4099_v50 = vrot.slane %v4085_v63, %v8436_v4 }
0x242d   :  { %4267 = vrot.lane.b32.xlu1 %v4103_v35, %s8183_s27  ;;  %v4107_v16 = vrot.slane %v4099_v50, %v8403_v21  ;;  %v4110_v32 = vmul.f32 %v8095_v36, %v4103_v35  ;;  %v8099_v50 = vld [vmem:[%s11288_s3 + $0x18] sm:$0xf] }
0x242e   :  { %v9991_v31 = vpop.f32.mrb[48].mxu1 }
0x242f   :  { %v9995_v28 = vadd.f32 %v9991_v31, %v11422_v58  ;;  %v7588_v56 = vpop.f32.mrb[49].mxu1  ;;  %4269 = vrot.lane.b32.xlu0 %v4107_v16, %s8183_s27  ;;  %v4111_v0 = vmul.f32 %v8094_v29, %v4107_v16  ;;  %v4112_v24 = vsel %vm11424_vm13, %v4110_v32, 0.0  ;;  %vm11425_vm13 = vmmov %vm11423_vm2 }
0x2430   :  { %v4993_v38 = vpop.f32.mrb[50].mxu1 }
0x2431   :  { %v7589_v37 = vpop.f32.mrb[51].mxu1  ;;  %v4115_v59 = vsel %vm11423_vm2, %v4111_v0, 0.0 }
0x244e   :  { %4116 = vadd.xlane.f32.xlu0 %v4115_v59 }
0x2451   :  { %4113 = vadd.xlane.f32.xlu1 %v4112_v24 }
0x2464   :  { %4119 = vperm.xlu0 %7707, %v9980_v62  }
0x2468   :  { %7710 = vset.pattern.permute.xlu0 %v11388_v3 }
0x249f   :  { %v4268_v30 = vpop.permute.xlu1 %4267 }
0x24a0   :  { %v4273_v61 = vmul.f32 %v8096_v33, %v4268_v30  ;;  %v4274_v55 = vmul.f32 %v8097_v48, %v4268_v30 }
0x24a1   :  { %v4270_v15 = vpop.permute.xlu0 %4269 }
0x24a2   :  { %v4277_v63 = vsel %vm142_vm1, %v4273_v61, 0.0  ;;  %v4275_v5 = vmul.f32 %v8098_v44, %v4270_v15  ;;  %v4280_v35 = vsel %vm11425_vm13, %v4274_v55, 0.0  ;;  %v4276_v16 = vmul.f32 %v8099_v50, %v4270_v15 }
0x24a3   :  { %4278 = vadd.xlane.f32.xlu1 %v4277_v63  ;;  %vm11443_vm13 = vcmask 1043459  }
0x24a4   :  { %v4283_v56 = vsel %vm142_vm1, %v4275_v5, 0.0  ;;  %v4286_v38 = vsel %vm11423_vm2, %v4276_v16, 0.0  ;;  %vm11444_vm2 = vmmov %vm11443_vm13 }
0x24a7   :  { %4281 = vadd.xlane.f32.xlu1 %v4280_v35 }
0x24ab   :  { %4284 = vadd.xlane.f32.xlu1 %v4283_v56 }
0x24af   :  { %4287 = vadd.xlane.f32.xlu1 %v4286_v38  ;;  %v11426_v38 = vld [vmem:[#allocation8_spill] sm:$0xff] }
0x24c0   :  { %4290 = vperm.xlu1 %7708, %v9980_v62  }
0x24c4   :  { %7709 = vset.pattern.permute.xlu1 %v11388_v3 }
0x24db   :  { %v4117_v37 = vpop.xlane.xlu0 %4116 }
0x24de   :  { %v4114_v32 = vpop.xlane.xlu1 %4113 }
0x24e3   :  { %v4120_v29 = vpop.permute.xlu0 %4119 }
0x24e4   :  { %v4124_v0 = vrot.slane %v4120_v29, %v8403_v21  ;;  %v4128_v36 = vrot.slane %v4120_v29, %v8407_v22 }
0x24e6   :  { %v4131_v59 = vadd.f32 %v4124_v0, %v4114_v32  ;;  %v4132_v24 = vadd.f32 %v4128_v36, %v4117_v37  ;;  %v11427_v0 = vld [vmem:[#allocation9_spill] sm:$0xff] }
0x24e7   :  { %v11428_v32 = vld [vmem:[#allocation13_spill] sm:$0xff] }
0x24e8   :  { %v10029_v30 = vadd.f32 %v4131_v59, %v8480_v18  ;;  %v10033_v33 = vadd.f32 %v4132_v24, %v8482_v19 }
0x24ea   :  { %4138 = vperm.xlu1 %7709, %v10029_v30  }
0x24ee   :  { %4141 = vperm.xlu1 %7709, %v10033_v33  }
0x2530   :  { %v4279_v61 = vpop.xlane.xlu1 %4278 }
0x2534   :  { %v4282_v48 = vpop.xlane.xlu1 %4281 }
0x2538   :  { %v4285_v55 = vpop.xlane.xlu1 %4284 }
0x253c   :  { %v4288_v63 = vpop.xlane.xlu1 %4287 }
0x2540   :  { %v4291_v15 = vpop.permute.xlu1 %4290 }
0x2541   :  { %v4295_v44 = vrot.slane %v4291_v15, %v8403_v21  ;;  %v4299_v29 = vrot.slane %v4291_v15, %v8407_v22 }
0x2543   :  { %v4302_v5 = vadd.f32 %v4295_v44, %v4279_v61  ;;  %v4303_v35 = vadd.f32 %v4295_v44, %v4282_v48  ;;  %v4304_v24 = vadd.f32 %v4299_v29, %v4285_v55  ;;  %v4305_v61 = vadd.f32 %v4299_v29, %v4288_v63  ;;  %v11429_v48 = vld [vmem:[#allocation17_spill] sm:$0xff]  ;;  %v11435_v63 = vld [vmem:[#allocation10_spill] sm:$0xff] }
0x2545   :  { %v10038_v50 = vadd.f32 %v4302_v5, %v8486_v23  ;;  %v10041_v16 = vadd.f32 %v4303_v35, %v8484_v20  ;;  %v11430_v5 = vld [vmem:[#allocation16_spill] sm:$0xff] }
0x2547   :  { %v4310_v56 = vadd.f32 %v10038_v50, %v8516_v51  ;;  %v4311_v37 = vadd.f32 %v10041_v16, %v11426_v38  ;;  %v4313_v36 = vadd.f32 %v10041_v16, %v11427_v0  ;;  %v4312_v59 = vadd.f32 %v10038_v50, %v11428_v32  ;;  %v11433_v0 = vld [vmem:[#allocation20_spill] sm:$0xff] }
0x2548   :  { %v4315_v44 = vadd.f32 %v10041_v16, %v11429_v48  ;;  %v4314_v35 = vadd.f32 %v10038_v50, %v11430_v5  ;;  %v11436_v5 = vld [vmem:[#allocation14_spill] sm:$0xff] }
0x2549   :  { %4343 = vperm.xlu0 %7710, %v4310_v56   ;;  %4346 = vperm.xlu1 %7709, %v4311_v37   ;;  %v11431_v56 = vld [vmem:[#allocation7_spill] sm:$0xff]  ;;  %v11432_v37 = vld [vmem:[#allocation6_spill] sm:$0xff] }
0x254a   :  { %v10057_v15 = vadd.f32 %v4304_v24, %v11431_v56  ;;  %v10060_v47 = vadd.f32 %v4305_v61, %v11432_v37  ;;  %v11437_v24 = vld [vmem:[#allocation11_spill] sm:$0xff] }
0x254c   :  { %v4319_v29 = vadd.f32 %v10060_v47, %v11435_v63  ;;  %v4321_v61 = vadd.f32 %v10060_v47, %v11437_v24  ;;  %v11441_v63 = vld [vmem:[#allocation23_spill] sm:$0xff] }
0x254d   :  { %4352 = vperm.xlu0 %7710, %v4313_v36   ;;  %4349 = vperm.xlu1 %7709, %v4312_v59   ;;  %v4317_v36 = vadd.f32 %v10041_v16, %v11433_v0  ;;  %v11434_v59 = vld [vmem:[#allocation21_spill] sm:$0xff]  ;;  %v11439_v0 = vld [vmem:[#allocation19_spill] sm:$0xff] }
0x254e   :  { %v4316_v55 = vadd.f32 %v10038_v50, %v11434_v59 }
0x2551   :  { %4358 = vperm.xlu0 %7710, %v4315_v44   ;;  %4355 = vperm.xlu1 %7709, %v4314_v35   ;;  %v4318_v44 = vadd.f32 %v10057_v15, %v11436_v5  ;;  %v11438_v35 = vld [vmem:[#allocation15_spill] sm:$0xff] }
0x2552   :  { %v4320_v37 = vadd.f32 %v10057_v15, %v11438_v35 }
0x2555   :  { %4364 = vperm.xlu0 %7710, %v4317_v36   ;;  %4361 = vperm.xlu1 %7709, %v4316_v55   ;;  %v4323_v36 = vadd.f32 %v10060_v47, %v11439_v0  ;;  %v11440_v55 = vld [vmem:[#allocation18_spill] sm:$0xff] }
0x2556   :  { %v4322_v59 = vadd.f32 %v10057_v15, %v11440_v55 }
0x2559   :  { %4370 = vperm.xlu0 %7710, %v4319_v29   ;;  %4367 = vperm.xlu1 %7709, %v4318_v44   ;;  %v4325_v29 = vadd.f32 %v10060_v47, %v11441_v63  ;;  %v11442_v44 = vld [vmem:[#allocation22_spill] sm:$0xff] }
0x255a   :  { %v4324_v5 = vadd.f32 %v10057_v15, %v11442_v44 }
0x255d   :  { %4376 = vperm.xlu0 %7710, %v4321_v61   ;;  %4373 = vperm.xlu1 %7709, %v4320_v37  }
0x2561   :  { %4382 = vperm.xlu0 %7710, %v4323_v36   ;;  %4379 = vperm.xlu1 %7709, %v4322_v59   ;;  %v8100_v59 = vld [vmem:[%s11283_s13 + $0x2] ss:$0 sm:$0xff] }
0x2562   :  { %v3801_v36 = vadd.f32 %v8100_v59, %v9928_v57 }
0x2565   :  { %4388 = vperm.xlu0 %7710, %v4325_v29   ;;  %4385 = vperm.xlu1 %7709, %v4324_v5   ;;  %v3802_v29 = vsel %vm1560_vm14, %v3801_v36, -inf }
0x2569   :  { %v4139_v24 = vpop.permute.xlu1 %4138 }
0x256a   :  { %v4146_v61 = vrot.slane %v4139_v24, %v8601_v49 }
0x256d   :  { %v4142_v35 = vpop.permute.xlu1 %4141 }
0x256e   :  { %v4150_v37 = vrot.slane %v4142_v35, %v8601_v49 }
0x2570   :  { %v4151_v0 = vsel %vm571_vm3, %v4150_v37, %v4146_v61 }
0x2571   :  { %v4153_v55 = vsel %vm574_vm4, %v4151_v0, -inf }
0x2584   :  { %4154 = vmax.xlane.f32.xlu0 %v4153_v55 }
0x2589   :  { %3803 = vmax.xlane.f32.xlu1 %v3802_v29 }
0x25c8   :  { %v4347_v5 = vpop.permute.xlu1 %4346  ;;  %v4344_v44 = vpop.permute.xlu0 %4343 }
0x25c9   :  { %v4397_v56 = vrot.slane %v4347_v5, %v8623_v60  ;;  %v4393_v48 = vrot.slane %v4344_v44, %v8601_v49 }
0x25cc   :  { %v4350_v63 = vpop.permute.xlu1 %4349  ;;  %v4353_v35 = vpop.permute.xlu0 %4352 }
0x25cd   :  { %v4402_v24 = vrot.slane %v4350_v63, %v8601_v49  ;;  %v4406_v37 = vrot.slane %v4353_v35, %v8623_v60  ;;  %v4398_v63 = vsel %vm958_vm5, %v4397_v56, %v4393_v48 }
0x25cf   :  { %v4407_v59 = vsel %vm958_vm5, %v4406_v37, %v4402_v24 }
0x25d0   :  { %v4356_v61 = vpop.permute.xlu1 %4355  ;;  %v4359_v0 = vpop.permute.xlu0 %4358  ;;  %v4462_v5 = vsel %vm571_vm3, %v4407_v59, %v4398_v63 }
0x25d1   :  { %v4411_v57 = vrot.slane %v4356_v61, %v8601_v49  ;;  %v4415_v55 = vrot.slane %v4359_v0, %v8623_v60 }
0x25d3   :  { %v4416_v29 = vsel %vm958_vm5, %v4415_v55, %v4411_v57 }
0x25d4   :  { %v4362_v32 = vpop.permute.xlu1 %4361  ;;  %v4365_v38 = vpop.permute.xlu0 %4364  ;;  %v4463_v61 = vsel %vm1024_vm6, %v4416_v29, %v4462_v5 }
0x25d5   :  { %v4420_v35 = vrot.slane %v4362_v32, %v8601_v49  ;;  %v4424_v51 = vrot.slane %v4365_v38, %v8623_v60 }
0x25d7   :  { %v4425_v44 = vsel %vm958_vm5, %v4424_v51, %v4420_v35 }
0x25d8   :  { %v4368_v20 = vpop.permute.xlu1 %4367  ;;  %v4371_v0 = vpop.permute.xlu0 %4370  ;;  %v4464_v24 = vsel %vm11443_vm13, %v4425_v44, %v4463_v61  ;;  %vm11445_vm13 = vcmask 261312  }
0x25d9   :  { %v4470_v37 = vsel %vm1033_vm8, %v4464_v24, -inf  ;;  %v4429_v59 = vrot.slane %v4368_v20, %v8601_v49  ;;  %v4433_v51 = vrot.slane %v4371_v0, %v8623_v60 }
0x25da   :  { %4471 = vmax.xlane.f32.xlu0 %v4470_v37 }
0x25db   :  { %v4434_v24 = vsel %vm958_vm5, %v4433_v51, %v4429_v59 }
0x25dc   :  { %v4374_v57 = vpop.permute.xlu1 %4373  ;;  %v4377_v55 = vpop.permute.xlu0 %4376 }
0x25dd   :  { %v4438_v48 = vrot.slane %v4374_v57, %v8601_v49  ;;  %v4442_v32 = vrot.slane %v4377_v55, %v8623_v60 }
0x25df   :  { %v4443_v35 = vsel %vm958_vm5, %v4442_v32, %v4438_v48 }
0x25e0   :  { %v4380_v38 = vpop.permute.xlu1 %4379  ;;  %v4383_v56 = vpop.permute.xlu0 %4382  ;;  %v4465_v20 = vsel %vm571_vm3, %v4443_v35, %v4434_v24 }
0x25e1   :  { %v4447_v29 = vrot.slane %v4380_v38, %v8601_v49  ;;  %v4451_v63 = vrot.slane %v4383_v56, %v8623_v60 }
0x25e3   :  { %v4452_v5 = vsel %vm958_vm5, %v4451_v63, %v4447_v29 }
0x25e4   :  { %v4386_v44 = vpop.permute.xlu1 %4385  ;;  %v4389_v61 = vpop.permute.xlu0 %4388  ;;  %v4466_v55 = vsel %vm1024_vm6, %v4452_v5, %v4465_v20 }
0x25e5   :  { %v4456_v37 = vrot.slane %v4386_v44, %v8601_v49  ;;  %v4460_v57 = vrot.slane %v4389_v61, %v8623_v60 }
0x25e7   :  { %v4461_v0 = vsel %vm958_vm5, %v4460_v57, %v4456_v37 }
0x25e8   :  { %v4467_v38 = vsel %vm11444_vm2, %v4461_v0, %v4466_v55  ;;  %vm11446_vm2 = vmmov %vm11445_vm13 }
0x25e9   :  { %v4473_v48 = vsel %vm1033_vm8, %v4467_v38, -inf  ;;  %v4213_v38 = vrot.slane %v8315_v10, 6  ;;  %v3828_v10 = vrot.slane %v9840_v2, %v9200_v42 }
0x25ea   :  { %4474 = vmax.xlane.f32.xlu1 %v4473_v48 }
0x2611   :  { %v4155_v32 = vpop.xlane.xlu0 %4154 }
0x2612   :  { %v4160_v56 = vrot.slane %v4155_v32, %v8403_v21  ;;  %v4164_v61 = vrot.slane %v4155_v32, %v8407_v22 }
0x2614   :  { %v4167_v59 = vsub.f32 %v10029_v30, %v4160_v56  ;;  %v4168_v37 = vsub.f32 %v10033_v33, %v4164_v61  ;;  %v3832_v56 = vrot.slane %v9844_v14, %v9197_v54 }
0x2616   :  { %v4169_v51 = vmul.f32 1.442695, %v4167_v59  ;;  %v3804_v29 = vpop.xlane.xlu1 %3803  ;;  %v4171_v57 = vmul.f32 1.442695, %v4168_v37  ;;  %v3819_v37 = vrot.slane %v9817_v25, %v9200_v42  ;;  %v3833_v14 = vsel %vm1584_vm15, %v3832_v56, %v3828_v10 }
0x2617   :  { %v3805_v63 = vsub.f32 %v3801_v36, %v3804_v29 }
0x2618   :  { %7882 = vpow2.f32 %v4169_v51 }
0x2619   :  { %v3806_v44 = vmul.f32 1.442695, %v3805_v63 }
0x261b   :  { %7884 = vpow2.f32 %v3806_v44  ;;  %v3823_v44 = vrot.slane %v9819_v11, %v9197_v54 }
0x261c   :  { %7886 = vpow2.f32 %v4171_v57 }
0x2622   :  { %v10125_v35 = vpop.eup %7882 }
0x2623   :  { %4176 = vperm.xlu1 %7709, %v10125_v35  }
0x2625   :  { %v7885_v5 = vpop.eup %7884 }
0x2626   :  { %v3808_v24 = vsel %vm1560_vm14, %v7885_v5, 0.0  ;;  %v10131_v30 = vpop.eup %7886 }
0x2627   :  { %3809 = vadd.xlane.f32.xlu0 %v3808_v24 }
0x263d   :  { %4179 = vperm.xlu0 %7710, %v10131_v30  }
0x2667   :  { %v4472_v36 = vpop.xlane.xlu0 %4471 }
0x2668   :  { %v4476_v20 = vmul.f32 %v4472_v36, %v8669_v12  ;;  %v3824_v36 = vsel %vm1584_vm15, %v3823_v44, %v3819_v37  ;;  %v10191_v44 = vld [vmem:[%s11291_s5 + $0x18] sm:$0xf] }
0x266a   :  { %4481 = vperm.xlu1 %7709, %v4476_v20   ;;  %v3834_v20 = vsel %vm571_vm3, %v3833_v14, %v3824_v36 }
0x2677   :  { %v4475_v0 = vpop.xlane.xlu1 %4474 }
0x2678   :  { %v4477_v55 = vmul.f32 %v4475_v0, %v8672_v7  ;;  %v10169_v0 = vld [vmem:[%s11291_s5] sm:$0xff] }
0x267a   :  { %4484 = vperm.xlu1 %7709, %v4477_v55  }
0x267e   :  { %4214 = vrot.lane.b32.xlu1 %v4213_v38, %s8185_s1 }
0x26a2   :  { %v4177_v33 = vpop.permute.xlu1 %4176 }
0x26a3   :  { %v4184_v59 = vrot.slane %v4177_v33, %v8601_v49 }
0x26b4   :  { %v3810_v48 = vpop.xlane.xlu0 %3809 }
0x26b5   :  { %7888 = vlog2.f32 %v3810_v48  ;;  %v10176_v48 = vld [vmem:[%s11291_s5 + $0x8] sm:$0xf] }
0x26bc   :  { %v4180_v32 = vpop.permute.xlu0 %4179 }
0x26bd   :  { %v4188_v51 = vrot.slane %v4180_v32, %v8601_v49 }
0x26bf   :  { %v7889_v29 = vpop.eup %7888  ;;  %v4189_v5 = vsel %vm571_vm3, %v4188_v51, %v4184_v59  ;;  %v10184_v59 = vld [vmem:[%s11291_s5 + $0x10] sm:$0xff] }
0x26c0   :  { %v3812_v61 = vmul.f32 0.6931472, %v7889_v29  ;;  %v4191_v24 = vsel %vm574_vm4, %v4189_v5, 0.0 }
0x26c1   :  { %4192 = vadd.xlane.f32.xlu1 %v4191_v24 }
0x26c2   :  { %v3813_v57 = vsub.f32 %v3805_v63, %v3812_v61 }
0x26c4   :  { %v4209_v11 = vmul.f32 %v3813_v57, %v9192_v41  ;;  %7232 = vst.msk [vmem:[%s11294_s14 + $0x4] sm:$0x3] %vm1560_vm14, %v3813_v57 }
0x26c5   :  { %7233 = vst.msk [vmem:[%s11294_s14 + $0x4] sm:$0x3] %vm1597_vm7, %v3834_v20 }
0x26c6   :  { %v4210_v25 = vsel %vm1560_vm14, %v4209_v11, 0.0 }
0x26c7   :  { %4211 = vadd.xlane.f32.xlu0 %v4210_v25 }
0x26dd   :  { %4218 = vrot.lane.b32.xlu0 %v9980_v62, %s8192_s30 }
0x26e9   :  { %v4482_v2 = vpop.permute.xlu1 %4481 }
0x26ea   :  { %v4489_v63 = vrot.slane %v4482_v2, %v8601_v49 }
0x26ec   :  { %v4510_v55 = vmul.f32 %v10169_v0, %v4489_v63  ;;  %v4511_v33 = vmul.f32 %v10176_v48, %v4489_v63 }
0x26ee   :  { %v4514_v38 = vsel %vm1099_vm10, %v4510_v55, 0.0  ;;  %v4517_v62 = vsel %vm1103_vm9, %v4511_v33, 0.0 }
0x26ef   :  { %4515 = vadd.xlane.f32.xlu1 %v4514_v38 }
0x26f3   :  { %4518 = vadd.xlane.f32.xlu1 %v4517_v62 }
0x26f9   :  { %v4485_v32 = vpop.permute.xlu1 %4484 }
0x26fa   :  { %v4493_v56 = vrot.slane %v4485_v32, %v8601_v49 }
0x26fc   :  { %v4512_v51 = vmul.f32 %v10184_v59, %v4493_v56  ;;  %v4513_v10 = vmul.f32 %v10191_v44, %v4493_v56 }
0x26fd   :  { %v4215_v61 = vpop.permute.xlu1 %4214 }
0x26fe   :  { %v4520_v29 = vsel %vm1099_vm10, %v4512_v51, 0.0  ;;  %v4523_v5 = vsel %vm1103_vm9, %v4513_v10, 0.0 }
0x26ff   :  { %4521 = vadd.xlane.f32.xlu1 %v4520_v29 }
0x2703   :  { %4524 = vadd.xlane.f32.xlu1 %v4523_v5 }
0x274e   :  { %v4193_v24 = vpop.xlane.xlu1 %4192 }
0x274f   :  { %v4198_v37 = vrot.slane %v4193_v24, %v8403_v21  ;;  %v4202_v14 = vrot.slane %v4193_v24, %v8407_v22 }
0x2751   :  { %7890 = vrcp.f32 %v4198_v37 }
0x2752   :  { %7892 = vrcp.f32 %v4202_v14 }
0x2754   :  { %v4212_v57 = vpop.xlane.xlu0 %4211 }
0x2755   :  { %v4217_v36 = vadd.f32 %v4215_v61, %v4212_v57 }
0x2758   :  { %v4219_v20 = vpop.permute.xlu0 %4218 }
0x2759   :  { %v4221_v11 = vadd.f32 %v4219_v20, %v4217_v36 }
0x275b   :  { %v7891_v25 = vpop.eup %7890  ;;  %v4222_v2 = vadd.f32 %v4221_v11, %v9259_v1  ;;  %v11459_v1 = vld [vmem:[#allocation20_spill] sm:$0xff] }
0x275c   :  { %v7893_v63 = vpop.eup %7892  ;;  %v4206_v55 = vmul.f32 %v7891_v25, %v10125_v35 }
0x275d   :  { %v7241_v38 = vmul.f32 -1.442695, %v4222_v2  ;;  %v4208_v33 = vmul.f32 %v7893_v63, %v10131_v30 }
0x275e   :  { %4238 = vperm.xlu0 %7710, %v4206_v55  }
0x275f   :  { %7894 = vpow2.f32 %v7241_v38  ;;  %4241 = vperm.xlu1 %7709, %v4208_v33  }
0x2769   :  { %v7895_v62 = vpop.eup %7894 }
0x276a   :  { %v4226_v32 = vadd.f32 1.0, %v7895_v62 }
0x276c   :  { %7896 = vrcp.f32 %v4226_v32 }
0x2776   :  { %v7897_v56 = vpop.eup %7896 }
0x2777   :  { %v4229_v51 = vsub.f32 1.0, %v7897_v56 }
0x2779   :  { %4232 = vperm.xlu0 %7710, %v4229_v51  }
0x277c   :  { %v4516_v29 = vpop.xlane.xlu1 %4515 }
0x277d   :  { %v4526_v10 = vsub.f32 %v10038_v50, %v4516_v29  ;;  %4256 = vperm.xlu0 %7710, %v7897_v56  }
0x277f   :  { %v4530_v5 = vmul.f32 1.442695, %v4526_v10 }
0x2780   :  { %v4519_v61 = vpop.xlane.xlu1 %4518 }
0x2781   :  { %7898 = vpow2.f32 %v4530_v5  ;;  %v4527_v35 = vsub.f32 %v10041_v16, %v4519_v61 }
0x2783   :  { %v4532_v24 = vmul.f32 1.442695, %v4527_v35 }
0x2785   :  { %7900 = vpow2.f32 %v4532_v24 }
0x278b   :  { %v7899_v30 = vpop.eup %7898 }
0x278c   :  { %v4522_v37 = vpop.xlane.xlu1 %4521  ;;  %v10203_v14 = vmul.f32 %v7899_v30, %v11398_v26 }
0x278d   :  { %v4528_v57 = vsub.f32 %v10057_v15, %v4522_v37 }
0x278e   :  { %4547 = vperm.xlu0 %7710, %v10203_v14  }
0x278f   :  { %v7901_v36 = vpop.eup %7900  ;;  %v4534_v20 = vmul.f32 1.442695, %v4528_v57 }
0x2790   :  { %v4525_v50 = vpop.xlane.xlu1 %4524  ;;  %v10208_v11 = vmul.f32 %v7901_v36, %v8733_v43  ;;  %v8105_v36 = vld [vmem:[%s11292_s6] sm:$0xf] }
0x2791   :  { %7902 = vpow2.f32 %v4534_v20  ;;  %v4529_v16 = vsub.f32 %v10060_v47, %v4525_v50 }
0x2792   :  { %4550 = vperm.xlu0 %7710, %v10208_v11  }
0x2793   :  { %v4536_v25 = vmul.f32 1.442695, %v4529_v16 }
0x2795   :  { %7904 = vpow2.f32 %v4536_v25 }
0x279b   :  { %v7903_v2 = vpop.eup %7902 }
0x279c   :  { %v10213_v63 = vmul.f32 %v7903_v2, %v11400_v13 }
0x279e   :  { %4553 = vperm.xlu0 %7710, %v10213_v63  }
0x279f   :  { %v7905_v15 = vpop.eup %7904 }
0x27a0   :  { %v10217_v55 = vmul.f32 %v7905_v15, %v11399_v8 }
0x27a2   :  { %4556 = vperm.xlu1 %7709, %v10217_v55  }
0x27dd   :  { %v4239_v38 = vpop.permute.xlu0 %4238 }
0x27de   :  { %v4242_v33 = vpop.permute.xlu1 %4241  ;;  %v4246_v62 = vrot.slane %v4239_v38, %v8601_v49 }
0x27df   :  { %v4250_v47 = vrot.slane %v4242_v33, %v8601_v49  ;;  %v8106_v33 = vld [vmem:[%s11292_s6 + $0x4] sm:$0xf] }
0x27e1   :  { %v4251_v56 = vsel %vm571_vm3, %v4250_v47, %v4246_v62 }
0x27f8   :  { %v4233_v32 = vpop.permute.xlu0 %4232 }
0x27f9   :  { %v4253_v29 = vmul.f32 %v4251_v56, %v4233_v32  ;;  %v5005_v32 = vadd.f32 %v9991_v31, %v11402_v34 }
0x27fc   :  { %v4257_v51 = vpop.permute.xlu0 %4256 }
0x27fd   :  { %v4259_v10 = vmul.f32 %v4257_v51, %v9776_v46 }
0x27ff   :  { %v4260_v5 = vadd.f32 %v4259_v10, %v4253_v29 }
0x2801   :  { %v4261_v61 = vsel %vm574_vm4, %v4260_v5, 0.0 }
0x2802   :  { %4262 = vadd.xlane.f32.xlu0 %v4261_v61 }
0x280d   :  { %v4548_v35 = vpop.permute.xlu0 %4547 }
0x280e   :  { %v4561_v30 = vrot.slane %v4548_v35, %v8601_v49 }
0x2811   :  { %v4551_v24 = vpop.permute.xlu0 %4550 }
0x2812   :  { %v4565_v37 = vrot.slane %v4551_v24, %v8623_v60 }
0x2814   :  { %v4566_v57 = vsel %vm958_vm5, %v4565_v37, %v4561_v30 }
0x2815   :  { %v4582_v20 = vmul.f32 %v8105_v36, %v4566_v57 }
0x2817   :  { %v4584_v50 = vsel %vm1033_vm8, %v4582_v20, 0.0 }
0x2818   :  { %4585 = vadd.xlane.f32.xlu1 %v4584_v50 }
0x281d   :  { %v4554_v16 = vpop.permute.xlu0 %4553 }
0x281e   :  { %v4570_v2 = vrot.slane %v4554_v16, %v8601_v49 }
0x2821   :  { %v4557_v25 = vpop.permute.xlu1 %4556 }
0x2822   :  { %v4574_v15 = vrot.slane %v4557_v25, %v8623_v60 }
0x2824   :  { %v4575_v38 = vsel %vm958_vm5, %v4574_v15, %v4570_v2  ;;  %v8107_v2 = vld [vmem:[%s11283_s13] ss:$0 sm:$0xff] }
0x2825   :  { %v4583_v47 = vmul.f32 %v8106_v33, %v4575_v38  ;;  %v4997_v15 = vadd.f32 %v8107_v2, %v9995_v28 }
0x2827   :  { %v4587_v62 = vsel %vm1033_vm8, %v4583_v47, 0.0 }
0x2828   :  { %4588 = vadd.xlane.f32.xlu0 %v4587_v62  ;;  %v7248_v62 = vmul.f32 -1.442695, %v4997_v15 }
0x283e   :  { %5007 = vrot.lane.b32.xlu0 %v5005_v32, %s8184_s0 }
0x288f   :  { %v4263_v56 = vpop.xlane.xlu0 %4262 }
0x2890   :  { %v4264_v51 = vadd.f32 1e-20, %v4263_v56 }
0x2892   :  { %7906 = vrcp.f32 %v4264_v51 }
0x2893   :  { %7908 = vpow2.f32 %v7248_v62 }
0x289c   :  { %v7907_v29 = vpop.eup %7906 }
0x289d   :  { %v10242_v10 = vmul.f32 %v7907_v29, %v4260_v5 }
0x289f   :  { %v4651_v61 = vrot.slane %v10242_v10, %v8436_v4 }
0x28a1   :  { %v4652_v35 = vcombine.high %v4651_v61, %v4651_v61  ;;  %v4659_v33 = vrot.slane %v4651_v61, %v8436_v4 }
0x28a3   :  { %v4666_v24 = vrot.slane %v4652_v35, %v8436_v4  ;;  %v4670_v51 = vrot.slane %v4659_v33, %v8403_v21 }
0x28a5   :  { %v4586_v30 = vpop.xlane.xlu1 %4585  ;;  %v4674_v37 = vrot.slane %v4666_v24, %v8403_v21  ;;  %v4677_v35 = vmul.f32 %v10169_v0, %v4670_v51  ;;  %v4678_v61 = vmul.f32 %v10176_v48, %v4670_v51 }
0x28a6   :  { %v4595_v57 = vrot.slane %v4586_v30, %v8601_v49  ;;  %v7909_v30 = vpop.eup %7908 }
0x28a7   :  { %v4679_v31 = vmul.f32 %v10184_v59, %v4674_v37  ;;  %v4681_v28 = vsel %vm1099_vm10, %v4677_v35, 0.0  ;;  %v4680_v24 = vmul.f32 %v10191_v44, %v4674_v37 }
0x28a8   :  { %v4616_v36 = vmul.f32 %v10169_v0, %v4595_v57  ;;  %v4617_v50 = vmul.f32 %v10176_v48, %v4595_v57 }
0x28a9   :  { %v4687_v20 = vsel %vm1099_vm10, %v4679_v31, 0.0  ;;  %v4690_v57 = vsel %vm1103_vm9, %v4680_v24, 0.0  ;;  %v5001_v31 = vadd.f32 1.0, %v7909_v30 }
0x28aa   :  { %4688 = vadd.xlane.f32.xlu0 %v4687_v20  ;;  %v4620_v5 = vsel %vm1099_vm10, %v4616_v36, 0.0  ;;  %v4623_v16 = vsel %vm1103_vm9, %v4617_v50, 0.0 }
0x28ab   :  { %4621 = vadd.xlane.f32.xlu1 %v4620_v5  ;;  %7910 = vrcp.f32 %v5001_v31 }
0x28af   :  { %4624 = vadd.xlane.f32.xlu1 %v4623_v16 }
0x28b5   :  { %v4589_v25 = vpop.xlane.xlu0 %4588  ;;  %v10272_v20 = vpop.eup %7910 }
0x28b6   :  { %v4599_v38 = vrot.slane %v4589_v25, %v8601_v49 }
0x28b8   :  { %v4618_v47 = vmul.f32 %v10184_v59, %v4599_v38  ;;  %v4619_v56 = vmul.f32 %v10191_v44, %v4599_v38  ;;  %v4684_v59 = vsel %vm1103_vm9, %v4678_v61, 0.0 }
0x28b9   :  { %v5008_v36 = vpop.permute.xlu0 %5007 }
0x28ba   :  { %v4626_v32 = vsel %vm1099_vm10, %v4618_v47, 0.0  ;;  %v4629_v29 = vsel %vm1103_vm9, %v4619_v56, 0.0  ;;  %v5010_v0 = vmul.f32 %v10272_v20, %v5008_v36 }
0x28bb   :  { %4627 = vadd.xlane.f32.xlu1 %v4626_v32 }
0x28bf   :  { %4630 = vadd.xlane.f32.xlu1 %v4629_v29 }
0x28c3   :  { %4682 = vadd.xlane.f32.xlu1 %v4681_v28 }
0x28c7   :  { %4685 = vadd.xlane.f32.xlu1 %v4684_v59 }
0x28cb   :  { %4691 = vadd.xlane.f32.xlu1 %v4690_v57 }
0x28dc   :  { %5012 = vrot.lane.b32.xlu1 %v5010_v0, %s8184_s0 }
0x2937   :  { %v4689_v61 = vpop.xlane.xlu0 %4688 }
0x2938   :  { %v4622_v48 = vpop.xlane.xlu1 %4621 }
0x2939   :  { %v4632_v5 = vmax.f32 %v4622_v48, 1e-20 }
0x293b   :  { %7912 = vrcp.f32 %v4632_v5 }
0x293c   :  { %v4625_v50 = vpop.xlane.xlu1 %4624 }
0x293d   :  { %v4633_v16 = vmax.f32 %v4625_v50, 1e-20  ;;  %v8108_v50 = vld [vmem:[%s11293_s4] sm:$0xff] }
0x293f   :  { %7914 = vrcp.f32 %v4633_v16 }
0x2945   :  { %v7913_v25 = vpop.eup %7912 }
0x2946   :  { %v4637_v33 = vmul.f32 %v7913_v25, %v10203_v14  ;;  %v10281_v14 = vadd.f32 %v8107_v2, %v11422_v58 }
0x2948   :  { %v4628_v44 = vpop.xlane.xlu1 %4627 }
0x2949   :  { %v4634_v37 = vmax.f32 %v4628_v44, 1e-20  ;;  %v7915_v47 = vpop.eup %7914  ;;  %v8109_v44 = vld [vmem:[%s11293_s4 + $0x8] sm:$0xff] }
0x294a   :  { %v4639_v56 = vmul.f32 %v7915_v47, %v10208_v11 }
0x294b   :  { %7916 = vrcp.f32 %v4634_v37 }
0x294c   :  { %v4631_v15 = vpop.xlane.xlu1 %4630 }
0x294d   :  { %v4635_v38 = vmax.f32 %v4631_v15, 1e-20 }
0x294f   :  { %7918 = vrcp.f32 %v4635_v38 }
0x2950   :  { %v4683_v62 = vpop.xlane.xlu1 %4682 }
0x2951   :  { %v4693_v32 = vmul.f32 %v4683_v62, %v4637_v33  ;;  %v8110_v33 = vld [vmem:[%s11293_s4 + $0x18] sm:$0xff]  ;;  %v8111_v62 = vld [vmem:[%s11293_s4 + $0x10] sm:$0xff] }
0x2953   :  { %4702 = vperm.xlu1 %7709, %v4693_v32  }
0x2954   :  { %v4686_v51 = vpop.xlane.xlu1 %4685 }
0x2955   :  { %v7917_v29 = vpop.eup %7916  ;;  %v4694_v35 = vmul.f32 %v4686_v51, %v4639_v56 }
0x2956   :  { %v4641_v28 = vmul.f32 %v7917_v29, %v10213_v63 }
0x2957   :  { %4705 = vperm.xlu1 %7709, %v4694_v35  }
0x2958   :  { %v4692_v59 = vpop.xlane.xlu1 %4691  ;;  %v4695_v24 = vmul.f32 %v4689_v61, %v4641_v28 }
0x2959   :  { %v7919_v30 = vpop.eup %7918 }
0x295a   :  { %v4643_v57 = vmul.f32 %v7919_v30, %v10217_v55  ;;  %4708 = vperm.xlu0 %7710, %v4695_v24   ;;  %v8113_v30 = vld [vmem:[%s11293_s4 + $0x20] sm:$0xff] }
0x295c   :  { %v4696_v31 = vmul.f32 %v4692_v59, %v4643_v57  ;;  %v5013_v36 = vpop.permute.xlu1 %5012  ;;  %v8112_v59 = vld [vmem:[%s11293_s4 + $0x30] sm:$0xff] }
0x295d   :  { %v5015_v11 = vadd.f32 %v5013_v36, %v10281_v14 }
0x295e   :  { %4711 = vperm.xlu1 %7709, %v4696_v31   ;;  %7711 = vset.pattern.permute.xlu0 %v11420_v52 }
0x295f   :  { %7920 = vtanh.f32 %v5015_v11  ;;  %v8114_v11 = vld [vmem:[%s11293_s4 + $0x28] sm:$0xff] }
0x2962   :  { %7712 = vset.pattern.permute.xlu1 %v11406_v9 }
0x2969   :  { %v7921_v63 = vpop.eup %7920 }
0x296a   :  { %5019 = vrot.lane.b32.xlu1 %v7921_v63, %s8183_s27 }
0x29d2   :  { %v10287_v0 = vpop.permute.xlu1 %4702 }
0x29d3   :  { %v4716_v2 = vrot.slane %v10287_v0, %v8601_v49 }
0x29d6   :  { %v10289_v55 = vpop.permute.xlu1 %4705 }
0x29d7   :  { %v4720_v48 = vrot.slane %v10289_v55, %v8623_v60 }
0x29d9   :  { %v4721_v5 = vsel %vm958_vm5, %v4720_v48, %v4716_v2  ;;  %v10302_v25 = vpop.permute.xlu0 %4708  ;;  %v8115_v48 = vld [vmem:[%s11293_s4 + $0x38] sm:$0xff] }
0x29da   :  { %v4745_v16 = vmul.f32 %v8108_v50, %v4721_v5  ;;  %v4746_v37 = vmul.f32 %v8109_v44, %v4721_v5  ;;  %v4748_v47 = vmul.f32 %v8110_v33, %v4721_v5  ;;  %v4747_v32 = vmul.f32 %v8111_v62, %v4721_v5 }
0x29db   :  { %v4725_v51 = vrot.slane %v10302_v25, %v8601_v49  ;;  %v5017_v44 = vsub.f32 1.0, %v10272_v20 }
0x29dc   :  { %v4753_v15 = vsel %vm1367_vm11, %v4745_v16, 0.0  ;;  %v4756_v38 = vsel %vm1367_vm11, %v4746_v37, 0.0  ;;  %v4762_v35 = vsel %vm1367_vm11, %v4748_v47, 0.0  ;;  %v4759_v28 = vsel %vm1367_vm11, %v4747_v32, 0.0 }
0x29dd   :  { %4754 = vadd.xlane.f32.xlu1 %v4753_v15  ;;  %v10312_v56 = vpop.permute.xlu1 %4711  ;;  %4757 = vadd.xlane.f32.xlu0 %v4756_v38  ;;  %v5024_v37 = vrot.slane %v9869_v40, 6 }
0x29de   :  { %v4729_v29 = vrot.slane %v10312_v56, %v8623_v60 }
0x29df   :  { %v5026_v38 = vmul.f32 %v10272_v20, %v5024_v37 }
0x29e0   :  { %v4730_v61 = vsel %vm958_vm5, %v4729_v29, %v4725_v51 }
0x29e1   :  { %4763 = vadd.xlane.f32.xlu1 %v4762_v35  ;;  %4760 = vadd.xlane.f32.xlu0 %v4759_v28  ;;  %v4751_v24 = vmul.f32 %v8112_v59, %v4730_v61  ;;  %v4749_v57 = vmul.f32 %v8113_v30, %v4730_v61  ;;  %v4750_v63 = vmul.f32 %v8114_v11, %v4730_v61  ;;  %v5020_v16 = vpop.permute.xlu1 %5019 }
0x29e2   :  { %v4752_v5 = vmul.f32 %v8115_v48, %v4730_v61  ;;  %v5022_v15 = vmul.f32 %v5020_v16, %v5017_v44 }
0x29e3   :  { %v4771_v31 = vsel %vm1367_vm11, %v4751_v24, 0.0  ;;  %v4765_v36 = vsel %vm1367_vm11, %v4749_v57, 0.0  ;;  %v4768_v2 = vsel %vm1367_vm11, %v4750_v63, 0.0 }
0x29e4   :  { %v4774_v50 = vsel %vm1367_vm11, %v4752_v5, 0.0  ;;  %v10340_v33 = vadd.f32 %v5026_v38, %v5022_v15  ;;  %v8117_v38 = vld [vmem:[%s11280_s12 + $0x68] sm:$0xff]  }
0x29e5   :  { %4772 = vadd.xlane.f32.xlu0 %v4771_v31  ;;  %4766 = vadd.xlane.f32.xlu1 %v4765_v36  ;;  %v8116_v36 = vld [vmem:[%s11280_s12 + $0x60] sm:$0xff]  }
0x29e6   :  { %v5028_v47 = vpack.c.bf16 %v10340_v33, %v10340_v33 }
0x29e9   :  { %4769 = vadd.xlane.f32.xlu1 %v4768_v2 }
0x29ed   :  { %4775 = vadd.xlane.f32.xlu1 %v4774_v50 }
0x29fb   :  { %5070 = vrot.lane.b32.xlu0 %v5028_v47, %s8183_s27 }
0x2a6a   :  { %v4755_v62 = vpop.xlane.xlu1 %4754  ;;  %v4758_v32 = vpop.xlane.xlu0 %4757 }
0x2a6b   :  { %v4777_v35 = vpack.c.bf16 %v4758_v32, %v4755_v62 }
0x2a6d   :  { %v4825_v24 = vunpack.c.l.b16 %v4777_v35  ;;  %v4826_v40 = vunpack.c.h.b16 %v4777_v35 }
0x2a6e   :  { %v4764_v51 = vpop.xlane.xlu1 %4763  ;;  %v4761_v29 = vpop.xlane.xlu0 %4760 }
0x2a6f   :  { %v4778_v59 = vpack.c.bf16 %v4764_v51, %v4761_v29  ;;  %v4836_v2 = vrot.slane %v4825_v24, %v8601_v49  ;;  %v4840_v48 = vrot.slane %v4826_v40, %v8623_v60 }
0x2a71   :  { %v4827_v20 = vunpack.c.l.b16 %v4778_v59  ;;  %v4828_v5 = vunpack.c.h.b16 %v4778_v59  ;;  %v4841_v32 = vsel %vm958_vm5, %v4840_v48, %v4836_v2 }
0x2a72   :  { %v4767_v28 = vpop.xlane.xlu1 %4766  ;;  %v4773_v61 = vpop.xlane.xlu0 %4772 }
0x2a73   :  { %v4845_v16 = vrot.slane %v4827_v20, %v8897_v6  ;;  %v4850_v51 = vrot.slane %v4828_v5, %v8902_v53 }
0x2a75   :  { %v4846_v29 = vsel %vm1474_vm12, %v4845_v16, %v4841_v32 }
0x2a76   :  { %v4770_v30 = vpop.xlane.xlu1 %4769  ;;  %v10345_v57 = vpop.permute.xlu0 %5070  ;;  %v4851_v24 = vsel %vm11445_vm13, %v4850_v51, %v4846_v29  ;;  %v8122_v51 = vld [vmem:[%s11283_s13 + $0x1] ss:$0 sm:$0xff]  ;;  %vm11447_vm13 = vcmask 257024  }
0x2a77   :  { %v4779_v31 = vpack.c.bf16 %v4770_v30, %v4767_v28  ;;  %7603 = vmatmul.mubr.msk.bf16.vlgmr.msra.gmra.mrb[52].mxu1 %vm142_vm1, %v10345_v57 }
0x2a78   :  { %7615 = vmatpush3.bf16.msra.mxu1 %v8116_v36  ;;  %7618 = vmatprep.mubr.msk.bf16.mxu1 %vm8182_vm0, %v11395_v45  ;;  %v8119_v36 = vld [vmem:[%s11280_s12 + $0x38] sm:$0xff]  }
0x2a79   :  { %v4829_v11 = vunpack.c.l.b16 %v4779_v31  ;;  %v4830_v63 = vunpack.c.h.b16 %v4779_v31  ;;  %7616 = vmatprep.subr.bf16.mxu1 %v11395_v45  ;;  %v8118_v31 = vld [vmem:[%s11280_s12 + $0x30] sm:$0xff]  }
0x2a7a   :  { %v4776_v50 = vpop.xlane.xlu1 %4775 }
0x2a7b   :  { %v4780_v44 = vpack.c.bf16 %v4776_v50, %v4773_v61  ;;  %v4855_v37 = vrot.slane %v4829_v11, %v8601_v49  ;;  %v4859_v15 = vrot.slane %v4830_v63, %v8623_v60  ;;  %v8120_v11 = vld [vmem:[%s11280_s12 + $0x40] sm:$0xff]   ;;  %v8121_v63 = vld [vmem:[%s11280_s12 + $0x48] sm:$0xff]  }
0x2a7c   :  { %7617 = vmatpush3.bf16.msra.mxu1 %v8117_v38 }
0x2a7d   :  { %v4831_v47 = vunpack.c.l.b16 %v4780_v44  ;;  %v4832_v62 = vunpack.c.h.b16 %v4780_v44  ;;  %7630 = vmatprep.subr.bf16.mxu1 %v11395_v45  ;;  %v4860_v61 = vsel %vm958_vm5, %v4859_v15, %v4855_v37 }
0x2a7f   :  { %v4864_v35 = vrot.slane %v4831_v47, %v8897_v6  ;;  %v4869_v28 = vrot.slane %v4832_v62, %v8902_v53 }
0x2a81   :  { %v4865_v59 = vsel %vm1474_vm12, %v4864_v35, %v4860_v61 }
0x2a82   :  { %v4870_v40 = vsel %vm11446_vm2, %v4869_v28, %v4865_v59  ;;  %vm11448_vm2 = vmmov %vm11447_vm13 }
0x2a83   :  { %v4871_v30 = vsel %vm571_vm3, %v4870_v40, %v4851_v24 }
0x2a84   :  { %v4872_v20 = vpack.c.b16 %v4871_v30, %v4871_v30 }
0x2a86   :  { %7579 = vmatmul.mubr.msk.bf16.vlgmr.msra.gmra.mrb[48].mxu0 %vm142_vm1, %v4872_v20 }
0x2a87   :  { %7591 = vmatpush3.bf16.msra.mxu0 %v8118_v31  ;;  %7594 = vmatprep.mubr.msk.bf16.mxu0 %vm8182_vm0, %v11395_v45 }
0x2a88   :  { %7592 = vmatprep.subr.bf16.mxu0 %v11395_v45 }
0x2a8b   :  { %7593 = vmatpush3.bf16.msra.mxu0 %v8119_v36 }
0x2a8c   :  { %7606 = vmatprep.subr.bf16.mxu0 %v11395_v45 }
0x2a8e   :  { %7595 = vmatmul.mubr.msk.bf16.vlgmr.msra.gmra.mrb[52].mxu0 %vm142_vm1, %v9942_v39 }
0x2a8f   :  { %7607 = vmatpush3.bf16.msra.mxu0 %v8120_v11  ;;  %7610 = vmatprep.mubr.msk.bf16.mxu0 %vm8182_vm0, %v11395_v45 }
0x2a90   :  { %7608 = vmatprep.subr.bf16.mxu0 %v11395_v45 }
0x2a93   :  { %7609 = vmatpush3.bf16.msra.mxu0 %v8121_v63 }
0x2a94   :  { %7622 = vmatprep.subr.bf16.mxu0 %v11395_v45 }
0x2b4a   :  { %v5109_v2 = vpop.f32.mrb[52].mxu1 }
0x2b4b   :  { %v7604_v48 = vpop.f32.mrb[53].mxu1 }
0x2b4c   :  { %v5112_v39 = vpop.f32.mrb[54].mxu1 }
0x2b4d   :  { %v7605_v5 = vpop.f32.mrb[55].mxu1 }
0x2b59   :  { %v4910_v50 = vpop.f32.mrb[48].mxu0 }
0x2b5a   :  { %v10398_v16 = vadd.f32 %v4910_v50, %v9982_v27  ;;  %v7580_v44 = vpop.f32.mrb[49].mxu0  ;;  %v8124_v50 = vld [vmem:[%s11280_s12 + $0x50] sm:$0xff]  }
0x2b5b   :  { %v4913_v37 = vpop.f32.mrb[50].mxu0  ;;  %v8125_v44 = vld [vmem:[%s11280_s12 + $0x18] sm:$0xff]  }
0x2b5c   :  { %v7581_v15 = vpop.f32.mrb[51].mxu0  ;;  %v8126_v37 = vld [vmem:[%s11280_s12 + $0x58] sm:$0xff]  }
0x2b5d   :  { %v8127_v15 = vld [vmem:[%s11280_s12 + $0x20] sm:$0xff]  }
0x2b61   :  { %v5063_v38 = vpop.f32.mrb[52].mxu0 }
0x2b62   :  { %v5110_v47 = vadd.f32 %v5109_v2, %v5063_v38  ;;  %v7596_v62 = vpop.f32.mrb[53].mxu0  ;;  %v8128_v38 = vld [vmem:[%s11280_s12 + $0x28] sm:$0xff]  }
0x2b63   :  { %v5066_v32 = vpop.f32.mrb[54].mxu0 }
0x2b64   :  { %v5115_v29 = vadd.f32 %v8122_v51, %v5110_v47  ;;  %v7597_v35 = vpop.f32.mrb[55].mxu0 }
0x2b66   :  { %5123 = vrot.lane.b32.xlu1 %v5115_v29, %s8185_s1  ;;  %v7251_v28 = vmul.f32 -1.442695, %v5115_v29 }
0x2b68   :  { %7922 = vpow2.f32 %v7251_v28 }
0x2b72   :  { %v7923_v61 = vpop.eup %7922 }
0x2b73   :  { %v5119_v27 = vadd.f32 1.0, %v7923_v61 }
0x2b75   :  { %7924 = vrcp.f32 %v5119_v27 }
0x2b7f   :  { %v7925_v59 = vpop.eup %7924 }
0x2b80   :  { %v5133_v36 = vsub.f32 1.0, %v7925_v59  ;;  %v5139_v63 = vmul.f32 %v7925_v59, %v9937_v17  ;;  %v8123_v17 = vld [vmem:[%s11280_s12 + $0x10] sm:$0xff]  }
0x2bd8   :  { %v5124_v24 = vpop.permute.xlu1 %5123 }
0x2bd9   :  { %v5126_v40 = vmul.f32 %v7925_v59, %v5124_v24 }
0x2bdb   :  { %5128 = vrot.lane.b32.xlu1 %v5126_v40, %s8184_s0 }
0x2c4d   :  { %v5129_v30 = vpop.permute.xlu1 %5128 }
0x2c4e   :  { %v5131_v20 = vadd.f32 %v5129_v30, %v5115_v29 }
0x2c50   :  { %7926 = vtanh.f32 %v5131_v20 }
0x2c5a   :  { %v7927_v31 = vpop.eup %7926 }
0x2c5b   :  { %5135 = vrot.lane.b32.xlu1 %v7927_v31, %s8183_s27 }
0x2ccd   :  { %v5136_v11 = vpop.permute.xlu1 %5135 }
0x2cce   :  { %v5138_v2 = vmul.f32 %v5136_v11, %v5133_v36 }
0x2cd0   :  { %v10407_v48 = vadd.f32 %v5139_v63, %v5138_v2 }
0x2cd2   :  { %v5141_v39 = vpack.c.bf16 %v10407_v48, %v10407_v48 }
0x2cd4   :  { %5143 = vrot.lane.b32.xlu0 %v5141_v39, %s8183_s27  ;;  %v8129_v39 = vld [vmem:[%s11287_s2 + $0x4] sm:$0xf] }
0x2d46   :  { %v10412_v5 = vpop.permute.xlu0 %5143 }
0x2d47   :  { %7611 = vmatmul.mubr.msk.bf16.vlgmr.msra.gmra.mrb[56].mxu0 %vm142_vm1, %v10412_v5  ;;  %7619 = vmatmul.mubr.msk.bf16.vlgmr.msra.gmra.mrb[56].mxu1 %vm142_vm1, %v10412_v5 }
0x2d48   :  { %7631 = vmatpush3.bf16.msra.mxu1 %v8123_v17  ;;  %7634 = vmatprep.mubr.msk.bf16.mxu1 %vm8182_vm0, %v11395_v45 }
0x2d49   :  { %7632 = vmatprep.subr.bf16.mxu1 %v11395_v45  ;;  %7623 = vmatpush3.bf16.msra.mxu0 %v8124_v50  ;;  %v8130_v50 = vld [vmem:[%s11287_s2] sm:$0xf] }
0x2d4a   :  { %7624 = vmatprep.subr.bf16.mxu0 %v11395_v45  ;;  %7626 = vmatprep.mubr.msk.bf16.mxu0 %vm8182_vm0, %v11395_v45 }
0x2d4c   :  { %7633 = vmatpush3.bf16.msra.mxu1 %v8125_v44 }
0x2d4d   :  { %7646 = vmatprep.subr.bf16.mxu1 %v11395_v45  ;;  %7625 = vmatpush3.bf16.msra.mxu0 %v8126_v37 }
0x2d4e   :  { %7638 = vmatprep.subr.bf16.mxu0 %v11395_v45 }
0x2d4f   :  { %7635 = vmatmul.mubr.msk.bf16.vlgmr.msra.gmra.mrb[60].mxu1 %vm142_vm1, %v10345_v57 }
0x2d50   :  { %7647 = vmatpush3.bf16.msra.mxu1 %v8127_v15  ;;  %7650 = vmatprep.mubr.msk.bf16.mxu1 %vm8182_vm0, %v11395_v45 }
0x2d51   :  { %7648 = vmatprep.subr.bf16.mxu1 %v11395_v45 }
0x2d54   :  { %7649 = vmatpush3.bf16.msra.mxu1 %v8128_v38 }
0x2d55   :  { %7662 = vmatprep.subr.bf16.mxu1 %v11395_v45 }
0x2e1a   :  { %v10450_v47 = vpop.f32.mrb[56].mxu0  ;;  %v10452_v57 = vpop.f32.mrb[56].mxu1 }
0x2e1b   :  { %v5195_v62 = vrot.slane %v10450_v47, %v8436_v4  ;;  %v7612_v32 = vpop.f32.mrb[57].mxu0  ;;  %v7620_v51 = vpop.f32.mrb[57].mxu1 }
0x2e1c   :  { %v5185_v29 = vpop.f32.mrb[58].mxu0  ;;  %v5925_v35 = vpop.f32.mrb[58].mxu1  ;;  %v8132_v51 = vld [vmem:[%s11288_s3 + $0x8] sm:$0xf] }
0x2e1d   :  { %v5196_v28 = vcombine.high %v5195_v62, %v5195_v62  ;;  %v5203_v61 = vrot.slane %v5195_v62, %v8436_v4  ;;  %v7613_v27 = vpop.f32.mrb[59].mxu0  ;;  %v7621_v59 = vpop.f32.mrb[59].mxu1  ;;  %v8131_v62 = vld [vmem:[%s11288_s3] sm:$0xff] }
0x2e1f   :  { %v5214_v24 = vrot.slane %v5203_v61, %v8403_v21  ;;  %v5210_v40 = vrot.slane %v5196_v28, %v8436_v4  ;;  %v8133_v61 = vld [vmem:[%s11288_s3 + $0x10] sm:$0xff] }
0x2e21   :  { %5374 = vrot.lane.b32.xlu1 %v5214_v24, %s8183_s27  ;;  %v5218_v30 = vrot.slane %v5210_v40, %v8403_v21  ;;  %v5221_v44 = vmul.f32 %v8130_v50, %v5214_v24  ;;  %v8134_v24 = vld [vmem:[%s11288_s3 + $0x18] sm:$0xf] }
0x2e22   :  { %v10461_v20 = vpop.f32.mrb[60].mxu1 }
0x2e23   :  { %v6104_v31 = vrot.slane %v10461_v20, 6  ;;  %v7636_v36 = vpop.f32.mrb[61].mxu1  ;;  %5376 = vrot.lane.b32.xlu0 %v5218_v30, %s8183_s27  ;;  %v5222_v17 = vmul.f32 %v8129_v39, %v5218_v30  ;;  %v5223_v15 = vsel %vm11448_vm2, %v5221_v44, 0.0 }
0x2e24   :  { %v6100_v11 = vpop.f32.mrb[62].mxu1 }
0x2e25   :  { %v10466_v63 = vadd.f32 %v6104_v31, %v11422_v58  ;;  %v7637_v2 = vpop.f32.mrb[63].mxu1  ;;  %v5226_v37 = vsel %vm11447_vm13, %v5222_v17, 0.0  ;;  %vm11449_vm13 = vmmov %vm11448_vm2 }
0x2e42   :  { %5227 = vadd.xlane.f32.xlu0 %v5226_v37 }
0x2e45   :  { %5224 = vadd.xlane.f32.xlu1 %v5223_v15 }
0x2e58   :  { %5230 = vperm.xlu0 %7711, %v10450_v47  }
0x2e5c   :  { %7714 = vset.pattern.permute.xlu0 %v11388_v3 }
0x2e93   :  { %v5375_v38 = vpop.permute.xlu1 %5374 }
0x2e94   :  { %v5380_v32 = vmul.f32 %v8131_v62, %v5375_v38  ;;  %v5381_v29 = vmul.f32 %v8132_v51, %v5375_v38 }
0x2e95   :  { %v5377_v28 = vpop.permute.xlu0 %5376 }
0x2e96   :  { %v5384_v35 = vsel %vm142_vm1, %v5380_v32, 0.0  ;;  %v5382_v27 = vmul.f32 %v8133_v61, %v5377_v28  ;;  %v5387_v59 = vsel %vm11449_vm13, %v5381_v29, 0.0  ;;  %v5383_v40 = vmul.f32 %v8134_v24, %v5377_v28 }
0x2e97   :  { %5385 = vadd.xlane.f32.xlu1 %v5384_v35  ;;  %vm11469_vm13 = vcmask 1043459  }
0x2e98   :  { %v5390_v30 = vsel %vm142_vm1, %v5382_v27, 0.0  ;;  %v5393_v31 = vsel %vm11448_vm2, %v5383_v40, 0.0  ;;  %v11451_v40 = vld [vmem:[#allocation12_spill] sm:$0xff]  ;;  %vm11470_vm2 = vmmov %vm11469_vm13 }
0x2e9b   :  { %5388 = vadd.xlane.f32.xlu1 %v5387_v59  ;;  %v11450_v59 = vld [vmem:[#allocation5_spill] sm:$0xff] }
0x2e9f   :  { %5391 = vadd.xlane.f32.xlu1 %v5390_v30 }
0x2ea3   :  { %5394 = vadd.xlane.f32.xlu1 %v5393_v31  ;;  %v11452_v31 = vld [vmem:[#allocation8_spill] sm:$0xff] }
0x2eb4   :  { %5397 = vperm.xlu1 %7712, %v10450_v47  }
0x2eb8   :  { %7713 = vset.pattern.permute.xlu1 %v11388_v3 }
0x2ecf   :  { %v5228_v36 = vpop.xlane.xlu0 %5227 }
0x2ed2   :  { %v5225_v17 = vpop.xlane.xlu1 %5224 }
0x2ed7   :  { %v5231_v11 = vpop.permute.xlu0 %5230 }
0x2ed8   :  { %v5235_v2 = vrot.slane %v5231_v11, %v8403_v21  ;;  %v5239_v39 = vrot.slane %v5231_v11, %v8407_v22 }
0x2eda   :  { %v5242_v50 = vadd.f32 %v5235_v2, %v5225_v17  ;;  %v5243_v44 = vadd.f32 %v5239_v39, %v5228_v36  ;;  %v11453_v2 = vld [vmem:[#allocation9_spill] sm:$0xff] }
0x2edb   :  { %v11454_v17 = vld [vmem:[#allocation13_spill] sm:$0xff] }
0x2edc   :  { %v10499_v37 = vadd.f32 %v5242_v50, %v8480_v18  ;;  %v10503_v15 = vadd.f32 %v5243_v44, %v8482_v19 }
0x2ede   :  { %5249 = vperm.xlu1 %7713, %v10499_v37  }
0x2ee2   :  { %5252 = vperm.xlu1 %7713, %v10503_v15  }
0x2f24   :  { %v5386_v38 = vpop.xlane.xlu1 %5385 }
0x2f28   :  { %v5389_v62 = vpop.xlane.xlu1 %5388 }
0x2f2c   :  { %v5392_v32 = vpop.xlane.xlu1 %5391 }
0x2f30   :  { %v5395_v51 = vpop.xlane.xlu1 %5394 }
0x2f34   :  { %v5398_v29 = vpop.permute.xlu1 %5397 }
0x2f35   :  { %v5402_v35 = vrot.slane %v5398_v29, %v8403_v21  ;;  %v5406_v11 = vrot.slane %v5398_v29, %v8407_v22 }
0x2f37   :  { %v5409_v28 = vadd.f32 %v5402_v35, %v5386_v38  ;;  %v5410_v61 = vadd.f32 %v5402_v35, %v5389_v62  ;;  %v5411_v44 = vadd.f32 %v5406_v11, %v5392_v32  ;;  %v5412_v38 = vadd.f32 %v5406_v11, %v5395_v51  ;;  %v11455_v62 = vld [vmem:[#allocation17_spill] sm:$0xff]  ;;  %v11461_v51 = vld [vmem:[#allocation10_spill] sm:$0xff] }
0x2f39   :  { %v10508_v27 = vadd.f32 %v5409_v28, %v8486_v23  ;;  %v10511_v24 = vadd.f32 %v5410_v61, %v11450_v59  ;;  %v11456_v28 = vld [vmem:[#allocation16_spill] sm:$0xff] }
0x2f3b   :  { %v5417_v30 = vadd.f32 %v10508_v27, %v11451_v40  ;;  %v5418_v36 = vadd.f32 %v10511_v24, %v11452_v31  ;;  %v5420_v39 = vadd.f32 %v10511_v24, %v11453_v2  ;;  %v5419_v50 = vadd.f32 %v10508_v27, %v11454_v17 }
0x2f3c   :  { %v5422_v35 = vadd.f32 %v10511_v24, %v11455_v62  ;;  %v5421_v61 = vadd.f32 %v10508_v27, %v11456_v28  ;;  %v11462_v28 = vld [vmem:[#allocation14_spill] sm:$0xff] }
0x2f3d   :  { %5450 = vperm.xlu0 %7714, %v5417_v30   ;;  %5453 = vperm.xlu1 %7713, %v5418_v36   ;;  %v11457_v30 = vld [vmem:[#allocation7_spill] sm:$0xff]  ;;  %v11458_v36 = vld [vmem:[#allocation6_spill] sm:$0xff] }
0x2f3e   :  { %v10527_v29 = vadd.f32 %v5411_v44, %v11457_v30  ;;  %v10530_v46 = vadd.f32 %v5412_v38, %v11458_v36  ;;  %v11463_v44 = vld [vmem:[#allocation11_spill] sm:$0xff] }
0x2f40   :  { %v5426_v11 = vadd.f32 %v10530_v46, %v11461_v51  ;;  %v5428_v38 = vadd.f32 %v10530_v46, %v11463_v44  ;;  %v11467_v51 = vld [vmem:[#allocation23_spill] sm:$0xff] }
0x2f41   :  { %5459 = vperm.xlu0 %7714, %v5420_v39   ;;  %5456 = vperm.xlu1 %7713, %v5419_v50   ;;  %v5424_v39 = vadd.f32 %v10511_v24, %v11459_v1  ;;  %v11460_v50 = vld [vmem:[#allocation21_spill] sm:$0xff]  ;;  %v11465_v1 = vld [vmem:[#allocation19_spill] sm:$0xff] }
0x2f42   :  { %v5423_v32 = vadd.f32 %v10508_v27, %v11460_v50 }
0x2f45   :  { %5465 = vperm.xlu0 %7714, %v5422_v35   ;;  %5462 = vperm.xlu1 %7713, %v5421_v61   ;;  %v5425_v35 = vadd.f32 %v10527_v29, %v11462_v28  ;;  %v11464_v61 = vld [vmem:[#allocation15_spill] sm:$0xff] }
0x2f46   :  { %v5427_v36 = vadd.f32 %v10527_v29, %v11464_v61 }
0x2f49   :  { %5471 = vperm.xlu0 %7714, %v5424_v39   ;;  %5468 = vperm.xlu1 %7713, %v5423_v32   ;;  %v5430_v39 = vadd.f32 %v10530_v46, %v11465_v1  ;;  %v11466_v32 = vld [vmem:[#allocation18_spill] sm:$0xff] }
0x2f4a   :  { %v5429_v50 = vadd.f32 %v10527_v29, %v11466_v32 }
0x2f4d   :  { %5477 = vperm.xlu0 %7714, %v5426_v11   ;;  %5474 = vperm.xlu1 %7713, %v5425_v35   ;;  %v5432_v11 = vadd.f32 %v10530_v46, %v11467_v51  ;;  %v11468_v35 = vld [vmem:[#allocation22_spill] sm:$0xff] }
0x2f4e   :  { %v5431_v28 = vadd.f32 %v10527_v29, %v11468_v35 }
0x2f51   :  { %5483 = vperm.xlu0 %7714, %v5428_v38   ;;  %5480 = vperm.xlu1 %7713, %v5427_v36  }
0x2f55   :  { %5489 = vperm.xlu0 %7714, %v5430_v39   ;;  %5486 = vperm.xlu1 %7713, %v5429_v50   ;;  %v8135_v50 = vld [vmem:[%s11283_s13 + $0x2] ss:$0 sm:$0xff] }
0x2f56   :  { %v4916_v39 = vadd.f32 %v8135_v50, %v10398_v16 }
0x2f59   :  { %5495 = vperm.xlu0 %7714, %v5432_v11   ;;  %5492 = vperm.xlu1 %7713, %v5431_v28   ;;  %v4917_v11 = vsel %vm1560_vm14, %v4916_v39, -inf }
0x2f5d   :  { %v5250_v44 = vpop.permute.xlu1 %5249 }
0x2f5e   :  { %v5257_v38 = vrot.slane %v5250_v44, %v8601_v49 }
0x2f61   :  { %v5253_v61 = vpop.permute.xlu1 %5252 }
0x2f62   :  { %v5261_v36 = vrot.slane %v5253_v61, %v8601_v49 }
0x2f64   :  { %v5262_v1 = vsel %vm571_vm3, %v5261_v36, %v5257_v38 }
0x2f65   :  { %v5264_v32 = vsel %vm574_vm4, %v5262_v1, -inf }
0x2f78   :  { %5265 = vmax.xlane.f32.xlu0 %v5264_v32 }
0x2f7d   :  { %4918 = vmax.xlane.f32.xlu1 %v4917_v11 }
0x2fbc   :  { %v5454_v28 = vpop.permute.xlu1 %5453  ;;  %v5451_v35 = vpop.permute.xlu0 %5450 }
0x2fbd   :  { %v5504_v30 = vrot.slane %v5454_v28, %v8623_v60  ;;  %v5500_v62 = vrot.slane %v5451_v35, %v8601_v49 }
0x2fc0   :  { %v5457_v51 = vpop.permute.xlu1 %5456  ;;  %v5460_v61 = vpop.permute.xlu0 %5459 }
0x2fc1   :  { %v5509_v44 = vrot.slane %v5457_v51, %v8601_v49  ;;  %v5513_v36 = vrot.slane %v5460_v61, %v8623_v60  ;;  %v5505_v51 = vsel %vm958_vm5, %v5504_v30, %v5500_v62 }
0x2fc3   :  { %v5514_v50 = vsel %vm958_vm5, %v5513_v36, %v5509_v44 }
0x2fc4   :  { %v5463_v38 = vpop.permute.xlu1 %5462  ;;  %v5466_v1 = vpop.permute.xlu0 %5465  ;;  %v5569_v28 = vsel %vm571_vm3, %v5514_v50, %v5505_v51 }
0x2fc5   :  { %v5518_v16 = vrot.slane %v5463_v38, %v8601_v49  ;;  %v5522_v32 = vrot.slane %v5466_v1, %v8623_v60 }
0x2fc7   :  { %v5523_v11 = vsel %vm958_vm5, %v5522_v32, %v5518_v16 }
0x2fc8   :  { %v5469_v17 = vpop.permute.xlu1 %5468  ;;  %v5472_v2 = vpop.permute.xlu0 %5471  ;;  %v5570_v38 = vsel %vm1024_vm6, %v5523_v11, %v5569_v28 }
0x2fc9   :  { %v5527_v61 = vrot.slane %v5469_v17, %v8601_v49  ;;  %v5531_v31 = vrot.slane %v5472_v2, %v8623_v60 }
0x2fcb   :  { %v5532_v35 = vsel %vm958_vm5, %v5531_v31, %v5527_v61 }
0x2fcc   :  { %v5475_v40 = vpop.permute.xlu1 %5474  ;;  %v5478_v1 = vpop.permute.xlu0 %5477  ;;  %v5571_v44 = vsel %vm11469_vm13, %v5532_v35, %v5570_v38  ;;  %vm11473_vm13 = vcmask 261312  }
0x2fcd   :  { %v5577_v36 = vsel %vm1033_vm8, %v5571_v44, -inf  ;;  %v5536_v50 = vrot.slane %v5475_v40, %v8601_v49  ;;  %v5540_v31 = vrot.slane %v5478_v1, %v8623_v60 }
0x2fce   :  { %5578 = vmax.xlane.f32.xlu0 %v5577_v36 }
0x2fcf   :  { %v5541_v44 = vsel %vm958_vm5, %v5540_v31, %v5536_v50 }
0x2fd0   :  { %v5481_v16 = vpop.permute.xlu1 %5480  ;;  %v5484_v32 = vpop.permute.xlu0 %5483 }
0x2fd1   :  { %v5545_v62 = vrot.slane %v5481_v16, %v8601_v49  ;;  %v5549_v17 = vrot.slane %v5484_v32, %v8623_v60 }
0x2fd3   :  { %v5550_v61 = vsel %vm958_vm5, %v5549_v17, %v5545_v62 }
0x2fd4   :  { %v5487_v2 = vpop.permute.xlu1 %5486  ;;  %v5490_v30 = vpop.permute.xlu0 %5489  ;;  %v5572_v40 = vsel %vm571_vm3, %v5550_v61, %v5541_v44 }
0x2fd5   :  { %v5554_v11 = vrot.slane %v5487_v2, %v8601_v49  ;;  %v5558_v51 = vrot.slane %v5490_v30, %v8623_v60 }
0x2fd7   :  { %v5559_v28 = vsel %vm958_vm5, %v5558_v51, %v5554_v11 }
0x2fd8   :  { %v5493_v35 = vpop.permute.xlu1 %5492  ;;  %v5496_v38 = vpop.permute.xlu0 %5495  ;;  %v5573_v32 = vsel %vm1024_vm6, %v5559_v28, %v5572_v40 }
0x2fd9   :  { %v5563_v36 = vrot.slane %v5493_v35, %v8601_v49  ;;  %v5567_v16 = vrot.slane %v5496_v38, %v8623_v60 }
0x2fdb   :  { %v5568_v1 = vsel %vm958_vm5, %v5567_v16, %v5563_v36 }
0x2fdc   :  { %v5574_v2 = vsel %vm11470_vm2, %v5568_v1, %v5573_v32  ;;  %vm11474_vm2 = vmmov %vm11473_vm13 }
0x2fdd   :  { %v5580_v62 = vsel %vm1033_vm8, %v5574_v2, -inf }
0x2fde   :  { %5581 = vmax.xlane.f32.xlu1 %v5580_v62 }
0x3005   :  { %v5266_v17 = vpop.xlane.xlu0 %5265 }
0x3006   :  { %v5271_v30 = vrot.slane %v5266_v17, %v8403_v21  ;;  %v5275_v38 = vrot.slane %v5266_v17, %v8407_v22 }
0x3008   :  { %v5278_v50 = vsub.f32 %v10499_v37, %v5271_v30  ;;  %v5279_v36 = vsub.f32 %v10503_v15, %v5275_v38  ;;  %v4947_v30 = vrot.slane %v10312_v56, %v9197_v54 }
0x300a   :  { %v5280_v31 = vmul.f32 1.442695, %v5278_v50  ;;  %v4919_v11 = vpop.xlane.xlu1 %4918  ;;  %v5282_v16 = vmul.f32 1.442695, %v5279_v36 }
0x300b   :  { %v4920_v51 = vsub.f32 %v4916_v39, %v4919_v11  ;;  %v11471_v39 = vmov 96  }
0x300c   :  { %7928 = vpow2.f32 %v5280_v31 }
0x300d   :  { %v4921_v35 = vmul.f32 1.442695, %v4920_v51 }
0x300f   :  { %7930 = vpow2.f32 %v4921_v35  ;;  %v4938_v35 = vrot.slane %v10289_v55, %v9197_v54 }
0x3010   :  { %7932 = vpow2.f32 %v5282_v16  ;;  %v4934_v16 = vrot.slane %v10287_v0, %v9200_v42 }
0x3016   :  { %v10595_v61 = vpop.eup %7928 }
0x3017   :  { %5287 = vperm.xlu1 %7713, %v10595_v61  }
0x3019   :  { %v7931_v28 = vpop.eup %7930 }
0x301a   :  { %v4923_v44 = vsel %vm1560_vm14, %v7931_v28, 0.0  ;;  %v10601_v37 = vpop.eup %7932  ;;  %v4943_v28 = vrot.slane %v10302_v25, %v9200_v42 }
0x301b   :  { %4924 = vadd.xlane.f32.xlu0 %v4923_v44 }
0x301c   :  { %v4948_v56 = vsel %vm1584_vm15, %v4947_v30, %v4943_v28  ;;  %v10660_v28 = vld [vmem:[%s11291_s5 + $0x18] sm:$0xf] }
0x3031   :  { %5290 = vperm.xlu0 %7714, %v10601_v37  }
0x3035   :  { %7715 = vset.pattern.permute.xlu0 %v11471_v39 }
0x305b   :  { %v5579_v40 = vpop.xlane.xlu0 %5578 }
0x305c   :  { %v5583_v1 = vmul.f32 %v5579_v40, %v8669_v12  ;;  %v4939_v40 = vsel %vm1584_vm15, %v4938_v35, %v4934_v16 }
0x305e   :  { %5588 = vperm.xlu1 %7713, %v5583_v1   ;;  %v4949_v1 = vsel %vm571_vm3, %v4948_v56, %v4939_v40 }
0x306b   :  { %v5582_v32 = vpop.xlane.xlu1 %5581 }
0x306c   :  { %v5584_v2 = vmul.f32 %v5582_v32, %v8672_v7  ;;  %v10638_v32 = vld [vmem:[%s11291_s5] sm:$0xff] }
0x306e   :  { %5591 = vperm.xlu1 %7713, %v5584_v2  }
0x3096   :  { %v5288_v17 = vpop.permute.xlu1 %5287 }
0x3097   :  { %v5295_v50 = vrot.slane %v5288_v17, %v8601_v49  ;;  %v10645_v17 = vld [vmem:[%s11291_s5 + $0x8] sm:$0xf] }
0x30a8   :  { %v4925_v62 = vpop.xlane.xlu0 %4924 }
0x30a9   :  { %7934 = vlog2.f32 %v4925_v62 }
0x30b0   :  { %v5291_v15 = vpop.permute.xlu0 %5290 }
0x30b1   :  { %v5299_v31 = vrot.slane %v5291_v15, %v8601_v49 }
0x30b3   :  { %v7935_v11 = vpop.eup %7934  ;;  %v5300_v38 = vsel %vm571_vm3, %v5299_v31, %v5295_v50  ;;  %v10653_v31 = vld [vmem:[%s11291_s5 + $0x10] sm:$0xff] }
0x30b4   :  { %v4927_v44 = vmul.f32 0.6931472, %v7935_v11  ;;  %v5302_v36 = vsel %vm574_vm4, %v5300_v38, 0.0 }
0x30b5   :  { %5303 = vadd.xlane.f32.xlu1 %v5302_v36 }
0x30b6   :  { %v4928_v39 = vsub.f32 %v4920_v51, %v4927_v44 }
0x30b8   :  { %v5320_v55 = vmul.f32 %v4928_v39, %v9192_v41  ;;  %7244 = vst.msk [vmem:[%s11294_s14 + $0x6] sm:$0x3] %vm1560_vm14, %v4928_v39 }
0x30b9   :  { %7245 = vst.msk [vmem:[%s11294_s14 + $0x6] sm:$0x3] %vm1597_vm7, %v4949_v1 }
0x30ba   :  { %v5321_v0 = vsel %vm1560_vm14, %v5320_v55, 0.0  ;;  %v11472_v55 = vld [vmem:[#allocation24_spill] sm:$0xff] }
0x30bb   :  { %5322 = vadd.xlane.f32.xlu0 %v5321_v0 }
0x30d1   :  { %5325 = vrot.lane.b32.xlu0 %v10450_v47, %s8190_s20 }
0x30dd   :  { %v5589_v25 = vpop.permute.xlu1 %5588 }
0x30de   :  { %v5596_v51 = vrot.slane %v5589_v25, %v8601_v49 }
0x30e0   :  { %v5617_v2 = vmul.f32 %v10638_v32, %v5596_v51  ;;  %v5618_v15 = vmul.f32 %v10645_v17, %v5596_v51 }
0x30e2   :  { %v5621_v62 = vsel %vm1099_vm10, %v5617_v2, 0.0  ;;  %v5624_v47 = vsel %vm1103_vm9, %v5618_v15, 0.0 }
0x30e3   :  { %5622 = vadd.xlane.f32.xlu1 %v5621_v62 }
0x30e7   :  { %5625 = vadd.xlane.f32.xlu1 %v5624_v47 }
0x30ed   :  { %v5592_v30 = vpop.permute.xlu1 %5591 }
0x30ee   :  { %v5600_v50 = vrot.slane %v5592_v30, %v8601_v49 }
0x30f0   :  { %v5619_v11 = vmul.f32 %v10653_v31, %v5600_v50  ;;  %v5620_v38 = vmul.f32 %v10660_v28, %v5600_v50 }
0x30f2   :  { %v5627_v35 = vsel %vm1099_vm10, %v5619_v11, 0.0  ;;  %v5630_v44 = vsel %vm1103_vm9, %v5620_v38, 0.0 }
0x30f3   :  { %5628 = vadd.xlane.f32.xlu1 %v5627_v35 }
0x30f7   :  { %5631 = vadd.xlane.f32.xlu1 %v5630_v44 }
0x3142   :  { %v5304_v36 = vpop.xlane.xlu1 %5303 }
0x3143   :  { %v5313_v16 = vrot.slane %v5304_v36, %v8407_v22  ;;  %v5309_v47 = vrot.slane %v5304_v36, %v8403_v21 }
0x3145   :  { %7936 = vrcp.f32 %v5313_v16 }
0x3148   :  { %v5323_v56 = vpop.xlane.xlu0 %5322 }
0x3149   :  { %v5324_v39 = vadd.f32 %v5323_v56, %v11422_v58 }
0x314c   :  { %v5326_v40 = vpop.permute.xlu0 %5325 }
0x314d   :  { %v5328_v1 = vadd.f32 %v5326_v40, %v5324_v39 }
0x314f   :  { %v5329_v0 = vadd.f32 %v5328_v1, %v11472_v55  ;;  %v7937_v25 = vpop.eup %7936 }
0x3150   :  { %v5319_v2 = vmul.f32 %v7937_v25, %v10601_v37 }
0x3151   :  { %v7253_v51 = vmul.f32 -1.442695, %v5329_v0 }
0x3152   :  { %5348 = vperm.xlu1 %7713, %v5319_v2  }
0x3153   :  { %7938 = vpow2.f32 %v7253_v51 }
0x315d   :  { %v7939_v62 = vpop.eup %7938 }
0x315e   :  { %v5333_v15 = vadd.f32 1.0, %v7939_v62 }
0x3160   :  { %7940 = vrcp.f32 %v5333_v15 }
0x3161   :  { %7942 = vrcp.f32 %v5309_v47 }
0x316a   :  { %v7941_v30 = vpop.eup %7940 }
0x316b   :  { %v5336_v50 = vsub.f32 1.0, %v7941_v30  ;;  %v7943_v35 = vpop.eup %7942 }
0x316c   :  { %v5317_v37 = vmul.f32 %v7943_v35, %v10595_v61 }
0x316d   :  { %5339 = vperm.xlu0 %7715, %v5336_v50  }
0x3170   :  { %v5623_v11 = vpop.xlane.xlu1 %5622 }
0x3171   :  { %v5633_v38 = vsub.f32 %v10508_v27, %v5623_v11  ;;  %5363 = vperm.xlu0 %7715, %v7941_v30  }
0x3173   :  { %v5637_v44 = vmul.f32 1.442695, %v5633_v38 }
0x3174   :  { %v5626_v16 = vpop.xlane.xlu1 %5625 }
0x3175   :  { %7944 = vpow2.f32 %v5637_v44  ;;  %v5634_v56 = vsub.f32 %v10511_v24, %v5626_v16  ;;  %7716 = vset.pattern.permute.xlu0 %v11388_v3 }
0x3176   :  { %5345 = vperm.xlu0 %7716, %v5317_v37  }
0x3177   :  { %v5639_v36 = vmul.f32 1.442695, %v5634_v56 }
0x3179   :  { %7946 = vpow2.f32 %v5639_v36 }
0x317f   :  { %v7945_v39 = vpop.eup %7944 }
0x3180   :  { %v5629_v40 = vpop.xlane.xlu1 %5628  ;;  %v10674_v1 = vmul.f32 %v7945_v39, %v11398_v26 }
0x3181   :  { %v5635_v27 = vsub.f32 %v10527_v29, %v5629_v40 }
0x3182   :  { %5654 = vperm.xlu0 %7716, %v10674_v1  }
0x3183   :  { %v7947_v55 = vpop.eup %7946  ;;  %v5641_v0 = vmul.f32 1.442695, %v5635_v27 }
0x3184   :  { %v5632_v61 = vpop.xlane.xlu1 %5631  ;;  %v10679_v25 = vmul.f32 %v7947_v55, %v8733_v43 }
0x3185   :  { %7948 = vpow2.f32 %v5641_v0  ;;  %v5636_v24 = vsub.f32 %v10530_v46, %v5632_v61  ;;  %v6114_v0 = vadd.f32 %v10461_v20, %v11402_v34  ;;  %v8140_v61 = vld [vmem:[%s11292_s6] sm:$0xf]  ;;  %v8141_v34 = vld [vmem:[%s11292_s6 + $0x4] sm:$0xf] }
0x3186   :  { %5657 = vperm.xlu1 %7713, %v10679_v25  }
0x3187   :  { %v5643_v51 = vmul.f32 1.442695, %v5636_v24 }
0x3189   :  { %7950 = vpow2.f32 %v5643_v51 }
0x318f   :  { %v7949_v2 = vpop.eup %7948 }
0x3190   :  { %v10684_v62 = vmul.f32 %v7949_v2, %v11400_v13  ;;  %v6116_v2 = vrot.slane %v6114_v0, 6 }
0x3192   :  { %5660 = vperm.xlu1 %7713, %v10684_v62  }
0x3193   :  { %v7951_v29 = vpop.eup %7950 }
0x3194   :  { %v10688_v15 = vmul.f32 %v7951_v29, %v11399_v8 }
0x3196   :  { %5663 = vperm.xlu0 %7716, %v10688_v15  }
0x31d1   :  { %v5349_v50 = vpop.permute.xlu1 %5348 }
0x31d2   :  { %v5357_v11 = vrot.slane %v5349_v50, %v8601_v49 }
0x31ec   :  { %v5340_v47 = vpop.permute.xlu0 %5339 }
0x31f0   :  { %v5364_v30 = vpop.permute.xlu0 %5363 }
0x31f1   :  { %v5366_v44 = vmul.f32 %v5364_v30, %v10242_v10 }
0x31f5   :  { %v5346_v46 = vpop.permute.xlu0 %5345 }
0x31f6   :  { %v5353_v35 = vrot.slane %v5346_v46, %v8601_v49 }
0x31f8   :  { %v5358_v38 = vsel %vm571_vm3, %v5357_v11, %v5353_v35 }
0x31f9   :  { %v5360_v16 = vmul.f32 %v5358_v38, %v5340_v47 }
0x31fb   :  { %v5367_v37 = vadd.f32 %v5366_v44, %v5360_v16 }
0x31fd   :  { %v5368_v56 = vsel %vm574_vm4, %v5367_v37, 0.0 }
0x31fe   :  { %5369 = vadd.xlane.f32.xlu1 %v5368_v56 }
0x3201   :  { %v5655_v36 = vpop.permute.xlu0 %5654 }
0x3202   :  { %v5668_v40 = vrot.slane %v5655_v36, %v8601_v49 }
0x3205   :  { %v5658_v39 = vpop.permute.xlu1 %5657 }
0x3206   :  { %v5672_v27 = vrot.slane %v5658_v39, %v8623_v60 }
0x3208   :  { %v5673_v55 = vsel %vm958_vm5, %v5672_v27, %v5668_v40 }
0x3209   :  { %v5689_v24 = vmul.f32 %v8140_v61, %v5673_v55 }
0x320b   :  { %v5691_v51 = vsel %vm1033_vm8, %v5689_v24, 0.0 }
0x320c   :  { %5692 = vadd.xlane.f32.xlu0 %v5691_v51 }
0x320f   :  { %6117 = vrot.lane.b32.xlu1 %v6116_v2, %s8184_s0 }
0x3211   :  { %v5661_v29 = vpop.permute.xlu1 %5660 }
0x3212   :  { %v5677_v30 = vrot.slane %v5661_v29, %v8601_v49 }
0x3215   :  { %v5664_v47 = vpop.permute.xlu0 %5663 }
0x3216   :  { %v5681_v50 = vrot.slane %v5664_v47, %v8623_v60 }
0x3218   :  { %v5682_v46 = vsel %vm958_vm5, %v5681_v50, %v5677_v30 }
0x3219   :  { %v5690_v20 = vmul.f32 %v8141_v34, %v5682_v46 }
0x321b   :  { %v5694_v11 = vsel %vm1033_vm8, %v5690_v20, 0.0 }
0x321c   :  { %5695 = vadd.xlane.f32.xlu0 %v5694_v11 }
0x328b   :  { %v5370_v35 = vpop.xlane.xlu1 %5369 }
0x328c   :  { %v5371_v38 = vadd.f32 1e-20, %v5370_v35 }
0x328e   :  { %7952 = vrcp.f32 %v5371_v38 }
0x3298   :  { %v7953_v44 = vpop.eup %7952 }
0x3299   :  { %v10713_v16 = vmul.f32 %v7953_v44, %v5367_v37  ;;  %v5693_v56 = vpop.xlane.xlu0 %5692 }
0x329a   :  { %v5702_v36 = vrot.slane %v5693_v56, %v8601_v49 }
0x329b   :  { %v5758_v39 = vrot.slane %v10713_v16, %v8436_v4 }
0x329c   :  { %v5723_v40 = vmul.f32 %v10638_v32, %v5702_v36  ;;  %v5724_v0 = vmul.f32 %v10645_v17, %v5702_v36 }
0x329d   :  { %v5766_v27 = vrot.slane %v5758_v39, %v8436_v4  ;;  %v5759_v47 = vcombine.high %v5758_v39, %v5758_v39 }
0x329e   :  { %v5727_v55 = vsel %vm1099_vm10, %v5723_v40, 0.0  ;;  %v5730_v24 = vsel %vm1103_vm9, %v5724_v0, 0.0 }
0x329f   :  { %5728 = vadd.xlane.f32.xlu0 %v5727_v55  ;;  %v5777_v61 = vrot.slane %v5766_v27, %v8403_v21  ;;  %v5773_v34 = vrot.slane %v5759_v47, %v8436_v4  ;;  %v6118_v55 = vpop.permute.xlu1 %6117 }
0x32a1   :  { %v5784_v37 = vmul.f32 %v10638_v32, %v5777_v61  ;;  %v8142_v32 = vld [vmem:[%s11283_s13] ss:$0 sm:$0xff]  ;;  %v5785_v35 = vmul.f32 %v10645_v17, %v5777_v61  ;;  %v5781_v38 = vrot.slane %v5773_v34, %v8403_v21 }
0x32a2   :  { %v6107_v20 = vadd.f32 %v8142_v32, %v10466_v63 }
0x32a3   :  { %5731 = vadd.xlane.f32.xlu0 %v5730_v24  ;;  %v5788_v51 = vsel %vm1099_vm10, %v5784_v37, 0.0  ;;  %v5791_v56 = vsel %vm1103_vm9, %v5785_v35, 0.0  ;;  %v5786_v36 = vmul.f32 %v10653_v31, %v5781_v38  ;;  %v5787_v40 = vmul.f32 %v10660_v28, %v5781_v38 }
0x32a4   :  { %5789 = vadd.xlane.f32.xlu1 %v5788_v51  ;;  %v7260_v44 = vmul.f32 -1.442695, %v6107_v20 }
0x32a5   :  { %v5794_v39 = vsel %vm1099_vm10, %v5786_v36, 0.0  ;;  %v5797_v63 = vsel %vm1103_vm9, %v5787_v40, 0.0 }
0x32a6   :  { %7954 = vpow2.f32 %v7260_v44 }
0x32a9   :  { %v5696_v2 = vpop.xlane.xlu0 %5695 }
0x32aa   :  { %v5706_v29 = vrot.slane %v5696_v2, %v8601_v49 }
0x32ac   :  { %v5725_v30 = vmul.f32 %v10653_v31, %v5706_v29  ;;  %v5726_v46 = vmul.f32 %v10660_v28, %v5706_v29 }
0x32ae   :  { %v5733_v50 = vsel %vm1099_vm10, %v5725_v30, 0.0  ;;  %v5736_v11 = vsel %vm1103_vm9, %v5726_v46, 0.0 }
0x32af   :  { %5734 = vadd.xlane.f32.xlu0 %v5733_v50 }
0x32b0   :  { %v7955_v27 = vpop.eup %7954 }
0x32b1   :  { %v6111_v17 = vadd.f32 1.0, %v7955_v27 }
0x32b3   :  { %5737 = vadd.xlane.f32.xlu0 %v5736_v11  ;;  %7956 = vrcp.f32 %v6111_v17 }
0x32b7   :  { %5792 = vadd.xlane.f32.xlu0 %v5791_v56 }
0x32bb   :  { %5795 = vadd.xlane.f32.xlu0 %v5794_v39 }
0x32bd   :  { %v10743_v0 = vpop.eup %7956 }
0x32be   :  { %v6120_v61 = vmul.f32 %v10743_v0, %v6118_v55 }
0x32bf   :  { %5798 = vadd.xlane.f32.xlu0 %v5797_v63 }
0x32d5   :  { %6122 = vrot.lane.b32.xlu0 %v6120_v61, %s8184_s0 }
0x332c   :  { %v5729_v31 = vpop.xlane.xlu0 %5728 }
0x332d   :  { %v5739_v37 = vmax.f32 %v5729_v31, 1e-20  ;;  %v8144_v31 = vld [vmem:[%s11293_s4] sm:$0xff] }
0x332f   :  { %7958 = vrcp.f32 %v5739_v37 }
0x3330   :  { %v5732_v24 = vpop.xlane.xlu0 %5731 }
0x3331   :  { %v5740_v51 = vmax.f32 %v5732_v24, 1e-20  ;;  %v5790_v29 = vpop.xlane.xlu1 %5789 }
0x3333   :  { %7960 = vrcp.f32 %v5740_v51 }
0x3339   :  { %v7959_v28 = vpop.eup %7958 }
0x333a   :  { %v5744_v2 = vmul.f32 %v7959_v28, %v10674_v1  ;;  %v8145_v28 = vld [vmem:[%s11293_s4 + $0x10] sm:$0xff] }
0x333c   :  { %v5800_v47 = vmul.f32 %v5790_v29, %v5744_v2  ;;  %v5735_v30 = vpop.xlane.xlu0 %5734  ;;  %v8146_v29 = vld [vmem:[%s11293_s4 + $0x18] sm:$0xff] }
0x333d   :  { %v5741_v50 = vmax.f32 %v5735_v30, 1e-20  ;;  %v7961_v46 = vpop.eup %7960 }
0x333e   :  { %5809 = vperm.xlu0 %7716, %v5800_v47   ;;  %v5746_v20 = vmul.f32 %v7961_v46, %v10679_v25 }
0x333f   :  { %7962 = vrcp.f32 %v5741_v50 }
0x3340   :  { %v5738_v34 = vpop.xlane.xlu0 %5737 }
0x3341   :  { %v5742_v32 = vmax.f32 %v5738_v34, 1e-20 }
0x3343   :  { %7964 = vrcp.f32 %v5742_v32 }
0x3344   :  { %v5793_v11 = vpop.xlane.xlu0 %5792 }
0x3345   :  { %v5801_v35 = vmul.f32 %v5793_v11, %v5746_v20 }
0x3347   :  { %5812 = vperm.xlu1 %7713, %v5801_v35  }
0x3348   :  { %v5796_v38 = vpop.xlane.xlu0 %5795 }
0x3349   :  { %v7963_v44 = vpop.eup %7962 }
0x334a   :  { %v5748_v56 = vmul.f32 %v7963_v44, %v10684_v62 }
0x334b   :  { %7718 = vset.pattern.permute.xlu1 %v11406_v9 }
0x334c   :  { %v5802_v1 = vmul.f32 %v5796_v38, %v5748_v56  ;;  %v5799_v36 = vpop.xlane.xlu0 %5798  ;;  %v8147_v56 = vld [vmem:[%s11293_s4 + $0x30] sm:$0xff] }
0x334d   :  { %v7965_v39 = vpop.eup %7964 }
0x334e   :  { %v5750_v40 = vmul.f32 %v7965_v39, %v10688_v15  ;;  %5815 = vperm.xlu0 %7716, %v5802_v1  }
0x3350   :  { %v5803_v63 = vmul.f32 %v5799_v36, %v5750_v40  ;;  %v6123_v27 = vpop.permute.xlu0 %6122  ;;  %v8148_v36 = vld [vmem:[%s11293_s4 + $0x20] sm:$0xff] }
0x3351   :  { %v6125_v17 = vadd.f32 %v6123_v27, %v10281_v14  ;;  %v8143_v14 = vld [vmem:[%s11293_s4 + $0x8] sm:$0xff] }
0x3352   :  { %5818 = vperm.xlu0 %7716, %v5803_v63   ;;  %v8149_v27 = vld [vmem:[%s11293_s4 + $0x28] sm:$0xff] }
0x3353   :  { %7966 = vtanh.f32 %v6125_v17 }
0x3356   :  { %7717 = vset.pattern.permute.xlu0 %v11420_v52 }
0x335d   :  { %v7967_v25 = vpop.eup %7966 }
0x335e   :  { %6129 = vrot.lane.b32.xlu0 %v7967_v25, %s8183_s27 }
0x33bd   :  { %v10755_v62 = vpop.permute.xlu0 %5809 }
0x33be   :  { %v5823_v55 = vrot.slane %v10755_v62, %v8601_v49 }
0x33c6   :  { %v10757_v9 = vpop.permute.xlu1 %5812 }
0x33c7   :  { %v5827_v15 = vrot.slane %v10757_v9, %v8623_v60 }
0x33c9   :  { %v5828_v61 = vsel %vm958_vm5, %v5827_v15, %v5823_v55  ;;  %v6127_v55 = vsub.f32 1.0, %v10743_v0  ;;  %v6134_v15 = vrot.slane %v10340_v33, 6 }
0x33ca   :  { %v5853_v52 = vmul.f32 %v8143_v14, %v5828_v61  ;;  %v5852_v37 = vmul.f32 %v8144_v31, %v5828_v61  ;;  %v5854_v2 = vmul.f32 %v8145_v28, %v5828_v61  ;;  %v5855_v47 = vmul.f32 %v8146_v29, %v5828_v61 }
0x33cc   :  { %v5863_v24 = vsel %vm1367_vm11, %v5853_v52, 0.0  ;;  %v5860_v51 = vsel %vm1367_vm11, %v5852_v37, 0.0  ;;  %v5866_v50 = vsel %vm1367_vm11, %v5854_v2, 0.0  ;;  %v5869_v46 = vsel %vm1367_vm11, %v5855_v47, 0.0  ;;  %v8150_v52 = vld [vmem:[%s11293_s4 + $0x38] sm:$0xff] }
0x33cd   :  { %5864 = vadd.xlane.f32.xlu1 %v5863_v24  ;;  %5861 = vadd.xlane.f32.xlu0 %v5860_v51  ;;  %v5816_v30 = vpop.permute.xlu0 %5815  ;;  %v6136_v37 = vmul.f32 %v10743_v0, %v6134_v15 }
0x33ce   :  { %v5832_v32 = vrot.slane %v5816_v30, %v8601_v49  ;;  %v6050_v20 = vrot.slane %v5816_v30, %v9200_v42 }
0x33d1   :  { %5867 = vadd.xlane.f32.xlu1 %v5866_v50  ;;  %5870 = vadd.xlane.f32.xlu0 %v5869_v46  ;;  %v5819_v34 = vpop.permute.xlu0 %5818 }
0x33d2   :  { %v5836_v11 = vrot.slane %v5819_v34, %v8623_v60  ;;  %v6054_v35 = vrot.slane %v5819_v34, %v9197_v54 }
0x33d4   :  { %v5837_v38 = vsel %vm958_vm5, %v5836_v11, %v5832_v32  ;;  %v10786_v44 = vsel %vm1584_vm15, %v6054_v35, %v6050_v20 }
0x33d5   :  { %v5858_v1 = vmul.f32 %v8147_v56, %v5837_v38  ;;  %v5856_v39 = vmul.f32 %v8148_v36, %v5837_v38  ;;  %v5857_v17 = vmul.f32 %v8149_v27, %v5837_v38  ;;  %v6130_v25 = vpop.permute.xlu0 %6129  ;;  %v5859_v31 = vmul.f32 %v8150_v52, %v5837_v38 }
0x33d6   :  { %v6132_v61 = vmul.f32 %v6130_v25, %v6127_v55 }
0x33d7   :  { %v5878_v40 = vsel %vm1367_vm11, %v5858_v1, 0.0  ;;  %v5872_v63 = vsel %vm1367_vm11, %v5856_v39, 0.0  ;;  %v5875_v14 = vsel %vm1367_vm11, %v5857_v17, 0.0  ;;  %v5881_v51 = vsel %vm1367_vm11, %v5859_v31, 0.0  ;;  %v8151_v1 = vld [vmem:[%s11280_s12 + $0x60] sm:$0xff]  }
0x33d8   :  { %5879 = vadd.xlane.f32.xlu1 %v5878_v40  ;;  %5873 = vadd.xlane.f32.xlu0 %v5872_v63  ;;  %v6137_v24 = vadd.f32 %v6136_v37, %v6132_v61 }
0x33da   :  { %v6138_v28 = vpack.c.bf16 %v6137_v24, %v6137_v24 }
0x33dc   :  { %5876 = vadd.xlane.f32.xlu0 %v5875_v14  ;;  %v6180_v2 = vrot.slane %v6138_v28, 1  ;;  %v8152_v14 = vld [vmem:[%s11280_s12 + $0x68] sm:$0xff]  }
0x33e0   :  { %5882 = vadd.xlane.f32.xlu0 %v5881_v51 }
0x33e9   :  { %6181 = vrot.lane.b32.xlu1 %v6180_v2, %s8183_s27 }
0x345a   :  { %v5865_v33 = vpop.xlane.xlu1 %5864  ;;  %v5862_v29 = vpop.xlane.xlu0 %5861 }
0x345b   :  { %v5884_v50 = vpack.c.bf16 %v5865_v33, %v5862_v29 }
0x345d   :  { %v5932_v20 = vunpack.c.l.b16 %v5884_v50  ;;  %v5933_v11 = vunpack.c.h.b16 %v5884_v50 }
0x345e   :  { %v5868_v47 = vpop.xlane.xlu1 %5867  ;;  %v5871_v30 = vpop.xlane.xlu0 %5870 }
0x345f   :  { %v5885_v32 = vpack.c.bf16 %v5871_v30, %v5868_v47  ;;  %v5943_v40 = vrot.slane %v5932_v20, %v8601_v49  ;;  %v5947_v63 = vrot.slane %v5933_v11, %v8623_v60  ;;  %v8155_v20 = vld [vmem:[%s11280_s12 + $0x40] sm:$0xff]   ;;  %v8156_v11 = vld [vmem:[%s11280_s12 + $0x48] sm:$0xff]  }
0x3461   :  { %v5934_v38 = vunpack.c.l.b16 %v5885_v32  ;;  %v5935_v27 = vunpack.c.h.b16 %v5885_v32  ;;  %v5948_v37 = vsel %vm958_vm5, %v5947_v63, %v5943_v40  ;;  %v8154_v32 = vld [vmem:[%s11280_s12 + $0x38] sm:$0xff]  }
0x3463   :  { %v5952_v25 = vrot.slane %v5934_v38, %v8897_v6  ;;  %v5957_v24 = vrot.slane %v5935_v27, %v8902_v53 }
0x3465   :  { %v5880_v46 = vpop.xlane.xlu1 %5879  ;;  %v5874_v34 = vpop.xlane.xlu0 %5873  ;;  %v5953_v51 = vsel %vm1474_vm12, %v5952_v25, %v5948_v37 }
0x3466   :  { %v5958_v47 = vsel %vm11473_vm13, %v5957_v24, %v5953_v51 }
0x3469   :  { %v6182_v35 = vpop.permute.xlu1 %6181  ;;  %v5877_v0 = vpop.xlane.xlu0 %5876 }
0x346a   :  { %v5886_v56 = vpack.c.bf16 %v5877_v0, %v5874_v34  ;;  %7651 = vmatmul.mubr.msk.bf16.vlgmr.msra.gmra.mrb[64].mxu1 %vm142_vm1, %v6182_v35  ;;  %v8153_v34 = vld [vmem:[%s11280_s12 + $0x30] sm:$0xff]  }
0x346b   :  { %7663 = vmatpush3.bf16.msra.mxu1 %v8151_v1  ;;  %7666 = vmatprep.mubr.msk.bf16.mxu1 %vm8182_vm0, %v11395_v45 }
0x346c   :  { %v5936_v36 = vunpack.c.l.b16 %v5886_v56  ;;  %v5937_v39 = vunpack.c.h.b16 %v5886_v56  ;;  %7664 = vmatprep.subr.bf16.mxu1 %v11395_v45 }
0x346d   :  { %v5883_v17 = vpop.xlane.xlu0 %5882 }
0x346e   :  { %v5887_v55 = vpack.c.bf16 %v5883_v17, %v5880_v46  ;;  %v5962_v15 = vrot.slane %v5936_v36, %v8601_v49  ;;  %v5966_v61 = vrot.slane %v5937_v39, %v8623_v60 }
0x346f   :  { %7665 = vmatpush3.bf16.msra.mxu1 %v8152_v14 }
0x3470   :  { %v5938_v52 = vunpack.c.l.b16 %v5887_v55  ;;  %v5939_v31 = vunpack.c.h.b16 %v5887_v55  ;;  %v5967_v33 = vsel %vm958_vm5, %v5966_v61, %v5962_v15  ;;  %v8157_v55 = vld [vmem:[%s11283_s13 + $0x1] ss:$0 sm:$0xff] }
0x3472   :  { %v5971_v28 = vrot.slane %v5938_v52, %v8897_v6  ;;  %v5976_v2 = vrot.slane %v5939_v31, %v8902_v53 }
0x3474   :  { %v5972_v29 = vsel %vm1474_vm12, %v5971_v28, %v5967_v33 }
0x3475   :  { %v5977_v30 = vsel %vm11474_vm2, %v5976_v2, %v5972_v29 }
0x3476   :  { %v5978_v50 = vsel %vm571_vm3, %v5977_v30, %v5958_v47 }
0x3477   :  { %v5979_v46 = vpack.c.b16 %v5978_v50, %v5978_v50 }
0x3479   :  { %7627 = vmatmul.mubr.msk.bf16.vlgmr.msra.gmra.mrb[60].mxu0 %vm142_vm1, %v5979_v46 }
0x347a   :  { %7639 = vmatpush3.bf16.msra.mxu0 %v8153_v34  ;;  %7642 = vmatprep.mubr.msk.bf16.mxu0 %vm8182_vm0, %v11395_v45 }
0x347b   :  { %7640 = vmatprep.subr.bf16.mxu0 %v11395_v45 }
0x347e   :  { %7641 = vmatpush3.bf16.msra.mxu0 %v8154_v32  ;;  %v8158_v32 = vld [vmem:[%s11280_s12 + $0x50] sm:$0xff]  }
0x347f   :  { %7654 = vmatprep.subr.bf16.mxu0 %v11395_v45 }
0x3481   :  { %7643 = vmatmul.mubr.msk.bf16.vlgmr.msra.gmra.mrb[64].mxu0 %vm142_vm1, %v10412_v5 }
0x3482   :  { %7655 = vmatpush3.bf16.msra.mxu0 %v8155_v20  ;;  %7658 = vmatprep.mubr.msk.bf16.mxu0 %vm8182_vm0, %v11395_v45 }
0x3483   :  { %7656 = vmatprep.subr.bf16.mxu0 %v11395_v45 }
0x3486   :  { %7657 = vmatpush3.bf16.msra.mxu0 %v8156_v11 }
0x3487   :  { %7670 = vmatprep.subr.bf16.mxu0 %v11395_v45 }
0x353d   :  { %v6220_v35 = vpop.f32.mrb[64].mxu1 }
0x353e   :  { %v7652_v0 = vpop.f32.mrb[65].mxu1 }
0x353f   :  { %v6223_v5 = vpop.f32.mrb[66].mxu1 }
0x3540   :  { %v7653_v38 = vpop.f32.mrb[67].mxu1 }
0x354c   :  { %v6017_v56 = vpop.f32.mrb[60].mxu0 }
0x354d   :  { %v10857_v1 = vadd.f32 %v6017_v56, %v10452_v57  ;;  %v7628_v36 = vpop.f32.mrb[61].mxu0 }
0x354e   :  { %v6020_v39 = vpop.f32.mrb[62].mxu0 }
0x354f   :  { %v7629_v40 = vpop.f32.mrb[63].mxu0 }
0x3554   :  { %v6173_v63 = vpop.f32.mrb[64].mxu0 }
0x3555   :  { %v6221_v27 = vadd.f32 %v6220_v35, %v6173_v63  ;;  %v7644_v17 = vpop.f32.mrb[65].mxu0 }
0x3556   :  { %v6176_v25 = vpop.f32.mrb[66].mxu0 }
0x3557   :  { %v6226_v15 = vadd.f32 %v8157_v55, %v6221_v27  ;;  %v7645_v61 = vpop.f32.mrb[67].mxu0  ;;  %v8160_v25 = vld [vmem:[%s11287_s2 + $0x4] sm:$0xf] }
0x3559   :  { %6234 = vrot.lane.b32.xlu0 %v6226_v15, %s8185_s1  ;;  %v7263_v14 = vmul.f32 -1.442695, %v6226_v15 }
0x355b   :  { %7968 = vpow2.f32 %v7263_v14 }
0x3565   :  { %v7969_v52 = vpop.eup %7968 }
0x3566   :  { %v6230_v57 = vadd.f32 1.0, %v7969_v52 }
0x3568   :  { %7970 = vrcp.f32 %v6230_v57 }
0x3572   :  { %v7971_v31 = vpop.eup %7970 }
0x3573   :  { %v6244_v33 = vsub.f32 1.0, %v7971_v31  ;;  %v6250_v47 = vmul.f32 %v7971_v31, %v10407_v48  ;;  %v8159_v48 = vld [vmem:[%s11280_s12 + $0x58] sm:$0xff]  }
0x35cb   :  { %v6235_v37 = vpop.permute.xlu0 %6234 }
0x35cc   :  { %v6237_v24 = vmul.f32 %v7971_v31, %v6235_v37  ;;  %v8162_v31 = vld [vmem:[%s11288_s3] sm:$0xff] }
0x35ce   :  { %6239 = vrot.lane.b32.xlu1 %v6237_v24, %s8184_s0  ;;  %v8163_v24 = vld [vmem:[%s11288_s3 + $0x8] sm:$0xf] }
0x3640   :  { %v6240_v51 = vpop.permute.xlu1 %6239 }
0x3641   :  { %v6242_v28 = vadd.f32 %v6240_v51, %v6226_v15  ;;  %v8161_v15 = vld [vmem:[%s11287_s2] sm:$0xf] }
0x3643   :  { %7972 = vtanh.f32 %v6242_v28 }
0x364d   :  { %v7973_v2 = vpop.eup %7972 }
0x364e   :  { %6246 = vrot.lane.b32.xlu1 %v7973_v2, %s8183_s27 }
0x36c0   :  { %v6247_v29 = vpop.permute.xlu1 %6246 }
0x36c1   :  { %v6249_v30 = vmul.f32 %v6247_v29, %v6244_v33  ;;  %v8164_v33 = vld [vmem:[%s11288_s3 + $0x10] sm:$0xff] }
0x36c3   :  { %v6251_v50 = vadd.f32 %v6250_v47, %v6249_v30  ;;  %v8165_v30 = vld [vmem:[%s11288_s3 + $0x18] sm:$0xf] }
0x36c5   :  { %v6252_v46 = vpack.c.bf16 %v6251_v50, %v6251_v50 }
0x36c7   :  { %6254 = vrot.lane.b32.xlu0 %v6252_v46, %s8183_s27 }
0x3739   :  { %v6255_v34 = vpop.permute.xlu0 %6254 }
0x373a   :  { %7659 = vmatmul.mubr.msk.bf16.vlgmr.msra.gmra.mrb[68].mxu0 %vm142_vm1, %v6255_v34  ;;  %7667 = vmatmul.mubr.msk.bf16.vlgmr.msra.gmra.mrb[68].mxu1 %vm142_vm1, %v6255_v34 }
0x373b   :  { %7671 = vmatpush3.bf16.msra.mxu0 %v8158_v32  ;;  %7674 = vmatprep.mubr.msk.bf16.mxu0 %vm8182_vm0, %v11395_v45  ;;  %vm11475_vm0 = vcmask 257024  }
0x373c   :  { %7672 = vmatprep.subr.bf16.mxu0 %v11395_v45  ;;  %vm11476_vm13 = vmmov %vm11475_vm0 }
0x373d   :  { %vm11477_vm2 = vmmov %vm11475_vm0 }
0x373f   :  { %7673 = vmatpush3.bf16.msra.mxu0 %v8159_v48 }
0x380d   :  { %v10878_v20 = vpop.f32.mrb[68].mxu0  ;;  %v10880_v11 = vpop.f32.mrb[68].mxu1 }
0x380e   :  { %v6306_v35 = vrot.slane %v10878_v20, %v8436_v4  ;;  %v7660_v0 = vpop.f32.mrb[69].mxu0  ;;  %v7668_v5 = vpop.f32.mrb[69].mxu1 }
0x380f   :  { %v6296_v38 = vpop.f32.mrb[70].mxu0  ;;  %v7041_v56 = vpop.f32.mrb[70].mxu1 }
0x3810   :  { %v6307_v36 = vcombine.high %v6306_v35, %v6306_v35  ;;  %v6314_v39 = vrot.slane %v6306_v35, %v8436_v4  ;;  %v7661_v45 = vpop.f32.mrb[71].mxu0  ;;  %v7669_v40 = vpop.f32.mrb[71].mxu1 }
0x3812   :  { %v6325_v63 = vrot.slane %v6314_v39, %v8403_v21  ;;  %v6321_v27 = vrot.slane %v6307_v36, %v8436_v4 }
0x3814   :  { %6490 = vrot.lane.b32.xlu1 %v6325_v63, %s8183_s27  ;;  %v6329_v17 = vrot.slane %v6321_v27, %v8403_v21  ;;  %v6332_v61 = vmul.f32 %v8161_v15, %v6325_v63 }
0x3816   :  { %6492 = vrot.lane.b32.xlu0 %v6329_v17, %s8183_s27  ;;  %v6333_v55 = vmul.f32 %v8160_v25, %v6329_v17  ;;  %v6334_v52 = vsel %vm11476_vm13, %v6332_v61, 0.0  ;;  %v11478_v61 = vld [vmem:[#allocation12_spill] sm:$0xff]  ;;  %vm11496_vm13 = vcmask 1043459  }
0x3818   :  { %v6337_v14 = vsel %vm11475_vm0, %v6333_v55, 0.0 }
0x3835   :  { %6338 = vadd.xlane.f32.xlu0 %v6337_v14  ;;  %v11479_v14 = vld [vmem:[#allocation8_spill] sm:$0xff] }
0x3838   :  { %6335 = vadd.xlane.f32.xlu1 %v6334_v52 }
0x384b   :  { %6341 = vperm.xlu0 %7717, %v10878_v20  }
0x384f   :  { %7720 = vset.pattern.permute.xlu0 %v11388_v3 }
0x3886   :  { %v6491_v57 = vpop.permute.xlu1 %6490 }
0x3887   :  { %v6496_v37 = vmul.f32 %v8162_v31, %v6491_v57  ;;  %v6497_v51 = vmul.f32 %v8163_v24, %v6491_v57  ;;  %v11480_v31 = vld [vmem:[#allocation9_spill] sm:$0xff] }
0x3888   :  { %v6493_v2 = vpop.permute.xlu0 %6492  ;;  %v11481_v24 = vld [vmem:[#allocation13_spill] sm:$0xff] }
0x3889   :  { %v6500_v28 = vsel %vm142_vm1, %v6496_v37, 0.0  ;;  %v6498_v29 = vmul.f32 %v8164_v33, %v6493_v2  ;;  %v6503_v47 = vsel %vm11477_vm2, %v6497_v51, 0.0  ;;  %v6499_v50 = vmul.f32 %v8165_v30, %v6493_v2  ;;  %v11483_v33 = vld [vmem:[#allocation16_spill] sm:$0xff]  ;;  %vm11497_vm2 = vmmov %vm11496_vm13 }
0x388a   :  { %6501 = vadd.xlane.f32.xlu1 %v6500_v28  ;;  %v11482_v28 = vld [vmem:[#allocation17_spill] sm:$0xff] }
0x388b   :  { %v6506_v46 = vsel %vm142_vm1, %v6498_v29, 0.0  ;;  %v6509_v34 = vsel %vm11475_vm0, %v6499_v50, 0.0  ;;  %v11485_v50 = vld [vmem:[#allocation6_spill] sm:$0xff] }
0x388e   :  { %6504 = vadd.xlane.f32.xlu1 %v6503_v47  ;;  %v11484_v47 = vld [vmem:[#allocation7_spill] sm:$0xff] }
0x3892   :  { %6507 = vadd.xlane.f32.xlu1 %v6506_v46 }
0x3896   :  { %6510 = vadd.xlane.f32.xlu1 %v6509_v34  ;;  %v11486_v34 = vld [vmem:[#allocation20_spill] sm:$0xff] }
0x38a7   :  { %6513 = vperm.xlu1 %7718, %v10878_v20  }
0x38ab   :  { %7719 = vset.pattern.permute.xlu1 %v11388_v3 }
0x38c2   :  { %v6339_v32 = vpop.xlane.xlu0 %6338 }
0x38c5   :  { %v6336_v5 = vpop.xlane.xlu1 %6335 }
0x38ca   :  { %v6342_v48 = vpop.permute.xlu0 %6341 }
0x38cb   :  { %v6346_v35 = vrot.slane %v6342_v48, %v8403_v21  ;;  %v6350_v0 = vrot.slane %v6342_v48, %v8407_v22  ;;  %v11487_v48 = vld [vmem:[#allocation21_spill] sm:$0xff] }
0x38cd   :  { %v6353_v38 = vadd.f32 %v6346_v35, %v6336_v5  ;;  %v6354_v56 = vadd.f32 %v6350_v0, %v6339_v32  ;;  %v11488_v0 = vld [vmem:[#allocation10_spill] sm:$0xff] }
0x38cf   :  { %v10921_v36 = vadd.f32 %v6353_v38, %v8480_v18  ;;  %v10925_v39 = vadd.f32 %v6354_v56, %v8482_v19  ;;  %v11489_v38 = vld [vmem:[#allocation14_spill] sm:$0xff] }
0x38d1   :  { %6360 = vperm.xlu1 %7719, %v10921_v36  }
0x38d5   :  { %6363 = vperm.xlu1 %7719, %v10925_v39  }
0x3917   :  { %v6502_v3 = vpop.xlane.xlu1 %6501 }
0x391b   :  { %v6505_v45 = vpop.xlane.xlu1 %6504 }
0x391f   :  { %v6508_v40 = vpop.xlane.xlu1 %6507 }
0x3923   :  { %v6511_v63 = vpop.xlane.xlu1 %6510 }
0x3927   :  { %v6514_v27 = vpop.permute.xlu1 %6513 }
0x3928   :  { %v6518_v17 = vrot.slane %v6514_v27, %v8403_v21  ;;  %v6522_v57 = vrot.slane %v6514_v27, %v8407_v22  ;;  %v11492_v27 = vld [vmem:[#allocation19_spill] sm:$0xff] }
0x392a   :  { %v6525_v25 = vadd.f32 %v6518_v17, %v6502_v3  ;;  %v6526_v55 = vadd.f32 %v6518_v17, %v6505_v45  ;;  %v6528_v51 = vadd.f32 %v6522_v57, %v6511_v63  ;;  %v11490_v3 = vld [vmem:[#allocation11_spill] sm:$0xff] }
0x392c   :  { %v10930_v15 = vadd.f32 %v6525_v25, %v8486_v23  ;;  %v10933_v18 = vadd.f32 %v6526_v55, %v11450_v59  ;;  %v6527_v59 = vadd.f32 %v6522_v57, %v6508_v40  ;;  %v10952_v46 = vadd.f32 %v6528_v51, %v11485_v50  ;;  %v11491_v40 = vld [vmem:[#allocation15_spill] sm:$0xff]  ;;  %v11493_v25 = vld [vmem:[#allocation18_spill] sm:$0xff] }
0x392d   :  { %v10981_v51 = vld [vmem:[%s11283_s13 + $0x2] ss:$0 sm:$0xff] }
0x392e   :  { %v6533_v19 = vadd.f32 %v10930_v15, %v11478_v61  ;;  %v6534_v52 = vadd.f32 %v10933_v18, %v11479_v14  ;;  %v6536_v37 = vadd.f32 %v10933_v18, %v11480_v31  ;;  %v6535_v23 = vadd.f32 %v10930_v15, %v11481_v24  ;;  %v11494_v61 = vld [vmem:[#allocation23_spill] sm:$0xff]  ;;  %v11495_v14 = vld [vmem:[#allocation22_spill] sm:$0xff] }
0x392f   :  { %v6538_v2 = vadd.f32 %v10933_v18, %v11482_v28  ;;  %v6537_v29 = vadd.f32 %v10930_v15, %v11483_v33  ;;  %v10949_v30 = vadd.f32 %v6527_v59, %v11484_v47  ;;  %v6540_v32 = vadd.f32 %v10933_v18, %v11486_v34 }
0x3930   :  { %6566 = vperm.xlu0 %7720, %v6533_v19   ;;  %6569 = vperm.xlu1 %7719, %v6534_v52   ;;  %v6539_v35 = vadd.f32 %v10930_v15, %v11487_v48  ;;  %v6542_v5 = vadd.f32 %v10952_v46, %v11488_v0  ;;  %v6544_v45 = vadd.f32 %v10952_v46, %v11490_v3 }
0x3931   :  { %v6541_v56 = vadd.f32 %v10949_v30, %v11489_v38  ;;  %v6543_v63 = vadd.f32 %v10949_v30, %v11491_v40  ;;  %v6546_v17 = vadd.f32 %v10952_v46, %v11492_v27  ;;  %v6545_v55 = vadd.f32 %v10949_v30, %v11493_v25 }
0x3932   :  { %v6548_v19 = vadd.f32 %v10952_v46, %v11494_v61  ;;  %v6547_v52 = vadd.f32 %v10949_v30, %v11495_v14  ;;  %v6023_v28 = vadd.f32 %v10981_v51, %v10857_v1 }
0x3934   :  { %6575 = vperm.xlu0 %7720, %v6536_v37   ;;  %6572 = vperm.xlu1 %7719, %v6535_v23  }
0x3938   :  { %6581 = vperm.xlu0 %7720, %v6538_v2   ;;  %6578 = vperm.xlu1 %7719, %v6537_v29   ;;  %v6024_v2 = vsel %vm1560_vm14, %v6023_v28, -inf }
0x393c   :  { %6587 = vperm.xlu0 %7720, %v6540_v32   ;;  %6584 = vperm.xlu1 %7719, %v6539_v35  }
0x3940   :  { %6593 = vperm.xlu0 %7720, %v6542_v5   ;;  %6590 = vperm.xlu1 %7719, %v6541_v56  }
0x3944   :  { %6599 = vperm.xlu0 %7720, %v6544_v45   ;;  %6596 = vperm.xlu1 %7719, %v6543_v63  }
0x3948   :  { %6605 = vperm.xlu0 %7720, %v6546_v17   ;;  %6602 = vperm.xlu1 %7719, %v6545_v55  }
0x394c   :  { %6611 = vperm.xlu0 %7720, %v6548_v19   ;;  %6608 = vperm.xlu1 %7719, %v6547_v52  }
0x3950   :  { %v6361_v57 = vpop.permute.xlu1 %6360 }
0x3951   :  { %v6368_v24 = vrot.slane %v6361_v57, %v8601_v49 }
0x3954   :  { %v6364_v31 = vpop.permute.xlu1 %6363 }
0x3955   :  { %v6372_v37 = vrot.slane %v6364_v31, %v8601_v49 }
0x3957   :  { %v6373_v23 = vsel %vm571_vm3, %v6372_v37, %v6368_v24 }
0x3958   :  { %v6375_v59 = vsel %vm574_vm4, %v6373_v23, -inf }
0x396b   :  { %6376 = vmax.xlane.f32.xlu0 %v6375_v59 }
0x3970   :  { %6025 = vmax.xlane.f32.xlu1 %v6024_v2 }
0x39af   :  { %v6570_v33 = vpop.permute.xlu1 %6569  ;;  %v6567_v29 = vpop.permute.xlu0 %6566 }
0x39b0   :  { %v6620_v0 = vrot.slane %v6570_v33, %v8623_v60  ;;  %v6616_v5 = vrot.slane %v6567_v29, %v8601_v49 }
0x39b2   :  { %v6621_v63 = vsel %vm958_vm5, %v6620_v0, %v6616_v5 }
0x39b3   :  { %v6573_v47 = vpop.permute.xlu1 %6572  ;;  %v6576_v50 = vpop.permute.xlu0 %6575 }
0x39b4   :  { %v6625_v34 = vrot.slane %v6573_v47, %v8601_v49  ;;  %v6629_v32 = vrot.slane %v6576_v50, %v8623_v60 }
0x39b6   :  { %v6630_v56 = vsel %vm958_vm5, %v6629_v32, %v6625_v34 }
0x39b7   :  { %v6579_v48 = vpop.permute.xlu1 %6578  ;;  %v6582_v35 = vpop.permute.xlu0 %6581  ;;  %v6685_v25 = vsel %vm571_vm3, %v6630_v56, %v6621_v63 }
0x39b8   :  { %v6634_v1 = vrot.slane %v6579_v48, %v8601_v49  ;;  %v6638_v38 = vrot.slane %v6582_v35, %v8623_v60 }
0x39ba   :  { %v6639_v3 = vsel %vm958_vm5, %v6638_v38, %v6634_v1 }
0x39bb   :  { %v6585_v45 = vpop.permute.xlu1 %6584  ;;  %v6588_v40 = vpop.permute.xlu0 %6587  ;;  %v6686_v61 = vsel %vm1024_vm6, %v6639_v3, %v6685_v25 }
0x39bc   :  { %v6643_v27 = vrot.slane %v6585_v45, %v8601_v49  ;;  %v6647_v17 = vrot.slane %v6588_v40, %v8623_v60 }
0x39be   :  { %v6648_v55 = vsel %vm958_vm5, %v6647_v17, %v6643_v27 }
0x39bf   :  { %v6591_v19 = vpop.permute.xlu1 %6590  ;;  %v6594_v14 = vpop.permute.xlu0 %6593  ;;  %v6687_v52 = vsel %vm11496_vm13, %v6648_v55, %v6686_v61 }
0x39c0   :  { %v6693_v57 = vsel %vm1033_vm8, %v6687_v52, -inf  ;;  %v6652_v33 = vrot.slane %v6591_v19, %v8601_v49  ;;  %v6656_v29 = vrot.slane %v6594_v14, %v8623_v60 }
0x39c1   :  { %6694 = vmax.xlane.f32.xlu0 %v6693_v57 }
0x39c2   :  { %v6657_v0 = vsel %vm958_vm5, %v6656_v29, %v6652_v33  ;;  %v6436_v33 = vrot.slane %v11422_v58, 2  ;;  %v6041_v58 = vrot.slane %v10755_v62, %v9200_v42 }
0x39c3   :  { %v6597_v31 = vpop.permute.xlu1 %6596  ;;  %v6600_v37 = vpop.permute.xlu0 %6599 }
0x39c4   :  { %v6661_v24 = vrot.slane %v6597_v31, %v8601_v49  ;;  %v6665_v23 = vrot.slane %v6600_v37, %v8623_v60 }
0x39c6   :  { %v6666_v34 = vsel %vm958_vm5, %v6665_v23, %v6661_v24 }
0x39c7   :  { %v6603_v59 = vpop.permute.xlu1 %6602  ;;  %v6606_v2 = vpop.permute.xlu0 %6605  ;;  %v6688_v38 = vsel %vm571_vm3, %v6666_v34, %v6657_v0 }
0x39c8   :  { %v6670_v47 = vrot.slane %v6603_v59, %v8601_v49  ;;  %v6674_v50 = vrot.slane %v6606_v2, %v8623_v60 }
0x39ca   :  { %v6675_v32 = vsel %vm958_vm5, %v6674_v50, %v6670_v47 }
0x39cb   :  { %v6609_v48 = vpop.permute.xlu1 %6608  ;;  %v6612_v35 = vpop.permute.xlu0 %6611  ;;  %v6689_v3 = vsel %vm1024_vm6, %v6675_v32, %v6688_v38  ;;  %vm11502_vm6 = vcmask 261312  }
0x39cc   :  { %v6679_v5 = vrot.slane %v6609_v48, %v8601_v49  ;;  %v6683_v1 = vrot.slane %v6612_v35, %v8623_v60 }
0x39ce   :  { %v6684_v56 = vsel %vm958_vm5, %v6683_v1, %v6679_v5 }
0x39cf   :  { %v6690_v45 = vsel %vm11497_vm2, %v6684_v56, %v6689_v3  ;;  %v11066_v3 = vld [vmem:[%s11291_s5 + $0x8] sm:$0xf] }
0x39d0   :  { %v6696_v40 = vsel %vm1033_vm8, %v6690_v45, -inf }
0x39d1   :  { %6697 = vmax.xlane.f32.xlu1 %v6696_v40 }
0x39f8   :  { %v6377_v63 = vpop.xlane.xlu0 %6376 }
0x39f9   :  { %v6382_v27 = vrot.slane %v6377_v63, %v8403_v21  ;;  %v6386_v57 = vrot.slane %v6377_v63, %v8407_v22 }
0x39fb   :  { %v6389_v17 = vsub.f32 %v10921_v36, %v6382_v27  ;;  %v6390_v37 = vsub.f32 %v10925_v39, %v6386_v57 }
0x39fd   :  { %v6391_v25 = vmul.f32 1.442695, %v6389_v17  ;;  %v6026_v55 = vpop.xlane.xlu1 %6025  ;;  %v6393_v24 = vmul.f32 1.442695, %v6390_v37  ;;  %v11075_v17 = vld [vmem:[%s11291_s5 + $0x10] sm:$0xff] }
0x39fe   :  { %v6027_v61 = vsub.f32 %v6023_v28, %v6026_v55  ;;  %v11081_v55 = vld [vmem:[%s11291_s5 + $0x18] sm:$0xf] }
0x39ff   :  { %7974 = vpow2.f32 %v6391_v25 }
0x3a00   :  { %v6028_v19 = vmul.f32 1.442695, %v6027_v61 }
0x3a02   :  { %7976 = vpow2.f32 %v6028_v19 }
0x3a03   :  { %7978 = vpow2.f32 %v6393_v24 }
0x3a09   :  { %v11020_v14 = vpop.eup %7974 }
0x3a0a   :  { %6398 = vperm.xlu1 %7719, %v11020_v14  }
0x3a0c   :  { %v7977_v52 = vpop.eup %7976 }
0x3a0d   :  { %v6030_v31 = vsel %vm1560_vm14, %v7977_v52, 0.0  ;;  %v11026_v36 = vpop.eup %7978 }
0x3a0e   :  { %6031 = vadd.xlane.f32.xlu0 %v6030_v31 }
0x3a24   :  { %6401 = vperm.xlu0 %7720, %v11026_v36  }
0x3a4e   :  { %v6695_v28 = vpop.xlane.xlu0 %6694 }
0x3a4f   :  { %v6699_v23 = vmul.f32 %v6695_v28, %v8669_v12  ;;  %v6045_v12 = vrot.slane %v10757_v9, %v9197_v54 }
0x3a51   :  { %6704 = vperm.xlu1 %7719, %v6699_v23   ;;  %v6046_v5 = vsel %vm1584_vm15, %v6045_v12, %v6041_v58 }
0x3a52   :  { %v6056_v1 = vsel %vm571_vm3, %v10786_v44, %v6046_v5 }
0x3a5e   :  { %v6698_v59 = vpop.xlane.xlu1 %6697 }
0x3a5f   :  { %v6700_v2 = vmul.f32 %v6698_v59, %v8672_v7 }
0x3a61   :  { %6707 = vperm.xlu1 %7719, %v6700_v2  }
0x3a65   :  { %6437 = vrot.lane.b32.xlu1 %v6436_v33, %s8185_s1 }
0x3a89   :  { %v6399_v39 = vpop.permute.xlu1 %6398 }
0x3a8a   :  { %v6406_v50 = vrot.slane %v6399_v39, %v8601_v49 }
0x3a9b   :  { %v6032_v29 = vpop.xlane.xlu0 %6031 }
0x3a9c   :  { %7980 = vlog2.f32 %v6032_v29  ;;  %v11498_v29 = vld [vmem:[#allocation30_spill] sm:$0xff] }
0x3aa3   :  { %v6402_v47 = vpop.permute.xlu0 %6401 }
0x3aa4   :  { %v6410_v34 = vrot.slane %v6402_v47, %v8601_v49 }
0x3aa6   :  { %v7981_v32 = vpop.eup %7980  ;;  %v6411_v48 = vsel %vm571_vm3, %v6410_v34, %v6406_v50 }
0x3aa7   :  { %v6034_v7 = vmul.f32 0.6931472, %v7981_v32  ;;  %v6413_v35 = vsel %vm574_vm4, %v6411_v48, 0.0 }
0x3aa8   :  { %6414 = vadd.xlane.f32.xlu1 %v6413_v35 }
0x3aa9   :  { %v6035_v0 = vsub.f32 %v6027_v61, %v6034_v7 }
0x3aab   :  { %v6431_v38 = vmul.f32 %v6035_v0, %v9192_v41  ;;  %7256 = vst.msk [vmem:[%s11294_s14 + $0x8] sm:$0x3] %vm1560_vm14, %v6035_v0  ;;  %v11060_v41 = vld [vmem:[%s11291_s5] sm:$0xff] }
0x3aac   :  { %7257 = vst.msk [vmem:[%s11294_s14 + $0x8] sm:$0x3] %vm1597_vm7, %v6056_v1 }
0x3aad   :  { %v6432_v62 = vsel %vm1560_vm14, %v6431_v38, 0.0 }
0x3aae   :  { %6433 = vadd.xlane.f32.xlu0 %v6432_v62 }
0x3ac4   :  { %6441 = vrot.lane.b32.xlu0 %v10878_v20, %s8192_s30 }
0x3ad0   :  { %v6705_v9 = vpop.permute.xlu1 %6704 }
0x3ad1   :  { %v6712_v44 = vrot.slane %v6705_v9, %v8601_v49 }
0x3ad3   :  { %v6733_v56 = vmul.f32 %v11060_v41, %v6712_v44  ;;  %v6734_v45 = vmul.f32 %v11066_v3, %v6712_v44 }
0x3ad5   :  { %v6737_v40 = vsel %vm1099_vm10, %v6733_v56, 0.0  ;;  %v6740_v20 = vsel %vm1103_vm9, %v6734_v45, 0.0 }
0x3ad6   :  { %6738 = vadd.xlane.f32.xlu1 %v6737_v40 }
0x3ada   :  { %6741 = vadd.xlane.f32.xlu1 %v6740_v20 }
0x3ae0   :  { %v6708_v63 = vpop.permute.xlu1 %6707 }
0x3ae1   :  { %v6716_v27 = vrot.slane %v6708_v63, %v8601_v49 }
0x3ae3   :  { %v6735_v25 = vmul.f32 %v11075_v17, %v6716_v27  ;;  %v6736_v61 = vmul.f32 %v11081_v55, %v6716_v27 }
0x3ae4   :  { %v6438_v57 = vpop.permute.xlu1 %6437 }
0x3ae5   :  { %v6743_v19 = vsel %vm1099_vm10, %v6735_v25, 0.0  ;;  %v6746_v52 = vsel %vm1103_vm9, %v6736_v61, 0.0 }
0x3ae6   :  { %6744 = vadd.xlane.f32.xlu1 %v6743_v19 }
0x3aea   :  { %6747 = vadd.xlane.f32.xlu1 %v6746_v52 }
0x3b35   :  { %v6415_v31 = vpop.xlane.xlu1 %6414 }
0x3b36   :  { %v6420_v37 = vrot.slane %v6415_v31, %v8403_v21  ;;  %v6424_v24 = vrot.slane %v6415_v31, %v8407_v22 }
0x3b38   :  { %7982 = vrcp.f32 %v6420_v37 }
0x3b39   :  { %7984 = vrcp.f32 %v6424_v24 }
0x3b3b   :  { %v6434_v28 = vpop.xlane.xlu0 %6433 }
0x3b3c   :  { %v6440_v23 = vadd.f32 %v6438_v57, %v6434_v28 }
0x3b3f   :  { %v6442_v59 = vpop.permute.xlu0 %6441 }
0x3b40   :  { %v6444_v2 = vadd.f32 %v6442_v59, %v6440_v23 }
0x3b42   :  { %v7983_v33 = vpop.eup %7982  ;;  %v6445_v39 = vadd.f32 %v6444_v2, %v11498_v29  ;;  %v8171_v2 = vld [vmem:[%s11292_s6] sm:$0xf] }
0x3b43   :  { %v7985_v47 = vpop.eup %7984  ;;  %v6428_v50 = vmul.f32 %v7983_v33, %v11020_v14 }
0x3b44   :  { %v7265_v34 = vmul.f32 -1.442695, %v6445_v39  ;;  %v6430_v32 = vmul.f32 %v7985_v47, %v11026_v36 }
0x3b45   :  { %6461 = vperm.xlu0 %7720, %v6428_v50  }
0x3b46   :  { %7986 = vpow2.f32 %v7265_v34  ;;  %6464 = vperm.xlu1 %7719, %v6430_v32  }
0x3b50   :  { %v7987_v12 = vpop.eup %7986 }
0x3b51   :  { %v6449_v22 = vadd.f32 1.0, %v7987_v12  ;;  %v8172_v12 = vld [vmem:[%s11292_s6 + $0x4] sm:$0xf] }
0x3b53   :  { %7988 = vrcp.f32 %v6449_v22 }
0x3b5d   :  { %v7989_v48 = vpop.eup %7988 }
0x3b5e   :  { %v6452_v7 = vsub.f32 1.0, %v7989_v48 }
0x3b60   :  { %6455 = vperm.xlu0 %7720, %v6452_v7  }
0x3b63   :  { %v6739_v35 = vpop.xlane.xlu1 %6738 }
0x3b64   :  { %v6749_v58 = vsub.f32 %v10930_v15, %v6739_v35  ;;  %6479 = vperm.xlu0 %7720, %v7989_v48  }
0x3b66   :  { %v6753_v0 = vmul.f32 1.442695, %v6749_v58 }
0x3b67   :  { %v6742_v5 = vpop.xlane.xlu1 %6741 }
0x3b68   :  { %7990 = vpow2.f32 %v6753_v0  ;;  %v6750_v14 = vsub.f32 %v10933_v18, %v6742_v5 }
0x3b6a   :  { %v6755_v1 = vmul.f32 1.442695, %v6750_v14 }
0x3b6c   :  { %7992 = vpow2.f32 %v6755_v1 }
0x3b72   :  { %v7991_v36 = vpop.eup %7990 }
0x3b73   :  { %v6745_v38 = vpop.xlane.xlu1 %6744  ;;  %v11094_v62 = vmul.f32 %v7991_v36, %v11398_v26 }
0x3b74   :  { %v6751_v9 = vsub.f32 %v10949_v30, %v6745_v38 }
0x3b75   :  { %6770 = vperm.xlu0 %7720, %v11094_v62  }
0x3b76   :  { %v7993_v44 = vpop.eup %7992  ;;  %v6757_v56 = vmul.f32 1.442695, %v6751_v9 }
0x3b77   :  { %v6748_v15 = vpop.xlane.xlu1 %6747  ;;  %v11099_v45 = vmul.f32 %v7993_v44, %v8733_v43 }
0x3b78   :  { %7994 = vpow2.f32 %v6757_v56  ;;  %v6752_v18 = vsub.f32 %v10952_v46, %v6748_v15 }
0x3b79   :  { %6773 = vperm.xlu0 %7720, %v11099_v45  }
0x3b7a   :  { %v6759_v40 = vmul.f32 1.442695, %v6752_v18 }
0x3b7c   :  { %7996 = vpow2.f32 %v6759_v40 }
0x3b82   :  { %v7995_v20 = vpop.eup %7994 }
0x3b83   :  { %v11104_v26 = vmul.f32 %v7995_v20, %v11400_v13 }
0x3b85   :  { %6776 = vperm.xlu0 %7720, %v11104_v26  }
0x3b86   :  { %v7997_v30 = vpop.eup %7996 }
0x3b87   :  { %v11108_v63 = vmul.f32 %v7997_v30, %v11399_v8 }
0x3b89   :  { %6779 = vperm.xlu1 %7719, %v11108_v63  }
0x3bc4   :  { %v6462_v43 = vpop.permute.xlu0 %6461 }
0x3bc5   :  { %v6465_v27 = vpop.permute.xlu1 %6464  ;;  %v6469_v25 = vrot.slane %v6462_v43, %v8601_v49 }
0x3bc6   :  { %v6473_v46 = vrot.slane %v6465_v27, %v8601_v49 }
0x3bc8   :  { %v6474_v19 = vsel %vm571_vm3, %v6473_v46, %v6469_v25 }
0x3bdf   :  { %v6456_v61 = vpop.permute.xlu0 %6455 }
0x3be0   :  { %v6476_v13 = vmul.f32 %v6474_v19, %v6456_v61 }
0x3be3   :  { %v6480_v52 = vpop.permute.xlu0 %6479 }
0x3be4   :  { %v6482_v57 = vmul.f32 %v6480_v52, %v10713_v16 }
0x3be6   :  { %v6483_v31 = vadd.f32 %v6482_v57, %v6476_v13 }
0x3be8   :  { %v6484_v37 = vsel %vm574_vm4, %v6483_v31, 0.0  ;;  %vm1602_vm4 = vcmask 386400  }
0x3be9   :  { %6485 = vadd.xlane.f32.xlu0 %v6484_v37 }
0x3bf4   :  { %v6771_v8 = vpop.permute.xlu0 %6770 }
0x3bf5   :  { %v6784_v28 = vrot.slane %v6771_v8, %v8601_v49 }
0x3bf8   :  { %v6774_v24 = vpop.permute.xlu0 %6773 }
0x3bf9   :  { %v6788_v23 = vrot.slane %v6774_v24, %v8623_v60 }
0x3bfb   :  { %v6789_v59 = vsel %vm958_vm5, %v6788_v23, %v6784_v28 }
0x3bfc   :  { %v6805_v33 = vmul.f32 %v8171_v2, %v6789_v59 }
0x3bfe   :  { %v6807_v29 = vsel %vm1033_vm8, %v6805_v33, 0.0 }
0x3bff   :  { %6808 = vadd.xlane.f32.xlu1 %v6807_v29 }
0x3c04   :  { %v6777_v39 = vpop.permute.xlu0 %6776 }
0x3c05   :  { %v6793_v50 = vrot.slane %v6777_v39, %v8601_v49 }
0x3c08   :  { %v6780_v47 = vpop.permute.xlu1 %6779 }
0x3c09   :  { %v6797_v34 = vrot.slane %v6780_v47, %v8623_v60 }
0x3c0b   :  { %v6798_v32 = vsel %vm958_vm5, %v6797_v34, %v6793_v50 }
0x3c0c   :  { %v6806_v22 = vmul.f32 %v8172_v12, %v6798_v32 }
0x3c0e   :  { %v6810_v48 = vsel %vm1033_vm8, %v6806_v22, 0.0  ;;  %vm11503_vm8 = vmmov %vm11502_vm6 }
0x3c0f   :  { %6811 = vadd.xlane.f32.xlu0 %v6810_v48 }
0x3c76   :  { %v6486_v7 = vpop.xlane.xlu0 %6485 }
0x3c77   :  { %v6487_v35 = vadd.f32 1e-20, %v6486_v7 }
0x3c79   :  { %7998 = vrcp.f32 %v6487_v35 }
0x3c83   :  { %v7999_v0 = vpop.eup %7998 }
0x3c84   :  { %v11133_v36 = vmul.f32 %v7999_v0, %v6483_v31 }
0x3c86   :  { %v6874_v44 = vrot.slane %v11133_v36, %v8436_v4 }
0x3c88   :  { %v6882_v56 = vrot.slane %v6874_v44, %v8436_v4  ;;  %v6875_v15 = vcombine.high %v6874_v44, %v6874_v44 }
0x3c8a   :  { %v6893_v40 = vrot.slane %v6882_v56, %v8403_v21  ;;  %v6889_v30 = vrot.slane %v6875_v15, %v8436_v4  ;;  %v8174_v56 = vld [vmem:[%s11293_s4] sm:$0xff] }
0x3c8c   :  { %v6809_v58 = vpop.xlane.xlu1 %6808  ;;  %v6901_v46 = vmul.f32 %v11066_v3, %v6893_v40  ;;  %v6900_v19 = vmul.f32 %v11060_v41, %v6893_v40  ;;  %v6897_v52 = vrot.slane %v6889_v30, %v8403_v21 }
0x3c8d   :  { %v6818_v5 = vrot.slane %v6809_v58, %v8601_v49 }
0x3c8e   :  { %v6907_v13 = vsel %vm1103_vm9, %v6901_v46, 0.0  ;;  %v6904_v4 = vsel %vm1099_vm10, %v6900_v19, 0.0  ;;  %v6903_v57 = vmul.f32 %v11081_v55, %v6897_v52  ;;  %v6902_v31 = vmul.f32 %v11075_v17, %v6897_v52 }
0x3c8f   :  { %v6839_v14 = vmul.f32 %v11060_v41, %v6818_v5  ;;  %v6840_v1 = vmul.f32 %v11066_v3, %v6818_v5 }
0x3c90   :  { %v6913_v3 = vsel %vm1103_vm9, %v6903_v57, 0.0  ;;  %v6910_v37 = vsel %vm1099_vm10, %v6902_v31, 0.0  ;;  %v8177_v57 = vld [vmem:[%s11293_s4 + $0x28] sm:$0xff] }
0x3c91   :  { %v6846_v38 = vsel %vm1103_vm9, %v6840_v1, 0.0  ;;  %v6843_v9 = vsel %vm1099_vm10, %v6839_v14, 0.0 }
0x3c92   :  { %6847 = vadd.xlane.f32.xlu1 %v6846_v38  ;;  %6844 = vadd.xlane.f32.xlu0 %v6843_v9 }
0x3c9c   :  { %v6812_v18 = vpop.xlane.xlu0 %6811 }
0x3c9d   :  { %v6822_v20 = vrot.slane %v6812_v18, %v8601_v49 }
0x3c9f   :  { %v6841_v43 = vmul.f32 %v11075_v17, %v6822_v20  ;;  %v6842_v27 = vmul.f32 %v11081_v55, %v6822_v20  ;;  %v8175_v20 = vld [vmem:[%s11293_s4 + $0x10] sm:$0xff] }
0x3ca1   :  { %v6852_v25 = vsel %vm1103_vm9, %v6842_v27, 0.0  ;;  %v6849_v61 = vsel %vm1099_vm10, %v6841_v43, 0.0  ;;  %v8176_v43 = vld [vmem:[%s11293_s4 + $0x18] sm:$0xff] }
0x3ca2   :  { %6853 = vadd.xlane.f32.xlu1 %v6852_v25  ;;  %6850 = vadd.xlane.f32.xlu0 %v6849_v61 }
0x3ca6   :  { %6908 = vadd.xlane.f32.xlu1 %v6907_v13  ;;  %6905 = vadd.xlane.f32.xlu0 %v6904_v4 }
0x3caa   :  { %6914 = vadd.xlane.f32.xlu1 %v6913_v3  ;;  %6911 = vadd.xlane.f32.xlu0 %v6910_v37  ;;  %v8178_v3 = vld [vmem:[%s11293_s4 + $0x20] sm:$0xff] }
0x3d1f   :  { %v6848_v41 = vpop.xlane.xlu1 %6847  ;;  %v6845_v21 = vpop.xlane.xlu0 %6844 }
0x3d20   :  { %v6856_v8 = vmax.f32 %v6848_v41, 1e-20  ;;  %v6855_v24 = vmax.f32 %v6845_v21, 1e-20 }
0x3d22   :  { %8000 = vrcp.f32 %v6856_v8  ;;  %v8179_v8 = vld [vmem:[%s11293_s4 + $0x38] sm:$0xff] }
0x3d23   :  { %8002 = vrcp.f32 %v6855_v24 }
0x3d2c   :  { %v8001_v28 = vpop.eup %8000 }
0x3d2d   :  { %v8003_v23 = vpop.eup %8002  ;;  %v6862_v33 = vmul.f32 %v8001_v28, %v11099_v45  ;;  %v8180_v28 = vld [vmem:[%s11293_s4 + $0x30] sm:$0xff] }
0x3d2e   :  { %v6860_v29 = vmul.f32 %v8003_v23, %v11094_v62 }
0x3d2f   :  { %v6854_v59 = vpop.xlane.xlu1 %6853  ;;  %v6851_v55 = vpop.xlane.xlu0 %6850 }
0x3d30   :  { %v6858_v2 = vmax.f32 %v6854_v59, 1e-20  ;;  %v6857_v17 = vmax.f32 %v6851_v55, 1e-20 }
0x3d32   :  { %8004 = vrcp.f32 %v6858_v2  ;;  %v11499_v2 = vld [vmem:[#allocation25_spill] sm:$0xff] }
0x3d33   :  { %8006 = vrcp.f32 %v6857_v17  ;;  %v6909_v39 = vpop.xlane.xlu1 %6908  ;;  %v6906_v47 = vpop.xlane.xlu0 %6905  ;;  %v11500_v17 = vld [vmem:[#allocation26_spill] sm:$0xff] }
0x3d34   :  { %v6917_v50 = vmul.f32 %v6909_v39, %v6862_v33  ;;  %v6916_v34 = vmul.f32 %v6906_v47, %v6860_v29  ;;  %v11501_v33 = vld [vmem:[#allocation28_spill] sm:$0xff] }
0x3d36   :  { %6928 = vperm.xlu1 %7719, %v6917_v50   ;;  %6925 = vperm.xlu0 %7720, %v6916_v34  }
0x3d37   :  { %v6915_v48 = vpop.xlane.xlu1 %6914  ;;  %v6912_v58 = vpop.xlane.xlu0 %6911 }
0x3d3c   :  { %v8005_v32 = vpop.eup %8004 }
0x3d3d   :  { %v8007_v12 = vpop.eup %8006  ;;  %v6866_v22 = vmul.f32 %v8005_v32, %v11108_v63 }
0x3d3e   :  { %v6864_v7 = vmul.f32 %v8007_v12, %v11104_v26  ;;  %v8173_v26 = vld [vmem:[%s11293_s4 + $0x8] sm:$0xff] }
0x3d3f   :  { %v6919_v35 = vmul.f32 %v6915_v48, %v6866_v22 }
0x3d40   :  { %v6918_v0 = vmul.f32 %v6912_v58, %v6864_v7 }
0x3d41   :  { %6934 = vperm.xlu0 %7720, %v6919_v35  }
0x3d42   :  { %6931 = vperm.xlu1 %7719, %v6918_v0  }
0x3db5   :  { %v6929_v62 = vpop.permute.xlu1 %6928  ;;  %v6926_v45 = vpop.permute.xlu0 %6925 }
0x3db6   :  { %v6943_v5 = vrot.slane %v6929_v62, %v8623_v60  ;;  %v7161_v14 = vrot.slane %v6929_v62, %v9197_v54  ;;  %v6939_v1 = vrot.slane %v6926_v45, %v8601_v49  ;;  %v7157_v38 = vrot.slane %v6926_v45, %v9200_v42 }
0x3db8   :  { %v6944_v63 = vsel %vm958_vm5, %v6943_v5, %v6939_v1  ;;  %v11166_v9 = vsel %vm1584_vm15, %v7161_v14, %v7157_v38 }
0x3db9   :  { %v6969_v44 = vmul.f32 %v8173_v26, %v6944_v63  ;;  %v6968_v15 = vmul.f32 %v8174_v56, %v6944_v63  ;;  %v6970_v30 = vmul.f32 %v8175_v20, %v6944_v63  ;;  %v6971_v27 = vmul.f32 %v8176_v43, %v6944_v63 }
0x3dbb   :  { %v6979_v18 = vsel %vm1367_vm11, %v6969_v44, 0.0  ;;  %v6976_v40 = vsel %vm1367_vm11, %v6968_v15, 0.0  ;;  %v6982_v46 = vsel %vm1367_vm11, %v6970_v30, 0.0  ;;  %v6985_v25 = vsel %vm1367_vm11, %v6971_v27, 0.0 }
0x3dbc   :  { %6980 = vadd.xlane.f32.xlu0 %v6979_v18  ;;  %6977 = vadd.xlane.f32.xlu1 %v6976_v40 }
0x3dc0   :  { %6983 = vadd.xlane.f32.xlu0 %v6982_v46  ;;  %6986 = vadd.xlane.f32.xlu1 %v6985_v25  ;;  %v11184_v61 = vpop.permute.xlu0 %6934 }
0x3dc1   :  { %v11186_v19 = vpop.permute.xlu1 %6931  ;;  %v6952_v52 = vrot.slane %v11184_v61, %v8623_v60 }
0x3dc2   :  { %v6948_v13 = vrot.slane %v11186_v19, %v8601_v49 }
0x3dc4   :  { %v6953_v4 = vsel %vm958_vm5, %v6952_v52, %v6948_v13 }
0x3dc5   :  { %v6973_v31 = vmul.f32 %v8177_v57, %v6953_v4  ;;  %v6972_v37 = vmul.f32 %v8178_v3, %v6953_v4  ;;  %v6975_v24 = vmul.f32 %v8179_v8, %v6953_v4  ;;  %v6974_v23 = vmul.f32 %v8180_v28, %v6953_v4 }
0x3dc7   :  { %v6991_v41 = vsel %vm1367_vm11, %v6973_v31, 0.0  ;;  %v6988_v21 = vsel %vm1367_vm11, %v6972_v37, 0.0  ;;  %v6997_v59 = vsel %vm1367_vm11, %v6975_v24, 0.0  ;;  %v6994_v55 = vsel %vm1367_vm11, %v6974_v23, 0.0 }
0x3dc8   :  { %6992 = vadd.xlane.f32.xlu1 %v6991_v41  ;;  %6989 = vadd.xlane.f32.xlu0 %v6988_v21 }
0x3dcc   :  { %6998 = vadd.xlane.f32.xlu1 %v6997_v59  ;;  %6995 = vadd.xlane.f32.xlu0 %v6994_v55 }
0x3ddd   :  { %2722 = vrot.lane.b32.xlu1 %v11499_v2, %s8193_s19  ;;  %v7170_v2 = vrot.slane %v11184_v61, %v9197_v54 }
0x3de1   :  { %3837 = vrot.lane.b32.xlu1 %v11500_v17, %s8193_s19 }
0x3de2   :  { %1599 = vrot.lane.b32.xlu0 %v11501_v33, %s8193_s19 }
0x3de5   :  { %6059 = vrot.lane.b32.xlu1 %v10713_v16, %s8193_s19 }
0x3de6   :  { %4952 = vrot.lane.b32.xlu0 %v10242_v10, %s8193_s19 }
0x3e49   :  { %v6978_v29 = vpop.xlane.xlu1 %6977  ;;  %v6981_v39 = vpop.xlane.xlu0 %6980 }
0x3e4a   :  { %v7000_v34 = vpack.c.bf16 %v6981_v39, %v6978_v29 }
0x3e4c   :  { %v7048_v12 = vunpack.c.l.b16 %v7000_v34  ;;  %v7049_v22 = vunpack.c.h.b16 %v7000_v34 }
0x3e4d   :  { %v6987_v47 = vpop.xlane.xlu1 %6986  ;;  %v6984_v50 = vpop.xlane.xlu0 %6983 }
0x3e4e   :  { %v7001_v32 = vpack.c.bf16 %v6987_v47, %v6984_v50  ;;  %v7059_v45 = vrot.slane %v7048_v12, %v8601_v49  ;;  %v7063_v16 = vrot.slane %v7049_v22, %v8623_v60 }
0x3e50   :  { %v7050_v35 = vunpack.c.l.b16 %v7001_v32  ;;  %v7051_v5 = vunpack.c.h.b16 %v7001_v32  ;;  %v7064_v15 = vsel %vm958_vm5, %v7063_v16, %v7059_v45 }
0x3e52   :  { %v7068_v1 = vrot.slane %v7050_v35, %v8897_v6  ;;  %v7073_v18 = vrot.slane %v7051_v5, %v8902_v53 }
0x3e54   :  { %v7069_v30 = vsel %vm1474_vm12, %v7068_v1, %v7064_v15 }
0x3e55   :  { %v6993_v48 = vpop.xlane.xlu1 %6992  ;;  %v6990_v7 = vpop.xlane.xlu0 %6989  ;;  %v7074_v46 = vsel %vm11502_vm6, %v7073_v18, %v7069_v30 }
0x3e56   :  { %v7002_v58 = vpack.c.bf16 %v6993_v48, %v6990_v7 }
0x3e58   :  { %v7052_v0 = vunpack.c.l.b16 %v7002_v58  ;;  %v7053_v62 = vunpack.c.h.b16 %v7002_v58 }
0x3e59   :  { %v6999_v10 = vpop.xlane.xlu1 %6998  ;;  %v6996_v14 = vpop.xlane.xlu0 %6995 }
0x3e5a   :  { %v7003_v38 = vpack.c.bf16 %v6999_v10, %v6996_v14  ;;  %v7078_v63 = vrot.slane %v7052_v0, %v8601_v49  ;;  %v7082_v26 = vrot.slane %v7053_v62, %v8623_v60 }
0x3e5c   :  { %v7054_v44 = vunpack.c.l.b16 %v7003_v38  ;;  %v7055_v56 = vunpack.c.h.b16 %v7003_v38  ;;  %v7083_v49 = vsel %vm958_vm5, %v7082_v26, %v7078_v63 }
0x3e5d   :  { %v2723_v40 = vpop.permute.xlu1 %2722  ;;  %v1600_v20 = vpop.permute.xlu0 %1599 }
0x3e5e   :  { %v7087_v43 = vrot.slane %v7054_v44, %v8897_v6  ;;  %v7092_v27 = vrot.slane %v7055_v56, %v8902_v53  ;;  %7222 = vst.msk [vmem:[%s11294_s14 + $0x2] sm:$0x3] %vm1602_vm4, %v2723_v40  ;;  %1603 = vst.msk [vmem:[%s11294_s14] sm:$0x3] %vm1602_vm4, %v1600_v20 }
0x3e60   :  { %v7088_v60 = vsel %vm1474_vm12, %v7087_v43, %v7083_v49 }
0x3e61   :  { %v7093_v6 = vsel %vm11503_vm8, %v7092_v27, %v7088_v60  ;;  %v3838_v25 = vpop.permute.xlu1 %3837  ;;  %v4953_v53 = vpop.permute.xlu0 %4952 }
0x3e62   :  { %v7094_v52 = vsel %vm571_vm3, %v7093_v6, %v7074_v46  ;;  %7234 = vst.msk [vmem:[%s11294_s14 + $0x4] sm:$0x3] %vm1602_vm4, %v3838_v25  ;;  %7246 = vst.msk [vmem:[%s11294_s14 + $0x6] sm:$0x3] %vm1602_vm4, %v4953_v53 }
0x3e63   :  { %v7095_v13 = vpack.c.b16 %v7094_v52, %v7094_v52 }
0x3e65   :  { %v6060_v4 = vpop.permute.xlu1 %6059  ;;  %7675 = vmatmul.mubr.msk.bf16.vlgmr.msra.gmra.mrb[72].mxu0 %vm142_vm1, %v7095_v13 }
0x3e66   :  { %7258 = vst.msk [vmem:[%s11294_s14 + $0x8] sm:$0x3] %vm1602_vm4, %v6060_v4 }
0x3f38   :  { %v7133_v57 = vpop.f32.mrb[72].mxu0 }
0x3f39   :  { %v7134_v31 = vadd.f32 %v7133_v57, %v10880_v11  ;;  %v7676_v3 = vpop.f32.mrb[73].mxu0 }
0x3f3a   :  { %v7136_v37 = vpop.f32.mrb[74].mxu0 }
0x3f3b   :  { %v7139_v41 = vadd.f32 %v10981_v51, %v7134_v31  ;;  %v7677_v21 = vpop.f32.mrb[75].mxu0  ;;  %v7166_v51 = vrot.slane %v11186_v19, %v9200_v42 }
0x3f3d   :  { %v7140_v8 = vsel %vm1560_vm14, %v7139_v41, -inf }
0x3f3e   :  { %7141 = vmax.xlane.f32.xlu0 %v7140_v8 }
0x3f54   :  { %7175 = vrot.lane.b32.xlu0 %v11133_v36, %s8193_s19  ;;  %v7171_v36 = vsel %vm1584_vm15, %v7170_v2, %v7166_v51 }
0x3f55   :  { %v7172_v39 = vsel %vm571_vm3, %v7171_v36, %v11166_v9 }
0x3fcb   :  { %v7142_v24 = vpop.xlane.xlu0 %7141 }
0x3fcc   :  { %v7143_v28 = vsub.f32 %v7139_v41, %v7142_v24 }
0x3fce   :  { %v7144_v23 = vmul.f32 1.442695, %v7143_v28 }
0x3fcf   :  { %v7176_v47 = vpop.permute.xlu0 %7175 }
0x3fd0   :  { %8008 = vpow2.f32 %v7144_v23 }
0x3fda   :  { %v8009_v59 = vpop.eup %8008 }
0x3fdb   :  { %v7146_v55 = vsel %vm1560_vm14, %v8009_v59, 0.0 }
0x3fdc   :  { %7147 = vadd.xlane.f32.xlu1 %v7146_v55 }
0x4069   :  { %v7148_v11 = vpop.xlane.xlu1 %7147 }
0x406a   :  { %8010 = vlog2.f32 %v7148_v11 }
0x4074   :  { %v8011_v17 = vpop.eup %8010 }
0x4075   :  { %v7150_v33 = vmul.f32 0.6931472, %v8011_v17 }
0x4077   :  { %v7151_v29 = vsub.f32 %v7143_v28, %v7150_v33 }
0x4079   :  { %7268 = vst.msk [vmem:[%s11294_s14 + $0xa] sm:$0x3] %vm1560_vm14, %v7151_v29 }
0x407a   :  { %7269 = vst.msk [vmem:[%s11294_s14 + $0xa] sm:$0x3] %vm1597_vm7, %v7172_v39 }
0x407b   :  { %7270 = vst.msk [vmem:[%s11294_s14 + $0xa] sm:$0x3] %vm1602_vm4, %v7176_v47 }

</bundles_post_ra>
